<compile_context>
chip_gen: v7x
topology: tpu7x:2x2x1
jax: 0.10.0
libtpu: 0.0.40
codegen_flags: <defaults>
</compile_context>

<pallas_src>
import functools

import jax
import jax.numpy as jnp
import numpy as np
from jax import lax
from jax.experimental import pallas as pl
from jax.experimental.pallas import tpu as pltpu

_VMEM_LIMIT = 32 * 1024 * 1024   # safe scoped-VMEM limit on v5e/v6e/v7x
_FC_NPAD = 128                   # FC output lanes padded 10 -> 128


def _pick_tb(n_rows):
    """Batch-tile size: large, divides n_rows, and gives >= 2 grid steps."""
    for tb in (32, 16, 8):
        if n_rows % tb == 0 and n_rows // tb >= 2:
            return tb
    return 8


# ---------------- Pallas kernels ----------------

def _conv_pool_kernel(x_ref, w_ref, b_ref, o_ref, *, cout):
    """Fused 3x3 conv (stride 1, pad 1) + bias + ReLU + 2x2 max-pool.

    x_ref : (M, 16*Cin)  bf16 tap-stacked space-to-depth input rows
    w_ref : (16*Cin, 4*Cout) bf16 folded weights (resident)
    b_ref : (1, Cout)    f32
    o_ref : (M, Cout)    bf16 pooled output rows
    """
    acc = jnp.dot(x_ref[...], w_ref[...],
                  preferred_element_type=jnp.float32)      # (M, 4*Cout)
    # 2x2 max-pool: max over the 4 pool positions laid out along N.
    p0 = acc[:, 0 * cout:1 * cout]
    p1 = acc[:, 1 * cout:2 * cout]
    p2 = acc[:, 2 * cout:3 * cout]
    p3 = acc[:, 3 * cout:4 * cout]
    pooled = jnp.maximum(jnp.maximum(p0, p1), jnp.maximum(p2, p3))
    # bias is uniform over the pool window and ReLU is monotone -> after max
    o_ref[...] = jnp.maximum(pooled + b_ref[...], 0.0).astype(o_ref.dtype)


def _fc_kernel(x_ref, w_ref, b_ref, o_ref):
    acc = jnp.dot(x_ref[...], w_ref[...], preferred_element_type=jnp.float32)
    o_ref[...] = (acc + b_ref[...]).astype(o_ref.dtype)


# ---------------- one-time host-side weight preparation ----------------

def _fold_conv_weights(w_oihw):
    """OIHW 3x3 weights -> (16*Cin, 4*Cout): taps folded into K, pool
    positions folded into N.

    K order: (d, e, p, q, ci)  -- tap cell offset (d,e) on the halved grid,
                                  position (p,q) inside the 2x2 s2d cell, Cin.
    N order: (a, b, co)        -- pool position (a,b), Cout.
    """
    cout, cin = int(w_oihw.shape[0]), int(w_oihw.shape[1])
    sel = np.zeros((2, 2, 2, 2, 2, 2, 3, 3), np.float32)  # d,e,p,q,a,b,kh,kw
    for d in range(2):
        for e in range(2):
            for p in range(2):
                for q in range(2):
                    for a in range(2):
                        for b in range(2):
                            kh, kw = 2 * d + p - a, 2 * e + q - b
                            if 0 <= kh < 3 and 0 <= kw < 3:
                                sel[d, e, p, q, a, b, kh, kw] = 1.0
    mats = jnp.einsum('depqabhw,oihw->depqiabo', jnp.asarray(sel),
                      w_oihw.astype(jnp.float32))
    return mats.reshape(16 * cin, 4 * cout)


def prepare_params(params):
    """Fold/permute/cast the PyTorch-layout parameters once (host side)."""
    w1, b1, w2, b2, wf, bf = params
    W1 = _fold_conv_weights(w1).astype(jnp.bfloat16)          # (16, 64)
    W2 = _fold_conv_weights(w2).astype(jnp.bfloat16)          # (256, 128)
    # FC rows: CHW-flatten order (torch .view) -> HWC-flatten order (our NHWC
    # activations), then pad N 10 -> 128 for lane-dense stores.
    cout2 = int(w2.shape[0])
    wf_hwc = wf.reshape(cout2, 7, 7, wf.shape[1]).transpose(1, 2, 0, 3)
    wf_hwc = wf_hwc.reshape(cout2 * 7 * 7, wf.shape[1])
    Wf = jnp.pad(wf_hwc, ((0, 0), (0, _FC_NPAD - wf.shape[1])))
    Wf = Wf.astype(jnp.bfloat16)
    Bf = jnp.pad(bf, (0, _FC_NPAD - bf.shape[0]))
    Bf = Bf.reshape(1, _FC_NPAD).astype(jnp.float32)
    return (W1, b1.reshape(1, -1).astype(jnp.float32),
            W2, b2.reshape(1, -1).astype(jnp.float32), Wf, Bf)


# ---------------- layer wrappers ----------------

def conv_pool_layer(x_nhwc, w_folded, bias2d):
    """3x3 conv (stride 1, pad 1) + bias + ReLU + 2x2 max-pool, fused."""
    n, h, w, cin = x_nhwc.shape
    cout = int(w_folded.shape[1]) // 4
    assert int(w_folded.shape[0]) == 16 * cin and h % 2 == 0 and w % 2 == 0
    ho, wo = h // 2, w // 2
    r = ho * wo
    tb = _pick_tb(n)
    ntiles = n // tb
    m = tb * r

    # XLA glue on small tensors: pad=1, 2x2 space-to-depth, stack the 4 taps
    # into K so the kernel is a single matmul.
    hp2, wp2 = h // 2 + 1, w // 2 + 1
    xp = jnp.pad(x_nhwc, ((0, 0), (1, 1), (1, 1), (0, 0)))
    xs = xp.reshape(n, hp2, 2, wp2, 2, cin).transpose(0, 1, 3, 2, 4, 5)
    # xs[n, I, J, p, q, ci] = xp[n, 2I+p, 2J+q, ci]
    xt = jnp.stack([xs[:, d:d + ho, e:e + wo]
                    for d in (0, 1) for e in (0, 1)], axis=3)
    xt = xt.reshape(ntiles * m, 16 * cin).astype(jnp.bfloat16)

    kernel = functools.partial(_conv_pool_kernel, cout=cout)
    out = pl.pallas_call(
        kernel,
        grid=(ntiles,),
        in_specs=[
            pl.BlockSpec((m, 16 * cin), lambda i: (i, 0)),
            pl.BlockSpec((16 * cin, 4 * cout), lambda i: (0, 0)),
            pl.BlockSpec((1, cout), lambda i: (0, 0)),
        ],
        out_specs=pl.BlockSpec((m, cout), lambda i: (i, 0)),
        out_shape=jax.ShapeDtypeStruct((ntiles * m, cout), jnp.bfloat16),
        compiler_params=pltpu.CompilerParams(
            dimension_semantics=("parallel",),
            vmem_limit_bytes=_VMEM_LIMIT),
    )(xt, w_folded, bias2d)

    return out.reshape(n, ho, wo, cout)


def fc_layer(x, w, bias2d):
    m, k = x.shape
    npad = int(w.shape[1])
    tb = _pick_tb(m)
    ntiles = m // tb
    return pl.pallas_call(
        _fc_kernel,
        grid=(ntiles,),
        in_specs=[
            pl.BlockSpec((tb, k), lambda i: (i, 0)),
            pl.BlockSpec((k, npad), lambda i: (0, 0)),
            pl.BlockSpec((1, npad), lambda i: (0, 0)),
        ],
        out_specs=pl.BlockSpec((tb, npad), lambda i: (i, 0)),
        out_shape=jax.ShapeDtypeStruct((m, npad), jnp.float32),
        compiler_params=pltpu.CompilerParams(
            dimension_semantics=("parallel",),
            vmem_limit_bytes=_VMEM_LIMIT),
    )(x.astype(jnp.bfloat16), w, bias2d)


@jax.jit
def simple_cnn_forward(x_nchw, prepared):
    W1, B1, W2, B2, Wf, Bf = prepared
    n = x_nchw.shape[0]
    n_pad = ((n + 15) // 16) * 16              # >= 2 grid steps of >= 8
    x = jnp.pad(x_nchw, ((0, n_pad - n), (0, 0), (0, 0), (0, 0)))
    x = jnp.transpose(x, (0, 2, 3, 1)).astype(jnp.bfloat16)   # NCHW -> NHWC

    x = conv_pool_layer(x, W1, B1)             # (n_pad, 14, 14, 16) bf16
    x = conv_pool_layer(x, W2, B2)             # (n_pad,  7,  7, 32) bf16

    feats = x.reshape(n_pad, 7 * 7 * 32)       # HWC flatten (Wf rows permuted)
    logits = fc_layer(feats, Wf, Bf)           # (n_pad, 128) f32
    return logits[:n, :10]


# ---------------- pure-JAX reference (correctness check) ----------------

def reference_forward(x, params):
    w1, b1, w2, b2, wf, bf = params

    def conv(x, w, b):
        y = lax.conv_general_dilated(
            x, w, (1, 1), ((1, 1), (1, 1)),
            dimension_numbers=('NCHW', 'OIHW', 'NCHW'),
            precision=lax.Precision.HIGHEST)
        return jax.nn.relu(y + b[None, :, None, None])

    def pool(x):
        n, c, h, w = x.shape
        return x.reshape(n, c, h // 2, 2, w // 2, 2).max(axis=(3, 5))

    y = pool(conv(x, w1, b1))
    y = pool(conv(y, w2, b2))
    y = y.reshape(y.shape[0], -1)
    return jnp.dot(y, wf, precision=lax.Precision.HIGHEST) + bf


if __name__ == "__main__":
    key = jax.random.PRNGKey(0)
    ks = jax.random.split(key, 7)
    # deterministic parameter init (shapes from SimpleCNN.__init__)
    w1 = jax.random.normal(ks[0], (16, 1, 3, 3), jnp.float32) * 0.10
    b1 = jax.random.normal(ks[1], (16,), jnp.float32) * 0.10
    w2 = jax.random.normal(ks[2], (32, 16, 3, 3), jnp.float32) * 0.05
    b2 = jax.random.normal(ks[3], (32,), jnp.float32) * 0.05
    wf = jax.random.normal(ks[4], (32 * 7 * 7, 10), jnp.float32) * 0.02
    bf = jax.random.normal(ks[5], (10,), jnp.float32) * 0.02
    params = (w1, b1, w2, b2, wf, bf)

    # fc1 expects 32*7*7 features -> input spatial must be 28x28 (MNIST-like)
    x = jax.random.normal(ks[6], (2, 1, 28, 28), jnp.float32)

    prepared = prepare_params(params)          # one-time host-side prep
    out = jax.block_until_ready(simple_cnn_forward(x, prepared))
    ref = reference_forward(x, params)
    np.testing.assert_allclose(np.asarray(out), np.asarray(ref),
                               rtol=5e-3, atol=5e-3)
    print("KERNEL_OK")
</pallas_src>

<mosaic_0001>
module attributes {stable_mosaic.version = 11 : i64} {
  func.func @_conv_pool_kernel(%arg0: i32, %arg1: memref<1568x16xbf16, #tpu.memory_space<vmem>>, %arg2: memref<16x64xbf16, #tpu.memory_space<vmem>>, %arg3: memref<1x16xf32, #tpu.memory_space<vmem>>, %arg4: memref<1568x16xbf16, #tpu.memory_space<vmem>>) attributes {dimension_semantics = [#tpu.dimension_semantics<parallel>], iteration_bounds = array<i64: 2>, scalar_prefetch = 0 : i64, scratch_operands = 0 : i64, tpu.core_type = #tpu.core_type<tc>, window_params = [{transform_indices = @transform_0, window_bounds = array<i64: 1568, 16>}, {pipeline_mode = #tpu.pipeline_mode<synchronous>, transform_indices = @transform_1, window_bounds = array<i64: 16, 64>}, {pipeline_mode = #tpu.pipeline_mode<synchronous>, transform_indices = @transform_2, window_bounds = array<i64: 1, 16>}, {transform_indices = @transform_3, window_bounds = array<i64: 1568, 16>}]} {
    %c0 = arith.constant 0 : index
    %c0_0 = arith.constant 0 : index
    %0 = vector.load %arg1[%c0, %c0_0] : memref<1568x16xbf16, #tpu.memory_space<vmem>>, vector<1568x16xbf16>
    %c0_1 = arith.constant 0 : index
    %c0_2 = arith.constant 0 : index
    %1 = vector.load %arg2[%c0_1, %c0_2] : memref<16x64xbf16, #tpu.memory_space<vmem>>, vector<16x64xbf16>
    %cst = arith.constant dense<0.000000e+00> : vector<1568x64xf32>
    %2 = tpu.matmul %0, %1, %cst {dimension_numbers = #tpu.dot_dimension_numbers<[1], [0], [0], [1], [0, 0, 1, 1], [], []>} : vector<1568x16xbf16>, vector<16x64xbf16>, vector<1568x64xf32> -> vector<1568x64xf32>
    %3 = vector.extract_strided_slice %2 {offsets = [0, 0], sizes = [1568, 16], strides = [1, 1]} : vector<1568x64xf32> to vector<1568x16xf32>
    %4 = vector.extract_strided_slice %2 {offsets = [0, 16], sizes = [1568, 16], strides = [1, 1]} : vector<1568x64xf32> to vector<1568x16xf32>
    %5 = vector.extract_strided_slice %2 {offsets = [0, 32], sizes = [1568, 16], strides = [1, 1]} : vector<1568x64xf32> to vector<1568x16xf32>
    %6 = vector.extract_strided_slice %2 {offsets = [0, 48], sizes = [1568, 16], strides = [1, 1]} : vector<1568x64xf32> to vector<1568x16xf32>
    %7 = arith.maximumf %3, %4 : vector<1568x16xf32>
    %8 = arith.maximumf %5, %6 : vector<1568x16xf32>
    %9 = arith.maximumf %7, %8 : vector<1568x16xf32>
    %c0_3 = arith.constant 0 : index
    %c0_4 = arith.constant 0 : index
    %10 = vector.load %arg3[%c0_3, %c0_4] : memref<1x16xf32, #tpu.memory_space<vmem>>, vector<1x16xf32>
    %11 = vector.broadcast %10 : vector<1x16xf32> to vector<1568x16xf32>
    %12 = arith.addf %9, %11 : vector<1568x16xf32>
    %cst_5 = arith.constant 0.000000e+00 : f32
    %13 = vector.broadcast %cst_5 : f32 to vector<1568x16xf32>
    %14 = arith.maximumf %12, %13 : vector<1568x16xf32>
    %15 = arith.truncf %14 : vector<1568x16xf32> to vector<1568x16xbf16>
    %c0_6 = arith.constant 0 : index
    %c0_7 = arith.constant 0 : index
    %16 = vector.load %arg4[%c0_6, %c0_7] : memref<1568x16xbf16, #tpu.memory_space<vmem>>, vector<1568x16xbf16>
    tpu.vector_store %arg4[%c0_6, %c0_7], %15 {strides = array<i32>} : memref<1568x16xbf16, #tpu.memory_space<vmem>>, vector<1568x16xbf16>,
    return
  }
  func.func @transform_0(%arg0: i32) -> (i32, i32) {
    %c0_i32 = arith.constant 0 : i32
    %c0_i32_0 = arith.constant 0 : i32
    return %arg0, %c0_i32 : i32, i32
  }
  func.func @transform_1(%arg0: i32) -> (i32, i32) {
    %c0_i32 = arith.constant 0 : i32
    %c0_i32_0 = arith.constant 0 : i32
    %c0_i32_1 = arith.constant 0 : i32
    return %c0_i32, %c0_i32_0 : i32, i32
  }
  func.func @transform_2(%arg0: i32) -> (i32, i32) {
    %c0_i32 = arith.constant 0 : i32
    %c0_i32_0 = arith.constant 0 : i32
    %c0_i32_1 = arith.constant 0 : i32
    return %c0_i32, %c0_i32_0 : i32, i32
  }
  func.func @transform_3(%arg0: i32) -> (i32, i32) {
    %c0_i32 = arith.constant 0 : i32
    %c0_i32_0 = arith.constant 0 : i32
    return %arg0, %c0_i32 : i32, i32
  }
}

module attributes {stable_mosaic.version = 11 : i64} {
  func.func @_conv_pool_kernel(%arg0: i32, %arg1: memref<392x256xbf16, #tpu.memory_space<vmem>>, %arg2: memref<256x128xbf16, #tpu.memory_space<vmem>>, %arg3: memref<1x32xf32, #tpu.memory_space<vmem>>, %arg4: memref<392x32xbf16, #tpu.memory_space<vmem>>) attributes {dimension_semantics = [#tpu.dimension_semantics<parallel>], iteration_bounds = array<i64: 2>, scalar_prefetch = 0 : i64, scratch_operands = 0 : i64, tpu.core_type = #tpu.core_type<tc>, window_params = [{transform_indices = @transform_0, window_bounds = array<i64: 392, 256>}, {pipeline_mode = #tpu.pipeline_mode<synchronous>, transform_indices = @transform_1, window_bounds = array<i64: 256, 128>}, {pipeline_mode = #tpu.pipeline_mode<synchronous>, transform_indices = @transform_2, window_bounds = array<i64: 1, 32>}, {transform_indices = @transform_3, window_bounds = array<i64: 392, 32>}]} {
    %c0 = arith.constant 0 : index
    %c0_0 = arith.constant 0 : index
    %0 = vector.load %arg1[%c0, %c0_0] : memref<392x256xbf16, #tpu.memory_space<vmem>>, vector<392x256xbf16>
    %c0_1 = arith.constant 0 : index
    %c0_2 = arith.constant 0 : index
    %1 = vector.load %arg2[%c0_1, %c0_2] : memref<256x128xbf16, #tpu.memory_space<vmem>>, vector<256x128xbf16>
    %cst = arith.constant dense<0.000000e+00> : vector<392x128xf32>
    %2 = tpu.matmul %0, %1, %cst {dimension_numbers = #tpu.dot_dimension_numbers<[1], [0], [0], [1], [0, 0, 1, 1], [], []>} : vector<392x256xbf16>, vector<256x128xbf16>, vector<392x128xf32> -> vector<392x128xf32>
    %3 = vector.extract_strided_slice %2 {offsets = [0, 0], sizes = [392, 32], strides = [1, 1]} : vector<392x128xf32> to vector<392x32xf32>
    %4 = vector.extract_strided_slice %2 {offsets = [0, 32], sizes = [392, 32], strides = [1, 1]} : vector<392x128xf32> to vector<392x32xf32>
    %5 = vector.extract_strided_slice %2 {offsets = [0, 64], sizes = [392, 32], strides = [1, 1]} : vector<392x128xf32> to vector<392x32xf32>
    %6 = vector.extract_strided_slice %2 {offsets = [0, 96], sizes = [392, 32], strides = [1, 1]} : vector<392x128xf32> to vector<392x32xf32>
    %7 = arith.maximumf %3, %4 : vector<392x32xf32>
    %8 = arith.maximumf %5, %6 : vector<392x32xf32>
    %9 = arith.maximumf %7, %8 : vector<392x32xf32>
    %c0_3 = arith.constant 0 : index
    %c0_4 = arith.constant 0 : index
    %10 = vector.load %arg3[%c0_3, %c0_4] : memref<1x32xf32, #tpu.memory_space<vmem>>, vector<1x32xf32>
    %11 = vector.broadcast %10 : vector<1x32xf32> to vector<392x32xf32>
    %12 = arith.addf %9, %11 : vector<392x32xf32>
    %cst_5 = arith.constant 0.000000e+00 : f32
    %13 = vector.broadcast %cst_5 : f32 to vector<392x32xf32>
    %14 = arith.maximumf %12, %13 : vector<392x32xf32>
    %15 = arith.truncf %14 : vector<392x32xf32> to vector<392x32xbf16>
    %c0_6 = arith.constant 0 : index
    %c0_7 = arith.constant 0 : index
    %16 = vector.load %arg4[%c0_6, %c0_7] : memref<392x32xbf16, #tpu.memory_space<vmem>>, vector<392x32xbf16>
    tpu.vector_store %arg4[%c0_6, %c0_7], %15 {strides = array<i32>} : memref<392x32xbf16, #tpu.memory_space<vmem>>, vector<392x32xbf16>,
    return
  }
  func.func @transform_0(%arg0: i32) -> (i32, i32) {
    %c0_i32 = arith.constant 0 : i32
    %c0_i32_0 = arith.constant 0 : i32
    return %arg0, %c0_i32 : i32, i32
  }
  func.func @transform_1(%arg0: i32) -> (i32, i32) {
    %c0_i32 = arith.constant 0 : i32
    %c0_i32_0 = arith.constant 0 : i32
    %c0_i32_1 = arith.constant 0 : i32
    return %c0_i32, %c0_i32_0 : i32, i32
  }
  func.func @transform_2(%arg0: i32) -> (i32, i32) {
    %c0_i32 = arith.constant 0 : i32
    %c0_i32_0 = arith.constant 0 : i32
    %c0_i32_1 = arith.constant 0 : i32
    return %c0_i32, %c0_i32_0 : i32, i32
  }
  func.func @transform_3(%arg0: i32) -> (i32, i32) {
    %c0_i32 = arith.constant 0 : i32
    %c0_i32_0 = arith.constant 0 : i32
    return %arg0, %c0_i32 : i32, i32
  }
}

module attributes {stable_mosaic.version = 11 : i64} {
  func.func @_fc_kernel(%arg0: i32, %arg1: memref<8x1568xbf16, #tpu.memory_space<vmem>>, %arg2: memref<1568x128xbf16, #tpu.memory_space<vmem>>, %arg3: memref<1x128xf32, #tpu.memory_space<vmem>>, %arg4: memref<8x128xf32, #tpu.memory_space<vmem>>) attributes {dimension_semantics = [#tpu.dimension_semantics<parallel>], iteration_bounds = array<i64: 2>, scalar_prefetch = 0 : i64, scratch_operands = 0 : i64, tpu.core_type = #tpu.core_type<tc>, window_params = [{transform_indices = @transform_0, window_bounds = array<i64: 8, 1568>}, {pipeline_mode = #tpu.pipeline_mode<synchronous>, transform_indices = @transform_1, window_bounds = array<i64: 1568, 128>}, {pipeline_mode = #tpu.pipeline_mode<synchronous>, transform_indices = @transform_2, window_bounds = array<i64: 1, 128>}, {transform_indices = @transform_3, window_bounds = array<i64: 8, 128>}]} {
    %c0 = arith.constant 0 : index
    %c0_0 = arith.constant 0 : index
    %0 = vector.load %arg1[%c0, %c0_0] : memref<8x1568xbf16, #tpu.memory_space<vmem>>, vector<8x1568xbf16>
    %c0_1 = arith.constant 0 : index
    %c0_2 = arith.constant 0 : index
    %1 = vector.load %arg2[%c0_1, %c0_2] : memref<1568x128xbf16, #tpu.memory_space<vmem>>, vector<1568x128xbf16>
    %cst = arith.constant dense<0.000000e+00> : vector<8x128xf32>
    %2 = tpu.matmul %0, %1, %cst {dimension_numbers = #tpu.dot_dimension_numbers<[1], [0], [0], [1], [0, 0, 1, 1], [], []>} : vector<8x1568xbf16>, vector<1568x128xbf16>, vector<8x128xf32> -> vector<8x128xf32>
    %c0_3 = arith.constant 0 : index
    %c0_4 = arith.constant 0 : index
    %3 = vector.load %arg3[%c0_3, %c0_4] : memref<1x128xf32, #tpu.memory_space<vmem>>, vector<1x128xf32>
    %4 = vector.broadcast %3 : vector<1x128xf32> to vector<8x128xf32>
    %5 = arith.addf %2, %4 : vector<8x128xf32>
    %c0_5 = arith.constant 0 : index
    %c0_6 = arith.constant 0 : index
    %6 = vector.load %arg4[%c0_5, %c0_6] : memref<8x128xf32, #tpu.memory_space<vmem>>, vector<8x128xf32>
    tpu.vector_store %arg4[%c0_5, %c0_6], %5 {strides = array<i32>} : memref<8x128xf32, #tpu.memory_space<vmem>>, vector<8x128xf32>,
    return
  }
  func.func @transform_0(%arg0: i32) -> (i32, i32) {
    %c0_i32 = arith.constant 0 : i32
    %c0_i32_0 = arith.constant 0 : i32
    return %arg0, %c0_i32 : i32, i32
  }
  func.func @transform_1(%arg0: i32) -> (i32, i32) {
    %c0_i32 = arith.constant 0 : i32
    %c0_i32_0 = arith.constant 0 : i32
    %c0_i32_1 = arith.constant 0 : i32
    return %c0_i32, %c0_i32_0 : i32, i32
  }
  func.func @transform_2(%arg0: i32) -> (i32, i32) {
    %c0_i32 = arith.constant 0 : i32
    %c0_i32_0 = arith.constant 0 : i32
    %c0_i32_1 = arith.constant 0 : i32
    return %c0_i32, %c0_i32_0 : i32, i32
  }
  func.func @transform_3(%arg0: i32) -> (i32, i32) {
    %c0_i32 = arith.constant 0 : i32
    %c0_i32_0 = arith.constant 0 : i32
    return %arg0, %c0_i32 : i32, i32
  }
}

</mosaic_0001>

<bundles_post_ra>
// kernel: simple_cnn_forward.3
= control target key start
LH: loop header
LB: loop body
LE: loop exit
PB: predicated region body
PF: predicated region fallthrough
CT: control target
= control target key end

     0   :  { %s6417_s12 = smov 0   ;;  %s9800_s0 = inlined_call_operand.vmem [shape: bf16[3136,16], index: 0, kind: input, shape index: {}]   ;;  %s9801_s1 = inlined_call_operand.vmem [shape: bf16[16,64], index: 1, kind: input, shape index: {}]   ;;  %s9802_s2 = inlined_call_operand.vmem [shape: f32[1,16], index: 2, kind: input, shape index: {}]   ;;  %s9803_s3 = inlined_call_operand.vmem [shape: bf16[3136,16], index: 3, kind: output, shape index: {}]  }
   0x1 LB: > { %s5377_s13 = sadd.s32 4294967295, %s6393_s12   ;;  %p5381_p0 = scmp.ge.s32.totalorder %s6393_s12, 1  ;;  %s6393_s12 = sphi %s6417_s12, %s13_s12  }
   0x2   : > { %p138_p1 = scmp.lt.s32.totalorder %s6393_s12, 3 }
   0x4   : > { %p139_p2 = pnand %p5381_p0, %p138_p1 }
   0x6   : > { %142 = sbr.rel (%p139_p2) target bundleno = 1139 (0x473), region = 32 }
   0xd   : > { %v6285_v0 = vld [vmem:[%s9801_s1] sm:$0xff]   ;;  %s162_s16 = smul.u32 196, %s5377_s13  ;;  %vm869_vm0 = vcmask 130048   ;;  %s6395_s21 = smov 112   ;;  %vm5124_vm1 = vcmask 125952  }
   0xe   : > { %6075 = vmatprep.subr.bf16.mxu0 %v6285_v0  ;;  %6273 = vmatprep.subr.bf16.mxu1 %v6285_v0  ;;  %s6396_s22 = smov 96  }
   0xf   : > { %p163_p3 = scmp.lt.s32.totalorder %s162_s16, 391  ;;  %6076 = vmatpush3.bf16.msra.mxu0 %v6285_v0  ;;  %6274 = vmatpush3.bf16.msra.mxu1 %v6285_v0 }
  0x11   : > { %s10825_s16 = smov (!%p163_p3, %s162_s16), 391 }
  0x12   : > { %s5382_s17 = sshll.u32 %s10825_s16, 2 }
  0x13   : > { %s6436_s20 = scalar_lea.vmem %s9800_s0, %s5382_s17  ;;  %s7697_s27 = scalar_lea.vmem %s9803_s3, %s5382_s17 }
  0x14   : > { %v6286_v1 = vld [vmem:[%s6436_s20] sm:$0xff]   ;;  %v6287_v2 = vld [vmem:[%s6436_s20 + $0x190] sm:$0xff]   ;;  %v6288_v3 = vld [vmem:[%s6436_s20 + $0x8] sm:$0xff]  }
  0x15   : > { %6077 = vmatprep.mubr.msk.bf16.mxu0 %vm869_vm0, %v6286_v1  ;;  %6177 = vmatprep.mubr.msk.bf16.mxu1 %vm869_vm0, %v6287_v2  ;;  %v6289_v4 = vld [vmem:[%s6436_s20 + $0x198] sm:$0xff]   ;;  %v6290_v5 = vld [vmem:[%s6436_s20 + $0x10] sm:$0xff]   ;;  %v6292_v6 = vld [vmem:[%s6436_s20 + $0x1a0] sm:$0xff]  }
  0x16   : > { %6078 = vmatmul.mubr.msk.bf16.vlgmr.msra.gmra.mrb[0].mxu0 %vm869_vm0, %v6288_v3  ;;  %6178 = vmatmul.mubr.msk.bf16.vlgmr.msra.gmra.mrb[0].mxu1 %vm869_vm0, %v6289_v4  ;;  %v6291_v7 = vld [vmem:[%s6436_s20 + $0x18] sm:$0xff]   ;;  %v6293_v8 = vld [vmem:[%s6436_s20 + $0x1a8] sm:$0xff]   ;;  %v6294_v9 = vld [vmem:[%s6436_s20 + $0x20] sm:$0xff]  }
  0x17   : > { %6081 = vmatprep.mubr.msk.bf16.mxu0 %vm869_vm0, %v6290_v5  ;;  %6181 = vmatprep.mubr.msk.bf16.mxu1 %vm869_vm0, %v6292_v6  ;;  %v6296_v10 = vld [vmem:[%s6436_s20 + $0x1b0] sm:$0xff]   ;;  %v6295_v11 = vld [vmem:[%s6436_s20 + $0x28] sm:$0xff]   ;;  %v6297_v12 = vld [vmem:[%s6436_s20 + $0x1b8] sm:$0xff]  }
  0x18   : > { %v6298_v13 = vld [vmem:[%s6436_s20 + $0x30] sm:$0xff]   ;;  %v6300_v14 = vld [vmem:[%s6436_s20 + $0x1c0] sm:$0xff]   ;;  %v6299_v15 = vld [vmem:[%s6436_s20 + $0x38] sm:$0xff]  }
  0x19   : > { %v6301_v16 = vld [vmem:[%s6436_s20 + $0x1c8] sm:$0xff]   ;;  %v6302_v17 = vld [vmem:[%s6436_s20 + $0x40] sm:$0xff]   ;;  %v6304_v18 = vld [vmem:[%s6436_s20 + $0x1d0] sm:$0xff]  }
  0x1a   : > { %v6303_v19 = vld [vmem:[%s6436_s20 + $0x48] sm:$0xff]   ;;  %v6305_v20 = vld [vmem:[%s6436_s20 + $0x1d8] sm:$0xff]   ;;  %v6306_v21 = vld [vmem:[%s6436_s20 + $0x50] sm:$0xff]  }
  0x1b   : > { %v6308_v22 = vld [vmem:[%s6436_s20 + $0x1e0] sm:$0xff]   ;;  %v6307_v23 = vld [vmem:[%s6436_s20 + $0x58] sm:$0xff]   ;;  %v6309_v24 = vld [vmem:[%s6436_s20 + $0x1e8] sm:$0xff]  }
  0x1c   : > { %v6310_v25 = vld [vmem:[%s6436_s20 + $0x60] sm:$0xff]   ;;  %v6312_v26 = vld [vmem:[%s6436_s20 + $0x1f0] sm:$0xff]   ;;  %v6311_v27 = vld [vmem:[%s6436_s20 + $0x68] sm:$0xff]  }
  0x1d   : > { %v6313_v28 = vld [vmem:[%s6436_s20 + $0x1f8] sm:$0xff]   ;;  %v6314_v29 = vld [vmem:[%s6436_s20 + $0x70] sm:$0xff]   ;;  %v6316_v30 = vld [vmem:[%s6436_s20 + $0x200] sm:$0xff]  }
  0x1e   : > { %6082 = vmatmul.mubr.msk.bf16.gmra.mrb[4].mxu0 %vm869_vm0, %v6291_v7  ;;  %6182 = vmatmul.mubr.msk.bf16.gmra.mrb[4].mxu1 %vm869_vm0, %v6293_v8  ;;  %v6315_v31 = vld [vmem:[%s6436_s20 + $0x78] sm:$0xff]   ;;  %v6317_v32 = vld [vmem:[%s6436_s20 + $0x208] sm:$0xff]   ;;  %v6318_v33 = vld [vmem:[%s6436_s20 + $0x80] sm:$0xff]  }
  0x1f   : > { %6085 = vmatprep.mubr.msk.bf16.mxu0 %vm869_vm0, %v6294_v9  ;;  %6185 = vmatprep.mubr.msk.bf16.mxu1 %vm869_vm0, %v6296_v10  ;;  %v6320_v34 = vld [vmem:[%s6436_s20 + $0x210] sm:$0xff]   ;;  %v6319_v35 = vld [vmem:[%s6436_s20 + $0x88] sm:$0xff]   ;;  %v6321_v36 = vld [vmem:[%s6436_s20 + $0x218] sm:$0xff]  }
  0x20   : > { %v6322_v37 = vld [vmem:[%s6436_s20 + $0x90] sm:$0xff]   ;;  %v6324_v38 = vld [vmem:[%s6436_s20 + $0x220] sm:$0xff]   ;;  %v6323_v39 = vld [vmem:[%s6436_s20 + $0x98] sm:$0xff]  }
  0x21   : > { %v6325_v40 = vld [vmem:[%s6436_s20 + $0x228] sm:$0xff]   ;;  %v6326_v41 = vld [vmem:[%s6436_s20 + $0xa0] sm:$0xff]   ;;  %v6328_v42 = vld [vmem:[%s6436_s20 + $0x230] sm:$0xff]  }
  0x22   : > { %v6327_v43 = vld [vmem:[%s6436_s20 + $0xa8] sm:$0xff]   ;;  %v6329_v44 = vld [vmem:[%s6436_s20 + $0x238] sm:$0xff]   ;;  %v6330_v45 = vld [vmem:[%s6436_s20 + $0xb0] sm:$0xff]  }
  0x23   : > { %v6332_v46 = vld [vmem:[%s6436_s20 + $0x240] sm:$0xff]   ;;  %v6331_v47 = vld [vmem:[%s6436_s20 + $0xb8] sm:$0xff]   ;;  %v6333_v48 = vld [vmem:[%s6436_s20 + $0x248] sm:$0xff]  }
  0x24   : > { %v6334_v49 = vld [vmem:[%s6436_s20 + $0xc0] sm:$0xff]   ;;  %v6336_v50 = vld [vmem:[%s6436_s20 + $0x250] sm:$0xff]   ;;  %v6335_v51 = vld [vmem:[%s6436_s20 + $0xc8] sm:$0xff]  }
  0x25   : > { %v6337_v52 = vld [vmem:[%s6436_s20 + $0x258] sm:$0xff]   ;;  %v6338_v53 = vld [vmem:[%s6436_s20 + $0xd0] sm:$0xff]   ;;  %v6340_v54 = vld [vmem:[%s6436_s20 + $0x260] sm:$0xff]  }
  0x26   : > { %6086 = vmatmul.mubr.msk.bf16.gmra.mrb[8].mxu0 %vm869_vm0, %v6295_v11  ;;  %6186 = vmatmul.mubr.msk.bf16.gmra.mrb[8].mxu1 %vm869_vm0, %v6297_v12  ;;  %v6339_v55 = vld [vmem:[%s6436_s20 + $0xd8] sm:$0xff]   ;;  %v6341_v56 = vld [vmem:[%s6436_s20 + $0x268] sm:$0xff]   ;;  %v6342_v57 = vld [vmem:[%s6436_s20 + $0xe0] sm:$0xff]  }
  0x27   : > { %6089 = vmatprep.mubr.msk.bf16.mxu0 %vm869_vm0, %v6298_v13  ;;  %6189 = vmatprep.mubr.msk.bf16.mxu1 %vm869_vm0, %v6300_v14  ;;  %v6344_v58 = vld [vmem:[%s6436_s20 + $0x270] sm:$0xff]   ;;  %v6343_v59 = vld [vmem:[%s6436_s20 + $0xe8] sm:$0xff]   ;;  %v6345_v60 = vld [vmem:[%s6436_s20 + $0x278] sm:$0xff]  }
  0x28   : > { %v6346_v61 = vld [vmem:[%s6436_s20 + $0xf0] sm:$0xff]   ;;  %v6347_v62 = vld [vmem:[%s6436_s20 + $0xf8] sm:$0xff]   ;;  %v6348_v63 = vld [vmem:[%s6436_s20 + $0x280] sm:$0xff]  }
  0x29   : > { %v6349_v0 = vld [vmem:[%s6436_s20 + $0x288] sm:$0xff]   ;;  %v6350_v1 = vld [vmem:[%s6436_s20 + $0x100] sm:$0xff]   ;;  %v6352_v3 = vld [vmem:[%s6436_s20 + $0x290] sm:$0xff]  }
  0x2a   : > { %v6351_v2 = vld [vmem:[%s6436_s20 + $0x108] sm:$0xff]   ;;  %v6353_v4 = vld [vmem:[%s6436_s20 + $0x298] sm:$0xff]   ;;  %v6354_v5 = vld [vmem:[%s6436_s20 + $0x110] sm:$0xff]  }
  0x2b   : > { %v6355_v6 = vld [vmem:[%s6436_s20 + $0x118] sm:$0xff]   ;;  %v6356_v7 = vld [vmem:[%s6436_s20 + $0x2a0] sm:$0xff]   ;;  %v6357_v8 = vld [vmem:[%s6436_s20 + $0x2a8] sm:$0xff]  }
  0x2c   : > { %v6358_v9 = vld [vmem:[%s6436_s20 + $0x120] sm:$0xff]   ;;  %v6359_v10 = vld [vmem:[%s6436_s20 + $0x128] sm:$0xff]   ;;  %v6360_v11 = vld [vmem:[%s6436_s20 + $0x2b0] sm:$0xff]  }
  0x2d   : > { %v6361_v12 = vld [vmem:[%s6436_s20 + $0x2b8] sm:$0xff]   ;;  %v6362_v13 = vld [vmem:[%s6436_s20 + $0x130] sm:$0xff]  }
  0x2e   : > { %6090 = vmatmul.mubr.msk.bf16.gmra.mrb[12].mxu0 %vm869_vm0, %v6299_v15  ;;  %6190 = vmatmul.mubr.msk.bf16.gmra.mrb[12].mxu1 %vm869_vm0, %v6301_v16  ;;  %v6363_v14 = vld [vmem:[%s6436_s20 + $0x138] sm:$0xff]   ;;  %v6364_v15 = vld [vmem:[%s6436_s20 + $0x2c0] sm:$0xff]   ;;  %v6365_v16 = vld [vmem:[%s6436_s20 + $0x2c8] sm:$0xff]  }
  0x2f   : > { %6093 = vmatprep.mubr.msk.bf16.mxu0 %vm869_vm0, %v6302_v17  ;;  %6193 = vmatprep.mubr.msk.bf16.mxu1 %vm869_vm0, %v6304_v18 }
  0x36   : > { %6094 = vmatmul.mubr.msk.bf16.gmra.mrb[16].mxu0 %vm869_vm0, %v6303_v19  ;;  %6194 = vmatmul.mubr.msk.bf16.gmra.mrb[16].mxu1 %vm869_vm0, %v6305_v20 }
  0x37   : > { %6097 = vmatprep.mubr.msk.bf16.mxu0 %vm869_vm0, %v6306_v21  ;;  %6197 = vmatprep.mubr.msk.bf16.mxu1 %vm869_vm0, %v6308_v22  ;;  %v6366_v22 = vld [vmem:[%s6436_s20 + $0x140] sm:$0xff]  }
  0x3e   : > { %6098 = vmatmul.mubr.msk.bf16.gmra.mrb[20].mxu0 %vm869_vm0, %v6307_v23  ;;  %6198 = vmatmul.mubr.msk.bf16.gmra.mrb[20].mxu1 %vm869_vm0, %v6309_v24 }
  0x3f   : > { %6101 = vmatprep.mubr.msk.bf16.mxu0 %vm869_vm0, %v6310_v25  ;;  %6201 = vmatprep.mubr.msk.bf16.mxu1 %vm869_vm0, %v6312_v26  ;;  %v6367_v25 = vld [vmem:[%s6436_s20 + $0x148] sm:$0xff]  }
  0x46   : > { %6102 = vmatmul.mubr.msk.bf16.gmra.mrb[24].mxu0 %vm869_vm0, %v6311_v27  ;;  %6202 = vmatmul.mubr.msk.bf16.gmra.mrb[24].mxu1 %vm869_vm0, %v6313_v28  ;;  %v6368_v27 = vld [vmem:[%s6436_s20 + $0x2d0] sm:$0xff]   ;;  %v6369_v28 = vld [vmem:[%s6436_s20 + $0x2d8] sm:$0xff]  }
  0x47   : > { %6105 = vmatprep.mubr.msk.bf16.mxu0 %vm869_vm0, %v6314_v29  ;;  %6205 = vmatprep.mubr.msk.bf16.mxu1 %vm869_vm0, %v6316_v30 }
  0x4e   : > { %6106 = vmatmul.mubr.msk.bf16.gmra.mrb[28].mxu0 %vm869_vm0, %v6315_v31  ;;  %6206 = vmatmul.mubr.msk.bf16.gmra.mrb[28].mxu1 %vm869_vm0, %v6317_v32 }
  0x4f   : > { %6109 = vmatprep.mubr.msk.bf16.mxu0 %vm869_vm0, %v6318_v33  ;;  %6209 = vmatprep.mubr.msk.bf16.mxu1 %vm869_vm0, %v6320_v34 }
  0x56   : > { %6110 = vmatmul.mubr.msk.bf16.gmra.mrb[32].mxu0 %vm869_vm0, %v6319_v35  ;;  %6210 = vmatmul.mubr.msk.bf16.gmra.mrb[32].mxu1 %vm869_vm0, %v6321_v36 }
  0x57   : > { %6113 = vmatprep.mubr.msk.bf16.mxu0 %vm869_vm0, %v6322_v37  ;;  %6213 = vmatprep.mubr.msk.bf16.mxu1 %vm869_vm0, %v6324_v38 }
  0x5e   : > { %6114 = vmatmul.mubr.msk.bf16.gmra.mrb[36].mxu0 %vm869_vm0, %v6323_v39  ;;  %6214 = vmatmul.mubr.msk.bf16.gmra.mrb[36].mxu1 %vm869_vm0, %v6325_v40 }
  0x5f   : > { %6117 = vmatprep.mubr.msk.bf16.mxu0 %vm869_vm0, %v6326_v41  ;;  %6217 = vmatprep.mubr.msk.bf16.mxu1 %vm869_vm0, %v6328_v42  ;;  %v6370_v42 = vld [vmem:[%s6436_s20 + $0x150] sm:$0xff]  }
  0x66   : > { %6118 = vmatmul.mubr.msk.bf16.gmra.mrb[40].mxu0 %vm869_vm0, %v6327_v43  ;;  %6218 = vmatmul.mubr.msk.bf16.gmra.mrb[40].mxu1 %vm869_vm0, %v6329_v44 }
  0x67   : > { %6121 = vmatprep.mubr.msk.bf16.mxu0 %vm869_vm0, %v6330_v45  ;;  %6221 = vmatprep.mubr.msk.bf16.mxu1 %vm869_vm0, %v6332_v46  ;;  %v6371_v45 = vld [vmem:[%s6436_s20 + $0x158] sm:$0xff]  }
  0x6e   : > { %6122 = vmatmul.mubr.msk.bf16.gmra.mrb[44].mxu0 %vm869_vm0, %v6331_v47  ;;  %6222 = vmatmul.mubr.msk.bf16.gmra.mrb[44].mxu1 %vm869_vm0, %v6333_v48  ;;  %v6372_v47 = vld [vmem:[%s6436_s20 + $0x2e0] sm:$0xff]   ;;  %v6373_v48 = vld [vmem:[%s6436_s20 + $0x2e8] sm:$0xff]  }
  0x6f   : > { %6125 = vmatprep.mubr.msk.bf16.mxu0 %vm869_vm0, %v6334_v49  ;;  %6225 = vmatprep.mubr.msk.bf16.mxu1 %vm869_vm0, %v6336_v50 }
  0x76   : > { %6126 = vmatmul.mubr.msk.bf16.gmra.mrb[48].mxu0 %vm869_vm0, %v6335_v51  ;;  %6226 = vmatmul.mubr.msk.bf16.gmra.mrb[48].mxu1 %vm869_vm0, %v6337_v52 }
  0x77   : > { %6129 = vmatprep.mubr.msk.bf16.mxu0 %vm869_vm0, %v6338_v53  ;;  %6229 = vmatprep.mubr.msk.bf16.mxu1 %vm869_vm0, %v6340_v54 }
  0x7e   : > { %6130 = vmatmul.mubr.msk.bf16.gmra.mrb[52].mxu0 %vm869_vm0, %v6339_v55  ;;  %6230 = vmatmul.mubr.msk.bf16.gmra.mrb[52].mxu1 %vm869_vm0, %v6341_v56 }
  0x7f   : > { %6133 = vmatprep.mubr.msk.bf16.mxu0 %vm869_vm0, %v6342_v57  ;;  %6233 = vmatprep.mubr.msk.bf16.mxu1 %vm869_vm0, %v6344_v58 }
  0x86   : > { %6134 = vmatmul.mubr.msk.bf16.gmra.mrb[56].mxu0 %vm869_vm0, %v6343_v59  ;;  %6234 = vmatmul.mubr.msk.bf16.gmra.mrb[56].mxu1 %vm869_vm0, %v6345_v60 }
  0x87   : > { %6137 = vmatprep.mubr.msk.bf16.mxu0 %vm869_vm0, %v6346_v61  ;;  %6237 = vmatprep.mubr.msk.bf16.mxu1 %vm869_vm0, %v6348_v63 }
  0x8e   : > { %6138 = vmatmul.mubr.msk.bf16.gmra.mrb[60].mxu0 %vm869_vm0, %v6347_v62  ;;  %6238 = vmatmul.mubr.msk.bf16.gmra.mrb[60].mxu1 %vm869_vm0, %v6349_v0  ;;  %v6374_v62 = vld [vmem:[%s6436_s20 + $0x160] sm:$0xff]  }
  0x8f   : > { %6141 = vmatprep.mubr.msk.bf16.mxu0 %vm869_vm0, %v6350_v1  ;;  %6241 = vmatprep.mubr.msk.bf16.mxu1 %vm869_vm0, %v6352_v3  ;;  %v6375_v1 = vld [vmem:[%s6436_s20 + $0x168] sm:$0xff]   ;;  %v6376_v3 = vld [vmem:[%s6436_s20 + $0x2f0] sm:$0xff]  }
  0x96   : > { %6142 = vmatmul.mubr.msk.bf16.gmra.mrb[64].mxu0 %vm869_vm0, %v6351_v2  ;;  %6242 = vmatmul.mubr.msk.bf16.gmra.mrb[64].mxu1 %vm869_vm0, %v6353_v4  ;;  %v6377_v4 = vld [vmem:[%s6436_s20 + $0x2f8] sm:$0xff]  }
  0x97   : > { %6145 = vmatprep.mubr.msk.bf16.mxu0 %vm869_vm0, %v6354_v5  ;;  %6245 = vmatprep.mubr.msk.bf16.mxu1 %vm869_vm0, %v6356_v7 }
  0x9e   : > { %6146 = vmatmul.mubr.msk.bf16.gmra.mrb[68].mxu0 %vm869_vm0, %v6355_v6  ;;  %6246 = vmatmul.mubr.msk.bf16.gmra.mrb[68].mxu1 %vm869_vm0, %v6357_v8 }
  0x9f   : > { %6149 = vmatprep.mubr.msk.bf16.mxu0 %vm869_vm0, %v6358_v9  ;;  %6249 = vmatprep.mubr.msk.bf16.mxu1 %vm869_vm0, %v6360_v11 }
  0xa6   : > { %6150 = vmatmul.mubr.msk.bf16.gmra.mrb[72].mxu0 %vm869_vm0, %v6359_v10  ;;  %6250 = vmatmul.mubr.msk.bf16.gmra.mrb[72].mxu1 %vm869_vm0, %v6361_v12 }
  0xa7   : > { %6153 = vmatprep.mubr.msk.bf16.mxu0 %vm869_vm0, %v6362_v13  ;;  %6253 = vmatprep.mubr.msk.bf16.mxu1 %vm869_vm0, %v6364_v15 }
  0xae   : > { %6154 = vmatmul.mubr.msk.bf16.gmra.mrb[76].mxu0 %vm869_vm0, %v6363_v14  ;;  %6254 = vmatmul.mubr.msk.bf16.gmra.mrb[76].mxu1 %vm869_vm0, %v6365_v16 }
  0xaf   : > { %6157 = vmatprep.mubr.msk.bf16.mxu0 %vm869_vm0, %v6366_v22  ;;  %6257 = vmatprep.mubr.msk.bf16.mxu1 %vm869_vm0, %v6368_v27 }
  0xb6   : > { %6158 = vmatmul.mubr.msk.bf16.gmra.mrb[80].mxu0 %vm869_vm0, %v6367_v25  ;;  %6258 = vmatmul.mubr.msk.bf16.gmra.mrb[80].mxu1 %vm869_vm0, %v6369_v28  ;;  %v6378_v25 = vld [vmem:[%s6436_s20 + $0x170] sm:$0xff]  }
  0xb7   : > { %6161 = vmatprep.mubr.msk.bf16.mxu0 %vm869_vm0, %v6370_v42  ;;  %6261 = vmatprep.mubr.msk.bf16.mxu1 %vm869_vm0, %v6372_v47  ;;  %v6379_v42 = vld [vmem:[%s6436_s20 + $0x178] sm:$0xff]   ;;  %v6380_v47 = vld [vmem:[%s6436_s20 + $0x300] sm:$0xff]  }
  0xbe   : > { %6162 = vmatmul.mubr.msk.bf16.gmra.mrb[84].mxu0 %vm869_vm0, %v6371_v45  ;;  %6262 = vmatmul.mubr.msk.bf16.gmra.mrb[84].mxu1 %vm869_vm0, %v6373_v48  ;;  %v6381_v48 = vld [vmem:[%s6436_s20 + $0x308] sm:$0xff]  }
  0xbf   : > { %6165 = vmatprep.mubr.msk.bf16.mxu0 %vm869_vm0, %v6374_v62  ;;  %6265 = vmatprep.mubr.msk.bf16.mxu1 %vm869_vm0, %v6376_v3 }
  0xc6   : > { %6166 = vmatmul.mubr.msk.bf16.gmra.mrb[88].mxu0 %vm869_vm0, %v6375_v1  ;;  %6266 = vmatmul.mubr.msk.bf16.gmra.mrb[88].mxu1 %vm869_vm0, %v6377_v4 }
  0xc7   : > { %6169 = vmatprep.mubr.msk.bf16.mxu0 %vm869_vm0, %v6378_v25  ;;  %6269 = vmatprep.mubr.msk.bf16.mxu1 %vm869_vm0, %v6380_v47 }
  0xce   : > { %6170 = vmatmul.mubr.msk.bf16.gmra.mrb[92].mxu0 %vm869_vm0, %v6379_v42  ;;  %6270 = vmatmul.mubr.msk.bf16.gmra.mrb[92].mxu1 %vm869_vm0, %v6381_v48 }
  0xe9   : > { %v6598_v17 = vpop.f32.mrb[0].mxu0  ;;  %v6600_v18 = vpop.f32.mrb[0].mxu1 }
  0xea   : > { %10047 = vst [vmem:[#allocation2_spill] sm:$0xff] %v6598_v17  ;;  %10048 = vst [vmem:[#allocation3_spill] sm:$0xff] %v6600_v18  ;;  %2181 = vrot.lane.b32.xlu1 %v6598_v17, %s6395_s21  ;;  %v6604_v19 = vpop.f32.mrb[1].mxu0  ;;  %2381 = vrot.lane.b32.xlu0 %v6600_v18, %s6395_s21  ;;  %v6608_v20 = vpop.f32.mrb[1].mxu1 }
  0xeb   : > { %10049 = vst [vmem:[#allocation4_spill] sm:$0xff] %v6604_v19  ;;  %10050 = vst [vmem:[#allocation5_spill] sm:$0xff] %v6608_v20  ;;  %v6610_v21 = vpop.f32.mrb[2].mxu0  ;;  %v6613_v23 = vpop.f32.mrb[2].mxu1 }
  0xec   : > { %10051 = vst [vmem:[#allocation6_spill] sm:$0xff] %v6610_v21  ;;  %10052 = vst [vmem:[#allocation7_spill] sm:$0xff] %v6613_v23  ;;  %v6615_v24 = vpop.f32.mrb[3].mxu0  ;;  %v6618_v26 = vpop.f32.mrb[3].mxu1 }
  0xed   : > { %10053 = vst [vmem:[#allocation8_spill] sm:$0xff] %v6615_v24  ;;  %10054 = vst [vmem:[#allocation9_spill] sm:$0xff] %v6618_v26 }
  0xee   : > { %2183 = vrot.lane.b32.xlu1 %v6610_v21, %s6395_s21  ;;  %2177 = vrot.lane.b32.xlu0 %v6604_v19, %s6395_s21 }
  0xf1   : > { %v6628_v29 = vpop.f32.mrb[4].mxu0  ;;  %v6635_v31 = vpop.f32.mrb[4].mxu1 }
  0xf2   : > { %10055 = vst [vmem:[#allocation10_spill] sm:$0xff] %v6628_v29  ;;  %2383 = vrot.lane.b32.xlu1 %v6613_v23, %s6395_s21  ;;  %v6633_v30 = vpop.f32.mrb[5].mxu0  ;;  %10057 = vst [vmem:[#allocation12_spill] sm:$0xff] %v6635_v31  ;;  %2377 = vrot.lane.b32.xlu0 %v6608_v20, %s6395_s21  ;;  %v6642_v33 = vpop.f32.mrb[5].mxu1 }
  0xf3   : > { %10056 = vst [vmem:[#allocation11_spill] sm:$0xff] %v6633_v30  ;;  %v6640_v32 = vpop.f32.mrb[6].mxu0  ;;  %10059 = vst [vmem:[#allocation14_spill] sm:$0xff] %v6642_v33  ;;  %v6646_v35 = vpop.f32.mrb[6].mxu1 }
  0xf4   : > { %10058 = vst [vmem:[#allocation13_spill] sm:$0xff] %v6640_v32  ;;  %v6644_v34 = vpop.f32.mrb[7].mxu0  ;;  %10061 = vst [vmem:[#allocation16_spill] sm:$0xff] %v6646_v35  ;;  %v6648_v36 = vpop.f32.mrb[7].mxu1 }
  0xf5   : > { %10060 = vst [vmem:[#allocation15_spill] sm:$0xff] %v6644_v34  ;;  %10062 = vst [vmem:[#allocation17_spill] sm:$0xff] %v6648_v36 }
  0xf6   : > { %2379 = vrot.lane.b32.xlu1 %v6618_v26, %s6395_s21  ;;  %2179 = vrot.lane.b32.xlu0 %v6615_v24, %s6395_s21 }
  0xf9   : > { %v6654_v37 = vpop.f32.mrb[8].mxu0  ;;  %v6660_v39 = vpop.f32.mrb[8].mxu1 }
  0xfa   : > { %10063 = vst [vmem:[#allocation18_spill] sm:$0xff] %v6654_v37  ;;  %2191 = vrot.lane.b32.xlu1 %v6640_v32, %s6395_s21  ;;  %v6658_v38 = vpop.f32.mrb[9].mxu0  ;;  %10065 = vst [vmem:[#allocation20_spill] sm:$0xff] %v6660_v39  ;;  %2189 = vrot.lane.b32.xlu0 %v6628_v29, %s6395_s21  ;;  %v6666_v41 = vpop.f32.mrb[9].mxu1 }
  0xfb   : > { %10064 = vst [vmem:[#allocation19_spill] sm:$0xff] %v6658_v38  ;;  %v6664_v40 = vpop.f32.mrb[10].mxu0  ;;  %10067 = vst [vmem:[#allocation22_spill] sm:$0xff] %v6666_v41  ;;  %v6671_v44 = vpop.f32.mrb[10].mxu1 }
  0xfc   : > { %10066 = vst [vmem:[#allocation21_spill] sm:$0xff] %v6664_v40  ;;  %v6669_v43 = vpop.f32.mrb[11].mxu0  ;;  %10069 = vst [vmem:[#allocation24_spill] sm:$0xff] %v6671_v44  ;;  %v6674_v46 = vpop.f32.mrb[11].mxu1 }
  0xfd   : > { %10068 = vst [vmem:[#allocation23_spill] sm:$0xff] %v6669_v43  ;;  %10070 = vst [vmem:[#allocation25_spill] sm:$0xff] %v6674_v46 }
  0xfe   : > { %2391 = vrot.lane.b32.xlu1 %v6646_v35, %s6395_s21  ;;  %2389 = vrot.lane.b32.xlu0 %v6635_v31, %s6395_s21  ;;  %v6383_v31 = vld [vmem:[%s6436_s20 + $0x188] sm:$0xff]  }
 0x101   : > { %v6684_v49 = vpop.f32.mrb[12].mxu0  ;;  %v6691_v51 = vpop.f32.mrb[12].mxu1 }
 0x102   : > { %10071 = vst [vmem:[#allocation26_spill] sm:$0xff] %v6684_v49  ;;  %2187 = vrot.lane.b32.xlu1 %v6644_v34, %s6395_s21  ;;  %v6689_v50 = vpop.f32.mrb[13].mxu0  ;;  %10073 = vst [vmem:[#allocation28_spill] sm:$0xff] %v6691_v51  ;;  %2185 = vrot.lane.b32.xlu0 %v6633_v30, %s6395_s21  ;;  %v6698_v53 = vpop.f32.mrb[13].mxu1 }
 0x103   : > { %10072 = vst [vmem:[#allocation27_spill] sm:$0xff] %v6689_v50  ;;  %v6696_v52 = vpop.f32.mrb[14].mxu0  ;;  %10075 = vst [vmem:[#allocation30_spill] sm:$0xff] %v6698_v53  ;;  %v6702_v55 = vpop.f32.mrb[14].mxu1 }
 0x104   : > { %10074 = vst [vmem:[#allocation29_spill] sm:$0xff] %v6696_v52  ;;  %v6700_v54 = vpop.f32.mrb[15].mxu0  ;;  %10077 = vst [vmem:[#allocation32_spill] sm:$0xff] %v6702_v55  ;;  %v6704_v56 = vpop.f32.mrb[15].mxu1 }
 0x105   : > { %10076 = vst [vmem:[#allocation31_spill] sm:$0xff] %v6700_v54  ;;  %10078 = vst [vmem:[#allocation33_spill] sm:$0xff] %v6704_v56 }
 0x106   : > { %2387 = vrot.lane.b32.xlu1 %v6648_v36, %s6395_s21  ;;  %2385 = vrot.lane.b32.xlu0 %v6642_v33, %s6395_s21 }
 0x109   : > { %v6710_v57 = vpop.f32.mrb[16].mxu0  ;;  %v6716_v59 = vpop.f32.mrb[16].mxu1 }
 0x10a   : > { %10079 = vst [vmem:[#allocation34_spill] sm:$0xff] %v6710_v57  ;;  %2199 = vrot.lane.b32.xlu1 %v6664_v40, %s6395_s21  ;;  %v6714_v58 = vpop.f32.mrb[17].mxu0  ;;  %10081 = vst [vmem:[#allocation36_spill] sm:$0xff] %v6716_v59  ;;  %2197 = vrot.lane.b32.xlu0 %v6654_v37, %s6395_s21  ;;  %v6722_v61 = vpop.f32.mrb[17].mxu1 }
 0x10b   : > { %10080 = vst [vmem:[#allocation35_spill] sm:$0xff] %v6714_v58  ;;  %v6720_v60 = vpop.f32.mrb[18].mxu0  ;;  %10083 = vst [vmem:[#allocation38_spill] sm:$0xff] %v6722_v61  ;;  %v6727_v0 = vpop.f32.mrb[18].mxu1 }
 0x10c   : > { %10082 = vst [vmem:[#allocation37_spill] sm:$0xff] %v6720_v60  ;;  %v6725_v63 = vpop.f32.mrb[19].mxu0  ;;  %10085 = vst [vmem:[#allocation40_spill] sm:$0xff] %v6727_v0  ;;  %v6730_v2 = vpop.f32.mrb[19].mxu1 }
 0x10d   : > { %10084 = vst [vmem:[#allocation39_spill] sm:$0xff] %v6725_v63  ;;  %10086 = vst [vmem:[#allocation41_spill] sm:$0xff] %v6730_v2 }
 0x10e   : > { %2399 = vrot.lane.b32.xlu1 %v6671_v44, %s6395_s21  ;;  %2397 = vrot.lane.b32.xlu0 %v6660_v39, %s6395_s21 }
 0x111   : > { %v6740_v5 = vpop.f32.mrb[20].mxu0  ;;  %v6747_v7 = vpop.f32.mrb[20].mxu1 }
 0x112   : > { %10087 = vst [vmem:[#allocation42_spill] sm:$0xff] %v6740_v5  ;;  %2195 = vrot.lane.b32.xlu1 %v6669_v43, %s6395_s21  ;;  %v6745_v6 = vpop.f32.mrb[21].mxu0  ;;  %10089 = vst [vmem:[#allocation44_spill] sm:$0xff] %v6747_v7  ;;  %2193 = vrot.lane.b32.xlu0 %v6658_v38, %s6395_s21  ;;  %v6754_v9 = vpop.f32.mrb[21].mxu1 }
 0x113   : > { %10088 = vst [vmem:[#allocation43_spill] sm:$0xff] %v6745_v6  ;;  %v6752_v8 = vpop.f32.mrb[22].mxu0  ;;  %10091 = vst [vmem:[#allocation46_spill] sm:$0xff] %v6754_v9  ;;  %v6758_v11 = vpop.f32.mrb[22].mxu1 }
 0x114   : > { %10090 = vst [vmem:[#allocation45_spill] sm:$0xff] %v6752_v8  ;;  %v6756_v10 = vpop.f32.mrb[23].mxu0  ;;  %10093 = vst [vmem:[#allocation48_spill] sm:$0xff] %v6758_v11  ;;  %v6760_v12 = vpop.f32.mrb[23].mxu1 }
 0x115   : > { %10092 = vst [vmem:[#allocation47_spill] sm:$0xff] %v6756_v10  ;;  %10094 = vst [vmem:[#allocation49_spill] sm:$0xff] %v6760_v12 }
 0x116   : > { %2395 = vrot.lane.b32.xlu1 %v6674_v46, %s6395_s21  ;;  %2393 = vrot.lane.b32.xlu0 %v6666_v41, %s6395_s21 }
 0x119   : > { %v6766_v13 = vpop.f32.mrb[24].mxu0  ;;  %v6772_v15 = vpop.f32.mrb[24].mxu1 }
 0x11a   : > { %10095 = vst [vmem:[#allocation50_spill] sm:$0xff] %v6766_v13  ;;  %2207 = vrot.lane.b32.xlu1 %v6696_v52, %s6395_s21  ;;  %v6770_v14 = vpop.f32.mrb[25].mxu0  ;;  %10097 = vst [vmem:[#allocation52_spill] sm:$0xff] %v6772_v15  ;;  %2205 = vrot.lane.b32.xlu0 %v6684_v49, %s6395_s21  ;;  %v6778_v22 = vpop.f32.mrb[25].mxu1 }
 0x11b   : > { %10096 = vst [vmem:[#allocation51_spill] sm:$0xff] %v6770_v14  ;;  %v6776_v16 = vpop.f32.mrb[26].mxu0  ;;  %10099 = vst [vmem:[#allocation54_spill] sm:$0xff] %v6778_v22  ;;  %v6783_v28 = vpop.f32.mrb[26].mxu1 }
 0x11c   : > { %10098 = vst [vmem:[#allocation53_spill] sm:$0xff] %v6776_v16  ;;  %v6781_v27 = vpop.f32.mrb[27].mxu0  ;;  %10101 = vst [vmem:[#allocation56_spill] sm:$0xff] %v6783_v28  ;;  %v6786_v45 = vpop.f32.mrb[27].mxu1 }
 0x11d   : > { %10100 = vst [vmem:[#allocation55_spill] sm:$0xff] %v6781_v27  ;;  %10102 = vst [vmem:[#allocation57_spill] sm:$0xff] %v6786_v45 }
 0x11e   : > { %2407 = vrot.lane.b32.xlu1 %v6702_v55, %s6395_s21  ;;  %2405 = vrot.lane.b32.xlu0 %v6691_v51, %s6395_s21 }
 0x121   : > { %v6796_v62 = vpop.f32.mrb[28].mxu0  ;;  %v6803_v3 = vpop.f32.mrb[28].mxu1 }
 0x122   : > { %10103 = vst [vmem:[#allocation58_spill] sm:$0xff] %v6796_v62  ;;  %2203 = vrot.lane.b32.xlu1 %v6700_v54, %s6395_s21  ;;  %v6801_v1 = vpop.f32.mrb[29].mxu0  ;;  %10105 = vst [vmem:[#allocation60_spill] sm:$0xff] %v6803_v3  ;;  %2201 = vrot.lane.b32.xlu0 %v6689_v50, %s6395_s21  ;;  %v6810_v25 = vpop.f32.mrb[29].mxu1 }
 0x123   : > { %10104 = vst [vmem:[#allocation59_spill] sm:$0xff] %v6801_v1  ;;  %v6808_v4 = vpop.f32.mrb[30].mxu0  ;;  %10107 = vst [vmem:[#allocation62_spill] sm:$0xff] %v6810_v25  ;;  %v6814_v47 = vpop.f32.mrb[30].mxu1 }
 0x124   : > { %10106 = vst [vmem:[#allocation61_spill] sm:$0xff] %v6808_v4  ;;  %v6812_v42 = vpop.f32.mrb[31].mxu0  ;;  %10109 = vst [vmem:[#allocation64_spill] sm:$0xff] %v6814_v47  ;;  %v6816_v51 = vpop.f32.mrb[31].mxu1 }
 0x125   : > { %10108 = vst [vmem:[#allocation63_spill] sm:$0xff] %v6812_v42  ;;  %10110 = vst [vmem:[#allocation65_spill] sm:$0xff] %v6816_v51 }
 0x126   : > { %2403 = vrot.lane.b32.xlu1 %v6704_v56, %s6395_s21  ;;  %2401 = vrot.lane.b32.xlu0 %v6698_v53, %s6395_s21  ;;  %v6382_v56 = vld [vmem:[%s6436_s20 + $0x180] sm:$0xff]  }
 0x127   : > { %6173 = vmatprep.mubr.msk.bf16.mxu0 %vm869_vm0, %v6382_v56 }
 0x128   : > { %6174 = vmatmul.mubr.msk.bf16.gmra.mrb[96].mxu0 %vm869_vm0, %v6383_v31 }
 0x129   : > { %v6822_v48 = vpop.f32.mrb[32].mxu0  ;;  %v6828_v39 = vpop.f32.mrb[32].mxu1 }
 0x12a   : > { %10111 = vst [vmem:[#allocation66_spill] sm:$0xff] %v6822_v48  ;;  %2215 = vrot.lane.b32.xlu1 %v6720_v60, %s6395_s21  ;;  %v6826_v55 = vpop.f32.mrb[33].mxu0  ;;  %10113 = vst [vmem:[#allocation68_spill] sm:$0xff] %v6828_v39  ;;  %2213 = vrot.lane.b32.xlu0 %v6710_v57, %s6395_s21  ;;  %v6834_v41 = vpop.f32.mrb[33].mxu1 }
 0x12b   : > { %10112 = vst [vmem:[#allocation67_spill] sm:$0xff] %v6826_v55  ;;  %v6832_v44 = vpop.f32.mrb[34].mxu0  ;;  %10115 = vst [vmem:[#allocation70_spill] sm:$0xff] %v6834_v41  ;;  %v6839_v53 = vpop.f32.mrb[34].mxu1 }
 0x12c   : > { %10114 = vst [vmem:[#allocation69_spill] sm:$0xff] %v6832_v44  ;;  %v6837_v46 = vpop.f32.mrb[35].mxu0  ;;  %10117 = vst [vmem:[#allocation72_spill] sm:$0xff] %v6839_v53  ;;  %v6842_v35 = vpop.f32.mrb[35].mxu1 }
 0x12d   : > { %10116 = vst [vmem:[#allocation71_spill] sm:$0xff] %v6837_v46  ;;  %10118 = vst [vmem:[#allocation73_spill] sm:$0xff] %v6842_v35 }
 0x12e   : > { %2415 = vrot.lane.b32.xlu1 %v6727_v0, %s6395_s21  ;;  %2413 = vrot.lane.b32.xlu0 %v6716_v59, %s6395_s21 }
 0x131   : > { %v6850_v33 = vpop.f32.mrb[36].mxu0  ;;  %v6856_v18 = vpop.f32.mrb[36].mxu1 }
 0x132   : > { %10119 = vst [vmem:[#allocation74_spill] sm:$0xff] %v6850_v33  ;;  %2211 = vrot.lane.b32.xlu1 %v6725_v63, %s6395_s21  ;;  %v6854_v36 = vpop.f32.mrb[37].mxu0  ;;  %10121 = vst [vmem:[#allocation76_spill] sm:$0xff] %v6856_v18  ;;  %2209 = vrot.lane.b32.xlu0 %v6714_v58, %s6395_s21  ;;  %v6862_v0 = vpop.f32.mrb[37].mxu1 }
 0x133   : > { %10120 = vst [vmem:[#allocation75_spill] sm:$0xff] %v6854_v36  ;;  %v6860_v56 = vpop.f32.mrb[38].mxu0  ;;  %10123 = vst [vmem:[#allocation78_spill] sm:$0xff] %v6862_v0  ;;  %v6866_v23 = vpop.f32.mrb[38].mxu1 }
 0x134   : > { %10122 = vst [vmem:[#allocation77_spill] sm:$0xff] %v6860_v56  ;;  %v6864_v31 = vpop.f32.mrb[39].mxu0  ;;  %10125 = vst [vmem:[#allocation80_spill] sm:$0xff] %v6866_v23  ;;  %v6868_v59 = vpop.f32.mrb[39].mxu1 }
 0x135   : > { %10124 = vst [vmem:[#allocation79_spill] sm:$0xff] %v6864_v31  ;;  %10126 = vst [vmem:[#allocation81_spill] sm:$0xff] %v6868_v59 }
 0x136   : > { %2411 = vrot.lane.b32.xlu1 %v6730_v2, %s6395_s21  ;;  %2409 = vrot.lane.b32.xlu0 %v6722_v61, %s6395_s21 }
 0x139   : > { %v6874_v20 = vpop.f32.mrb[40].mxu0  ;;  %v6880_v57 = vpop.f32.mrb[40].mxu1 }
 0x13a   : > { %10127 = vst [vmem:[#allocation82_spill] sm:$0xff] %v6874_v20  ;;  %2223 = vrot.lane.b32.xlu1 %v6752_v8, %s6395_s21  ;;  %v6878_v26 = vpop.f32.mrb[41].mxu0  ;;  %10129 = vst [vmem:[#allocation84_spill] sm:$0xff] %v6880_v57  ;;  %2221 = vrot.lane.b32.xlu0 %v6740_v5, %s6395_s21  ;;  %v6886_v58 = vpop.f32.mrb[41].mxu1 }
 0x13b   : > { %10128 = vst [vmem:[#allocation83_spill] sm:$0xff] %v6878_v26  ;;  %v6884_v60 = vpop.f32.mrb[42].mxu0  ;;  %10131 = vst [vmem:[#allocation86_spill] sm:$0xff] %v6886_v58  ;;  %v6890_v63 = vpop.f32.mrb[42].mxu1 }
 0x13c   : > { %10130 = vst [vmem:[#allocation85_spill] sm:$0xff] %v6884_v60  ;;  %v6888_v2 = vpop.f32.mrb[43].mxu0  ;;  %10133 = vst [vmem:[#allocation88_spill] sm:$0xff] %v6890_v63  ;;  %v6892_v61 = vpop.f32.mrb[43].mxu1 }
 0x13d   : > { %10132 = vst [vmem:[#allocation87_spill] sm:$0xff] %v6888_v2  ;;  %10134 = vst [vmem:[#allocation89_spill] sm:$0xff] %v6892_v61 }
 0x13e   : > { %2423 = vrot.lane.b32.xlu1 %v6758_v11, %s6395_s21  ;;  %2421 = vrot.lane.b32.xlu0 %v6747_v7, %s6395_s21 }
 0x141   : > { %v6898_v8 = vpop.f32.mrb[44].mxu0  ;;  %v6904_v49 = vpop.f32.mrb[44].mxu1 }
 0x142   : > { %10135 = vst [vmem:[#allocation90_spill] sm:$0xff] %v6898_v8  ;;  %2219 = vrot.lane.b32.xlu1 %v6756_v10, %s6395_s21  ;;  %v6902_v5 = vpop.f32.mrb[45].mxu0  ;;  %10137 = vst [vmem:[#allocation92_spill] sm:$0xff] %v6904_v49  ;;  %2217 = vrot.lane.b32.xlu0 %v6745_v6, %s6395_s21  ;;  %v6910_v50 = vpop.f32.mrb[45].mxu1 }
 0x143   : > { %10136 = vst [vmem:[#allocation91_spill] sm:$0xff] %v6902_v5  ;;  %v6908_v52 = vpop.f32.mrb[46].mxu0  ;;  %10139 = vst [vmem:[#allocation94_spill] sm:$0xff] %v6910_v50  ;;  %v6914_v54 = vpop.f32.mrb[46].mxu1 }
 0x144   : > { %10138 = vst [vmem:[#allocation93_spill] sm:$0xff] %v6908_v52  ;;  %v6912_v11 = vpop.f32.mrb[47].mxu0  ;;  %10141 = vst [vmem:[#allocation96_spill] sm:$0xff] %v6914_v54  ;;  %v6916_v7 = vpop.f32.mrb[47].mxu1 }
 0x145   : > { %10140 = vst [vmem:[#allocation95_spill] sm:$0xff] %v6912_v11  ;;  %10142 = vst [vmem:[#allocation97_spill] sm:$0xff] %v6916_v7 }
 0x146   : > { %2419 = vrot.lane.b32.xlu1 %v6760_v12, %s6395_s21  ;;  %2417 = vrot.lane.b32.xlu0 %v6754_v9, %s6395_s21 }
 0x149   : > { %v6922_v10 = vpop.f32.mrb[48].mxu0  ;;  %v6928_v38 = vpop.f32.mrb[48].mxu1 }
 0x14a   : > { %10143 = vst [vmem:[#allocation98_spill] sm:$0xff] %v6922_v10  ;;  %2231 = vrot.lane.b32.xlu1 %v6776_v16, %s6395_s21  ;;  %v6926_v6 = vpop.f32.mrb[49].mxu0  ;;  %10145 = vst [vmem:[#allocation100_spill] sm:$0xff] %v6928_v38  ;;  %2229 = vrot.lane.b32.xlu0 %v6766_v13, %s6395_s21  ;;  %v6934_v37 = vpop.f32.mrb[49].mxu1 }
 0x14b   : > { %10144 = vst [vmem:[#allocation99_spill] sm:$0xff] %v6926_v6  ;;  %v6932_v43 = vpop.f32.mrb[50].mxu0  ;;  %10147 = vst [vmem:[#allocation102_spill] sm:$0xff] %v6934_v37  ;;  %v6938_v40 = vpop.f32.mrb[50].mxu1 }
 0x14c   : > { %10146 = vst [vmem:[#allocation101_spill] sm:$0xff] %v6932_v43  ;;  %v6936_v12 = vpop.f32.mrb[51].mxu0  ;;  %10149 = vst [vmem:[#allocation104_spill] sm:$0xff] %v6938_v40  ;;  %v6940_v9 = vpop.f32.mrb[51].mxu1 }
 0x14d   : > { %10148 = vst [vmem:[#allocation103_spill] sm:$0xff] %v6936_v12  ;;  %10150 = vst [vmem:[#allocation105_spill] sm:$0xff] %v6940_v9 }
 0x14e   : > { %2431 = vrot.lane.b32.xlu1 %v6783_v28, %s6395_s21  ;;  %2429 = vrot.lane.b32.xlu0 %v6772_v15, %s6395_s21 }
 0x151   : > { %v6946_v16 = vpop.f32.mrb[52].mxu0  ;;  %v6952_v30 = vpop.f32.mrb[52].mxu1 }
 0x152   : > { %10151 = vst [vmem:[#allocation106_spill] sm:$0xff] %v6946_v16  ;;  %2227 = vrot.lane.b32.xlu1 %v6781_v27, %s6395_s21  ;;  %v6950_v13 = vpop.f32.mrb[53].mxu0  ;;  %10153 = vst [vmem:[#allocation108_spill] sm:$0xff] %v6952_v30  ;;  %2225 = vrot.lane.b32.xlu0 %v6770_v14, %s6395_s21  ;;  %v6958_v29 = vpop.f32.mrb[53].mxu1 }
 0x153   : > { %10152 = vst [vmem:[#allocation107_spill] sm:$0xff] %v6950_v13  ;;  %v6956_v34 = vpop.f32.mrb[54].mxu0  ;;  %10155 = vst [vmem:[#allocation110_spill] sm:$0xff] %v6958_v29  ;;  %v6962_v32 = vpop.f32.mrb[54].mxu1 }
 0x154   : > { %10154 = vst [vmem:[#allocation109_spill] sm:$0xff] %v6956_v34  ;;  %v6960_v28 = vpop.f32.mrb[55].mxu0  ;;  %10157 = vst [vmem:[#allocation112_spill] sm:$0xff] %v6962_v32  ;;  %v6964_v15 = vpop.f32.mrb[55].mxu1 }
 0x155   : > { %10156 = vst [vmem:[#allocation111_spill] sm:$0xff] %v6960_v28  ;;  %10158 = vst [vmem:[#allocation113_spill] sm:$0xff] %v6964_v15 }
 0x156   : > { %2427 = vrot.lane.b32.xlu1 %v6786_v45, %s6395_s21  ;;  %2425 = vrot.lane.b32.xlu0 %v6778_v22, %s6395_s21 }
 0x159   : > { %v6970_v27 = vpop.f32.mrb[56].mxu0  ;;  %v6976_v19 = vpop.f32.mrb[56].mxu1 }
 0x15a   : > { %10159 = vst [vmem:[#allocation114_spill] sm:$0xff] %v6970_v27  ;;  %2239 = vrot.lane.b32.xlu1 %v6808_v4, %s6395_s21  ;;  %v6974_v14 = vpop.f32.mrb[57].mxu0  ;;  %10161 = vst [vmem:[#allocation116_spill] sm:$0xff] %v6976_v19  ;;  %2237 = vrot.lane.b32.xlu0 %v6796_v62, %s6395_s21  ;;  %v6982_v17 = vpop.f32.mrb[57].mxu1 }
 0x15b   : > { %10160 = vst [vmem:[#allocation115_spill] sm:$0xff] %v6974_v14  ;;  %v6980_v24 = vpop.f32.mrb[58].mxu0  ;;  %10163 = vst [vmem:[#allocation118_spill] sm:$0xff] %v6982_v17  ;;  %v6990_v27 = vpop.f32.mrb[58].mxu1 }
 0x15c   : > { %10162 = vst [vmem:[#allocation117_spill] sm:$0xff] %v6980_v24  ;;  %v6984_v45 = vpop.permute.xlu1 %2181  ;;  %v6986_v21 = vpop.f32.mrb[59].mxu0  ;;  %10167 = vst [vmem:[#allocation122_spill] sm:$0xff] %v6990_v27 }
 0x15d   : > { %10164 = vst [vmem:[#allocation119_spill] sm:$0xff] %v6984_v45  ;;  %10165 = vst [vmem:[#allocation120_spill] sm:$0xff] %v6986_v21  ;;  %v6988_v22 = vpop.permute.xlu0 %2381  ;;  %v6994_v4 = vpop.f32.mrb[59].mxu1 }
 0x15e   : > { %10166 = vst [vmem:[#allocation121_spill] sm:$0xff] %v6988_v22  ;;  %2439 = vrot.lane.b32.xlu1 %v6814_v47, %s6395_s21  ;;  %10168 = vst [vmem:[#allocation123_spill] sm:$0xff] %v6994_v4  ;;  %2437 = vrot.lane.b32.xlu0 %v6803_v3, %s6395_s21 }
 0x160   : > { %v6998_v62 = vpop.permute.xlu1 %2183 }
 0x161   : > { %10169 = vst [vmem:[#allocation124_spill] sm:$0xff] %v6998_v62  ;;  %v7000_v14 = vpop.permute.xlu0 %2177  ;;  %v7002_v17 = vpop.f32.mrb[60].mxu0 }
 0x162   : > { %10170 = vst [vmem:[#allocation125_spill] sm:$0xff] %v7000_v14  ;;  %10171 = vst [vmem:[#allocation126_spill] sm:$0xff] %v7002_v17  ;;  %2235 = vrot.lane.b32.xlu1 %v6812_v42, %s6395_s21  ;;  %v7006_v22 = vpop.f32.mrb[61].mxu0  ;;  %v7008_v45 = vpop.f32.mrb[60].mxu1  ;;  %2233 = vrot.lane.b32.xlu0 %v6801_v1, %s6395_s21 }
 0x163   : > { %10172 = vst [vmem:[#allocation127_spill] sm:$0xff] %v7006_v22  ;;  %10173 = vst [vmem:[#allocation128_spill] sm:$0xff] %v7008_v45  ;;  %v7012_v47 = vpop.f32.mrb[62].mxu0  ;;  %v7014_v4 = vpop.f32.mrb[61].mxu1 }
 0x164   : > { %10174 = vst [vmem:[#allocation129_spill] sm:$0xff] %v7012_v47  ;;  %10175 = vst [vmem:[#allocation130_spill] sm:$0xff] %v7014_v4  ;;  %v7016_v3 = vpop.permute.xlu1 %2383  ;;  %v7018_v62 = vpop.f32.mrb[63].mxu0 }
 0x165   : > { %10176 = vst [vmem:[#allocation131_spill] sm:$0xff] %v7016_v3  ;;  %10177 = vst [vmem:[#allocation132_spill] sm:$0xff] %v7018_v62  ;;  %v7020_v14 = vpop.permute.xlu0 %2377  ;;  %v7022_v17 = vpop.f32.mrb[62].mxu1 }
 0x166   : > { %10178 = vst [vmem:[#allocation133_spill] sm:$0xff] %v7020_v14  ;;  %10179 = vst [vmem:[#allocation134_spill] sm:$0xff] %v7022_v17  ;;  %2435 = vrot.lane.b32.xlu1 %v6816_v51, %s6395_s21  ;;  %v7026_v42 = vpop.f32.mrb[63].mxu1  ;;  %2433 = vrot.lane.b32.xlu0 %v6810_v25, %s6395_s21 }
 0x167   : > { %10180 = vst [vmem:[#allocation135_spill] sm:$0xff] %v7026_v42 }
 0x168   : > { %v7030_v1 = vpop.permute.xlu1 %2379 }
 0x169   : > { %10181 = vst [vmem:[#allocation136_spill] sm:$0xff] %v7030_v1  ;;  %v7032_v22 = vpop.permute.xlu0 %2179 }
 0x16a   : > { %2247 = vrot.lane.b32.xlu1 %v6832_v44, %s6395_s21  ;;  %2245 = vrot.lane.b32.xlu0 %v6822_v48, %s6395_s21  ;;  %v7058_v44 = vpop.f32.mrb[64].mxu0 }
 0x16b   : > { %10184 = vst [vmem:[#allocation139_spill] sm:$0xff] %v7058_v44 }
 0x16c   : > { %v7038_v3 = vpop.permute.xlu1 %2191 }
 0x16d   : > { %v7040_v14 = vpop.permute.xlu0 %2189 }
 0x16e   : > { %2447 = vrot.lane.b32.xlu1 %v6839_v53, %s6395_s21  ;;  %2445 = vrot.lane.b32.xlu0 %v6828_v39, %s6395_s21  ;;  %v7062_v39 = vpop.f32.mrb[65].mxu0 }
 0x16f   : > { %10185 = vst [vmem:[#allocation140_spill] sm:$0xff] %v7062_v39  ;;  %v7066_v53 = vpop.f32.mrb[66].mxu0 }
 0x170   : > { %v7046_v25 = vpop.permute.xlu1 %2391  ;;  %10186 = vst [vmem:[#allocation141_spill] sm:$0xff] %v7066_v53 }
 0x171   : > { %10182 = vst [vmem:[#allocation137_spill] sm:$0xff] %v7046_v25  ;;  %v7048_v51 = vpop.permute.xlu0 %2389  ;;  %v7070_v25 = vpop.f32.mrb[67].mxu0 }
 0x172   : > { %10183 = vst [vmem:[#allocation138_spill] sm:$0xff] %v7048_v51  ;;  %2243 = vrot.lane.b32.xlu1 %v6837_v46, %s6395_s21  ;;  %2241 = vrot.lane.b32.xlu0 %v6826_v55, %s6395_s21  ;;  %10188 = vst [vmem:[#allocation143_spill] sm:$0xff] %v7070_v25  ;;  %v7074_v46 = vpop.f32.mrb[64].mxu1 }
 0x173   : > { %10190 = vst [vmem:[#allocation145_spill] sm:$0xff] %v7074_v46  ;;  %v7078_v44 = vpop.f32.mrb[65].mxu1 }
 0x174   : > { %v7054_v1 = vpop.permute.xlu1 %2187  ;;  %10191 = vst [vmem:[#allocation146_spill] sm:$0xff] %v7078_v44 }
 0x175   : > { %v7056_v48 = vpop.permute.xlu0 %2185 }
 0x176   : > { %2443 = vrot.lane.b32.xlu1 %v6842_v35, %s6395_s21  ;;  %2441 = vrot.lane.b32.xlu0 %v6834_v41, %s6395_s21  ;;  %v7082_v35 = vpop.f32.mrb[66].mxu1 }
 0x177   : > { %10192 = vst [vmem:[#allocation147_spill] sm:$0xff] %v7082_v35  ;;  %v7086_v39 = vpop.f32.mrb[67].mxu1 }
 0x178   : > { %v7068_v51 = vpop.permute.xlu1 %2387  ;;  %10194 = vst [vmem:[#allocation149_spill] sm:$0xff] %v7086_v39 }
 0x179   : > { %10187 = vst [vmem:[#allocation142_spill] sm:$0xff] %v7068_v51  ;;  %v7072_v55 = vpop.permute.xlu0 %2385 }
 0x17a   : > { %10189 = vst [vmem:[#allocation144_spill] sm:$0xff] %v7072_v55  ;;  %2255 = vrot.lane.b32.xlu1 %v6860_v56, %s6395_s21  ;;  %2253 = vrot.lane.b32.xlu0 %v6850_v33, %s6395_s21 }
 0x17c   : > { %v7084_v41 = vpop.permute.xlu1 %2199 }
 0x17d   : > { %10193 = vst [vmem:[#allocation148_spill] sm:$0xff] %v7084_v41  ;;  %v7088_v51 = vpop.permute.xlu0 %2197 }
 0x17e   : > { %2455 = vrot.lane.b32.xlu1 %v6866_v23, %s6395_s21  ;;  %2453 = vrot.lane.b32.xlu0 %v6856_v18, %s6395_s21 }
 0x180   : > { %v7094_v55 = vpop.permute.xlu1 %2399 }
 0x181   : > { %10195 = vst [vmem:[#allocation150_spill] sm:$0xff] %v7094_v55  ;;  %v7096_v56 = vpop.permute.xlu0 %2397 }
 0x182   : > { %10196 = vst [vmem:[#allocation151_spill] sm:$0xff] %v7096_v56  ;;  %2251 = vrot.lane.b32.xlu1 %v6864_v31, %s6395_s21  ;;  %2249 = vrot.lane.b32.xlu0 %v6854_v36, %s6395_s21  ;;  %v7122_v36 = vpop.f32.mrb[68].mxu0 }
 0x183   : > { %10201 = vst [vmem:[#allocation156_spill] sm:$0xff] %v7122_v36 }
 0x184   : > { %v7102_v33 = vpop.permute.xlu1 %2195 }
 0x185   : > { %v7104_v41 = vpop.permute.xlu0 %2193 }
 0x186   : > { %2451 = vrot.lane.b32.xlu1 %v6868_v59, %s6395_s21  ;;  %2449 = vrot.lane.b32.xlu0 %v6862_v0, %s6395_s21  ;;  %v7126_v0 = vpop.f32.mrb[69].mxu0 }
 0x187   : > { %v7130_v59 = vpop.f32.mrb[70].mxu0 }
 0x188   : > { %v7110_v18 = vpop.permute.xlu1 %2395  ;;  %10202 = vst [vmem:[#allocation157_spill] sm:$0xff] %v7130_v59 }
 0x189   : > { %10197 = vst [vmem:[#allocation152_spill] sm:$0xff] %v7110_v18  ;;  %v7112_v23 = vpop.permute.xlu0 %2393  ;;  %v7134_v18 = vpop.f32.mrb[71].mxu0 }
 0x18a   : > { %10198 = vst [vmem:[#allocation153_spill] sm:$0xff] %v7112_v23  ;;  %2263 = vrot.lane.b32.xlu1 %v6884_v60, %s6395_s21  ;;  %2261 = vrot.lane.b32.xlu0 %v6874_v20, %s6395_s21  ;;  %v7138_v60 = vpop.f32.mrb[68].mxu1 }
 0x18b   : > { %10205 = vst [vmem:[#allocation160_spill] sm:$0xff] %v7138_v60  ;;  %v7142_v31 = vpop.f32.mrb[69].mxu1 }
 0x18c   : > { %v7118_v56 = vpop.permute.xlu1 %2207  ;;  %10206 = vst [vmem:[#allocation161_spill] sm:$0xff] %v7142_v31 }
 0x18d   : > { %10199 = vst [vmem:[#allocation154_spill] sm:$0xff] %v7118_v56  ;;  %v7120_v55 = vpop.permute.xlu0 %2205 }
 0x18e   : > { %10200 = vst [vmem:[#allocation155_spill] sm:$0xff] %v7120_v55  ;;  %2463 = vrot.lane.b32.xlu1 %v6890_v63, %s6395_s21  ;;  %2461 = vrot.lane.b32.xlu0 %v6880_v57, %s6395_s21  ;;  %v7146_v63 = vpop.f32.mrb[70].mxu1 }
 0x18f   : > { %10207 = vst [vmem:[#allocation162_spill] sm:$0xff] %v7146_v63  ;;  %v7150_v55 = vpop.f32.mrb[71].mxu1 }
 0x190   : > { %v7132_v23 = vpop.permute.xlu1 %2407  ;;  %10208 = vst [vmem:[#allocation163_spill] sm:$0xff] %v7150_v55 }
 0x191   : > { %10203 = vst [vmem:[#allocation158_spill] sm:$0xff] %v7132_v23  ;;  %v7136_v20 = vpop.permute.xlu0 %2405 }
 0x192   : > { %10204 = vst [vmem:[#allocation159_spill] sm:$0xff] %v7136_v20  ;;  %2259 = vrot.lane.b32.xlu1 %v6888_v2, %s6395_s21  ;;  %2257 = vrot.lane.b32.xlu0 %v6878_v26, %s6395_s21 }
 0x194   : > { %v7148_v57 = vpop.permute.xlu1 %2203 }
 0x195   : > { %v7152_v23 = vpop.permute.xlu0 %2201 }
 0x196   : > { %2459 = vrot.lane.b32.xlu1 %v6892_v61, %s6395_s21  ;;  %2457 = vrot.lane.b32.xlu0 %v6886_v58, %s6395_s21 }
 0x198   : > { %v7158_v20 = vpop.permute.xlu1 %2403 }
 0x199   : > { %10209 = vst [vmem:[#allocation164_spill] sm:$0xff] %v7158_v20  ;;  %v7160_v2 = vpop.permute.xlu0 %2401 }
 0x19a   : > { %10210 = vst [vmem:[#allocation165_spill] sm:$0xff] %v7160_v2  ;;  %2271 = vrot.lane.b32.xlu1 %v6908_v52, %s6395_s21  ;;  %2269 = vrot.lane.b32.xlu0 %v6898_v8, %s6395_s21  ;;  %v7178_v2 = vpop.f32.mrb[72].mxu0 }
 0x19b   : > { %v7182_v20 = vpop.f32.mrb[73].mxu0 }
 0x19c   : > { %v7166_v26 = vpop.permute.xlu1 %2215  ;;  %v7186_v8 = vpop.f32.mrb[74].mxu0 }
 0x19d   : > { %10211 = vst [vmem:[#allocation166_spill] sm:$0xff] %v7166_v26  ;;  %v7168_v56 = vpop.permute.xlu0 %2213  ;;  %v7190_v52 = vpop.f32.mrb[75].mxu0 }
 0x19e   : > { %10212 = vst [vmem:[#allocation167_spill] sm:$0xff] %v7168_v56  ;;  %2471 = vrot.lane.b32.xlu1 %v6914_v54, %s6395_s21  ;;  %2469 = vrot.lane.b32.xlu0 %v6904_v49, %s6395_s21 }
 0x1a0   : > { %v7174_v58 = vpop.permute.xlu1 %2415 }
 0x1a1   : > { %10213 = vst [vmem:[#allocation168_spill] sm:$0xff] %v7174_v58  ;;  %v7176_v61 = vpop.permute.xlu0 %2413  ;;  %v7194_v58 = vpop.f32.mrb[72].mxu1 }
 0x1a2   : > { %10214 = vst [vmem:[#allocation169_spill] sm:$0xff] %v7176_v61  ;;  %2267 = vrot.lane.b32.xlu1 %v6912_v11, %s6395_s21  ;;  %2265 = vrot.lane.b32.xlu0 %v6902_v5, %s6395_s21  ;;  %10217 = vst [vmem:[#allocation172_spill] sm:$0xff] %v7194_v58  ;;  %v7198_v61 = vpop.f32.mrb[73].mxu1 }
 0x1a3   : > { %10218 = vst [vmem:[#allocation173_spill] sm:$0xff] %v7198_v61  ;;  %v7202_v11 = vpop.f32.mrb[74].mxu1 }
 0x1a4   : > { %v7188_v54 = vpop.permute.xlu1 %2211  ;;  %10219 = vst [vmem:[#allocation174_spill] sm:$0xff] %v7202_v11  ;;  %v7206_v56 = vpop.f32.mrb[75].mxu1 }
 0x1a5   : > { %10215 = vst [vmem:[#allocation170_spill] sm:$0xff] %v7188_v54  ;;  %v7192_v49 = vpop.permute.xlu0 %2209  ;;  %10221 = vst [vmem:[#allocation176_spill] sm:$0xff] %v7206_v56 }
 0x1a6   : > { %10216 = vst [vmem:[#allocation171_spill] sm:$0xff] %v7192_v49  ;;  %2467 = vrot.lane.b32.xlu1 %v6916_v7, %s6395_s21  ;;  %2465 = vrot.lane.b32.xlu0 %v6910_v50, %s6395_s21 }
 0x1a8   : > { %v7204_v5 = vpop.permute.xlu1 %2411 }
 0x1a9   : > { %10220 = vst [vmem:[#allocation175_spill] sm:$0xff] %v7204_v5  ;;  %v7208_v26 = vpop.permute.xlu0 %2409 }
 0x1aa   : > { %10222 = vst [vmem:[#allocation177_spill] sm:$0xff] %v7208_v26  ;;  %2279 = vrot.lane.b32.xlu1 %v6932_v43, %s6395_s21  ;;  %2277 = vrot.lane.b32.xlu0 %v6922_v10, %s6395_s21  ;;  %v7226_v26 = vpop.f32.mrb[76].mxu0 }
 0x1ab   : > { %10227 = vst [vmem:[#allocation182_spill] sm:$0xff] %v7226_v26  ;;  %v7230_v10 = vpop.f32.mrb[77].mxu0 }
 0x1ac   : > { %v7214_v7 = vpop.permute.xlu1 %2223  ;;  %v7234_v43 = vpop.f32.mrb[78].mxu0 }
 0x1ad   : > { %10223 = vst [vmem:[#allocation178_spill] sm:$0xff] %v7214_v7  ;;  %v7216_v49 = vpop.permute.xlu0 %2221 }
 0x1ae   : > { %10224 = vst [vmem:[#allocation179_spill] sm:$0xff] %v7216_v49  ;;  %2479 = vrot.lane.b32.xlu1 %v6938_v40, %s6395_s21  ;;  %2477 = vrot.lane.b32.xlu0 %v6928_v38, %s6395_s21  ;;  %v7238_v49 = vpop.f32.mrb[79].mxu0 }
 0x1b0   : > { %v7222_v50 = vpop.permute.xlu1 %2423 }
 0x1b1   : > { %10225 = vst [vmem:[#allocation180_spill] sm:$0xff] %v7222_v50  ;;  %v7224_v5 = vpop.permute.xlu0 %2421  ;;  %v7242_v50 = vpop.f32.mrb[76].mxu1 }
 0x1b2   : > { %10226 = vst [vmem:[#allocation181_spill] sm:$0xff] %v7224_v5  ;;  %2275 = vrot.lane.b32.xlu1 %v6936_v12, %s6395_s21  ;;  %2273 = vrot.lane.b32.xlu0 %v6926_v6, %s6395_s21  ;;  %10230 = vst [vmem:[#allocation185_spill] sm:$0xff] %v7242_v50  ;;  %v7246_v5 = vpop.f32.mrb[77].mxu1 }
 0x1b3   : > { %10231 = vst [vmem:[#allocation186_spill] sm:$0xff] %v7246_v5  ;;  %v7250_v12 = vpop.f32.mrb[78].mxu1 }
 0x1b4   : > { %v7236_v40 = vpop.permute.xlu1 %2219  ;;  %10232 = vst [vmem:[#allocation187_spill] sm:$0xff] %v7250_v12  ;;  %v7254_v7 = vpop.f32.mrb[79].mxu1 }
 0x1b5   : > { %10228 = vst [vmem:[#allocation183_spill] sm:$0xff] %v7236_v40  ;;  %v7240_v38 = vpop.permute.xlu0 %2217  ;;  %10234 = vst [vmem:[#allocation189_spill] sm:$0xff] %v7254_v7 }
 0x1b6   : > { %10229 = vst [vmem:[#allocation184_spill] sm:$0xff] %v7240_v38  ;;  %2475 = vrot.lane.b32.xlu1 %v6940_v9, %s6395_s21  ;;  %2473 = vrot.lane.b32.xlu0 %v6934_v37, %s6395_s21 }
 0x1b8   : > { %v7252_v6 = vpop.permute.xlu1 %2419 }
 0x1b9   : > { %10233 = vst [vmem:[#allocation188_spill] sm:$0xff] %v7252_v6  ;;  %v7256_v40 = vpop.permute.xlu0 %2417 }
 0x1ba   : > { %10235 = vst [vmem:[#allocation190_spill] sm:$0xff] %v7256_v40  ;;  %2287 = vrot.lane.b32.xlu1 %v6956_v34, %s6395_s21  ;;  %2285 = vrot.lane.b32.xlu0 %v6946_v16, %s6395_s21  ;;  %v7274_v40 = vpop.f32.mrb[80].mxu0 }
 0x1bb   : > { %10240 = vst [vmem:[#allocation195_spill] sm:$0xff] %v7274_v40  ;;  %v7278_v16 = vpop.f32.mrb[81].mxu0 }
 0x1bc   : > { %v7262_v9 = vpop.permute.xlu1 %2231  ;;  %10241 = vst [vmem:[#allocation196_spill] sm:$0xff] %v7278_v16  ;;  %v7282_v34 = vpop.f32.mrb[82].mxu0 }
 0x1bd   : > { %10236 = vst [vmem:[#allocation191_spill] sm:$0xff] %v7262_v9  ;;  %v7264_v38 = vpop.permute.xlu0 %2229  ;;  %10242 = vst [vmem:[#allocation197_spill] sm:$0xff] %v7282_v34 }
 0x1be   : > { %10237 = vst [vmem:[#allocation192_spill] sm:$0xff] %v7264_v38  ;;  %2487 = vrot.lane.b32.xlu1 %v6962_v32, %s6395_s21  ;;  %2485 = vrot.lane.b32.xlu0 %v6952_v30, %s6395_s21  ;;  %v7286_v38 = vpop.f32.mrb[83].mxu0 }
 0x1bf   : > { %10244 = vst [vmem:[#allocation199_spill] sm:$0xff] %v7286_v38 }
 0x1c0   : > { %v7270_v37 = vpop.permute.xlu1 %2431 }
 0x1c1   : > { %10238 = vst [vmem:[#allocation193_spill] sm:$0xff] %v7270_v37  ;;  %v7272_v6 = vpop.permute.xlu0 %2429  ;;  %v7290_v37 = vpop.f32.mrb[80].mxu1 }
 0x1c2   : > { %10239 = vst [vmem:[#allocation194_spill] sm:$0xff] %v7272_v6  ;;  %2283 = vrot.lane.b32.xlu1 %v6960_v28, %s6395_s21  ;;  %2281 = vrot.lane.b32.xlu0 %v6950_v13, %s6395_s21  ;;  %10246 = vst [vmem:[#allocation201_spill] sm:$0xff] %v7290_v37  ;;  %v7294_v6 = vpop.f32.mrb[81].mxu1 }
 0x1c3   : > { %10247 = vst [vmem:[#allocation202_spill] sm:$0xff] %v7294_v6  ;;  %v7298_v28 = vpop.f32.mrb[82].mxu1 }
 0x1c4   : > { %v7284_v32 = vpop.permute.xlu1 %2227  ;;  %10248 = vst [vmem:[#allocation203_spill] sm:$0xff] %v7298_v28  ;;  %v7302_v9 = vpop.f32.mrb[83].mxu1 }
 0x1c5   : > { %10243 = vst [vmem:[#allocation198_spill] sm:$0xff] %v7284_v32  ;;  %v7288_v30 = vpop.permute.xlu0 %2225  ;;  %10250 = vst [vmem:[#allocation205_spill] sm:$0xff] %v7302_v9 }
 0x1c6   : > { %10245 = vst [vmem:[#allocation200_spill] sm:$0xff] %v7288_v30  ;;  %2483 = vrot.lane.b32.xlu1 %v6964_v15, %s6395_s21  ;;  %2481 = vrot.lane.b32.xlu0 %v6958_v29, %s6395_s21  ;;  %v10252_v30 = vld [vmem:[#allocation114_spill] sm:$0xff] }
 0x1c8   : > { %v7300_v13 = vpop.permute.xlu1 %2427 }
 0x1c9   : > { %10249 = vst [vmem:[#allocation204_spill] sm:$0xff] %v7300_v13  ;;  %v7304_v32 = vpop.permute.xlu0 %2425 }
 0x1ca   : > { %10251 = vst [vmem:[#allocation206_spill] sm:$0xff] %v7304_v32  ;;  %2295 = vrot.lane.b32.xlu1 %v6980_v24, %s6395_s21  ;;  %2293 = vrot.lane.b32.xlu0 %v10252_v30, %s6395_s21  ;;  %v7322_v32 = vpop.f32.mrb[84].mxu0  ;;  %v10259_v24 = vld [vmem:[#allocation115_spill] sm:$0xff] }
 0x1cb   : > { %10257 = vst [vmem:[#allocation211_spill] sm:$0xff] %v7322_v32  ;;  %v7326_v30 = vpop.f32.mrb[85].mxu0 }
 0x1cc   : > { %v7310_v15 = vpop.permute.xlu1 %2239  ;;  %10258 = vst [vmem:[#allocation212_spill] sm:$0xff] %v7326_v30 }
 0x1cd   : > { %10253 = vst [vmem:[#allocation207_spill] sm:$0xff] %v7310_v15  ;;  %v7312_v54 = vpop.permute.xlu0 %2237 }
 0x1ce   : > { %10254 = vst [vmem:[#allocation208_spill] sm:$0xff] %v7312_v54  ;;  %2495 = vrot.lane.b32.xlu1 %v6990_v27, %s6395_s21  ;;  %2493 = vrot.lane.b32.xlu0 %v6976_v19, %s6395_s21  ;;  %v7330_v54 = vpop.f32.mrb[86].mxu0 }
 0x1cf   : > { %10260 = vst [vmem:[#allocation213_spill] sm:$0xff] %v7330_v54  ;;  %v7334_v15 = vpop.f32.mrb[87].mxu0  ;;  %v10270_v54 = vld [vmem:[#allocation6_spill] sm:$0xff] }
 0x1d0   : > { %v7318_v29 = vpop.permute.xlu1 %2439  ;;  %10262 = vst [vmem:[#allocation215_spill] sm:$0xff] %v7334_v15 }
 0x1d1   : > { %10255 = vst [vmem:[#allocation209_spill] sm:$0xff] %v7318_v29  ;;  %v7320_v13 = vpop.permute.xlu0 %2437  ;;  %v7338_v29 = vpop.f32.mrb[84].mxu1 }
 0x1d2   : > { %10256 = vst [vmem:[#allocation210_spill] sm:$0xff] %v7320_v13  ;;  %2291 = vrot.lane.b32.xlu1 %v6986_v21, %s6395_s21  ;;  %2289 = vrot.lane.b32.xlu0 %v10259_v24, %s6395_s21  ;;  %10264 = vst [vmem:[#allocation217_spill] sm:$0xff] %v7338_v29  ;;  %v10265_v13 = vld [vmem:[#allocation123_spill] sm:$0xff]  ;;  %v7342_v32 = vpop.f32.mrb[85].mxu1  ;;  %v10267_v21 = vld [vmem:[#allocation118_spill] sm:$0xff] }
 0x1d3   : > { %10266 = vst [vmem:[#allocation218_spill] sm:$0xff] %v7342_v32  ;;  %v7346_v30 = vpop.f32.mrb[86].mxu1  ;;  %v10269_v24 = vld [vmem:[#allocation124_spill] sm:$0xff]  ;;  %v10274_v29 = vld [vmem:[#allocation2_spill] sm:$0xff] }
 0x1d4   : > { %v7332_v27 = vpop.permute.xlu1 %2235  ;;  %10268 = vst [vmem:[#allocation219_spill] sm:$0xff] %v7346_v30  ;;  %v7350_v6 = vmax.f32 %v10270_v54, %v10269_v24  ;;  %v7354_v15 = vpop.f32.mrb[87].mxu1  ;;  %v10276_v24 = vld [vmem:[#allocation8_spill] sm:$0xff] }
 0x1d5   : > { %10261 = vst [vmem:[#allocation214_spill] sm:$0xff] %v7332_v27  ;;  %v7336_v19 = vpop.permute.xlu0 %2233  ;;  %10272 = vst [vmem:[#allocation6_spill] sm:$0xff] %v7354_v15  ;;  %v7368_v54 = vmax.f32 %v10276_v24, %v7032_v22  ;;  %v10279_v32 = vld [vmem:[#allocation4_spill] sm:$0xff]  ;;  %v7386_v22 = vpop.f32.mrb[88].mxu0 }
 0x1d6   : > { %10263 = vst [vmem:[#allocation216_spill] sm:$0xff] %v7336_v19  ;;  %2491 = vrot.lane.b32.xlu1 %v10265_v13, %s6395_s21  ;;  %2489 = vrot.lane.b32.xlu0 %v10267_v21, %s6395_s21  ;;  %v10273_v19 = vld [vmem:[#allocation119_spill] sm:$0xff]  ;;  %10283 = vst [vmem:[#allocation220_spill] sm:$0xff] %v7386_v22  ;;  %v7390_v24 = vpop.f32.mrb[89].mxu0 }
 0x1d7   : > { %v7358_v9 = vmax.f32 %v10274_v29, %v10273_v19  ;;  %10284 = vst [vmem:[#allocation221_spill] sm:$0xff] %v7390_v24 }
 0x1d8   : > { %v7352_v27 = vpop.permute.xlu1 %2435 }
 0x1d9   : > { %10271 = vst [vmem:[#allocation124_spill] sm:$0xff] %v7352_v27  ;;  %v7360_v13 = vpop.permute.xlu0 %2433  ;;  %v10278_v27 = vld [vmem:[#allocation125_spill] sm:$0xff] }
 0x1da   : > { %10275 = vst [vmem:[#allocation119_spill] sm:$0xff] %v7360_v13  ;;  %3163 = vrot.lane.b32.xlu1 %v7350_v6, %s6396_s22  ;;  %3161 = vrot.lane.b32.xlu0 %v7358_v9, %s6396_s22  ;;  %v7374_v15 = vmax.f32 %v10279_v32, %v10278_v27  ;;  %v10285_v32 = vld [vmem:[#allocation126_spill] sm:$0xff]  ;;  %v7394_v27 = vpop.f32.mrb[90].mxu0 }
 0x1db   : > { %10286 = vst [vmem:[#allocation222_spill] sm:$0xff] %v7394_v27 }
 0x1dc   : > { %v7370_v21 = vpop.permute.xlu1 %2247 }
 0x1dd   : > { %10277 = vst [vmem:[#allocation2_spill] sm:$0xff] %v7370_v21  ;;  %v7376_v19 = vpop.permute.xlu0 %2245  ;;  %v7398_v21 = vpop.f32.mrb[91].mxu0 }
 0x1de   : > { %10280 = vst [vmem:[#allocation8_spill] sm:$0xff] %v7376_v19  ;;  %3159 = vrot.lane.b32.xlu1 %v7368_v54, %s6396_s22  ;;  %3157 = vrot.lane.b32.xlu0 %v7374_v15, %s6396_s22  ;;  %10288 = vst [vmem:[#allocation224_spill] sm:$0xff] %v7398_v21 }
 0x1e0   : > { %v7382_v29 = vpop.permute.xlu1 %2447 }
 0x1e1   : > { %10281 = vst [vmem:[#allocation125_spill] sm:$0xff] %v7382_v29  ;;  %v7384_v13 = vpop.permute.xlu0 %2445  ;;  %v7402_v29 = vpop.f32.mrb[88].mxu1 }
 0x1e2   : > { %10282 = vst [vmem:[#allocation4_spill] sm:$0xff] %v7384_v13  ;;  %2303 = vrot.lane.b32.xlu1 %v7012_v47, %s6395_s21  ;;  %2301 = vrot.lane.b32.xlu0 %v10285_v32, %s6395_s21  ;;  %10290 = vst [vmem:[#allocation226_spill] sm:$0xff] %v7402_v29  ;;  %v7406_v13 = vpop.f32.mrb[89].mxu1 }
 0x1e3   : > { %10291 = vst [vmem:[#allocation227_spill] sm:$0xff] %v7406_v13  ;;  %v7410_v47 = vpop.f32.mrb[90].mxu1 }
 0x1e4   : > { %v7396_v19 = vpop.permute.xlu1 %2243  ;;  %10292 = vst [vmem:[#allocation228_spill] sm:$0xff] %v7410_v47  ;;  %v7414_v24 = vpop.f32.mrb[91].mxu1 }
 0x1e5   : > { %10287 = vst [vmem:[#allocation223_spill] sm:$0xff] %v7396_v19  ;;  %v7400_v30 = vpop.permute.xlu0 %2241  ;;  %10294 = vst [vmem:[#allocation230_spill] sm:$0xff] %v7414_v24 }
 0x1e6   : > { %10289 = vst [vmem:[#allocation225_spill] sm:$0xff] %v7400_v30  ;;  %2503 = vrot.lane.b32.xlu1 %v7022_v17, %s6395_s21  ;;  %2501 = vrot.lane.b32.xlu0 %v7008_v45, %s6395_s21  ;;  %v10296_v30 = vld [vmem:[#allocation127_spill] sm:$0xff]  ;;  %v10299_v45 = vld [vmem:[#allocation13_spill] sm:$0xff] }
 0x1e8   : > { %v7412_v32 = vpop.permute.xlu1 %2443 }
 0x1e9   : > { %10293 = vst [vmem:[#allocation229_spill] sm:$0xff] %v7412_v32  ;;  %v7416_v19 = vpop.permute.xlu0 %2441  ;;  %v7432_v32 = vmax.f32 %v10299_v45, %v7038_v3  ;;  %v10306_v3 = vld [vmem:[#allocation15_spill] sm:$0xff] }
 0x1ea   : > { %10295 = vst [vmem:[#allocation231_spill] sm:$0xff] %v7416_v19  ;;  %2299 = vrot.lane.b32.xlu1 %v7018_v62, %s6395_s21  ;;  %2297 = vrot.lane.b32.xlu0 %v10296_v30, %s6395_s21  ;;  %v10301_v62 = vld [vmem:[#allocation10_spill] sm:$0xff] }
 0x1eb   : > { %v7438_v24 = vmax.f32 %v10301_v62, %v7040_v14 }
 0x1ec   : > { %v7422_v17 = vpop.permute.xlu1 %2255 }
 0x1ed   : > { %10297 = vst [vmem:[#allocation232_spill] sm:$0xff] %v7422_v17  ;;  %v7424_v13 = vpop.permute.xlu0 %2253  ;;  %v7442_v17 = vpop.f32.mrb[92].mxu0 }
 0x1ee   : > { %10298 = vst [vmem:[#allocation233_spill] sm:$0xff] %v7424_v13  ;;  %2499 = vrot.lane.b32.xlu1 %v7026_v42, %s6395_s21  ;;  %2497 = vrot.lane.b32.xlu0 %v7014_v4, %s6395_s21  ;;  %10303 = vst [vmem:[#allocation234_spill] sm:$0xff] %v7442_v17  ;;  %v7446_v42 = vpop.f32.mrb[93].mxu0  ;;  %v7454_v4 = vmax.f32 %v10306_v3, %v7054_v1 }
 0x1ef   : > { %10304 = vst [vmem:[#allocation235_spill] sm:$0xff] %v7446_v42  ;;  %v7450_v45 = vpop.f32.mrb[94].mxu0  ;;  %v7466_v42 = vpop.f32.mrb[92].mxu1 }
 0x1f0   : > { %v7434_v19 = vpop.permute.xlu1 %2455  ;;  %10305 = vst [vmem:[#allocation236_spill] sm:$0xff] %v7450_v45  ;;  %v7458_v62 = vpop.f32.mrb[95].mxu0  ;;  %10311 = vst [vmem:[#allocation238_spill] sm:$0xff] %v7466_v42 }
 0x1f1   : > { %10300 = vst [vmem:[#allocation13_spill] sm:$0xff] %v7434_v19  ;;  %v7440_v30 = vpop.permute.xlu0 %2453  ;;  %10308 = vst [vmem:[#allocation237_spill] sm:$0xff] %v7458_v62  ;;  %v7470_v17 = vpop.f32.mrb[93].mxu1 }
 0x1f2   : > { %10302 = vst [vmem:[#allocation10_spill] sm:$0xff] %v7440_v30  ;;  %3171 = vrot.lane.b32.xlu1 %v7432_v32, %s6396_s22  ;;  %3169 = vrot.lane.b32.xlu0 %v7438_v24, %s6396_s22  ;;  %v10309_v30 = vld [vmem:[#allocation11_spill] sm:$0xff]  ;;  %10312 = vst [vmem:[#allocation239_spill] sm:$0xff] %v7470_v17  ;;  %v7474_v1 = vpop.f32.mrb[94].mxu1 }
 0x1f3   : > { %v7462_v19 = vmax.f32 %v10309_v30, %v7056_v48  ;;  %10313 = vst [vmem:[#allocation240_spill] sm:$0xff] %v7474_v1  ;;  %v10317_v48 = vld [vmem:[#allocation139_spill] sm:$0xff] }
 0x1f4   : > { %v7456_v14 = vpop.permute.xlu1 %2251 }
 0x1f5   : > { %10307 = vst [vmem:[#allocation15_spill] sm:$0xff] %v7456_v14  ;;  %v7464_v13 = vpop.permute.xlu0 %2249  ;;  %v7478_v14 = vpop.f32.mrb[95].mxu1 }
 0x1f6   : > { %10310 = vst [vmem:[#allocation11_spill] sm:$0xff] %v7464_v13  ;;  %3167 = vrot.lane.b32.xlu1 %v7454_v4, %s6396_s22  ;;  %3165 = vrot.lane.b32.xlu0 %v7462_v19, %s6396_s22  ;;  %10315 = vst [vmem:[#allocation242_spill] sm:$0xff] %v7478_v14 }
 0x1f8   : > { %v7476_v3 = vpop.permute.xlu1 %2451 }
 0x1f9   : > { %10314 = vst [vmem:[#allocation241_spill] sm:$0xff] %v7476_v3  ;;  %v7480_v30 = vpop.permute.xlu0 %2449 }
 0x1fa   : > { %10316 = vst [vmem:[#allocation243_spill] sm:$0xff] %v7480_v30  ;;  %2311 = vrot.lane.b32.xlu1 %v7066_v53, %s6395_s21  ;;  %2309 = vrot.lane.b32.xlu0 %v10317_v48, %s6395_s21  ;;  %v10324_v53 = vld [vmem:[#allocation140_spill] sm:$0xff] }
 0x1fb   : > { %v7498_v30 = vpop.f32.mrb[96].mxu0 }
 0x1fc   : > { %v7486_v13 = vpop.permute.xlu1 %2263  ;;  %10322 = vst [vmem:[#allocation248_spill] sm:$0xff] %v7498_v30  ;;  %v7502_v48 = vpop.f32.mrb[97].mxu0 }
 0x1fd   : > { %10318 = vst [vmem:[#allocation244_spill] sm:$0xff] %v7486_v13  ;;  %v7488_v17 = vpop.permute.xlu0 %2261  ;;  %10323 = vst [vmem:[#allocation249_spill] sm:$0xff] %v7502_v48 }
 0x1fe   : > { %10319 = vst [vmem:[#allocation245_spill] sm:$0xff] %v7488_v17  ;;  %2511 = vrot.lane.b32.xlu1 %v7082_v35, %s6395_s21  ;;  %2509 = vrot.lane.b32.xlu0 %v7074_v46, %s6395_s21  ;;  %v7506_v17 = vpop.f32.mrb[98].mxu0 }
 0x1ff   : > { %10325 = vst [vmem:[#allocation250_spill] sm:$0xff] %v7506_v17  ;;  %v7510_v13 = vpop.f32.mrb[99].mxu0 }
 0x200   : > { %v7494_v3 = vpop.permute.xlu1 %2463  ;;  %10327 = vst [vmem:[#allocation252_spill] sm:$0xff] %v7510_v13 }
 0x201   : > { %10320 = vst [vmem:[#allocation246_spill] sm:$0xff] %v7494_v3  ;;  %v7496_v14 = vpop.permute.xlu0 %2461  ;;  %v10329_v3 = vld [vmem:[#allocation21_spill] sm:$0xff] }
 0x202   : > { %10321 = vst [vmem:[#allocation247_spill] sm:$0xff] %v7496_v14  ;;  %2307 = vrot.lane.b32.xlu1 %v7070_v25, %s6395_s21  ;;  %2305 = vrot.lane.b32.xlu0 %v10324_v53, %s6395_s21  ;;  %v10328_v14 = vld [vmem:[#allocation148_spill] sm:$0xff]  ;;  %v10331_v53 = vld [vmem:[#allocation18_spill] sm:$0xff] }
 0x203   : > { %v7520_v25 = vmax.f32 %v10329_v3, %v10328_v14  ;;  %v7526_v30 = vmax.f32 %v10331_v53, %v7088_v51  ;;  %v10334_v3 = vld [vmem:[#allocation19_spill] sm:$0xff] }
 0x204   : > { %v7508_v35 = vpop.permute.xlu1 %2259 }
 0x205   : > { %10326 = vst [vmem:[#allocation251_spill] sm:$0xff] %v7508_v35  ;;  %v7512_v46 = vpop.permute.xlu0 %2257 }
 0x206   : > { %2507 = vrot.lane.b32.xlu1 %v7086_v39, %s6395_s21  ;;  %2505 = vrot.lane.b32.xlu0 %v7078_v44, %s6395_s21  ;;  %v10333_v44 = vld [vmem:[#allocation23_spill] sm:$0xff] }
 0x207   : > { %v7536_v39 = vmax.f32 %v10333_v44, %v7102_v33 }
 0x208   : > { %v7522_v48 = vpop.permute.xlu1 %2459 }
 0x209   : > { %10330 = vst [vmem:[#allocation148_spill] sm:$0xff] %v7522_v48  ;;  %v7528_v35 = vpop.permute.xlu0 %2457  ;;  %v7542_v48 = vmax.f32 %v10334_v3, %v7104_v41 }
 0x20a   : > { %10332 = vst [vmem:[#allocation21_spill] sm:$0xff] %v7528_v35  ;;  %3179 = vrot.lane.b32.xlu1 %v7520_v25, %s6396_s22  ;;  %3177 = vrot.lane.b32.xlu0 %v7526_v30, %s6396_s22 }
 0x20c   : > { %v7538_v14 = vpop.permute.xlu1 %2271 }
 0x20d   : > { %v7544_v51 = vpop.permute.xlu0 %2269 }
 0x20e   : > { %3175 = vrot.lane.b32.xlu1 %v7536_v39, %s6396_s22  ;;  %3173 = vrot.lane.b32.xlu0 %v7542_v48, %s6396_s22 }
 0x210   : > { %v7550_v53 = vpop.permute.xlu1 %2471 }
 0x211   : > { %10335 = vst [vmem:[#allocation18_spill] sm:$0xff] %v7550_v53  ;;  %v7552_v35 = vpop.permute.xlu0 %2469 }
 0x212   : > { %10336 = vst [vmem:[#allocation23_spill] sm:$0xff] %v7552_v35  ;;  %2319 = vrot.lane.b32.xlu1 %v7130_v59, %s6395_s21  ;;  %2317 = vrot.lane.b32.xlu0 %v7122_v36, %s6395_s21 }
 0x214   : > { %v7558_v33 = vpop.permute.xlu1 %2267 }
 0x215   : > { %v7560_v41 = vpop.permute.xlu0 %2265 }
 0x216   : > { %2519 = vrot.lane.b32.xlu1 %v7146_v63, %s6395_s21  ;;  %2517 = vrot.lane.b32.xlu0 %v7138_v60, %s6395_s21  ;;  %v10339_v60 = vld [vmem:[#allocation31_spill] sm:$0xff] }
 0x217   : > { %v7584_v63 = vmax.f32 %v10339_v60, %v7148_v57 }
 0x218   : > { %v7566_v44 = vpop.permute.xlu1 %2467 }
 0x219   : > { %10337 = vst [vmem:[#allocation19_spill] sm:$0xff] %v7566_v44  ;;  %v7568_v3 = vpop.permute.xlu0 %2465  ;;  %v10341_v44 = vld [vmem:[#allocation27_spill] sm:$0xff] }
 0x21a   : > { %10338 = vst [vmem:[#allocation253_spill] sm:$0xff] %v7568_v3  ;;  %2315 = vrot.lane.b32.xlu1 %v7134_v18, %s6395_s21  ;;  %2313 = vrot.lane.b32.xlu0 %v7126_v0, %s6395_s21  ;;  %v7590_v36 = vmax.f32 %v10341_v44, %v7152_v23 }
 0x21c   : > { %v7574_v35 = vpop.permute.xlu1 %2279 }
 0x21d   : > { %v7576_v53 = vpop.permute.xlu0 %2277 }
 0x21e   : > { %2515 = vrot.lane.b32.xlu1 %v7150_v55, %s6395_s21  ;;  %2513 = vrot.lane.b32.xlu0 %v7142_v31, %s6395_s21 }
 0x220   : > { %v7586_v3 = vpop.permute.xlu1 %2479 }
 0x221   : > { %10340 = vst [vmem:[#allocation31_spill] sm:$0xff] %v7586_v3  ;;  %v7592_v59 = vpop.permute.xlu0 %2477 }
 0x222   : > { %10342 = vst [vmem:[#allocation27_spill] sm:$0xff] %v7592_v59  ;;  %3183 = vrot.lane.b32.xlu1 %v7584_v63, %s6396_s22  ;;  %3181 = vrot.lane.b32.xlu0 %v7590_v36, %s6396_s22 }
 0x224   : > { %v7598_v55 = vpop.permute.xlu1 %2275 }
 0x225   : > { %v7600_v31 = vpop.permute.xlu0 %2273 }
 0x226   : > { %2327 = vrot.lane.b32.xlu1 %v7186_v8, %s6395_s21  ;;  %2325 = vrot.lane.b32.xlu0 %v7178_v2, %s6395_s21 }
 0x228   : > { %v7606_v23 = vpop.permute.xlu1 %2475 }
 0x229   : > { %10343 = vst [vmem:[#allocation254_spill] sm:$0xff] %v7606_v23  ;;  %v7608_v57 = vpop.permute.xlu0 %2473 }
 0x22a   : > { %10344 = vst [vmem:[#allocation255_spill] sm:$0xff] %v7608_v57  ;;  %2527 = vrot.lane.b32.xlu1 %v7202_v11, %s6395_s21  ;;  %2525 = vrot.lane.b32.xlu0 %v7194_v58, %s6395_s21 }
 0x22c   : > { %v7614_v60 = vpop.permute.xlu1 %2287 }
 0x22d   : > { %v7616_v44 = vpop.permute.xlu0 %2285 }
 0x22e   : > { %2323 = vrot.lane.b32.xlu1 %v7190_v52, %s6395_s21  ;;  %2321 = vrot.lane.b32.xlu0 %v7182_v20, %s6395_s21 }
 0x230   : > { %v7622_v59 = vpop.permute.xlu1 %2487 }
 0x231   : > { %10345 = vst [vmem:[#allocation256_spill] sm:$0xff] %v7622_v59  ;;  %v7624_v3 = vpop.permute.xlu0 %2485 }
 0x232   : > { %10346 = vst [vmem:[#allocation257_spill] sm:$0xff] %v7624_v3  ;;  %2523 = vrot.lane.b32.xlu1 %v7206_v56, %s6395_s21  ;;  %2521 = vrot.lane.b32.xlu0 %v7198_v61, %s6395_s21 }
 0x234   : > { %v7630_v58 = vpop.permute.xlu1 %2283 }
 0x235   : > { %v7632_v11 = vpop.permute.xlu0 %2281 }
 0x236   : > { %2335 = vrot.lane.b32.xlu1 %v7234_v43, %s6395_s21  ;;  %2333 = vrot.lane.b32.xlu0 %v7226_v26, %s6395_s21 }
 0x238   : > { %v7638_v57 = vpop.permute.xlu1 %2483 }
 0x239   : > { %10347 = vst [vmem:[#allocation258_spill] sm:$0xff] %v7638_v57  ;;  %v7640_v59 = vpop.permute.xlu0 %2481 }
 0x23a   : > { %10348 = vst [vmem:[#allocation259_spill] sm:$0xff] %v7640_v59  ;;  %2535 = vrot.lane.b32.xlu1 %v7250_v12, %s6395_s21  ;;  %2533 = vrot.lane.b32.xlu0 %v7242_v50, %s6395_s21 }
 0x23c   : > { %v7646_v61 = vpop.permute.xlu1 %2295 }
 0x23d   : > { %v7648_v56 = vpop.permute.xlu0 %2293 }
 0x23e   : > { %2331 = vrot.lane.b32.xlu1 %v7238_v49, %s6395_s21  ;;  %2329 = vrot.lane.b32.xlu0 %v7230_v10, %s6395_s21 }
 0x240   : > { %v7654_v3 = vpop.permute.xlu1 %2495 }
 0x241   : > { %10349 = vst [vmem:[#allocation260_spill] sm:$0xff] %v7654_v3  ;;  %v7656_v57 = vpop.permute.xlu0 %2493 }
 0x242   : > { %10350 = vst [vmem:[#allocation261_spill] sm:$0xff] %v7656_v57  ;;  %2531 = vrot.lane.b32.xlu1 %v7254_v7, %s6395_s21  ;;  %2529 = vrot.lane.b32.xlu0 %v7246_v5, %s6395_s21  ;;  %v7681_v5 = vld [vmem:[%s9802_s2] ss:$0 sm:$0xff] }
 0x244   : > { %v7662_v50 = vpop.permute.xlu1 %2291 }
 0x245   : > { %v7664_v12 = vpop.permute.xlu0 %2289 }
 0x246   : > { %2343 = vrot.lane.b32.xlu1 %v7282_v34, %s6395_s21  ;;  %2341 = vrot.lane.b32.xlu0 %v7274_v40, %s6395_s21 }
 0x248   : > { %v7670_v59 = vpop.permute.xlu1 %2491 }
 0x249   : > { %10351 = vst [vmem:[#allocation262_spill] sm:$0xff] %v7670_v59  ;;  %v7672_v3 = vpop.permute.xlu0 %2489 }
 0x24a   : > { %10352 = vst [vmem:[#allocation263_spill] sm:$0xff] %v7672_v3  ;;  %2543 = vrot.lane.b32.xlu1 %v7298_v28, %s6395_s21  ;;  %2541 = vrot.lane.b32.xlu0 %v7290_v37, %s6395_s21 }
 0x24c   : > { %v3164_v7 = vpop.permute.xlu1 %3163 }
 0x24d   : > { %v3162_v57 = vpop.permute.xlu0 %3161  ;;  %v3748_v23 = vmax.f32 %v7350_v6, %v3164_v7 }
 0x24e   : > { %v3747_v59 = vmax.f32 %v7358_v9, %v3162_v57  ;;  %2339 = vrot.lane.b32.xlu1 %v7286_v38, %s6395_s21  ;;  %2337 = vrot.lane.b32.xlu0 %v7278_v16, %s6395_s21  ;;  %v10353_v9 = vld [vmem:[#allocation205_spill] sm:$0xff] }
 0x24f   : > { %v3951_v3 = vadd.f32 %v7681_v5, %v3748_v23 }
 0x250   : > { %v3950_v37 = vadd.f32 %v7681_v5, %v3747_v59  ;;  %v3160_v28 = vpop.permute.xlu1 %3159 }
 0x251   : > { %v4147_v40 = vmax.f32 %v3951_v3, 0.0  ;;  %v3158_v34 = vpop.permute.xlu0 %3157  ;;  %v3746_v26 = vmax.f32 %v7368_v54, %v3160_v28  ;;  %v10354_v28 = vld [vmem:[#allocation202_spill] sm:$0xff] }
 0x252   : > { %v4146_v6 = vmax.f32 %v3950_v37, 0.0  ;;  %v3745_v7 = vmax.f32 %v7374_v15, %v3158_v34  ;;  %2539 = vrot.lane.b32.xlu1 %v10353_v9, %s6395_s21  ;;  %2537 = vrot.lane.b32.xlu0 %v10354_v28, %s6395_s21  ;;  %v10355_v15 = vld [vmem:[#allocation213_spill] sm:$0xff]  ;;  %v10356_v28 = vld [vmem:[#allocation211_spill] sm:$0xff] }
 0x253   : > { %v5783_v59 = vpack.c.bf16 %v4147_v40, %v4147_v40  ;;  %v3949_v3 = vadd.f32 %v7681_v5, %v3746_v26 }
 0x254   : > { %v5782_v54 = vpack.c.bf16 %v4146_v6, %v4146_v6  ;;  %v3948_v23 = vadd.f32 %v7681_v5, %v3745_v7  ;;  %v7706_v57 = vpop.permute.xlu1 %2303 }
 0x255   : > { %5128 = vst.msk [vmem:[%s7697_s27 + $0xc] sm:$0xf] %vm5124_vm1, %v5783_v59  ;;  %v4145_v37 = vmax.f32 %v3949_v3, 0.0  ;;  %v7710_v34 = vpop.permute.xlu0 %2301  ;;  %v10359_v59 = vld [vmem:[#allocation219_spill] sm:$0xff]  ;;  %v10360_v3 = vld [vmem:[#allocation217_spill] sm:$0xff] }
 0x256   : > { %5127 = vst.msk [vmem:[%s7697_s27 + $0x8] sm:$0xf] %vm5124_vm1, %v5782_v54  ;;  %v4144_v40 = vmax.f32 %v3948_v23, 0.0  ;;  %2351 = vrot.lane.b32.xlu1 %v10355_v15, %s6395_s21  ;;  %2349 = vrot.lane.b32.xlu0 %v10356_v28, %s6395_s21 }
 0x257   : > { %v5781_v26 = vpack.c.bf16 %v4145_v37, %v4145_v37  ;;  %v10361_v37 = vld [vmem:[#allocation215_spill] sm:$0xff] }
 0x258   : > { %v5780_v6 = vpack.c.bf16 %v4144_v40, %v4144_v40  ;;  %v7718_v9 = vpop.permute.xlu1 %2503  ;;  %v10362_v40 = vld [vmem:[#allocation212_spill] sm:$0xff] }
 0x259   : > { %10357 = vst [vmem:[#allocation264_spill] sm:$0xff] %v7718_v9  ;;  %5126 = vst.msk [vmem:[%s7697_s27 + $0x4] sm:$0xf] %vm5124_vm1, %v5781_v26  ;;  %v7722_v7 = vpop.permute.xlu0 %2501 }
 0x25a   : > { %10358 = vst [vmem:[#allocation265_spill] sm:$0xff] %v7722_v7  ;;  %5125 = vst.msk [vmem:[%s7697_s27] sm:$0xf] %vm5124_vm1, %v5780_v6  ;;  %2551 = vrot.lane.b32.xlu1 %v10359_v59, %s6395_s21  ;;  %2549 = vrot.lane.b32.xlu0 %v10360_v3, %s6395_s21  ;;  %v10365_v6 = vld [vmem:[#allocation6_spill] sm:$0xff] }
 0x25b   : > { %v10366_v59 = vld [vmem:[#allocation218_spill] sm:$0xff] }
 0x25c   : > { %v7730_v54 = vpop.permute.xlu1 %2299 }
 0x25d   : > { %v7732_v23 = vpop.permute.xlu0 %2297 }
 0x25e   : > { %2347 = vrot.lane.b32.xlu1 %v10361_v37, %s6395_s21  ;;  %2345 = vrot.lane.b32.xlu0 %v10362_v40, %s6395_s21 }
 0x260   : > { %v7738_v26 = vpop.permute.xlu1 %2499 }
 0x261   : > { %10363 = vst [vmem:[#allocation266_spill] sm:$0xff] %v7738_v26  ;;  %v7740_v7 = vpop.permute.xlu0 %2497 }
 0x262   : > { %10364 = vst [vmem:[#allocation267_spill] sm:$0xff] %v7740_v7  ;;  %2547 = vrot.lane.b32.xlu1 %v10365_v6, %s6395_s21  ;;  %2545 = vrot.lane.b32.xlu0 %v10366_v59, %s6395_s21 }
 0x264   : > { %v3172_v3 = vpop.permute.xlu1 %3171 }
 0x265   : > { %v3170_v9 = vpop.permute.xlu0 %3169  ;;  %v3752_v28 = vmax.f32 %v7432_v32, %v3172_v3 }
 0x266   : > { %v3751_v15 = vmax.f32 %v7438_v24, %v3170_v9  ;;  %2359 = vrot.lane.b32.xlu1 %v7394_v27, %s6395_s21  ;;  %2357 = vrot.lane.b32.xlu0 %v7386_v22, %s6395_s21 }
 0x267   : > { %v3955_v40 = vadd.f32 %v7681_v5, %v3752_v28 }
 0x268   : > { %v3954_v6 = vadd.f32 %v7681_v5, %v3751_v15  ;;  %v3168_v7 = vpop.permute.xlu1 %3167 }
 0x269   : > { %v4151_v59 = vmax.f32 %v3955_v40, 0.0  ;;  %v3166_v26 = vpop.permute.xlu0 %3165  ;;  %v3750_v37 = vmax.f32 %v7454_v4, %v3168_v7 }
 0x26a   : > { %v4150_v32 = vmax.f32 %v3954_v6, 0.0  ;;  %v3749_v24 = vmax.f32 %v7462_v19, %v3166_v26  ;;  %2559 = vrot.lane.b32.xlu1 %v7410_v47, %s6395_s21  ;;  %2557 = vrot.lane.b32.xlu0 %v7402_v29, %s6395_s21 }
 0x26b   : > { %v5787_v9 = vpack.c.bf16 %v4151_v59, %v4151_v59  ;;  %v3953_v28 = vadd.f32 %v7681_v5, %v3750_v37  ;;  %v10367_v37 = vld [vmem:[#allocation221_spill] sm:$0xff] }
 0x26c   : > { %v5786_v15 = vpack.c.bf16 %v4150_v32, %v4150_v32  ;;  %v3952_v3 = vadd.f32 %v7681_v5, %v3749_v24  ;;  %v7762_v40 = vpop.permute.xlu1 %2311  ;;  %v10370_v24 = vld [vmem:[#allocation230_spill] sm:$0xff] }
 0x26d   : > { %5132 = vst.msk [vmem:[%s7697_s27 + $0x1c] sm:$0xf] %vm5124_vm1, %v5787_v9  ;;  %v4149_v4 = vmax.f32 %v3953_v28, 0.0  ;;  %v7766_v19 = vpop.permute.xlu0 %2309  ;;  %v10371_v9 = vld [vmem:[#allocation227_spill] sm:$0xff] }
 0x26e   : > { %5131 = vst.msk [vmem:[%s7697_s27 + $0x18] sm:$0xf] %vm5124_vm1, %v5786_v15  ;;  %v4148_v7 = vmax.f32 %v3952_v3, 0.0  ;;  %2355 = vrot.lane.b32.xlu1 %v7398_v21, %s6395_s21  ;;  %2353 = vrot.lane.b32.xlu0 %v10367_v37, %s6395_s21  ;;  %v10372_v3 = vld [vmem:[#allocation234_spill] sm:$0xff] }
 0x26f   : > { %v5785_v59 = vpack.c.bf16 %v4149_v4, %v4149_v4 }
 0x270   : > { %v5784_v26 = vpack.c.bf16 %v4148_v7, %v4148_v7  ;;  %v7774_v6 = vpop.permute.xlu1 %2511 }
 0x271   : > { %10368 = vst [vmem:[#allocation268_spill] sm:$0xff] %v7774_v6  ;;  %5130 = vst.msk [vmem:[%s7697_s27 + $0x14] sm:$0xf] %vm5124_vm1, %v5785_v59  ;;  %v7778_v32 = vpop.permute.xlu0 %2509 }
 0x272   : > { %10369 = vst [vmem:[#allocation269_spill] sm:$0xff] %v7778_v32  ;;  %5129 = vst.msk [vmem:[%s7697_s27 + $0x10] sm:$0xf] %vm5124_vm1, %v5784_v26  ;;  %2555 = vrot.lane.b32.xlu1 %v10370_v24, %s6395_s21  ;;  %2553 = vrot.lane.b32.xlu0 %v10371_v9, %s6395_s21  ;;  %v10375_v24 = vld [vmem:[#allocation235_spill] sm:$0xff] }
 0x274   : > { %v7786_v28 = vpop.permute.xlu1 %2307 }
 0x275   : > { %v7788_v15 = vpop.permute.xlu0 %2305 }
 0x276   : > { %2367 = vrot.lane.b32.xlu1 %v7450_v45, %s6395_s21  ;;  %2365 = vrot.lane.b32.xlu0 %v10372_v3, %s6395_s21 }
 0x278   : > { %v7794_v4 = vpop.permute.xlu1 %2507 }
 0x279   : > { %10373 = vst [vmem:[#allocation270_spill] sm:$0xff] %v7794_v4  ;;  %v7796_v7 = vpop.permute.xlu0 %2505  ;;  %v10377_v4 = vld [vmem:[#allocation239_spill] sm:$0xff] }
 0x27a   : > { %10374 = vst [vmem:[#allocation271_spill] sm:$0xff] %v7796_v7  ;;  %2567 = vrot.lane.b32.xlu1 %v7474_v1, %s6395_s21  ;;  %2565 = vrot.lane.b32.xlu0 %v7466_v42, %s6395_s21 }
 0x27c   : > { %v3180_v59 = vpop.permute.xlu1 %3179 }
 0x27d   : > { %v3178_v26 = vpop.permute.xlu0 %3177  ;;  %v3756_v29 = vmax.f32 %v7520_v25, %v3180_v59  ;;  %v10376_v59 = vld [vmem:[#allocation242_spill] sm:$0xff] }
 0x27e   : > { %v3755_v47 = vmax.f32 %v7526_v30, %v3178_v26  ;;  %2363 = vrot.lane.b32.xlu1 %v7458_v62, %s6395_s21  ;;  %2361 = vrot.lane.b32.xlu0 %v10375_v24, %s6395_s21 }
 0x27f   : > { %v3959_v9 = vadd.f32 %v7681_v5, %v3756_v29 }
 0x280   : > { %v3958_v1 = vadd.f32 %v7681_v5, %v3755_v47  ;;  %v3176_v32 = vpop.permute.xlu1 %3175 }
 0x281   : > { %v4155_v42 = vmax.f32 %v3959_v9, 0.0  ;;  %v3174_v6 = vpop.permute.xlu0 %3173  ;;  %v3754_v7 = vmax.f32 %v7536_v39, %v3176_v32 }
 0x282   : > { %v4154_v25 = vmax.f32 %v3958_v1, 0.0  ;;  %v3753_v30 = vmax.f32 %v7542_v48, %v3174_v6  ;;  %2563 = vrot.lane.b32.xlu1 %v10376_v59, %s6395_s21  ;;  %2561 = vrot.lane.b32.xlu0 %v10377_v4, %s6395_s21  ;;  %v10378_v6 = vld [vmem:[#allocation248_spill] sm:$0xff]  ;;  %v10387_v59 = vld [vmem:[#allocation39_spill] sm:$0xff] }
 0x283   : > { %v5791_v26 = vpack.c.bf16 %v4155_v42, %v4155_v42  ;;  %v3957_v29 = vadd.f32 %v7681_v5, %v3754_v7 }
 0x284   : > { %v5790_v47 = vpack.c.bf16 %v4154_v25, %v4154_v25  ;;  %v3956_v9 = vadd.f32 %v7681_v5, %v3753_v30  ;;  %v7818_v3 = vpop.permute.xlu1 %2319  ;;  %v10381_v30 = vld [vmem:[#allocation249_spill] sm:$0xff] }
 0x285   : > { %5136 = vst.msk [vmem:[%s7697_s27 + $0x2c] sm:$0xf] %vm5124_vm1, %v5791_v26  ;;  %v4153_v39 = vmax.f32 %v3957_v29, 0.0  ;;  %v7822_v1 = vpop.permute.xlu0 %2317  ;;  %v10382_v26 = vld [vmem:[#allocation154_spill] sm:$0xff]  ;;  %v10383_v29 = vld [vmem:[#allocation29_spill] sm:$0xff] }
 0x286   : > { %5135 = vst.msk [vmem:[%s7697_s27 + $0x28] sm:$0xf] %vm5124_vm1, %v5790_v47  ;;  %v4152_v42 = vmax.f32 %v3956_v9, 0.0  ;;  %2375 = vrot.lane.b32.xlu1 %v7506_v17, %s6395_s21  ;;  %2373 = vrot.lane.b32.xlu0 %v10378_v6, %s6395_s21  ;;  %v7844_v47 = vmax.f32 %v10383_v29, %v10382_v26  ;;  %v10389_v29 = vld [vmem:[#allocation171_spill] sm:$0xff]  ;;  %v10393_v17 = vld [vmem:[#allocation37_spill] sm:$0xff] }
 0x287   : > { %v5789_v48 = vpack.c.bf16 %v4153_v39, %v4153_v39  ;;  %v10384_v39 = vld [vmem:[#allocation155_spill] sm:$0xff] }
 0x288   : > { %v5788_v32 = vpack.c.bf16 %v4152_v42, %v4152_v42  ;;  %v7830_v7 = vpop.permute.xlu1 %2519  ;;  %v10385_v42 = vld [vmem:[#allocation26_spill] sm:$0xff] }
 0x289   : > { %10379 = vst [vmem:[#allocation272_spill] sm:$0xff] %v7830_v7  ;;  %5134 = vst.msk [vmem:[%s7697_s27 + $0x24] sm:$0xf] %vm5124_vm1, %v5789_v48  ;;  %v7834_v25 = vpop.permute.xlu0 %2517  ;;  %v7850_v4 = vmax.f32 %v10385_v42, %v10384_v39  ;;  %v10390_v7 = vld [vmem:[#allocation35_spill] sm:$0xff]  ;;  %v10392_v42 = vld [vmem:[#allocation166_spill] sm:$0xff] }
 0x28a   : > { %10380 = vst [vmem:[#allocation273_spill] sm:$0xff] %v7834_v25  ;;  %5133 = vst.msk [vmem:[%s7697_s27 + $0x20] sm:$0xf] %vm5124_vm1, %v5788_v32  ;;  %2371 = vrot.lane.b32.xlu1 %v7510_v13, %s6395_s21  ;;  %2369 = vrot.lane.b32.xlu0 %v10381_v30, %s6395_s21  ;;  %v10386_v32 = vld [vmem:[#allocation170_spill] sm:$0xff]  ;;  %v7866_v6 = vmax.f32 %v10390_v7, %v10389_v29  ;;  %v7876_v30 = vmax.f32 %v10393_v17, %v10392_v42  ;;  %v10396_v17 = vld [vmem:[#allocation183_spill] sm:$0xff] }
 0x28b   : > { %v7860_v25 = vmax.f32 %v10387_v59, %v10386_v32  ;;  %v10394_v32 = vld [vmem:[#allocation167_spill] sm:$0xff]  ;;  %v10395_v13 = vld [vmem:[#allocation34_spill] sm:$0xff] }
 0x28c   : > { %v7846_v9 = vpop.permute.xlu1 %2315  ;;  %v10397_v42 = vld [vmem:[#allocation47_spill] sm:$0xff] }
 0x28d   : > { %v7852_v48 = vpop.permute.xlu0 %2313  ;;  %v7891_v24 = vmax.f32 %v10397_v42, %v10396_v17  ;;  %v10402_v17 = vld [vmem:[#allocation178_spill] sm:$0xff]  ;;  %v10403_v42 = vld [vmem:[#allocation45_spill] sm:$0xff] }
 0x28e   : > { %3187 = vrot.lane.b32.xlu1 %v7844_v47, %s6396_s22  ;;  %3185 = vrot.lane.b32.xlu0 %v7850_v4, %s6396_s22 }
 0x28f   : > { %10398 = vst [vmem:[#allocation155_spill] sm:$0xff] %v7891_v24 }
 0x290   : > { %v7862_v26 = vpop.permute.xlu1 %2515 }
 0x291   : > { %10388 = vst [vmem:[#allocation154_spill] sm:$0xff] %v7862_v26  ;;  %v7868_v39 = vpop.permute.xlu0 %2513  ;;  %v7880_v26 = vmax.f32 %v10395_v13, %v10394_v32 }
 0x292   : > { %10391 = vst [vmem:[#allocation29_spill] sm:$0xff] %v7868_v39  ;;  %3191 = vrot.lane.b32.xlu1 %v7860_v25, %s6396_s22  ;;  %3189 = vrot.lane.b32.xlu0 %v7866_v6, %s6396_s22 }
 0x294   : > { %v3184_v59 = vpop.permute.xlu1 %3183 }
 0x295   : > { %v3182_v45 = vpop.permute.xlu0 %3181  ;;  %v3758_v7 = vmax.f32 %v7584_v63, %v3184_v59  ;;  %v10399_v63 = vld [vmem:[#allocation184_spill] sm:$0xff] }
 0x296   : > { %v3757_v29 = vmax.f32 %v7590_v36, %v3182_v45  ;;  %3195 = vrot.lane.b32.xlu1 %v7876_v30, %s6396_s22  ;;  %3193 = vrot.lane.b32.xlu0 %v7880_v26, %s6396_s22  ;;  %v10400_v36 = vld [vmem:[#allocation43_spill] sm:$0xff] }
 0x297   : > { %v3961_v39 = vadd.f32 %v7681_v5, %v3758_v7  ;;  %v7898_v45 = vmax.f32 %v10400_v36, %v10399_v63  ;;  %v10406_v63 = vld [vmem:[#allocation179_spill] sm:$0xff]  ;;  %v10407_v36 = vld [vmem:[#allocation42_spill] sm:$0xff] }
 0x298   : > { %v3960_v13 = vadd.f32 %v7681_v5, %v3757_v29  ;;  %v7894_v32 = vpop.permute.xlu1 %2327  ;;  %v7908_v29 = vmax.f32 %v10403_v42, %v10402_v17 }
 0x299   : > { %10401 = vst [vmem:[#allocation26_spill] sm:$0xff] %v7898_v45  ;;  %v4157_v59 = vmax.f32 %v3961_v39, 0.0  ;;  %v7900_v62 = vpop.permute.xlu0 %2325  ;;  %v7914_v39 = vmax.f32 %v10407_v36, %v10406_v63  ;;  %v10413_v63 = vld [vmem:[#allocation200_spill] sm:$0xff]  ;;  %v10414_v36 = vld [vmem:[#allocation51_spill] sm:$0xff] }
 0x29a   : > { %v4156_v7 = vmax.f32 %v3960_v13, 0.0  ;;  %3199 = vrot.lane.b32.xlu1 %v7891_v24, %s6396_s22  ;;  %3197 = vrot.lane.b32.xlu0 %v7898_v45, %s6396_s22  ;;  %10404 = vst [vmem:[#allocation170_spill] sm:$0xff] %v7908_v29 }
 0x29b   : > { %v5793_v22 = vpack.c.bf16 %v4157_v59, %v4157_v59  ;;  %10408 = vst [vmem:[#allocation171_spill] sm:$0xff] %v7914_v39  ;;  %v10410_v59 = vld [vmem:[#allocation198_spill] sm:$0xff] }
 0x29c   : > { %v5792_v27 = vpack.c.bf16 %v4156_v7, %v4156_v7  ;;  %v7910_v37 = vpop.permute.xlu1 %2527  ;;  %v10411_v7 = vld [vmem:[#allocation55_spill] sm:$0xff] }
 0x29d   : > { %10405 = vst [vmem:[#allocation39_spill] sm:$0xff] %v7910_v37  ;;  %5138 = vst.msk [vmem:[%s7697_s27 + $0x34] sm:$0xf] %vm5124_vm1, %v5793_v22  ;;  %v7918_v13 = vpop.permute.xlu0 %2525  ;;  %v7928_v17 = vmax.f32 %v10411_v7, %v10410_v59  ;;  %v7934_v37 = vmax.f32 %v10414_v36, %v10413_v63  ;;  %v10420_v7 = vld [vmem:[#allocation192_spill] sm:$0xff]  ;;  %v10424_v36 = vld [vmem:[#allocation214_spill] sm:$0xff] }
 0x29e   : > { %10409 = vst [vmem:[#allocation35_spill] sm:$0xff] %v7918_v13  ;;  %5137 = vst.msk [vmem:[%s7697_s27 + $0x30] sm:$0xf] %vm5124_vm1, %v5792_v27  ;;  %3203 = vrot.lane.b32.xlu1 %v7908_v29, %s6396_s22  ;;  %3201 = vrot.lane.b32.xlu0 %v7914_v39, %s6396_s22  ;;  %v10416_v27 = vld [vmem:[#allocation191_spill] sm:$0xff]  ;;  %v10417_v13 = vld [vmem:[#allocation53_spill] sm:$0xff] }
 0x29f   : > { %10412 = vst [vmem:[#allocation166_spill] sm:$0xff] %v7928_v17  ;;  %10415 = vst [vmem:[#allocation37_spill] sm:$0xff] %v7934_v37  ;;  %v7944_v21 = vmax.f32 %v10417_v13, %v10416_v27  ;;  %v10421_v39 = vld [vmem:[#allocation50_spill] sm:$0xff]  ;;  %v10427_v27 = vld [vmem:[#allocation216_spill] sm:$0xff] }
 0x2a0   : > { %v7930_v42 = vpop.permute.xlu1 %2323  ;;  %v7950_v29 = vmax.f32 %v10421_v39, %v10420_v7  ;;  %v10431_v7 = vld [vmem:[#allocation207_spill] sm:$0xff] }
 0x2a1   : > { %v7936_v22 = vpop.permute.xlu0 %2321  ;;  %10418 = vst [vmem:[#allocation167_spill] sm:$0xff] %v7944_v21 }
 0x2a2   : > { %3207 = vrot.lane.b32.xlu1 %v7928_v17, %s6396_s22  ;;  %3205 = vrot.lane.b32.xlu0 %v7934_v37, %s6396_s22  ;;  %10422 = vst [vmem:[#allocation183_spill] sm:$0xff] %v7950_v29  ;;  %v10425_v37 = vld [vmem:[#allocation63_spill] sm:$0xff] }
 0x2a3   : > { %v7960_v17 = vmax.f32 %v10425_v37, %v10424_v36  ;;  %v10435_v36 = vld [vmem:[#allocation208_spill] sm:$0xff] }
 0x2a4   : > { %v7946_v59 = vpop.permute.xlu1 %2523 }
 0x2a5   : > { %10419 = vst [vmem:[#allocation34_spill] sm:$0xff] %v7946_v59  ;;  %v7952_v63 = vpop.permute.xlu0 %2521  ;;  %10426 = vst [vmem:[#allocation184_spill] sm:$0xff] %v7960_v17  ;;  %v10428_v59 = vld [vmem:[#allocation59_spill] sm:$0xff] }
 0x2a6   : > { %10423 = vst [vmem:[#allocation47_spill] sm:$0xff] %v7952_v63  ;;  %3211 = vrot.lane.b32.xlu1 %v7944_v21, %s6396_s22  ;;  %3209 = vrot.lane.b32.xlu0 %v7950_v29, %s6396_s22  ;;  %v7966_v16 = vmax.f32 %v10428_v59, %v10427_v27  ;;  %v10432_v63 = vld [vmem:[#allocation61_spill] sm:$0xff]  ;;  %v10436_v21 = vld [vmem:[#allocation58_spill] sm:$0xff]  ;;  %v10439_v27 = vld [vmem:[#allocation223_spill] sm:$0xff] }
 0x2a7   : > { %v7976_v29 = vmax.f32 %v10432_v63, %v10431_v7  ;;  %v7982_v38 = vmax.f32 %v10436_v21, %v10435_v36  ;;  %v10442_v7 = vld [vmem:[#allocation225_spill] sm:$0xff]  ;;  %v10445_v36 = vld [vmem:[#allocation2_spill] sm:$0xff] }
 0x2a8   : > { %v7962_v13 = vpop.permute.xlu1 %2335  ;;  %10429 = vst [vmem:[#allocation43_spill] sm:$0xff] %v7966_v16 }
 0x2a9   : > { %v7968_v39 = vpop.permute.xlu0 %2333  ;;  %10433 = vst [vmem:[#allocation45_spill] sm:$0xff] %v7976_v29  ;;  %10437 = vst [vmem:[#allocation42_spill] sm:$0xff] %v7982_v38 }
 0x2aa   : > { %10430 = vst [vmem:[#allocation178_spill] sm:$0xff] %v7968_v39  ;;  %3215 = vrot.lane.b32.xlu1 %v7960_v17, %s6396_s22  ;;  %3213 = vrot.lane.b32.xlu0 %v7966_v16, %s6396_s22  ;;  %v10440_v16 = vld [vmem:[#allocation71_spill] sm:$0xff] }
 0x2ab   : > { %v7992_v17 = vmax.f32 %v10440_v16, %v10439_v27  ;;  %v10449_v27 = vld [vmem:[#allocation8_spill] sm:$0xff] }
 0x2ac   : > { %v7978_v37 = vpop.permute.xlu1 %2535 }
 0x2ad   : > { %10434 = vst [vmem:[#allocation179_spill] sm:$0xff] %v7978_v37  ;;  %v7984_v59 = vpop.permute.xlu0 %2533  ;;  %10441 = vst [vmem:[#allocation55_spill] sm:$0xff] %v7992_v17  ;;  %v10443_v37 = vld [vmem:[#allocation67_spill] sm:$0xff] }
 0x2ae   : > { %10438 = vst [vmem:[#allocation198_spill] sm:$0xff] %v7984_v59  ;;  %3219 = vrot.lane.b32.xlu1 %v7976_v29, %s6396_s22  ;;  %3217 = vrot.lane.b32.xlu0 %v7982_v38, %s6396_s22  ;;  %v7998_v45 = vmax.f32 %v10443_v37, %v10442_v7  ;;  %v10446_v59 = vld [vmem:[#allocation69_spill] sm:$0xff]  ;;  %v10450_v29 = vld [vmem:[#allocation66_spill] sm:$0xff]  ;;  %v10453_v7 = vld [vmem:[#allocation15_spill] sm:$0xff] }
 0x2af   : > { %v8008_v38 = vmax.f32 %v10446_v59, %v10445_v36  ;;  %v8014_v24 = vmax.f32 %v10450_v29, %v10449_v27  ;;  %v10457_v36 = vld [vmem:[#allocation11_spill] sm:$0xff]  ;;  %v10461_v27 = vld [vmem:[#allocation232_spill] sm:$0xff] }
 0x2b0   : > { %v7994_v63 = vpop.permute.xlu1 %2331  ;;  %10444 = vst [vmem:[#allocation200_spill] sm:$0xff] %v7998_v45 }
 0x2b1   : > { %v8000_v21 = vpop.permute.xlu0 %2329  ;;  %10447 = vst [vmem:[#allocation51_spill] sm:$0xff] %v8008_v38  ;;  %10451 = vst [vmem:[#allocation53_spill] sm:$0xff] %v8014_v24 }
 0x2b2   : > { %3223 = vrot.lane.b32.xlu1 %v7992_v17, %s6396_s22  ;;  %3221 = vrot.lane.b32.xlu0 %v7998_v45, %s6396_s22  ;;  %v10454_v45 = vld [vmem:[#allocation79_spill] sm:$0xff] }
 0x2b3   : > { %v8024_v17 = vmax.f32 %v10454_v45, %v10453_v7  ;;  %v10465_v7 = vld [vmem:[#allocation233_spill] sm:$0xff] }
 0x2b4   : > { %v8010_v16 = vpop.permute.xlu1 %2531 }
 0x2b5   : > { %10448 = vst [vmem:[#allocation191_spill] sm:$0xff] %v8010_v16  ;;  %v8016_v37 = vpop.permute.xlu0 %2529  ;;  %10455 = vst [vmem:[#allocation50_spill] sm:$0xff] %v8024_v17  ;;  %v10458_v16 = vld [vmem:[#allocation75_spill] sm:$0xff] }
 0x2b6   : > { %10452 = vst [vmem:[#allocation192_spill] sm:$0xff] %v8016_v37  ;;  %3227 = vrot.lane.b32.xlu1 %v8008_v38, %s6396_s22  ;;  %3225 = vrot.lane.b32.xlu0 %v8014_v24, %s6396_s22  ;;  %v8030_v39 = vmax.f32 %v10458_v16, %v10457_v36  ;;  %v10462_v37 = vld [vmem:[#allocation77_spill] sm:$0xff]  ;;  %v10466_v38 = vld [vmem:[#allocation74_spill] sm:$0xff]  ;;  %v10469_v36 = vld [vmem:[#allocation251_spill] sm:$0xff] }
 0x2b7   : > { %v8040_v24 = vmax.f32 %v10462_v37, %v10461_v27  ;;  %v10471_v27 = vld [vmem:[#allocation83_spill] sm:$0xff] }
 0x2b8   : > { %v8026_v59 = vpop.permute.xlu1 %2343  ;;  %10459 = vst [vmem:[#allocation63_spill] sm:$0xff] %v8030_v39 }
 0x2b9   : > { %10456 = vst [vmem:[#allocation214_spill] sm:$0xff] %v8026_v59  ;;  %v8032_v29 = vpop.permute.xlu0 %2341  ;;  %10463 = vst [vmem:[#allocation59_spill] sm:$0xff] %v8040_v24  ;;  %v8046_v59 = vmax.f32 %v10466_v38, %v10465_v7  ;;  %v10473_v7 = vld [vmem:[#allocation244_spill] sm:$0xff] }
 0x2ba   : > { %10460 = vst [vmem:[#allocation216_spill] sm:$0xff] %v8032_v29  ;;  %3231 = vrot.lane.b32.xlu1 %v8024_v17, %s6396_s22  ;;  %3229 = vrot.lane.b32.xlu0 %v8030_v39, %s6396_s22  ;;  %v10470_v39 = vld [vmem:[#allocation87_spill] sm:$0xff] }
 0x2bb   : > { %10467 = vst [vmem:[#allocation61_spill] sm:$0xff] %v8046_v59  ;;  %v8056_v17 = vmax.f32 %v10470_v39, %v10469_v36  ;;  %v10476_v36 = vld [vmem:[#allocation245_spill] sm:$0xff] }
 0x2bc   : > { %v8042_v45 = vpop.permute.xlu1 %2543 }
 0x2bd   : > { %10464 = vst [vmem:[#allocation207_spill] sm:$0xff] %v8042_v45  ;;  %v8048_v16 = vpop.permute.xlu0 %2541  ;;  %v8062_v45 = vmax.f32 %v10471_v27, %v7512_v46  ;;  %v10480_v27 = vld [vmem:[#allocation95_spill] sm:$0xff] }
 0x2be   : > { %10468 = vst [vmem:[#allocation208_spill] sm:$0xff] %v8048_v16  ;;  %3235 = vrot.lane.b32.xlu1 %v8040_v24, %s6396_s22  ;;  %3233 = vrot.lane.b32.xlu0 %v8046_v59, %s6396_s22  ;;  %v10474_v16 = vld [vmem:[#allocation85_spill] sm:$0xff]  ;;  %v10477_v24 = vld [vmem:[#allocation82_spill] sm:$0xff] }
 0x2bf   : > { %10472 = vst [vmem:[#allocation58_spill] sm:$0xff] %v8062_v45  ;;  %v8072_v59 = vmax.f32 %v10474_v16, %v10473_v7  ;;  %v8078_v29 = vmax.f32 %v10477_v24, %v10476_v36  ;;  %v10481_v7 = vld [vmem:[#allocation91_spill] sm:$0xff]  ;;  %v10483_v36 = vld [vmem:[#allocation93_spill] sm:$0xff] }
 0x2c0   : > { %v8058_v37 = vpop.permute.xlu1 %2339 }
 0x2c1   : > { %v8064_v38 = vpop.permute.xlu0 %2337  ;;  %10478 = vst [vmem:[#allocation71_spill] sm:$0xff] %v8078_v29 }
 0x2c2   : > { %3239 = vrot.lane.b32.xlu1 %v8056_v17, %s6396_s22  ;;  %3237 = vrot.lane.b32.xlu0 %v8062_v45, %s6396_s22  ;;  %v8088_v45 = vmax.f32 %v10480_v27, %v7558_v33  ;;  %v10485_v27 = vld [vmem:[#allocation90_spill] sm:$0xff] }
 0x2c4   : > { %v8074_v39 = vpop.permute.xlu1 %2539 }
 0x2c5   : > { %10475 = vst [vmem:[#allocation223_spill] sm:$0xff] %v8074_v39  ;;  %v8080_v46 = vpop.permute.xlu0 %2537  ;;  %v8094_v39 = vmax.f32 %v10481_v7, %v7560_v41  ;;  %v10488_v7 = vld [vmem:[#allocation103_spill] sm:$0xff] }
 0x2c6   : > { %10479 = vst [vmem:[#allocation225_spill] sm:$0xff] %v8080_v46  ;;  %3243 = vrot.lane.b32.xlu1 %v8072_v59, %s6396_s22  ;;  %3241 = vrot.lane.b32.xlu0 %v8078_v29, %s6396_s22  ;;  %v8104_v46 = vmax.f32 %v10483_v36, %v7538_v14  ;;  %v8110_v29 = vmax.f32 %v10485_v27, %v7544_v51  ;;  %v10489_v36 = vld [vmem:[#allocation99_spill] sm:$0xff]  ;;  %v10491_v27 = vld [vmem:[#allocation101_spill] sm:$0xff] }
 0x2c7   : > { %10482 = vst [vmem:[#allocation67_spill] sm:$0xff] %v8094_v39 }
 0x2c8   : > { %v8090_v16 = vpop.permute.xlu1 %2351  ;;  %10486 = vst [vmem:[#allocation69_spill] sm:$0xff] %v8110_v29 }
 0x2c9   : > { %v8096_v24 = vpop.permute.xlu0 %2349 }
 0x2ca   : > { %3247 = vrot.lane.b32.xlu1 %v8088_v45, %s6396_s22  ;;  %3245 = vrot.lane.b32.xlu0 %v8094_v39, %s6396_s22  ;;  %v8120_v39 = vmax.f32 %v10488_v7, %v7598_v55  ;;  %v10493_v7 = vld [vmem:[#allocation98_spill] sm:$0xff] }
 0x2cc   : > { %v8106_v33 = vpop.permute.xlu1 %2551 }
 0x2cd   : > { %10484 = vst [vmem:[#allocation2_spill] sm:$0xff] %v8106_v33  ;;  %v8112_v41 = vpop.permute.xlu0 %2549  ;;  %v8126_v33 = vmax.f32 %v10489_v36, %v7600_v31  ;;  %v10496_v36 = vld [vmem:[#allocation111_spill] sm:$0xff] }
 0x2ce   : > { %10487 = vst [vmem:[#allocation8_spill] sm:$0xff] %v8112_v41  ;;  %3251 = vrot.lane.b32.xlu1 %v8104_v46, %s6396_s22  ;;  %3249 = vrot.lane.b32.xlu0 %v8110_v29, %s6396_s22  ;;  %v8136_v41 = vmax.f32 %v10491_v27, %v7574_v35  ;;  %v8142_v29 = vmax.f32 %v10493_v7, %v7576_v53  ;;  %v10497_v27 = vld [vmem:[#allocation107_spill] sm:$0xff]  ;;  %v10499_v7 = vld [vmem:[#allocation109_spill] sm:$0xff] }
 0x2cf   : > { %10490 = vst [vmem:[#allocation66_spill] sm:$0xff] %v8126_v33 }
 0x2d0   : > { %v8122_v14 = vpop.permute.xlu1 %2347  ;;  %10494 = vst [vmem:[#allocation79_spill] sm:$0xff] %v8142_v29 }
 0x2d1   : > { %v8128_v51 = vpop.permute.xlu0 %2345 }
 0x2d2   : > { %3255 = vrot.lane.b32.xlu1 %v8120_v39, %s6396_s22  ;;  %3253 = vrot.lane.b32.xlu0 %v8126_v33, %s6396_s22  ;;  %v8152_v33 = vmax.f32 %v10496_v36, %v7630_v58  ;;  %v10501_v36 = vld [vmem:[#allocation106_spill] sm:$0xff] }
 0x2d4   : > { %v8138_v55 = vpop.permute.xlu1 %2547 }
 0x2d5   : > { %10492 = vst [vmem:[#allocation15_spill] sm:$0xff] %v8138_v55  ;;  %v8144_v31 = vpop.permute.xlu0 %2545  ;;  %v8158_v55 = vmax.f32 %v10497_v27, %v7632_v11  ;;  %v10504_v27 = vld [vmem:[#allocation120_spill] sm:$0xff] }
 0x2d6   : > { %10495 = vst [vmem:[#allocation11_spill] sm:$0xff] %v8144_v31  ;;  %3259 = vrot.lane.b32.xlu1 %v8136_v41, %s6396_s22  ;;  %3257 = vrot.lane.b32.xlu0 %v8142_v29, %s6396_s22  ;;  %v8168_v31 = vmax.f32 %v10499_v7, %v7614_v60  ;;  %v8174_v29 = vmax.f32 %v10501_v36, %v7616_v44  ;;  %v10505_v7 = vld [vmem:[#allocation115_spill] sm:$0xff]  ;;  %v10507_v36 = vld [vmem:[#allocation117_spill] sm:$0xff] }
 0x2d7   : > { %10498 = vst [vmem:[#allocation75_spill] sm:$0xff] %v8158_v55 }
 0x2d8   : > { %v8154_v35 = vpop.permute.xlu1 %2359  ;;  %10502 = vst [vmem:[#allocation77_spill] sm:$0xff] %v8174_v29 }
 0x2d9   : > { %v8160_v53 = vpop.permute.xlu0 %2357 }
 0x2da   : > { %3263 = vrot.lane.b32.xlu1 %v8152_v33, %s6396_s22  ;;  %3261 = vrot.lane.b32.xlu0 %v8158_v55, %s6396_s22  ;;  %v8184_v55 = vmax.f32 %v10504_v27, %v7662_v50  ;;  %v10509_v27 = vld [vmem:[#allocation114_spill] sm:$0xff] }
 0x2dc   : > { %v8170_v58 = vpop.permute.xlu1 %2559 }
 0x2dd   : > { %10500 = vst [vmem:[#allocation232_spill] sm:$0xff] %v8170_v58  ;;  %v8176_v11 = vpop.permute.xlu0 %2557  ;;  %v8190_v58 = vmax.f32 %v10505_v7, %v7664_v12  ;;  %v10512_v7 = vld [vmem:[#allocation132_spill] sm:$0xff] }
 0x2de   : > { %10503 = vst [vmem:[#allocation233_spill] sm:$0xff] %v8176_v11  ;;  %3267 = vrot.lane.b32.xlu1 %v8168_v31, %s6396_s22  ;;  %3265 = vrot.lane.b32.xlu0 %v8174_v29, %s6396_s22  ;;  %v8200_v11 = vmax.f32 %v10507_v36, %v7646_v61  ;;  %v8206_v29 = vmax.f32 %v10509_v27, %v7648_v56  ;;  %v10513_v36 = vld [vmem:[#allocation127_spill] sm:$0xff]  ;;  %v10515_v27 = vld [vmem:[#allocation129_spill] sm:$0xff] }
 0x2df   : > { %10506 = vst [vmem:[#allocation74_spill] sm:$0xff] %v8190_v58 }
 0x2e0   : > { %v8186_v60 = vpop.permute.xlu1 %2355  ;;  %10510 = vst [vmem:[#allocation87_spill] sm:$0xff] %v8206_v29 }
 0x2e1   : > { %v8192_v44 = vpop.permute.xlu0 %2353 }
 0x2e2   : > { %3271 = vrot.lane.b32.xlu1 %v8184_v55, %s6396_s22  ;;  %3269 = vrot.lane.b32.xlu0 %v8190_v58, %s6396_s22  ;;  %v8216_v58 = vmax.f32 %v10512_v7, %v7730_v54  ;;  %v10517_v7 = vld [vmem:[#allocation126_spill] sm:$0xff] }
 0x2e4   : > { %v8202_v50 = vpop.permute.xlu1 %2555 }
 0x2e5   : > { %10508 = vst [vmem:[#allocation251_spill] sm:$0xff] %v8202_v50  ;;  %v8208_v12 = vpop.permute.xlu0 %2553  ;;  %v8222_v50 = vmax.f32 %v10513_v36, %v7732_v23  ;;  %v10520_v36 = vld [vmem:[#allocation143_spill] sm:$0xff] }
 0x2e6   : > { %10511 = vst [vmem:[#allocation83_spill] sm:$0xff] %v8208_v12  ;;  %3275 = vrot.lane.b32.xlu1 %v8200_v11, %s6396_s22  ;;  %3273 = vrot.lane.b32.xlu0 %v8206_v29, %s6396_s22  ;;  %v8232_v12 = vmax.f32 %v10515_v27, %v7706_v57  ;;  %v8238_v29 = vmax.f32 %v10517_v7, %v7710_v34  ;;  %v10521_v27 = vld [vmem:[#allocation140_spill] sm:$0xff]  ;;  %v10522_v7 = vld [vmem:[#allocation141_spill] sm:$0xff] }
 0x2e7   : > { %10514 = vst [vmem:[#allocation244_spill] sm:$0xff] %v8222_v50 }
 0x2e8   : > { %v8218_v61 = vpop.permute.xlu1 %2367  ;;  %10518 = vst [vmem:[#allocation245_spill] sm:$0xff] %v8238_v29 }
 0x2e9   : > { %v8224_v56 = vpop.permute.xlu0 %2365 }
 0x2ea   : > { %3279 = vrot.lane.b32.xlu1 %v8216_v58, %s6396_s22  ;;  %3277 = vrot.lane.b32.xlu0 %v8222_v50, %s6396_s22  ;;  %v8248_v50 = vmax.f32 %v10520_v36, %v7786_v28  ;;  %v10524_v36 = vld [vmem:[#allocation139_spill] sm:$0xff] }
 0x2ec   : > { %v8234_v54 = vpop.permute.xlu1 %2567 }
 0x2ed   : > { %10516 = vst [vmem:[#allocation85_spill] sm:$0xff] %v8234_v54  ;;  %v8240_v23 = vpop.permute.xlu0 %2565  ;;  %v8254_v54 = vmax.f32 %v10521_v27, %v7788_v15  ;;  %v8280_v27 = vmax.f32 %v7134_v18, %v7846_v9  ;;  %v10529_v9 = vld [vmem:[#allocation156_spill] sm:$0xff] }
 0x2ee   : > { %10519 = vst [vmem:[#allocation82_spill] sm:$0xff] %v8240_v23  ;;  %3283 = vrot.lane.b32.xlu1 %v8232_v12, %s6396_s22  ;;  %3281 = vrot.lane.b32.xlu0 %v8238_v29, %s6396_s22  ;;  %v8264_v23 = vmax.f32 %v10522_v7, %v7762_v40  ;;  %v8270_v29 = vmax.f32 %v10524_v36, %v7766_v19  ;;  %v10527_v36 = vld [vmem:[#allocation157_spill] sm:$0xff] }
 0x2ef   : > { %v8286_v7 = vmax.f32 %v7126_v0, %v7852_v48  ;;  %v8312_v48 = vmax.f32 %v7190_v52, %v7930_v42  ;;  %v8327_v52 = vmax.f32 %v7186_v8, %v7894_v32 }
 0x2f0   : > { %v8250_v57 = vpop.permute.xlu1 %2363 }
 0x2f1   : > { %v8256_v34 = vpop.permute.xlu0 %2361  ;;  %10526 = vst [vmem:[#allocation93_spill] sm:$0xff] %v8286_v7 }
 0x2f2   : > { %3287 = vrot.lane.b32.xlu1 %v8248_v50, %s6396_s22  ;;  %3285 = vrot.lane.b32.xlu0 %v8254_v54, %s6396_s22 }
 0x2f4   : > { %v8266_v28 = vpop.permute.xlu1 %2563 }
 0x2f5   : > { %10523 = vst [vmem:[#allocation95_spill] sm:$0xff] %v8266_v28  ;;  %v8272_v15 = vpop.permute.xlu0 %2561  ;;  %v8302_v28 = vmax.f32 %v10529_v9, %v7822_v1 }
 0x2f6   : > { %10525 = vst [vmem:[#allocation91_spill] sm:$0xff] %v8272_v15  ;;  %3291 = vrot.lane.b32.xlu1 %v8264_v23, %s6396_s22  ;;  %3289 = vrot.lane.b32.xlu0 %v8270_v29, %s6396_s22  ;;  %v8296_v15 = vmax.f32 %v10527_v36, %v7818_v3  ;;  %v8316_v36 = vmax.f32 %v7182_v20, %v7936_v22 }
 0x2f8   : > { %v8282_v40 = vpop.permute.xlu1 %2375  ;;  %10528 = vst [vmem:[#allocation90_spill] sm:$0xff] %v8296_v15 }
 0x2f9   : > { %v8288_v19 = vpop.permute.xlu0 %2373 }
 0x2fa   : > { %3295 = vrot.lane.b32.xlu1 %v8280_v27, %s6396_s22  ;;  %3293 = vrot.lane.b32.xlu0 %v8286_v7, %s6396_s22 }
 0x2fc   : > { %v8298_v18 = vpop.permute.xlu1 %2371 }
 0x2fd   : > { %v8304_v0 = vpop.permute.xlu0 %2369 }
 0x2fe   : > { %3299 = vrot.lane.b32.xlu1 %v8296_v15, %s6396_s22  ;;  %3297 = vrot.lane.b32.xlu0 %v8302_v28, %s6396_s22 }
 0x300   : > { %v3188_v3 = vpop.permute.xlu1 %3187 }
 0x301   : > { %v3186_v7 = vpop.permute.xlu0 %3185  ;;  %v3760_v1 = vmax.f32 %v7844_v47, %v3188_v3  ;;  %v8332_v47 = vmax.f32 %v7178_v2, %v7900_v62  ;;  %v8343_v2 = vmax.f32 %v7238_v49, %v7994_v63 }
 0x302   : > { %v3759_v9 = vmax.f32 %v7850_v4, %v3186_v7  ;;  %3303 = vrot.lane.b32.xlu1 %v8312_v48, %s6396_s22  ;;  %3301 = vrot.lane.b32.xlu0 %v8316_v36, %s6396_s22 }
 0x303   : > { %v3963_v15 = vadd.f32 %v7681_v5, %v3760_v1 }
 0x304   : > { %v3962_v20 = vadd.f32 %v7681_v5, %v3759_v9  ;;  %v3192_v42 = vpop.permute.xlu1 %3191 }
 0x305   : > { %v4159_v4 = vmax.f32 %v3963_v15, 0.0  ;;  %v3190_v22 = vpop.permute.xlu0 %3189  ;;  %v3762_v7 = vmax.f32 %v7860_v25, %v3192_v42 }
 0x306   : > { %v4158_v3 = vmax.f32 %v3962_v20, 0.0  ;;  %v3761_v1 = vmax.f32 %v7866_v6, %v3190_v22  ;;  %3307 = vrot.lane.b32.xlu1 %v8327_v52, %s6396_s22  ;;  %3305 = vrot.lane.b32.xlu0 %v8332_v47, %s6396_s22  ;;  %v8348_v6 = vmax.f32 %v7230_v10, %v8000_v21  ;;  %v8363_v21 = vmax.f32 %v7234_v43, %v7962_v13  ;;  %v10533_v13 = vld [vmem:[#allocation26_spill] sm:$0xff] }
 0x307   : > { %v5795_v8 = vpack.c.bf16 %v4159_v4, %v4159_v4  ;;  %v3965_v32 = vadd.f32 %v7681_v5, %v3762_v7 }
 0x308   : > { %v5794_v62 = vpack.c.bf16 %v4158_v3, %v4158_v3  ;;  %v3964_v25 = vadd.f32 %v7681_v5, %v3761_v1  ;;  %v3196_v15 = vpop.permute.xlu1 %3195  ;;  %v10530_v3 = vld [vmem:[#allocation178_spill] sm:$0xff] }
 0x309   : > { %5140 = vst.msk [vmem:[%s7697_s27 + $0x3c] sm:$0xf] %vm5124_vm1, %v5795_v8  ;;  %v4161_v9 = vmax.f32 %v3965_v32, 0.0  ;;  %v3194_v20 = vpop.permute.xlu0 %3193  ;;  %v3764_v42 = vmax.f32 %v7876_v30, %v3196_v15  ;;  %v10531_v1 = vld [vmem:[#allocation182_spill] sm:$0xff] }
 0x30a   : > { %5139 = vst.msk [vmem:[%s7697_s27 + $0x38] sm:$0xf] %vm5124_vm1, %v5794_v62  ;;  %v4160_v49 = vmax.f32 %v3964_v25, 0.0  ;;  %v3763_v63 = vmax.f32 %v7880_v26, %v3194_v20  ;;  %3311 = vrot.lane.b32.xlu1 %v8343_v2, %s6396_s22  ;;  %3309 = vrot.lane.b32.xlu0 %v8348_v6, %s6396_s22  ;;  %v8368_v26 = vmax.f32 %v10531_v1, %v10530_v3  ;;  %v10532_v62 = vld [vmem:[#allocation155_spill] sm:$0xff]  ;;  %v10536_v1 = vld [vmem:[#allocation170_spill] sm:$0xff] }
 0x30b   : > { %v5797_v4 = vpack.c.bf16 %v4161_v9, %v4161_v9  ;;  %v3967_v10 = vadd.f32 %v7681_v5, %v3764_v42  ;;  %v10534_v42 = vld [vmem:[#allocation199_spill] sm:$0xff] }
 0x30c   : > { %v5796_v30 = vpack.c.bf16 %v4160_v49, %v4160_v49  ;;  %v3966_v22 = vadd.f32 %v7681_v5, %v3763_v63  ;;  %v3200_v7 = vpop.permute.xlu1 %3199  ;;  %v8383_v49 = vmax.f32 %v10534_v42, %v8058_v37 }
 0x30d   : > { %5142 = vst.msk [vmem:[%s7697_s27 + $0x44] sm:$0xf] %vm5124_vm1, %v5797_v4  ;;  %v4163_v8 = vmax.f32 %v3967_v10, 0.0  ;;  %v3198_v32 = vpop.permute.xlu0 %3197  ;;  %v3766_v25 = vmax.f32 %v10532_v62, %v3200_v7 }
 0x30e   : > { %5141 = vst.msk [vmem:[%s7697_s27 + $0x40] sm:$0xf] %vm5124_vm1, %v5796_v30  ;;  %v4162_v43 = vmax.f32 %v3966_v22, 0.0  ;;  %v3765_v15 = vmax.f32 %v10533_v13, %v3198_v32  ;;  %3315 = vrot.lane.b32.xlu1 %v8363_v21, %s6396_s22  ;;  %3313 = vrot.lane.b32.xlu0 %v8368_v26, %s6396_s22  ;;  %v10535_v30 = vld [vmem:[#allocation196_spill] sm:$0xff]  ;;  %v10537_v32 = vld [vmem:[#allocation171_spill] sm:$0xff]  ;;  %v10539_v13 = vld [vmem:[#allocation197_spill] sm:$0xff] }
 0x30f   : > { %v5799_v9 = vpack.c.bf16 %v4163_v8, %v4163_v8  ;;  %v3969_v20 = vadd.f32 %v7681_v5, %v3766_v25  ;;  %v8388_v22 = vmax.f32 %v10535_v30, %v8064_v38 }
 0x310   : > { %v5798_v63 = vpack.c.bf16 %v4162_v43, %v4162_v43  ;;  %v3968_v4 = vadd.f32 %v7681_v5, %v3765_v15  ;;  %v3204_v10 = vpop.permute.xlu1 %3203  ;;  %v10538_v43 = vld [vmem:[#allocation214_spill] sm:$0xff] }
 0x311   : > { %5144 = vst.msk [vmem:[%s7697_s27 + $0x4c] sm:$0xf] %vm5124_vm1, %v5799_v9  ;;  %v4165_v7 = vmax.f32 %v3969_v20, 0.0  ;;  %v3202_v3 = vpop.permute.xlu0 %3201  ;;  %v3768_v8 = vmax.f32 %v10536_v1, %v3204_v10  ;;  %v8403_v15 = vmax.f32 %v10539_v13, %v10538_v43 }
 0x312   : > { %5143 = vst.msk [vmem:[%s7697_s27 + $0x48] sm:$0xf] %vm5124_vm1, %v5798_v63  ;;  %v4164_v37 = vmax.f32 %v3968_v4, 0.0  ;;  %v3767_v62 = vmax.f32 %v10537_v32, %v3202_v3  ;;  %3319 = vrot.lane.b32.xlu1 %v8383_v49, %s6396_s22  ;;  %3317 = vrot.lane.b32.xlu0 %v8388_v22, %s6396_s22  ;;  %v10540_v63 = vld [vmem:[#allocation216_spill] sm:$0xff]  ;;  %v10541_v4 = vld [vmem:[#allocation195_spill] sm:$0xff]  ;;  %v10542_v3 = vld [vmem:[#allocation166_spill] sm:$0xff] }
 0x313   : > { %v5801_v25 = vpack.c.bf16 %v4165_v7, %v4165_v7  ;;  %v3971_v38 = vadd.f32 %v7681_v5, %v3768_v8  ;;  %v8408_v10 = vmax.f32 %v10541_v4, %v10540_v63  ;;  %v10543_v32 = vld [vmem:[#allocation37_spill] sm:$0xff] }
 0x314   : > { %v5800_v9 = vpack.c.bf16 %v4164_v37, %v4164_v37  ;;  %v3970_v20 = vadd.f32 %v7681_v5, %v3767_v62  ;;  %v3208_v42 = vpop.permute.xlu1 %3207 }
 0x315   : > { %5146 = vst.msk [vmem:[%s7697_s27 + $0x54] sm:$0xf] %vm5124_vm1, %v5801_v25  ;;  %v4167_v30 = vmax.f32 %v3971_v38, 0.0  ;;  %v3206_v7 = vpop.permute.xlu0 %3205  ;;  %v3770_v1 = vmax.f32 %v10542_v3, %v3208_v42  ;;  %v10544_v25 = vld [vmem:[#allocation215_spill] sm:$0xff] }
 0x316   : > { %5145 = vst.msk [vmem:[%s7697_s27 + $0x50] sm:$0xf] %vm5124_vm1, %v5800_v9  ;;  %v4166_v8 = vmax.f32 %v3970_v20, 0.0  ;;  %v3769_v37 = vmax.f32 %v10543_v32, %v3206_v7  ;;  %3323 = vrot.lane.b32.xlu1 %v8403_v15, %s6396_s22  ;;  %3321 = vrot.lane.b32.xlu0 %v8408_v10, %s6396_s22  ;;  %v8423_v38 = vmax.f32 %v10544_v25, %v8122_v14  ;;  %v10545_v20 = vld [vmem:[#allocation212_spill] sm:$0xff]  ;;  %v10546_v7 = vld [vmem:[#allocation167_spill] sm:$0xff] }
 0x317   : > { %v5803_v62 = vpack.c.bf16 %v4167_v30, %v4167_v30  ;;  %v3973_v43 = vadd.f32 %v7681_v5, %v3770_v1  ;;  %v8428_v63 = vmax.f32 %v10545_v20, %v8128_v51  ;;  %v10547_v1 = vld [vmem:[#allocation183_spill] sm:$0xff] }
 0x318   : > { %v5802_v13 = vpack.c.bf16 %v4166_v8, %v4166_v8  ;;  %v3972_v9 = vadd.f32 %v7681_v5, %v3769_v37  ;;  %v3212_v42 = vpop.permute.xlu1 %3211  ;;  %v10548_v37 = vld [vmem:[#allocation213_spill] sm:$0xff] }
 0x319   : > { %5148 = vst.msk [vmem:[%s7697_s27 + $0x5c] sm:$0xf] %vm5124_vm1, %v5803_v62  ;;  %v4169_v4 = vmax.f32 %v3973_v43, 0.0  ;;  %v3210_v30 = vpop.permute.xlu0 %3209  ;;  %v3772_v3 = vmax.f32 %v10546_v7, %v3212_v42  ;;  %v8443_v62 = vmax.f32 %v10548_v37, %v8090_v16 }
 0x31a   : > { %5147 = vst.msk [vmem:[%s7697_s27 + $0x58] sm:$0xf] %vm5124_vm1, %v5802_v13  ;;  %v4168_v14 = vmax.f32 %v3972_v9, 0.0  ;;  %v3771_v8 = vmax.f32 %v10547_v1, %v3210_v30  ;;  %3327 = vrot.lane.b32.xlu1 %v8423_v38, %s6396_s22  ;;  %3325 = vrot.lane.b32.xlu0 %v8428_v63, %s6396_s22  ;;  %v10549_v9 = vld [vmem:[#allocation211_spill] sm:$0xff]  ;;  %v10550_v30 = vld [vmem:[#allocation184_spill] sm:$0xff] }
 0x31b   : > { %v5805_v32 = vpack.c.bf16 %v4169_v4, %v4169_v4  ;;  %v3975_v51 = vadd.f32 %v7681_v5, %v3772_v3  ;;  %v8448_v42 = vmax.f32 %v10549_v9, %v8096_v24  ;;  %v10551_v3 = vld [vmem:[#allocation43_spill] sm:$0xff] }
 0x31c   : > { %v5804_v43 = vpack.c.bf16 %v4168_v14, %v4168_v14  ;;  %v3974_v25 = vadd.f32 %v7681_v5, %v3771_v8  ;;  %v3216_v13 = vpop.permute.xlu1 %3215  ;;  %v10552_v8 = vld [vmem:[#allocation224_spill] sm:$0xff] }
 0x31d   : > { %5150 = vst.msk [vmem:[%s7697_s27 + $0x64] sm:$0xf] %vm5124_vm1, %v5805_v32  ;;  %v4171_v20 = vmax.f32 %v3975_v51, 0.0  ;;  %v3214_v4 = vpop.permute.xlu0 %3213  ;;  %v3774_v7 = vmax.f32 %v10550_v30, %v3216_v13  ;;  %v8463_v32 = vmax.f32 %v10552_v8, %v8186_v60 }
 0x31e   : > { %5149 = vst.msk [vmem:[%s7697_s27 + $0x60] sm:$0xf] %vm5124_vm1, %v5804_v43  ;;  %v4170_v16 = vmax.f32 %v3974_v25, 0.0  ;;  %v3773_v14 = vmax.f32 %v10551_v3, %v3214_v4  ;;  %3331 = vrot.lane.b32.xlu1 %v8443_v62, %s6396_s22  ;;  %3329 = vrot.lane.b32.xlu0 %v8448_v42, %s6396_s22  ;;  %v10553_v25 = vld [vmem:[#allocation221_spill] sm:$0xff] }
 0x31f   : > { %v5807_v1 = vpack.c.bf16 %v4171_v20, %v4171_v20  ;;  %v3977_v24 = vadd.f32 %v7681_v5, %v3774_v7  ;;  %v8468_v13 = vmax.f32 %v10553_v25, %v8192_v44  ;;  %v10554_v4 = vld [vmem:[#allocation45_spill] sm:$0xff]  ;;  %v10555_v7 = vld [vmem:[#allocation42_spill] sm:$0xff] }
 0x320   : > { %v5806_v51 = vpack.c.bf16 %v4170_v16, %v4170_v16  ;;  %v3976_v37 = vadd.f32 %v7681_v5, %v3773_v14  ;;  %v3220_v43 = vpop.permute.xlu1 %3219  ;;  %v10556_v14 = vld [vmem:[#allocation222_spill] sm:$0xff] }
 0x321   : > { %5152 = vst.msk [vmem:[%s7697_s27 + $0x6c] sm:$0xf] %vm5124_vm1, %v5807_v1  ;;  %v4173_v9 = vmax.f32 %v3977_v24, 0.0  ;;  %v3218_v20 = vpop.permute.xlu0 %3217  ;;  %v3776_v30 = vmax.f32 %v10554_v4, %v3220_v43  ;;  %v8483_v1 = vmax.f32 %v10556_v14, %v8154_v35 }
 0x322   : > { %5151 = vst.msk [vmem:[%s7697_s27 + $0x68] sm:$0xf] %vm5124_vm1, %v5806_v51  ;;  %v4172_v60 = vmax.f32 %v3976_v37, 0.0  ;;  %v3775_v16 = vmax.f32 %v10555_v7, %v3218_v20  ;;  %3335 = vrot.lane.b32.xlu1 %v8463_v32, %s6396_s22  ;;  %3333 = vrot.lane.b32.xlu0 %v8468_v13, %s6396_s22  ;;  %v10557_v37 = vld [vmem:[#allocation220_spill] sm:$0xff]  ;;  %v10558_v20 = vld [vmem:[#allocation55_spill] sm:$0xff] }
 0x323   : > { %v5809_v3 = vpack.c.bf16 %v4173_v9, %v4173_v9  ;;  %v3979_v44 = vadd.f32 %v7681_v5, %v3776_v30  ;;  %v8488_v43 = vmax.f32 %v10557_v37, %v8160_v53  ;;  %v10559_v30 = vld [vmem:[#allocation200_spill] sm:$0xff] }
 0x324   : > { %v5808_v24 = vpack.c.bf16 %v4172_v60, %v4172_v60  ;;  %v3978_v8 = vadd.f32 %v7681_v5, %v3775_v16  ;;  %v3224_v51 = vpop.permute.xlu1 %3223  ;;  %v10560_v16 = vld [vmem:[#allocation237_spill] sm:$0xff] }
 0x325   : > { %5154 = vst.msk [vmem:[%s7697_s27 + $0x74] sm:$0xf] %vm5124_vm1, %v5809_v3  ;;  %v4175_v25 = vmax.f32 %v3979_v44, 0.0  ;;  %v3222_v9 = vpop.permute.xlu0 %3221  ;;  %v3778_v4 = vmax.f32 %v10558_v20, %v3224_v51  ;;  %v8503_v3 = vmax.f32 %v10560_v16, %v8250_v57 }
 0x326   : > { %5153 = vst.msk [vmem:[%s7697_s27 + $0x70] sm:$0xf] %vm5124_vm1, %v5808_v24  ;;  %v4174_v35 = vmax.f32 %v3978_v8, 0.0  ;;  %v3777_v60 = vmax.f32 %v10559_v30, %v3222_v9  ;;  %3339 = vrot.lane.b32.xlu1 %v8483_v1, %s6396_s22  ;;  %3337 = vrot.lane.b32.xlu0 %v8488_v43, %s6396_s22  ;;  %v10561_v8 = vld [vmem:[#allocation235_spill] sm:$0xff] }
 0x327   : > { %v5811_v7 = vpack.c.bf16 %v4175_v25, %v4175_v25  ;;  %v3981_v53 = vadd.f32 %v7681_v5, %v3778_v4  ;;  %v8508_v51 = vmax.f32 %v10561_v8, %v8256_v34  ;;  %v10562_v9 = vld [vmem:[#allocation51_spill] sm:$0xff]  ;;  %v10563_v4 = vld [vmem:[#allocation53_spill] sm:$0xff] }
 0x328   : > { %v5810_v44 = vpack.c.bf16 %v4174_v35, %v4174_v35  ;;  %v3980_v14 = vadd.f32 %v7681_v5, %v3777_v60  ;;  %v3228_v24 = vpop.permute.xlu1 %3227  ;;  %v10564_v60 = vld [vmem:[#allocation236_spill] sm:$0xff] }
 0x329   : > { %5156 = vst.msk [vmem:[%s7697_s27 + $0x7c] sm:$0xf] %vm5124_vm1, %v5811_v7  ;;  %v4177_v37 = vmax.f32 %v3981_v53, 0.0  ;;  %v3226_v25 = vpop.permute.xlu0 %3225  ;;  %v3780_v20 = vmax.f32 %v10562_v9, %v3228_v24  ;;  %v8523_v7 = vmax.f32 %v10564_v60, %v8218_v61 }
 0x32a   : > { %5155 = vst.msk [vmem:[%s7697_s27 + $0x78] sm:$0xf] %vm5124_vm1, %v5810_v44  ;;  %v4176_v57 = vmax.f32 %v3980_v14, 0.0  ;;  %v3779_v35 = vmax.f32 %v10563_v4, %v3226_v25  ;;  %3343 = vrot.lane.b32.xlu1 %v8503_v3, %s6396_s22  ;;  %3341 = vrot.lane.b32.xlu0 %v8508_v51, %s6396_s22  ;;  %v10565_v14 = vld [vmem:[#allocation234_spill] sm:$0xff] }
 0x32b   : > { %v5813_v30 = vpack.c.bf16 %v4177_v37, %v4177_v37  ;;  %v3983_v34 = vadd.f32 %v7681_v5, %v3780_v20  ;;  %v8528_v24 = vmax.f32 %v10565_v14, %v8224_v56  ;;  %v10566_v25 = vld [vmem:[#allocation50_spill] sm:$0xff]  ;;  %v10567_v20 = vld [vmem:[#allocation63_spill] sm:$0xff] }
 0x32c   : > { %v5812_v53 = vpack.c.bf16 %v4176_v57, %v4176_v57  ;;  %v3982_v16 = vadd.f32 %v7681_v5, %v3779_v35  ;;  %v3232_v44 = vpop.permute.xlu1 %3231  ;;  %v10568_v35 = vld [vmem:[#allocation252_spill] sm:$0xff] }
 0x32d   : > { %5158 = vst.msk [vmem:[%s7697_s27 + $0x84] sm:$0xf] %vm5124_vm1, %v5813_v30  ;;  %v4179_v8 = vmax.f32 %v3983_v34, 0.0  ;;  %v3230_v37 = vpop.permute.xlu0 %3229  ;;  %v3782_v9 = vmax.f32 %v10566_v25, %v3232_v44  ;;  %v8543_v30 = vmax.f32 %v10568_v35, %v8298_v18 }
 0x32e   : > { %5157 = vst.msk [vmem:[%s7697_s27 + $0x80] sm:$0xf] %vm5124_vm1, %v5812_v53  ;;  %v4178_v61 = vmax.f32 %v3982_v16, 0.0  ;;  %v3781_v57 = vmax.f32 %v10567_v20, %v3230_v37  ;;  %3347 = vrot.lane.b32.xlu1 %v8523_v7, %s6396_s22  ;;  %3345 = vrot.lane.b32.xlu0 %v8528_v24, %s6396_s22  ;;  %v10569_v16 = vld [vmem:[#allocation249_spill] sm:$0xff]  ;;  %v10570_v37 = vld [vmem:[#allocation59_spill] sm:$0xff] }
 0x32f   : > { %v5815_v4 = vpack.c.bf16 %v4179_v8, %v4179_v8  ;;  %v3985_v56 = vadd.f32 %v7681_v5, %v3782_v9  ;;  %v8548_v44 = vmax.f32 %v10569_v16, %v8304_v0  ;;  %v10571_v9 = vld [vmem:[#allocation61_spill] sm:$0xff] }
 0x330   : > { %v5814_v34 = vpack.c.bf16 %v4178_v61, %v4178_v61  ;;  %v3984_v60 = vadd.f32 %v7681_v5, %v3781_v57  ;;  %v3236_v53 = vpop.permute.xlu1 %3235  ;;  %v10572_v57 = vld [vmem:[#allocation250_spill] sm:$0xff] }
 0x331   : > { %5160 = vst.msk [vmem:[%s7697_s27 + $0x8c] sm:$0xf] %vm5124_vm1, %v5815_v4  ;;  %v4181_v14 = vmax.f32 %v3985_v56, 0.0  ;;  %v3234_v8 = vpop.permute.xlu0 %3233  ;;  %v3784_v25 = vmax.f32 %v10570_v37, %v3236_v53  ;;  %v8563_v4 = vmax.f32 %v10572_v57, %v8282_v40  ;;  %v10574_v40 = vld [vmem:[#allocation58_spill] sm:$0xff] }
 0x332   : > { %5159 = vst.msk [vmem:[%s7697_s27 + $0x88] sm:$0xf] %vm5124_vm1, %v5814_v34  ;;  %v4180_v18 = vmax.f32 %v3984_v60, 0.0  ;;  %v3783_v61 = vmax.f32 %v10571_v9, %v3234_v8  ;;  %3351 = vrot.lane.b32.xlu1 %v8543_v30, %s6396_s22  ;;  %3349 = vrot.lane.b32.xlu0 %v8548_v44, %s6396_s22  ;;  %v10573_v60 = vld [vmem:[#allocation248_spill] sm:$0xff]  ;;  %v10576_v9 = vld [vmem:[#allocation9_spill] sm:$0xff] }
 0x333   : > { %v5817_v20 = vpack.c.bf16 %v4181_v14, %v4181_v14  ;;  %v3987_v0 = vadd.f32 %v7681_v5, %v3784_v25  ;;  %v8568_v53 = vmax.f32 %v10573_v60, %v8288_v19  ;;  %v8581_v19 = vld [vmem:[%s9802_s2] ss:$0 sm:$0xff] }
 0x334   : > { %v5816_v56 = vpack.c.bf16 %v4180_v18, %v4180_v18  ;;  %v3986_v35 = vadd.f32 %v7681_v5, %v3783_v61  ;;  %v3240_v34 = vpop.permute.xlu1 %3239 }
 0x335   : > { %5162 = vst.msk [vmem:[%s7697_s27 + $0x94] sm:$0xf] %vm5124_vm1, %v5817_v20  ;;  %v4183_v16 = vmax.f32 %v3987_v0, 0.0  ;;  %v3238_v14 = vpop.permute.xlu0 %3237  ;;  %v3786_v8 = vmax.f32 %v8056_v17, %v3240_v34  ;;  %v10575_v17 = vld [vmem:[#allocation136_spill] sm:$0xff] }
 0x336   : > { %5161 = vst.msk [vmem:[%s7697_s27 + $0x90] sm:$0xf] %vm5124_vm1, %v5816_v56  ;;  %v4182_v37 = vmax.f32 %v3986_v35, 0.0  ;;  %v3785_v25 = vmax.f32 %v10574_v40, %v3238_v14  ;;  %3355 = vrot.lane.b32.xlu1 %v8563_v4, %s6396_s22  ;;  %3353 = vrot.lane.b32.xlu0 %v8568_v53, %s6396_s22  ;;  %v8588_v61 = vmax.f32 %v10576_v9, %v10575_v17  ;;  %v10577_v56 = vld [vmem:[#allocation133_spill] sm:$0xff]  ;;  %v10579_v40 = vld [vmem:[#allocation71_spill] sm:$0xff] }
 0x337   : > { %v5819_v5 = vpack.c.bf16 %v4183_v16, %v4183_v16  ;;  %v3989_v18 = vadd.f32 %v8581_v19, %v3786_v8  ;;  %v10578_v35 = vld [vmem:[#allocation5_spill] sm:$0xff] }
 0x338   : > { %v5818_v20 = vpack.c.bf16 %v4182_v37, %v4182_v37  ;;  %v3988_v0 = vadd.f32 %v8581_v19, %v3785_v25  ;;  %v3244_v57 = vpop.permute.xlu1 %3243  ;;  %v8593_v34 = vmax.f32 %v10578_v35, %v10577_v56  ;;  %v10583_v56 = vld [vmem:[#allocation3_spill] sm:$0xff] }
 0x339   : > { %5164 = vst.msk [vmem:[%s7697_s27 + $0x9c] sm:$0xf] %vm5124_vm1, %v5819_v5  ;;  %v4185_v60 = vmax.f32 %v3989_v18, 0.0  ;;  %v3242_v16 = vpop.permute.xlu0 %3241  ;;  %v3788_v14 = vmax.f32 %v8072_v59, %v3244_v57  ;;  %v10580_v5 = vld [vmem:[#allocation131_spill] sm:$0xff] }
 0x33a   : > { %5163 = vst.msk [vmem:[%s7697_s27 + $0x98] sm:$0xf] %vm5124_vm1, %v5818_v20  ;;  %v4184_v8 = vmax.f32 %v3988_v0, 0.0  ;;  %v3787_v37 = vmax.f32 %v10579_v40, %v3242_v16  ;;  %3359 = vrot.lane.b32.xlu1 %v8588_v61, %s6396_s22  ;;  %3357 = vrot.lane.b32.xlu0 %v8593_v34, %s6396_s22  ;;  %v10581_v18 = vld [vmem:[#allocation7_spill] sm:$0xff]  ;;  %v10582_v0 = vld [vmem:[#allocation121_spill] sm:$0xff] }
 0x33b   : > { %v5821_v25 = vpack.c.bf16 %v4185_v60, %v4185_v60  ;;  %v3991_v17 = vadd.f32 %v8581_v19, %v3788_v14  ;;  %v8608_v9 = vmax.f32 %v10581_v18, %v10580_v5  ;;  %v8613_v35 = vmax.f32 %v10583_v56, %v10582_v0  ;;  %v10585_v5 = vld [vmem:[#allocation67_spill] sm:$0xff]  ;;  %v10589_v56 = vld [vmem:[#allocation14_spill] sm:$0xff] }
 0x33c   : > { %v5820_v59 = vpack.c.bf16 %v4184_v8, %v4184_v8  ;;  %v3990_v20 = vadd.f32 %v8581_v19, %v3787_v37  ;;  %v3248_v57 = vpop.permute.xlu1 %3247 }
 0x33d   : > { %10584 = vst [vmem:[#allocation103_spill] sm:$0xff] %v8613_v35  ;;  %5166 = vst.msk [vmem:[%s7697_s27 + $0xa4] sm:$0xf] %vm5124_vm1, %v5821_v25  ;;  %v4187_v60 = vmax.f32 %v3991_v17, 0.0  ;;  %v3246_v16 = vpop.permute.xlu0 %3245  ;;  %v3790_v14 = vmax.f32 %v8088_v45, %v3248_v57  ;;  %v10586_v25 = vld [vmem:[#allocation142_spill] sm:$0xff]  ;;  %v10587_v17 = vld [vmem:[#allocation17_spill] sm:$0xff] }
 0x33e   : > { %5165 = vst.msk [vmem:[%s7697_s27 + $0xa0] sm:$0xf] %vm5124_vm1, %v5820_v59  ;;  %v4186_v40 = vmax.f32 %v3990_v20, 0.0  ;;  %v3789_v8 = vmax.f32 %v10585_v5, %v3246_v16  ;;  %3363 = vrot.lane.b32.xlu1 %v8608_v9, %s6396_s22  ;;  %3361 = vrot.lane.b32.xlu0 %v8613_v35, %s6396_s22  ;;  %v8628_v0 = vmax.f32 %v10587_v17, %v10586_v25  ;;  %v10588_v20 = vld [vmem:[#allocation144_spill] sm:$0xff]  ;;  %v10591_v17 = vld [vmem:[#allocation69_spill] sm:$0xff] }
 0x33f   : > { %v5823_v37 = vpack.c.bf16 %v4187_v60, %v4187_v60  ;;  %v3993_v18 = vadd.f32 %v8581_v19, %v3790_v14  ;;  %v8633_v16 = vmax.f32 %v10589_v56, %v10588_v20  ;;  %v10595_v35 = vld [vmem:[#allocation12_spill] sm:$0xff] }
 0x340   : > { %v5822_v45 = vpack.c.bf16 %v4186_v40, %v4186_v40  ;;  %v3992_v59 = vadd.f32 %v8581_v19, %v3789_v8  ;;  %v3252_v57 = vpop.permute.xlu1 %3251 }
 0x341   : > { %10590 = vst [vmem:[#allocation99_spill] sm:$0xff] %v8633_v16  ;;  %5168 = vst.msk [vmem:[%s7697_s27 + $0xac] sm:$0xf] %vm5124_vm1, %v5823_v37  ;;  %v4189_v60 = vmax.f32 %v3993_v18, 0.0  ;;  %v3250_v14 = vpop.permute.xlu0 %3249  ;;  %v3792_v5 = vmax.f32 %v8104_v46, %v3252_v57  ;;  %v10592_v37 = vld [vmem:[#allocation137_spill] sm:$0xff]  ;;  %v10593_v18 = vld [vmem:[#allocation16_spill] sm:$0xff] }
 0x342   : > { %5167 = vst.msk [vmem:[%s7697_s27 + $0xa8] sm:$0xf] %vm5124_vm1, %v5822_v45  ;;  %v4188_v25 = vmax.f32 %v3992_v59, 0.0  ;;  %v3791_v40 = vmax.f32 %v10591_v17, %v3250_v14  ;;  %3367 = vrot.lane.b32.xlu1 %v8628_v0, %s6396_s22  ;;  %3365 = vrot.lane.b32.xlu0 %v8633_v16, %s6396_s22  ;;  %v8648_v56 = vmax.f32 %v10593_v18, %v10592_v37  ;;  %v10594_v59 = vld [vmem:[#allocation138_spill] sm:$0xff] }
 0x343   : > { %v5825_v8 = vpack.c.bf16 %v4189_v60, %v4189_v60  ;;  %v3995_v20 = vadd.f32 %v8581_v19, %v3792_v5  ;;  %v8653_v14 = vmax.f32 %v10595_v35, %v10594_v59  ;;  %v10597_v18 = vld [vmem:[#allocation66_spill] sm:$0xff] }
 0x344   : > { %v5824_v46 = vpack.c.bf16 %v4188_v25, %v4188_v25  ;;  %v3994_v45 = vadd.f32 %v8581_v19, %v3791_v40  ;;  %v3256_v57 = vpop.permute.xlu1 %3255  ;;  %v10601_v16 = vld [vmem:[#allocation22_spill] sm:$0xff] }
 0x345   : > { %10596 = vst [vmem:[#allocation101_spill] sm:$0xff] %v8653_v14  ;;  %5170 = vst.msk [vmem:[%s7697_s27 + $0xb4] sm:$0xf] %vm5124_vm1, %v5825_v8  ;;  %v4191_v60 = vmax.f32 %v3995_v20, 0.0  ;;  %v3254_v5 = vpop.permute.xlu0 %3253  ;;  %v3794_v17 = vmax.f32 %v8120_v39, %v3256_v57  ;;  %v10598_v8 = vld [vmem:[#allocation152_spill] sm:$0xff]  ;;  %v10599_v20 = vld [vmem:[#allocation25_spill] sm:$0xff] }
 0x346   : > { %5169 = vst.msk [vmem:[%s7697_s27 + $0xb0] sm:$0xf] %vm5124_vm1, %v5824_v46  ;;  %v4190_v37 = vmax.f32 %v3994_v45, 0.0  ;;  %v3793_v25 = vmax.f32 %v10597_v18, %v3254_v5  ;;  %3371 = vrot.lane.b32.xlu1 %v8648_v56, %s6396_s22  ;;  %3369 = vrot.lane.b32.xlu0 %v8653_v14, %s6396_s22  ;;  %v8668_v59 = vmax.f32 %v10599_v20, %v10598_v8  ;;  %v10600_v45 = vld [vmem:[#allocation153_spill] sm:$0xff]  ;;  %v10603_v20 = vld [vmem:[#allocation79_spill] sm:$0xff]  ;;  %v10607_v14 = vld [vmem:[#allocation20_spill] sm:$0xff] }
 0x347   : > { %v5827_v40 = vpack.c.bf16 %v4191_v60, %v4191_v60  ;;  %v3997_v35 = vadd.f32 %v8581_v19, %v3794_v17  ;;  %v8673_v5 = vmax.f32 %v10601_v16, %v10600_v45 }
 0x348   : > { %v5826_v39 = vpack.c.bf16 %v4190_v37, %v4190_v37  ;;  %v3996_v46 = vadd.f32 %v8581_v19, %v3793_v25  ;;  %v3260_v57 = vpop.permute.xlu1 %3259 }
 0x349   : > { %10602 = vst [vmem:[#allocation98_spill] sm:$0xff] %v8673_v5  ;;  %5172 = vst.msk [vmem:[%s7697_s27 + $0xbc] sm:$0xf] %vm5124_vm1, %v5827_v40  ;;  %v4193_v60 = vmax.f32 %v3997_v35, 0.0  ;;  %v3258_v17 = vpop.permute.xlu0 %3257  ;;  %v3796_v18 = vmax.f32 %v8136_v41, %v3260_v57  ;;  %v10604_v40 = vld [vmem:[#allocation150_spill] sm:$0xff]  ;;  %v10605_v35 = vld [vmem:[#allocation24_spill] sm:$0xff] }
 0x34a   : > { %5171 = vst.msk [vmem:[%s7697_s27 + $0xb8] sm:$0xf] %vm5124_vm1, %v5826_v39  ;;  %v4192_v8 = vmax.f32 %v3996_v46, 0.0  ;;  %v3795_v37 = vmax.f32 %v10603_v20, %v3258_v17  ;;  %3375 = vrot.lane.b32.xlu1 %v8668_v59, %s6396_s22  ;;  %3373 = vrot.lane.b32.xlu0 %v8673_v5, %s6396_s22  ;;  %v8688_v45 = vmax.f32 %v10605_v35, %v10604_v40  ;;  %v10606_v46 = vld [vmem:[#allocation151_spill] sm:$0xff]  ;;  %v10613_v5 = vld [vmem:[#allocation30_spill] sm:$0xff] }
 0x34b   : > { %v5829_v25 = vpack.c.bf16 %v4193_v60, %v4193_v60  ;;  %v3999_v16 = vadd.f32 %v8581_v19, %v3796_v18  ;;  %v8693_v17 = vmax.f32 %v10607_v14, %v10606_v46  ;;  %v10609_v35 = vld [vmem:[#allocation75_spill] sm:$0xff] }
 0x34c   : > { %v5828_v41 = vpack.c.bf16 %v4192_v8, %v4192_v8  ;;  %v3998_v39 = vadd.f32 %v8581_v19, %v3795_v37  ;;  %v3264_v57 = vpop.permute.xlu1 %3263 }
 0x34d   : > { %10608 = vst [vmem:[#allocation111_spill] sm:$0xff] %v8693_v17  ;;  %5174 = vst.msk [vmem:[%s7697_s27 + $0xc4] sm:$0xf] %vm5124_vm1, %v5829_v25  ;;  %v4195_v60 = vmax.f32 %v3999_v16, 0.0  ;;  %v3262_v18 = vpop.permute.xlu0 %3261  ;;  %v3798_v20 = vmax.f32 %v8152_v33, %v3264_v57  ;;  %v10610_v25 = vld [vmem:[#allocation164_spill] sm:$0xff]  ;;  %v10611_v16 = vld [vmem:[#allocation33_spill] sm:$0xff] }
 0x34e   : > { %5173 = vst.msk [vmem:[%s7697_s27 + $0xc0] sm:$0xf] %vm5124_vm1, %v5828_v41  ;;  %v4194_v40 = vmax.f32 %v3998_v39, 0.0  ;;  %v3797_v8 = vmax.f32 %v10609_v35, %v3262_v18  ;;  %3379 = vrot.lane.b32.xlu1 %v8688_v45, %s6396_s22  ;;  %3377 = vrot.lane.b32.xlu0 %v8693_v17, %s6396_s22  ;;  %v8708_v46 = vmax.f32 %v10611_v16, %v10610_v25  ;;  %v10612_v39 = vld [vmem:[#allocation165_spill] sm:$0xff]  ;;  %v10619_v17 = vld [vmem:[#allocation28_spill] sm:$0xff] }
 0x34f   : > { %v5831_v37 = vpack.c.bf16 %v4195_v60, %v4195_v60  ;;  %v4001_v14 = vadd.f32 %v8581_v19, %v3798_v20  ;;  %v8713_v18 = vmax.f32 %v10613_v5, %v10612_v39  ;;  %v10615_v16 = vld [vmem:[#allocation77_spill] sm:$0xff] }
 0x350   : > { %v5830_v33 = vpack.c.bf16 %v4194_v40, %v4194_v40  ;;  %v4000_v41 = vadd.f32 %v8581_v19, %v3797_v8  ;;  %v3268_v57 = vpop.permute.xlu1 %3267 }
 0x351   : > { %10614 = vst [vmem:[#allocation107_spill] sm:$0xff] %v8713_v18  ;;  %5176 = vst.msk [vmem:[%s7697_s27 + $0xcc] sm:$0xf] %vm5124_vm1, %v5831_v37  ;;  %v4197_v60 = vmax.f32 %v4001_v14, 0.0  ;;  %v3266_v20 = vpop.permute.xlu0 %3265  ;;  %v3800_v35 = vmax.f32 %v8168_v31, %v3268_v57  ;;  %v10616_v37 = vld [vmem:[#allocation158_spill] sm:$0xff]  ;;  %v10617_v14 = vld [vmem:[#allocation32_spill] sm:$0xff] }
 0x352   : > { %5175 = vst.msk [vmem:[%s7697_s27 + $0xc8] sm:$0xf] %vm5124_vm1, %v5830_v33  ;;  %v4196_v25 = vmax.f32 %v4000_v41, 0.0  ;;  %v3799_v40 = vmax.f32 %v10615_v16, %v3266_v20  ;;  %3383 = vrot.lane.b32.xlu1 %v8708_v46, %s6396_s22  ;;  %3381 = vrot.lane.b32.xlu0 %v8713_v18, %s6396_s22  ;;  %v8728_v39 = vmax.f32 %v10617_v14, %v10616_v37  ;;  %v10618_v41 = vld [vmem:[#allocation159_spill] sm:$0xff]  ;;  %v10621_v14 = vld [vmem:[#allocation74_spill] sm:$0xff] }
 0x353   : > { %v5833_v8 = vpack.c.bf16 %v4197_v60, %v4197_v60  ;;  %v4003_v5 = vadd.f32 %v8581_v19, %v3800_v35  ;;  %v8733_v20 = vmax.f32 %v10619_v17, %v10618_v41  ;;  %v10625_v18 = vld [vmem:[#allocation38_spill] sm:$0xff] }
 0x354   : > { %v5832_v31 = vpack.c.bf16 %v4196_v25, %v4196_v25  ;;  %v4002_v33 = vadd.f32 %v8581_v19, %v3799_v40  ;;  %v3272_v57 = vpop.permute.xlu1 %3271 }
 0x355   : > { %10620 = vst [vmem:[#allocation109_spill] sm:$0xff] %v8733_v20  ;;  %5178 = vst.msk [vmem:[%s7697_s27 + $0xd4] sm:$0xf] %vm5124_vm1, %v5833_v8  ;;  %v4199_v60 = vmax.f32 %v4003_v5, 0.0  ;;  %v3270_v35 = vpop.permute.xlu0 %3269  ;;  %v3802_v16 = vmax.f32 %v8184_v55, %v3272_v57  ;;  %v10622_v8 = vld [vmem:[#allocation175_spill] sm:$0xff]  ;;  %v10623_v5 = vld [vmem:[#allocation41_spill] sm:$0xff] }
 0x356   : > { %5177 = vst.msk [vmem:[%s7697_s27 + $0xd0] sm:$0xf] %vm5124_vm1, %v5832_v31  ;;  %v4198_v37 = vmax.f32 %v4002_v33, 0.0  ;;  %v3801_v25 = vmax.f32 %v10621_v14, %v3270_v35  ;;  %3387 = vrot.lane.b32.xlu1 %v8728_v39, %s6396_s22  ;;  %3385 = vrot.lane.b32.xlu0 %v8733_v20, %s6396_s22  ;;  %v8748_v41 = vmax.f32 %v10623_v5, %v10622_v8  ;;  %v10624_v33 = vld [vmem:[#allocation177_spill] sm:$0xff]  ;;  %v10627_v5 = vld [vmem:[#allocation87_spill] sm:$0xff]  ;;  %v10631_v20 = vld [vmem:[#allocation36_spill] sm:$0xff] }
 0x357   : > { %v5835_v40 = vpack.c.bf16 %v4199_v60, %v4199_v60  ;;  %v4005_v17 = vadd.f32 %v8581_v19, %v3802_v16  ;;  %v8753_v35 = vmax.f32 %v10625_v18, %v10624_v33 }
 0x358   : > { %v5834_v55 = vpack.c.bf16 %v4198_v37, %v4198_v37  ;;  %v4004_v31 = vadd.f32 %v8581_v19, %v3801_v25  ;;  %v3276_v57 = vpop.permute.xlu1 %3275 }
 0x359   : > { %10626 = vst [vmem:[#allocation106_spill] sm:$0xff] %v8753_v35  ;;  %5180 = vst.msk [vmem:[%s7697_s27 + $0xdc] sm:$0xf] %vm5124_vm1, %v5835_v40  ;;  %v4201_v60 = vmax.f32 %v4005_v17, 0.0  ;;  %v3274_v16 = vpop.permute.xlu0 %3273  ;;  %v3804_v14 = vmax.f32 %v8200_v11, %v3276_v57  ;;  %v10628_v40 = vld [vmem:[#allocation168_spill] sm:$0xff] }
 0x35a   : > { %5179 = vst.msk [vmem:[%s7697_s27 + $0xd8] sm:$0xf] %vm5124_vm1, %v5834_v55  ;;  %v4200_v8 = vmax.f32 %v4004_v31, 0.0  ;;  %v3803_v37 = vmax.f32 %v10627_v5, %v3274_v16  ;;  %3391 = vrot.lane.b32.xlu1 %v8748_v41, %s6396_s22  ;;  %3389 = vrot.lane.b32.xlu0 %v8753_v35, %s6396_s22  ;;  %v10629_v17 = vld [vmem:[#allocation40_spill] sm:$0xff]  ;;  %v10630_v31 = vld [vmem:[#allocation169_spill] sm:$0xff]  ;;  %v10637_v35 = vld [vmem:[#allocation46_spill] sm:$0xff] }
 0x35b   : > { %v5837_v25 = vpack.c.bf16 %v4201_v60, %v4201_v60  ;;  %v4007_v18 = vadd.f32 %v8581_v19, %v3804_v14  ;;  %v8768_v33 = vmax.f32 %v10629_v17, %v10628_v40  ;;  %v8773_v16 = vmax.f32 %v10631_v20, %v10630_v31  ;;  %v10633_v17 = vld [vmem:[#allocation244_spill] sm:$0xff] }
 0x35c   : > { %v5836_v11 = vpack.c.bf16 %v4200_v8, %v4200_v8  ;;  %v4006_v55 = vadd.f32 %v8581_v19, %v3803_v37  ;;  %v3280_v57 = vpop.permute.xlu1 %3279 }
 0x35d   : > { %10632 = vst [vmem:[#allocation120_spill] sm:$0xff] %v8773_v16  ;;  %5182 = vst.msk [vmem:[%s7697_s27 + $0xe4] sm:$0xf] %vm5124_vm1, %v5837_v25  ;;  %v4203_v60 = vmax.f32 %v4007_v18, 0.0  ;;  %v3278_v14 = vpop.permute.xlu0 %3277  ;;  %v3806_v5 = vmax.f32 %v8216_v58, %v3280_v57  ;;  %v10634_v25 = vld [vmem:[#allocation188_spill] sm:$0xff]  ;;  %v10635_v18 = vld [vmem:[#allocation49_spill] sm:$0xff] }
 0x35e   : > { %5181 = vst.msk [vmem:[%s7697_s27 + $0xe0] sm:$0xf] %vm5124_vm1, %v5836_v11  ;;  %v4202_v40 = vmax.f32 %v4006_v55, 0.0  ;;  %v3805_v8 = vmax.f32 %v10633_v17, %v3278_v14  ;;  %3395 = vrot.lane.b32.xlu1 %v8768_v33, %s6396_s22  ;;  %3393 = vrot.lane.b32.xlu0 %v8773_v16, %s6396_s22  ;;  %v8788_v31 = vmax.f32 %v10635_v18, %v10634_v25  ;;  %v10636_v55 = vld [vmem:[#allocation190_spill] sm:$0xff]  ;;  %v10638_v18 = vld [vmem:[#allocation245_spill] sm:$0xff]  ;;  %v10642_v16 = vld [vmem:[#allocation44_spill] sm:$0xff] }
 0x35f   : > { %v5839_v37 = vpack.c.bf16 %v4203_v60, %v4203_v60  ;;  %v4009_v20 = vadd.f32 %v8581_v19, %v3806_v5  ;;  %v8793_v14 = vmax.f32 %v10637_v35, %v10636_v55 }
 0x360   : > { %v5838_v58 = vpack.c.bf16 %v4202_v40, %v4202_v40  ;;  %v4008_v11 = vadd.f32 %v8581_v19, %v3805_v8  ;;  %v3284_v57 = vpop.permute.xlu1 %3283 }
 0x361   : > { %5184 = vst.msk [vmem:[%s7697_s27 + $0xec] sm:$0xf] %vm5124_vm1, %v5839_v37  ;;  %v4205_v60 = vmax.f32 %v4009_v20, 0.0  ;;  %v3282_v5 = vpop.permute.xlu0 %3281  ;;  %v3808_v17 = vmax.f32 %v8232_v12, %v3284_v57  ;;  %v10639_v37 = vld [vmem:[#allocation180_spill] sm:$0xff] }
 0x362   : > { %5183 = vst.msk [vmem:[%s7697_s27 + $0xe8] sm:$0xf] %vm5124_vm1, %v5838_v58  ;;  %v4204_v25 = vmax.f32 %v4008_v11, 0.0  ;;  %v3807_v40 = vmax.f32 %v10638_v18, %v3282_v5  ;;  %3399 = vrot.lane.b32.xlu1 %v8788_v31, %s6396_s22  ;;  %3397 = vrot.lane.b32.xlu0 %v8793_v14, %s6396_s22  ;;  %v10640_v20 = vld [vmem:[#allocation48_spill] sm:$0xff]  ;;  %v10641_v11 = vld [vmem:[#allocation181_spill] sm:$0xff] }
 0x363   : > { %v5841_v8 = vpack.c.bf16 %v4205_v60, %v4205_v60  ;;  %v4011_v35 = vadd.f32 %v8581_v19, %v3808_v17  ;;  %v8808_v55 = vmax.f32 %v10640_v20, %v10639_v37  ;;  %v8813_v5 = vmax.f32 %v10642_v16, %v10641_v11  ;;  %v10646_v11 = vld [vmem:[#allocation54_spill] sm:$0xff] }
 0x364   : > { %v5840_v12 = vpack.c.bf16 %v4204_v25, %v4204_v25  ;;  %v4010_v58 = vadd.f32 %v8581_v19, %v3807_v40  ;;  %v3288_v57 = vpop.permute.xlu1 %3287 }
 0x365   : > { %5186 = vst.msk [vmem:[%s7697_s27 + $0xf4] sm:$0xf] %vm5124_vm1, %v5841_v8  ;;  %v4207_v60 = vmax.f32 %v4011_v35, 0.0  ;;  %v3286_v17 = vpop.permute.xlu0 %3285  ;;  %v3810_v18 = vmax.f32 %v8248_v50, %v3288_v57  ;;  %v10643_v8 = vld [vmem:[#allocation204_spill] sm:$0xff]  ;;  %v10644_v35 = vld [vmem:[#allocation57_spill] sm:$0xff] }
 0x366   : > { %5185 = vst.msk [vmem:[%s7697_s27 + $0xf0] sm:$0xf] %vm5124_vm1, %v5840_v12  ;;  %v4206_v37 = vmax.f32 %v4010_v58, 0.0  ;;  %v3809_v25 = vmax.f32 %v8254_v54, %v3286_v17  ;;  %3403 = vrot.lane.b32.xlu1 %v8808_v55, %s6396_s22  ;;  %3401 = vrot.lane.b32.xlu0 %v8813_v5, %s6396_s22  ;;  %v8828_v20 = vmax.f32 %v10644_v35, %v10643_v8  ;;  %v10645_v58 = vld [vmem:[#allocation206_spill] sm:$0xff] }
 0x367   : > { %v5843_v40 = vpack.c.bf16 %v4207_v60, %v4207_v60  ;;  %v4013_v16 = vadd.f32 %v8581_v19, %v3810_v18  ;;  %v8833_v54 = vmax.f32 %v10646_v11, %v10645_v58  ;;  %v10652_v11 = vld [vmem:[#allocation52_spill] sm:$0xff] }
 0x368   : > { %v5842_v50 = vpack.c.bf16 %v4206_v37, %v4206_v37  ;;  %v4012_v12 = vadd.f32 %v8581_v19, %v3809_v25  ;;  %v3292_v57 = vpop.permute.xlu1 %3291 }
 0x369   : > { %10647 = vst [vmem:[#allocation115_spill] sm:$0xff] %v8833_v54  ;;  %5188 = vst.msk [vmem:[%s7697_s27 + $0xfc] sm:$0xf] %vm5124_vm1, %v5843_v40  ;;  %v4209_v60 = vmax.f32 %v4013_v16, 0.0  ;;  %v3290_v17 = vpop.permute.xlu0 %3289  ;;  %v3812_v18 = vmax.f32 %v8264_v23, %v3292_v57  ;;  %v10648_v40 = vld [vmem:[#allocation193_spill] sm:$0xff]  ;;  %v10649_v16 = vld [vmem:[#allocation56_spill] sm:$0xff] }
 0x36a   : > { %5187 = vst.msk [vmem:[%s7697_s27 + $0xf8] sm:$0xf] %vm5124_vm1, %v5842_v50  ;;  %v4208_v8 = vmax.f32 %v4012_v12, 0.0  ;;  %v3811_v37 = vmax.f32 %v8270_v29, %v3290_v17  ;;  %3407 = vrot.lane.b32.xlu1 %v8828_v20, %s6396_s22  ;;  %3405 = vrot.lane.b32.xlu0 %v8833_v54, %s6396_s22  ;;  %v8848_v58 = vmax.f32 %v10649_v16, %v10648_v40  ;;  %v10651_v12 = vld [vmem:[#allocation194_spill] sm:$0xff]  ;;  %v10653_v16 = vld [vmem:[#allocation93_spill] sm:$0xff] }
 0x36b   : > { %v5845_v25 = vpack.c.bf16 %v4209_v60, %v4209_v60  ;;  %v4015_v35 = vadd.f32 %v8581_v19, %v3812_v18  ;;  %v8853_v29 = vmax.f32 %v10652_v11, %v10651_v12  ;;  %v10657_v54 = vld [vmem:[#allocation62_spill] sm:$0xff] }
 0x36c   : > { %10650 = vst [vmem:[#allocation117_spill] sm:$0xff] %v8848_v58  ;;  %v5844_v23 = vpack.c.bf16 %v4208_v8, %v4208_v8  ;;  %v4014_v50 = vadd.f32 %v8581_v19, %v3811_v37  ;;  %v3296_v57 = vpop.permute.xlu1 %3295 }
 0x36d   : > { %5190 = vst.msk [vmem:[%s7697_s27 + $0x104] sm:$0xf] %vm5124_vm1, %v5845_v25  ;;  %v4211_v60 = vmax.f32 %v4015_v35, 0.0  ;;  %v3294_v17 = vpop.permute.xlu0 %3293  ;;  %v3814_v18 = vmax.f32 %v8280_v27, %v3296_v57  ;;  %v10654_v25 = vld [vmem:[#allocation124_spill] sm:$0xff]  ;;  %v10655_v35 = vld [vmem:[#allocation65_spill] sm:$0xff] }
 0x36e   : > { %5189 = vst.msk [vmem:[%s7697_s27 + $0x100] sm:$0xf] %vm5124_vm1, %v5844_v23  ;;  %v4210_v40 = vmax.f32 %v4014_v50, 0.0  ;;  %v3813_v8 = vmax.f32 %v10653_v16, %v3294_v17  ;;  %3411 = vrot.lane.b32.xlu1 %v8848_v58, %s6396_s22  ;;  %3409 = vrot.lane.b32.xlu0 %v8853_v29, %s6396_s22  ;;  %v8868_v11 = vmax.f32 %v10655_v35, %v10654_v25  ;;  %v10656_v50 = vld [vmem:[#allocation119_spill] sm:$0xff]  ;;  %v10658_v16 = vld [vmem:[#allocation90_spill] sm:$0xff] }
 0x36f   : > { %v5847_v37 = vpack.c.bf16 %v4211_v60, %v4211_v60  ;;  %v4017_v12 = vadd.f32 %v8581_v19, %v3814_v18  ;;  %v8873_v17 = vmax.f32 %v10657_v54, %v10656_v50 }
 0x370   : > { %v5846_v27 = vpack.c.bf16 %v4210_v40, %v4210_v40  ;;  %v4016_v23 = vadd.f32 %v8581_v19, %v3813_v8  ;;  %v3300_v57 = vpop.permute.xlu1 %3299 }
 0x371   : > { %5192 = vst.msk [vmem:[%s7697_s27 + $0x10c] sm:$0xf] %vm5124_vm1, %v5847_v37  ;;  %v4213_v60 = vmax.f32 %v4017_v12, 0.0  ;;  %v3298_v18 = vpop.permute.xlu0 %3297  ;;  %v3816_v58 = vmax.f32 %v10658_v16, %v3300_v57  ;;  %v10659_v37 = vld [vmem:[#allocation209_spill] sm:$0xff]  ;;  %v10660_v12 = vld [vmem:[#allocation64_spill] sm:$0xff] }
 0x372   : > { %5191 = vst.msk [vmem:[%s7697_s27 + $0x108] sm:$0xf] %vm5124_vm1, %v5846_v27  ;;  %v4212_v25 = vmax.f32 %v4016_v23, 0.0  ;;  %v3815_v40 = vmax.f32 %v8302_v28, %v3298_v18  ;;  %3415 = vrot.lane.b32.xlu1 %v8868_v11, %s6396_s22  ;;  %3413 = vrot.lane.b32.xlu0 %v8873_v17, %s6396_s22  ;;  %v8888_v35 = vmax.f32 %v10660_v12, %v10659_v37  ;;  %v10661_v23 = vld [vmem:[#allocation210_spill] sm:$0xff]  ;;  %v10662_v16 = vld [vmem:[#allocation60_spill] sm:$0xff] }
 0x373   : > { %v5849_v8 = vpack.c.bf16 %v4213_v60, %v4213_v60  ;;  %v4019_v54 = vadd.f32 %v8581_v19, %v3816_v58  ;;  %v8893_v28 = vmax.f32 %v10662_v16, %v10661_v23  ;;  %v10666_v16 = vld [vmem:[#allocation70_spill] sm:$0xff] }
 0x374   : > { %v5848_v57 = vpack.c.bf16 %v4212_v25, %v4212_v25  ;;  %v4018_v27 = vadd.f32 %v8581_v19, %v3815_v40  ;;  %v3304_v50 = vpop.permute.xlu1 %3303 }
 0x375   : > { %5194 = vst.msk [vmem:[%s7697_s27 + $0x114] sm:$0xf] %vm5124_vm1, %v5849_v8  ;;  %v4215_v60 = vmax.f32 %v4019_v54, 0.0  ;;  %v3302_v58 = vpop.permute.xlu0 %3301  ;;  %v3818_v18 = vmax.f32 %v8312_v48, %v3304_v50  ;;  %v10663_v8 = vld [vmem:[#allocation229_spill] sm:$0xff] }
 0x376   : > { %5193 = vst.msk [vmem:[%s7697_s27 + $0x110] sm:$0xf] %vm5124_vm1, %v5848_v57  ;;  %v4214_v37 = vmax.f32 %v4018_v27, 0.0  ;;  %v3817_v25 = vmax.f32 %v8316_v36, %v3302_v58  ;;  %3419 = vrot.lane.b32.xlu1 %v8888_v35, %s6396_s22  ;;  %3417 = vrot.lane.b32.xlu0 %v8893_v28, %s6396_s22  ;;  %v10664_v54 = vld [vmem:[#allocation73_spill] sm:$0xff]  ;;  %v10665_v27 = vld [vmem:[#allocation231_spill] sm:$0xff] }
 0x377   : > { %v5851_v40 = vpack.c.bf16 %v4215_v60, %v4215_v60  ;;  %v4021_v12 = vadd.f32 %v8581_v19, %v3818_v18  ;;  %v8908_v23 = vmax.f32 %v10664_v54, %v10663_v8  ;;  %v8913_v36 = vmax.f32 %v10666_v16, %v10665_v27  ;;  %v10670_v16 = vld [vmem:[#allocation68_spill] sm:$0xff] }
 0x378   : > { %v5850_v48 = vpack.c.bf16 %v4214_v37, %v4214_v37  ;;  %v4020_v57 = vadd.f32 %v8581_v19, %v3817_v25  ;;  %v3308_v50 = vpop.permute.xlu1 %3307 }
 0x379   : > { %5196 = vst.msk [vmem:[%s7697_s27 + $0x11c] sm:$0xf] %vm5124_vm1, %v5851_v40  ;;  %v4217_v60 = vmax.f32 %v4021_v12, 0.0  ;;  %v3306_v58 = vpop.permute.xlu0 %3305  ;;  %v3820_v18 = vmax.f32 %v8327_v52, %v3308_v50  ;;  %v10667_v40 = vld [vmem:[#allocation125_spill] sm:$0xff]  ;;  %v10668_v12 = vld [vmem:[#allocation72_spill] sm:$0xff] }
 0x37a   : > { %5195 = vst.msk [vmem:[%s7697_s27 + $0x118] sm:$0xf] %vm5124_vm1, %v5850_v48  ;;  %v4216_v8 = vmax.f32 %v4020_v57, 0.0  ;;  %v3819_v37 = vmax.f32 %v8332_v47, %v3306_v58  ;;  %3423 = vrot.lane.b32.xlu1 %v8908_v23, %s6396_s22  ;;  %3421 = vrot.lane.b32.xlu0 %v8913_v36, %s6396_s22  ;;  %v8928_v27 = vmax.f32 %v10668_v12, %v10667_v40  ;;  %v10669_v57 = vld [vmem:[#allocation4_spill] sm:$0xff] }
 0x37b   : > { %v5853_v25 = vpack.c.bf16 %v4217_v60, %v4217_v60  ;;  %v4023_v54 = vadd.f32 %v8581_v19, %v3820_v18  ;;  %v8933_v47 = vmax.f32 %v10670_v16, %v10669_v57  ;;  %v10674_v16 = vld [vmem:[#allocation78_spill] sm:$0xff] }
 0x37c   : > { %v5852_v52 = vpack.c.bf16 %v4216_v8, %v4216_v8  ;;  %v4022_v48 = vadd.f32 %v8581_v19, %v3819_v37  ;;  %v3312_v50 = vpop.permute.xlu1 %3311 }
 0x37d   : > { %5198 = vst.msk [vmem:[%s7697_s27 + $0x124] sm:$0xf] %vm5124_vm1, %v5853_v25  ;;  %v4219_v60 = vmax.f32 %v4023_v54, 0.0  ;;  %v3310_v58 = vpop.permute.xlu0 %3309  ;;  %v3822_v18 = vmax.f32 %v8343_v2, %v3312_v50  ;;  %v10671_v25 = vld [vmem:[#allocation241_spill] sm:$0xff] }
 0x37e   : > { %5197 = vst.msk [vmem:[%s7697_s27 + $0x120] sm:$0xf] %vm5124_vm1, %v5852_v52  ;;  %v4218_v40 = vmax.f32 %v4022_v48, 0.0  ;;  %v3821_v8 = vmax.f32 %v8348_v6, %v3310_v58  ;;  %3427 = vrot.lane.b32.xlu1 %v8928_v27, %s6396_s22  ;;  %3425 = vrot.lane.b32.xlu0 %v8933_v47, %s6396_s22  ;;  %v10672_v54 = vld [vmem:[#allocation81_spill] sm:$0xff]  ;;  %v10673_v48 = vld [vmem:[#allocation243_spill] sm:$0xff] }
 0x37f   : > { %v5855_v37 = vpack.c.bf16 %v4219_v60, %v4219_v60  ;;  %v4025_v12 = vadd.f32 %v8581_v19, %v3822_v18  ;;  %v8948_v57 = vmax.f32 %v10672_v54, %v10671_v25  ;;  %v8953_v6 = vmax.f32 %v10674_v16, %v10673_v48  ;;  %v10678_v16 = vld [vmem:[#allocation76_spill] sm:$0xff] }
 0x380   : > { %v5854_v2 = vpack.c.bf16 %v4218_v40, %v4218_v40  ;;  %v4024_v52 = vadd.f32 %v8581_v19, %v3821_v8  ;;  %v3316_v50 = vpop.permute.xlu1 %3315 }
 0x381   : > { %5200 = vst.msk [vmem:[%s7697_s27 + $0x12c] sm:$0xf] %vm5124_vm1, %v5855_v37  ;;  %v4221_v60 = vmax.f32 %v4025_v12, 0.0  ;;  %v3314_v58 = vpop.permute.xlu0 %3313  ;;  %v3824_v18 = vmax.f32 %v8363_v21, %v3316_v50  ;;  %v10675_v37 = vld [vmem:[#allocation13_spill] sm:$0xff]  ;;  %v10676_v12 = vld [vmem:[#allocation80_spill] sm:$0xff] }
 0x382   : > { %5199 = vst.msk [vmem:[%s7697_s27 + $0x128] sm:$0xf] %vm5124_vm1, %v5854_v2  ;;  %v4220_v25 = vmax.f32 %v4024_v52, 0.0  ;;  %v3823_v40 = vmax.f32 %v8368_v26, %v3314_v58  ;;  %3431 = vrot.lane.b32.xlu1 %v8948_v57, %s6396_s22  ;;  %3429 = vrot.lane.b32.xlu0 %v8953_v6, %s6396_s22  ;;  %v8968_v48 = vmax.f32 %v10676_v12, %v10675_v37  ;;  %v10677_v52 = vld [vmem:[#allocation10_spill] sm:$0xff] }
 0x383   : > { %v5857_v8 = vpack.c.bf16 %v4221_v60, %v4221_v60  ;;  %v4027_v54 = vadd.f32 %v8581_v19, %v3824_v18  ;;  %v8973_v26 = vmax.f32 %v10678_v16, %v10677_v52  ;;  %v10682_v16 = vld [vmem:[#allocation86_spill] sm:$0xff] }
 0x384   : > { %v5856_v21 = vpack.c.bf16 %v4220_v25, %v4220_v25  ;;  %v4026_v2 = vadd.f32 %v8581_v19, %v3823_v40  ;;  %v3320_v50 = vpop.permute.xlu1 %3319 }
 0x385   : > { %5202 = vst.msk [vmem:[%s7697_s27 + $0x134] sm:$0xf] %vm5124_vm1, %v5857_v8  ;;  %v4223_v60 = vmax.f32 %v4027_v54, 0.0  ;;  %v3318_v58 = vpop.permute.xlu0 %3317  ;;  %v3826_v18 = vmax.f32 %v8383_v49, %v3320_v50  ;;  %v10679_v8 = vld [vmem:[#allocation148_spill] sm:$0xff]  ;;  %v10680_v54 = vld [vmem:[#allocation89_spill] sm:$0xff] }
 0x386   : > { %5201 = vst.msk [vmem:[%s7697_s27 + $0x130] sm:$0xf] %vm5124_vm1, %v5856_v21  ;;  %v4222_v37 = vmax.f32 %v4026_v2, 0.0  ;;  %v3825_v25 = vmax.f32 %v8388_v22, %v3318_v58  ;;  %3435 = vrot.lane.b32.xlu1 %v8968_v48, %s6396_s22  ;;  %3433 = vrot.lane.b32.xlu0 %v8973_v26, %s6396_s22  ;;  %v8988_v52 = vmax.f32 %v10680_v54, %v10679_v8  ;;  %v10681_v2 = vld [vmem:[#allocation21_spill] sm:$0xff] }
 0x387   : > { %v5859_v40 = vpack.c.bf16 %v4223_v60, %v4223_v60  ;;  %v4029_v12 = vadd.f32 %v8581_v19, %v3826_v18  ;;  %v8993_v22 = vmax.f32 %v10682_v16, %v10681_v2  ;;  %v10686_v16 = vld [vmem:[#allocation84_spill] sm:$0xff] }
 0x388   : > { %v5858_v49 = vpack.c.bf16 %v4222_v37, %v4222_v37  ;;  %v4028_v21 = vadd.f32 %v8581_v19, %v3825_v25  ;;  %v3324_v50 = vpop.permute.xlu1 %3323 }
 0x389   : > { %5204 = vst.msk [vmem:[%s7697_s27 + $0x13c] sm:$0xf] %vm5124_vm1, %v5859_v40  ;;  %v4225_v60 = vmax.f32 %v4029_v12, 0.0  ;;  %v3322_v58 = vpop.permute.xlu0 %3321  ;;  %v3828_v18 = vmax.f32 %v8403_v15, %v3324_v50  ;;  %v10683_v40 = vld [vmem:[#allocation246_spill] sm:$0xff]  ;;  %v10684_v12 = vld [vmem:[#allocation88_spill] sm:$0xff] }
 0x38a   : > { %5203 = vst.msk [vmem:[%s7697_s27 + $0x138] sm:$0xf] %vm5124_vm1, %v5858_v49  ;;  %v4224_v8 = vmax.f32 %v4028_v21, 0.0  ;;  %v3827_v37 = vmax.f32 %v8408_v10, %v3322_v58  ;;  %3439 = vrot.lane.b32.xlu1 %v8988_v52, %s6396_s22  ;;  %3437 = vrot.lane.b32.xlu0 %v8993_v22, %s6396_s22  ;;  %v9008_v2 = vmax.f32 %v10684_v12, %v10683_v40  ;;  %v10685_v21 = vld [vmem:[#allocation247_spill] sm:$0xff] }
 0x38b   : > { %v5861_v25 = vpack.c.bf16 %v4225_v60, %v4225_v60  ;;  %v4031_v54 = vadd.f32 %v8581_v19, %v3828_v18  ;;  %v9013_v10 = vmax.f32 %v10686_v16, %v10685_v21  ;;  %v10690_v16 = vld [vmem:[#allocation94_spill] sm:$0xff] }
 0x38c   : > { %v5860_v15 = vpack.c.bf16 %v4224_v8, %v4224_v8  ;;  %v4030_v49 = vadd.f32 %v8581_v19, %v3827_v37  ;;  %v3328_v50 = vpop.permute.xlu1 %3327 }
 0x38d   : > { %5206 = vst.msk [vmem:[%s7697_s27 + $0x144] sm:$0xf] %vm5124_vm1, %v5861_v25  ;;  %v4227_v60 = vmax.f32 %v4031_v54, 0.0  ;;  %v3326_v58 = vpop.permute.xlu0 %3325  ;;  %v3830_v18 = vmax.f32 %v8423_v38, %v3328_v50  ;;  %v10687_v25 = vld [vmem:[#allocation19_spill] sm:$0xff]  ;;  %v10688_v54 = vld [vmem:[#allocation97_spill] sm:$0xff] }
 0x38e   : > { %5205 = vst.msk [vmem:[%s7697_s27 + $0x140] sm:$0xf] %vm5124_vm1, %v5860_v15  ;;  %v4226_v40 = vmax.f32 %v4030_v49, 0.0  ;;  %v3829_v8 = vmax.f32 %v8428_v63, %v3326_v58  ;;  %3443 = vrot.lane.b32.xlu1 %v9008_v2, %s6396_s22  ;;  %3441 = vrot.lane.b32.xlu0 %v9013_v10, %s6396_s22  ;;  %v9028_v21 = vmax.f32 %v10688_v54, %v10687_v25  ;;  %v10689_v49 = vld [vmem:[#allocation253_spill] sm:$0xff] }
 0x38f   : > { %v5863_v37 = vpack.c.bf16 %v4227_v60, %v4227_v60  ;;  %v4033_v12 = vadd.f32 %v8581_v19, %v3830_v18  ;;  %v9033_v63 = vmax.f32 %v10690_v16, %v10689_v49  ;;  %v10694_v16 = vld [vmem:[#allocation92_spill] sm:$0xff] }
 0x390   : > { %v5862_v38 = vpack.c.bf16 %v4226_v40, %v4226_v40  ;;  %v4032_v15 = vadd.f32 %v8581_v19, %v3829_v8  ;;  %v3332_v50 = vpop.permute.xlu1 %3331 }
 0x391   : > { %5208 = vst.msk [vmem:[%s7697_s27 + $0x14c] sm:$0xf] %vm5124_vm1, %v5863_v37  ;;  %v4229_v60 = vmax.f32 %v4033_v12, 0.0  ;;  %v3330_v58 = vpop.permute.xlu0 %3329  ;;  %v3832_v18 = vmax.f32 %v8443_v62, %v3332_v50  ;;  %v10691_v37 = vld [vmem:[#allocation18_spill] sm:$0xff]  ;;  %v10692_v12 = vld [vmem:[#allocation96_spill] sm:$0xff] }
 0x392   : > { %5207 = vst.msk [vmem:[%s7697_s27 + $0x148] sm:$0xf] %vm5124_vm1, %v5862_v38  ;;  %v4228_v25 = vmax.f32 %v4032_v15, 0.0  ;;  %v3831_v40 = vmax.f32 %v8448_v42, %v3330_v58  ;;  %3447 = vrot.lane.b32.xlu1 %v9028_v21, %s6396_s22  ;;  %3445 = vrot.lane.b32.xlu0 %v9033_v63, %s6396_s22  ;;  %v9048_v49 = vmax.f32 %v10692_v12, %v10691_v37  ;;  %v10693_v15 = vld [vmem:[#allocation23_spill] sm:$0xff] }
 0x393   : > { %v5865_v8 = vpack.c.bf16 %v4229_v60, %v4229_v60  ;;  %v4035_v54 = vadd.f32 %v8581_v19, %v3832_v18  ;;  %v9053_v42 = vmax.f32 %v10694_v16, %v10693_v15  ;;  %v10698_v16 = vld [vmem:[#allocation102_spill] sm:$0xff] }
 0x394   : > { %v5864_v62 = vpack.c.bf16 %v4228_v25, %v4228_v25  ;;  %v4034_v38 = vadd.f32 %v8581_v19, %v3831_v40  ;;  %v3336_v50 = vpop.permute.xlu1 %3335 }
 0x395   : > { %5210 = vst.msk [vmem:[%s7697_s27 + $0x154] sm:$0xf] %vm5124_vm1, %v5865_v8  ;;  %v4231_v60 = vmax.f32 %v4035_v54, 0.0  ;;  %v3334_v58 = vpop.permute.xlu0 %3333  ;;  %v3834_v18 = vmax.f32 %v8463_v32, %v3336_v50  ;;  %v10695_v8 = vld [vmem:[#allocation254_spill] sm:$0xff]  ;;  %v10696_v54 = vld [vmem:[#allocation105_spill] sm:$0xff] }
 0x396   : > { %5209 = vst.msk [vmem:[%s7697_s27 + $0x150] sm:$0xf] %vm5124_vm1, %v5864_v62  ;;  %v4230_v37 = vmax.f32 %v4034_v38, 0.0  ;;  %v3833_v25 = vmax.f32 %v8468_v13, %v3334_v58  ;;  %3451 = vrot.lane.b32.xlu1 %v9048_v49, %s6396_s22  ;;  %3449 = vrot.lane.b32.xlu0 %v9053_v42, %s6396_s22  ;;  %v9068_v15 = vmax.f32 %v10696_v54, %v10695_v8  ;;  %v10697_v38 = vld [vmem:[#allocation255_spill] sm:$0xff] }
 0x397   : > { %v5867_v40 = vpack.c.bf16 %v4231_v60, %v4231_v60  ;;  %v4037_v12 = vadd.f32 %v8581_v19, %v3834_v18  ;;  %v9073_v13 = vmax.f32 %v10698_v16, %v10697_v38  ;;  %v10702_v16 = vld [vmem:[#allocation100_spill] sm:$0xff] }
 0x398   : > { %v5866_v32 = vpack.c.bf16 %v4230_v37, %v4230_v37  ;;  %v4036_v62 = vadd.f32 %v8581_v19, %v3833_v25  ;;  %v3340_v50 = vpop.permute.xlu1 %3339 }
 0x399   : > { %5212 = vst.msk [vmem:[%s7697_s27 + $0x15c] sm:$0xf] %vm5124_vm1, %v5867_v40  ;;  %v4233_v60 = vmax.f32 %v4037_v12, 0.0  ;;  %v3338_v58 = vpop.permute.xlu0 %3337  ;;  %v3836_v18 = vmax.f32 %v8483_v1, %v3340_v50  ;;  %v10699_v40 = vld [vmem:[#allocation31_spill] sm:$0xff]  ;;  %v10700_v12 = vld [vmem:[#allocation104_spill] sm:$0xff] }
 0x39a   : > { %5211 = vst.msk [vmem:[%s7697_s27 + $0x158] sm:$0xf] %vm5124_vm1, %v5866_v32  ;;  %v4232_v8 = vmax.f32 %v4036_v62, 0.0  ;;  %v3835_v37 = vmax.f32 %v8488_v43, %v3338_v58  ;;  %3455 = vrot.lane.b32.xlu1 %v9068_v15, %s6396_s22  ;;  %3453 = vrot.lane.b32.xlu0 %v9073_v13, %s6396_s22  ;;  %v9088_v38 = vmax.f32 %v10700_v12, %v10699_v40  ;;  %v10701_v62 = vld [vmem:[#allocation27_spill] sm:$0xff] }
 0x39b   : > { %v5869_v25 = vpack.c.bf16 %v4233_v60, %v4233_v60  ;;  %v4039_v54 = vadd.f32 %v8581_v19, %v3836_v18  ;;  %v9093_v43 = vmax.f32 %v10702_v16, %v10701_v62  ;;  %v10706_v16 = vld [vmem:[#allocation110_spill] sm:$0xff] }
 0x39c   : > { %v5868_v1 = vpack.c.bf16 %v4232_v8, %v4232_v8  ;;  %v4038_v32 = vadd.f32 %v8581_v19, %v3835_v37  ;;  %v3344_v50 = vpop.permute.xlu1 %3343 }
 0x39d   : > { %5214 = vst.msk [vmem:[%s7697_s27 + $0x164] sm:$0xf] %vm5124_vm1, %v5869_v25  ;;  %v4235_v60 = vmax.f32 %v4039_v54, 0.0  ;;  %v3342_v58 = vpop.permute.xlu0 %3341  ;;  %v3838_v18 = vmax.f32 %v8503_v3, %v3344_v50  ;;  %v10703_v25 = vld [vmem:[#allocation258_spill] sm:$0xff]  ;;  %v10704_v54 = vld [vmem:[#allocation113_spill] sm:$0xff] }
 0x39e   : > { %5213 = vst.msk [vmem:[%s7697_s27 + $0x160] sm:$0xf] %vm5124_vm1, %v5868_v1  ;;  %v4234_v40 = vmax.f32 %v4038_v32, 0.0  ;;  %v3837_v8 = vmax.f32 %v8508_v51, %v3342_v58  ;;  %3459 = vrot.lane.b32.xlu1 %v9088_v38, %s6396_s22  ;;  %3457 = vrot.lane.b32.xlu0 %v9093_v43, %s6396_s22  ;;  %v9108_v62 = vmax.f32 %v10704_v54, %v10703_v25  ;;  %v10705_v32 = vld [vmem:[#allocation259_spill] sm:$0xff] }
 0x39f   : > { %v5871_v37 = vpack.c.bf16 %v4235_v60, %v4235_v60  ;;  %v4041_v12 = vadd.f32 %v8581_v19, %v3838_v18  ;;  %v9113_v51 = vmax.f32 %v10706_v16, %v10705_v32  ;;  %v10710_v16 = vld [vmem:[#allocation108_spill] sm:$0xff] }
 0x3a0   : > { %v5870_v3 = vpack.c.bf16 %v4234_v40, %v4234_v40  ;;  %v4040_v1 = vadd.f32 %v8581_v19, %v3837_v8  ;;  %v3348_v50 = vpop.permute.xlu1 %3347 }
 0x3a1   : > { %5216 = vst.msk [vmem:[%s7697_s27 + $0x16c] sm:$0xf] %vm5124_vm1, %v5871_v37  ;;  %v4237_v60 = vmax.f32 %v4041_v12, 0.0  ;;  %v3346_v58 = vpop.permute.xlu0 %3345  ;;  %v3840_v18 = vmax.f32 %v8523_v7, %v3348_v50  ;;  %v10707_v37 = vld [vmem:[#allocation256_spill] sm:$0xff] }
 0x3a2   : > { %5215 = vst.msk [vmem:[%s7697_s27 + $0x168] sm:$0xf] %vm5124_vm1, %v5870_v3  ;;  %v4236_v25 = vmax.f32 %v4040_v1, 0.0  ;;  %v3839_v40 = vmax.f32 %v8528_v24, %v3346_v58  ;;  %3463 = vrot.lane.b32.xlu1 %v9108_v62, %s6396_s22  ;;  %3461 = vrot.lane.b32.xlu0 %v9113_v51, %s6396_s22  ;;  %v10708_v12 = vld [vmem:[#allocation112_spill] sm:$0xff]  ;;  %v10709_v1 = vld [vmem:[#allocation257_spill] sm:$0xff] }
 0x3a3   : > { %v5873_v8 = vpack.c.bf16 %v4237_v60, %v4237_v60  ;;  %v4043_v54 = vadd.f32 %v8581_v19, %v3840_v18  ;;  %v9128_v32 = vmax.f32 %v10708_v12, %v10707_v37  ;;  %v9133_v24 = vmax.f32 %v10710_v16, %v10709_v1  ;;  %v10714_v16 = vld [vmem:[#allocation118_spill] sm:$0xff] }
 0x3a4   : > { %v5872_v7 = vpack.c.bf16 %v4236_v25, %v4236_v25  ;;  %v4042_v3 = vadd.f32 %v8581_v19, %v3839_v40  ;;  %v3352_v50 = vpop.permute.xlu1 %3351 }
 0x3a5   : > { %5218 = vst.msk [vmem:[%s7697_s27 + $0x174] sm:$0xf] %vm5124_vm1, %v5873_v8  ;;  %v4239_v60 = vmax.f32 %v4043_v54, 0.0  ;;  %v3350_v58 = vpop.permute.xlu0 %3349  ;;  %v3842_v18 = vmax.f32 %v8543_v30, %v3352_v50  ;;  %v10711_v8 = vld [vmem:[#allocation262_spill] sm:$0xff]  ;;  %v10712_v54 = vld [vmem:[#allocation123_spill] sm:$0xff] }
 0x3a6   : > { %5217 = vst.msk [vmem:[%s7697_s27 + $0x170] sm:$0xf] %vm5124_vm1, %v5872_v7  ;;  %v4238_v37 = vmax.f32 %v4042_v3, 0.0  ;;  %v3841_v25 = vmax.f32 %v8548_v44, %v3350_v58  ;;  %3467 = vrot.lane.b32.xlu1 %v9128_v32, %s6396_s22  ;;  %3465 = vrot.lane.b32.xlu0 %v9133_v24, %s6396_s22  ;;  %v9148_v1 = vmax.f32 %v10712_v54, %v10711_v8  ;;  %v10713_v3 = vld [vmem:[#allocation263_spill] sm:$0xff] }
 0x3a7   : > { %v5875_v40 = vpack.c.bf16 %v4239_v60, %v4239_v60  ;;  %v4045_v12 = vadd.f32 %v8581_v19, %v3842_v18  ;;  %v9153_v44 = vmax.f32 %v10714_v16, %v10713_v3  ;;  %v10718_v16 = vld [vmem:[#allocation116_spill] sm:$0xff] }
 0x3a8   : > { %v5874_v30 = vpack.c.bf16 %v4238_v37, %v4238_v37  ;;  %v4044_v7 = vadd.f32 %v8581_v19, %v3841_v25  ;;  %v3356_v50 = vpop.permute.xlu1 %3355 }
 0x3a9   : > { %5220 = vst.msk [vmem:[%s7697_s27 + $0x17c] sm:$0xf] %vm5124_vm1, %v5875_v40  ;;  %v4241_v60 = vmax.f32 %v4045_v12, 0.0  ;;  %v3354_v58 = vpop.permute.xlu0 %3353  ;;  %v3844_v18 = vmax.f32 %v8563_v4, %v3356_v50  ;;  %v10715_v40 = vld [vmem:[#allocation260_spill] sm:$0xff]  ;;  %v10716_v12 = vld [vmem:[#allocation122_spill] sm:$0xff] }
 0x3aa   : > { %5219 = vst.msk [vmem:[%s7697_s27 + $0x178] sm:$0xf] %vm5124_vm1, %v5874_v30  ;;  %v4240_v8 = vmax.f32 %v4044_v7, 0.0  ;;  %v3843_v37 = vmax.f32 %v8568_v53, %v3354_v58  ;;  %3471 = vrot.lane.b32.xlu1 %v9148_v1, %s6396_s22  ;;  %3469 = vrot.lane.b32.xlu0 %v9153_v44, %s6396_s22  ;;  %v9168_v3 = vmax.f32 %v10716_v12, %v10715_v40  ;;  %v10717_v7 = vld [vmem:[#allocation261_spill] sm:$0xff] }
 0x3ab   : > { %v5877_v25 = vpack.c.bf16 %v4241_v60, %v4241_v60  ;;  %v4047_v54 = vadd.f32 %v8581_v19, %v3844_v18  ;;  %v9173_v53 = vmax.f32 %v10718_v16, %v10717_v7  ;;  %v10723_v16 = vld [vmem:[#allocation130_spill] sm:$0xff] }
 0x3ac   : > { %v5876_v4 = vpack.c.bf16 %v4240_v8, %v4240_v8  ;;  %v4046_v30 = vadd.f32 %v8581_v19, %v3843_v37  ;;  %v3360_v50 = vpop.permute.xlu1 %3359 }
 0x3ad   : > { %10719 = vst [vmem:[#allocation114_spill] sm:$0xff] %v9173_v53  ;;  %5222 = vst.msk [vmem:[%s7697_s27 + $0x184] sm:$0xf] %vm5124_vm1, %v5877_v25  ;;  %v4243_v60 = vmax.f32 %v4047_v54, 0.0  ;;  %v3358_v58 = vpop.permute.xlu0 %3357  ;;  %v3846_v18 = vmax.f32 %v8588_v61, %v3360_v50  ;;  %v10720_v25 = vld [vmem:[#allocation266_spill] sm:$0xff]  ;;  %v10721_v54 = vld [vmem:[#allocation135_spill] sm:$0xff] }
 0x3ae   : > { %5221 = vst.msk [vmem:[%s7697_s27 + $0x180] sm:$0xf] %vm5124_vm1, %v5876_v4  ;;  %v4242_v40 = vmax.f32 %v4046_v30, 0.0  ;;  %v3845_v8 = vmax.f32 %v8593_v34, %v3358_v58  ;;  %3475 = vrot.lane.b32.xlu1 %v9168_v3, %s6396_s22  ;;  %3473 = vrot.lane.b32.xlu0 %v9173_v53, %s6396_s22  ;;  %v9188_v7 = vmax.f32 %v10721_v54, %v10720_v25  ;;  %v10722_v30 = vld [vmem:[#allocation267_spill] sm:$0xff]  ;;  %v10729_v53 = vld [vmem:[#allocation128_spill] sm:$0xff] }
 0x3af   : > { %v5879_v37 = vpack.c.bf16 %v4243_v60, %v4243_v60  ;;  %v4049_v12 = vadd.f32 %v8581_v19, %v3846_v18  ;;  %v9193_v34 = vmax.f32 %v10723_v16, %v10722_v30  ;;  %v10725_v54 = vld [vmem:[#allocation103_spill] sm:$0xff] }
 0x3b0   : > { %v5878_v61 = vpack.c.bf16 %v4242_v40, %v4242_v40  ;;  %v4048_v4 = vadd.f32 %v8581_v19, %v3845_v8  ;;  %v3364_v50 = vpop.permute.xlu1 %3363 }
 0x3b1   : > { %10724 = vst [vmem:[#allocation132_spill] sm:$0xff] %v9193_v34  ;;  %5224 = vst.msk [vmem:[%s7697_s27 + $0x18c] sm:$0xf] %vm5124_vm1, %v5879_v37  ;;  %v4245_v60 = vmax.f32 %v4049_v12, 0.0  ;;  %v3362_v58 = vpop.permute.xlu0 %3361  ;;  %v3848_v18 = vmax.f32 %v8608_v9, %v3364_v50  ;;  %v10726_v37 = vld [vmem:[#allocation264_spill] sm:$0xff]  ;;  %v10727_v12 = vld [vmem:[#allocation134_spill] sm:$0xff] }
 0x3b2   : > { %5223 = vst.msk [vmem:[%s7697_s27 + $0x188] sm:$0xf] %vm5124_vm1, %v5878_v61  ;;  %v4244_v25 = vmax.f32 %v4048_v4, 0.0  ;;  %v3847_v40 = vmax.f32 %v10725_v54, %v3362_v58  ;;  %3479 = vrot.lane.b32.xlu1 %v9188_v7, %s6396_s22  ;;  %3477 = vrot.lane.b32.xlu0 %v9193_v34, %s6396_s22  ;;  %v9208_v16 = vmax.f32 %v10727_v12, %v10726_v37  ;;  %v10728_v4 = vld [vmem:[#allocation265_spill] sm:$0xff]  ;;  %v10731_v37 = vld [vmem:[#allocation99_spill] sm:$0xff] }
 0x3b3   : > { %v5881_v8 = vpack.c.bf16 %v4245_v60, %v4245_v60  ;;  %v4051_v30 = vadd.f32 %v8581_v19, %v3848_v18  ;;  %v9213_v58 = vmax.f32 %v10729_v53, %v10728_v4  ;;  %v9226_v53 = vld [vmem:[%s9802_s2] ss:$0 sm:$0xff] }
 0x3b4   : > { %v5880_v9 = vpack.c.bf16 %v4244_v25, %v4244_v25  ;;  %v4050_v61 = vadd.f32 %v8581_v19, %v3847_v40  ;;  %v3368_v50 = vpop.permute.xlu1 %3367  ;;  %v10735_v4 = vld [vmem:[#allocation146_spill] sm:$0xff] }
 0x3b5   : > { %10730 = vst [vmem:[#allocation127_spill] sm:$0xff] %v9213_v58  ;;  %5226 = vst.msk [vmem:[%s7697_s27 + $0x194] sm:$0xf] %vm5124_vm1, %v5881_v8  ;;  %v4247_v60 = vmax.f32 %v4051_v30, 0.0  ;;  %v3366_v18 = vpop.permute.xlu0 %3365  ;;  %v3850_v54 = vmax.f32 %v8628_v0, %v3368_v50  ;;  %v10732_v0 = vld [vmem:[#allocation270_spill] sm:$0xff]  ;;  %v10733_v8 = vld [vmem:[#allocation149_spill] sm:$0xff] }
 0x3b6   : > { %5225 = vst.msk [vmem:[%s7697_s27 + $0x190] sm:$0xf] %vm5124_vm1, %v5880_v9  ;;  %v4246_v34 = vmax.f32 %v4050_v61, 0.0  ;;  %v3849_v25 = vmax.f32 %v10731_v37, %v3366_v18  ;;  %3483 = vrot.lane.b32.xlu1 %v9208_v16, %s6396_s22  ;;  %3481 = vrot.lane.b32.xlu0 %v9213_v58, %s6396_s22  ;;  %v9233_v30 = vmax.f32 %v10733_v8, %v10732_v0  ;;  %v10734_v50 = vld [vmem:[#allocation271_spill] sm:$0xff]  ;;  %v10737_v8 = vld [vmem:[#allocation101_spill] sm:$0xff] }
 0x3b7   : > { %v5883_v19 = vpack.c.bf16 %v4247_v60, %v4247_v60  ;;  %v4053_v40 = vadd.f32 %v9226_v53, %v3850_v54  ;;  %v9238_v60 = vmax.f32 %v10735_v4, %v10734_v50  ;;  %v10741_v58 = vld [vmem:[#allocation145_spill] sm:$0xff] }
 0x3b8   : > { %v5882_v12 = vpack.c.bf16 %v4246_v34, %v4246_v34  ;;  %v4052_v9 = vadd.f32 %v9226_v53, %v3849_v25  ;;  %v3372_v61 = vpop.permute.xlu1 %3371 }
 0x3b9   : > { %10736 = vst [vmem:[#allocation129_spill] sm:$0xff] %v9238_v60  ;;  %5228 = vst.msk [vmem:[%s7697_s27 + $0x19c] sm:$0xf] %vm5124_vm1, %v5883_v19  ;;  %v4249_v18 = vmax.f32 %v4053_v40, 0.0  ;;  %v3370_v54 = vpop.permute.xlu0 %3369  ;;  %v3852_v37 = vmax.f32 %v8648_v56, %v3372_v61  ;;  %v10738_v19 = vld [vmem:[#allocation268_spill] sm:$0xff]  ;;  %v10739_v40 = vld [vmem:[#allocation147_spill] sm:$0xff] }
 0x3ba   : > { %5227 = vst.msk [vmem:[%s7697_s27 + $0x198] sm:$0xf] %vm5124_vm1, %v5882_v12  ;;  %v4248_v0 = vmax.f32 %v4052_v9, 0.0  ;;  %v3851_v34 = vmax.f32 %v10737_v8, %v3370_v54  ;;  %3487 = vrot.lane.b32.xlu1 %v9233_v30, %s6396_s22  ;;  %3485 = vrot.lane.b32.xlu0 %v9238_v60, %s6396_s22  ;;  %v9253_v4 = vmax.f32 %v10739_v40, %v10738_v19  ;;  %v10740_v9 = vld [vmem:[#allocation269_spill] sm:$0xff]  ;;  %v10743_v40 = vld [vmem:[#allocation98_spill] sm:$0xff] }
 0x3bb   : > { %v5885_v25 = vpack.c.bf16 %v4249_v18, %v4249_v18  ;;  %v4055_v50 = vadd.f32 %v9226_v53, %v3852_v37  ;;  %v9258_v54 = vmax.f32 %v10741_v58, %v10740_v9  ;;  %v10747_v60 = vld [vmem:[#allocation161_spill] sm:$0xff] }
 0x3bc   : > { %v5884_v56 = vpack.c.bf16 %v4248_v0, %v4248_v0  ;;  %v4054_v12 = vadd.f32 %v9226_v53, %v3851_v34  ;;  %v3376_v61 = vpop.permute.xlu1 %3375 }
 0x3bd   : > { %10742 = vst [vmem:[#allocation126_spill] sm:$0xff] %v9258_v54  ;;  %5230 = vst.msk [vmem:[%s7697_s27 + $0x1a4] sm:$0xf] %vm5124_vm1, %v5885_v25  ;;  %v4251_v18 = vmax.f32 %v4055_v50, 0.0  ;;  %v3374_v37 = vpop.permute.xlu0 %3373  ;;  %v3854_v8 = vmax.f32 %v8668_v59, %v3376_v61  ;;  %v10744_v25 = vld [vmem:[#allocation154_spill] sm:$0xff]  ;;  %v10745_v50 = vld [vmem:[#allocation163_spill] sm:$0xff] }
 0x3be   : > { %5229 = vst.msk [vmem:[%s7697_s27 + $0x1a0] sm:$0xf] %vm5124_vm1, %v5884_v56  ;;  %v4250_v19 = vmax.f32 %v4054_v12, 0.0  ;;  %v3853_v0 = vmax.f32 %v10743_v40, %v3374_v37  ;;  %3491 = vrot.lane.b32.xlu1 %v9253_v4, %s6396_s22  ;;  %3489 = vrot.lane.b32.xlu0 %v9258_v54, %s6396_s22  ;;  %v9273_v9 = vmax.f32 %v10745_v50, %v10744_v25  ;;  %v10746_v12 = vld [vmem:[#allocation29_spill] sm:$0xff]  ;;  %v10749_v50 = vld [vmem:[#allocation111_spill] sm:$0xff]  ;;  %v10753_v54 = vld [vmem:[#allocation160_spill] sm:$0xff] }
 0x3bf   : > { %v5887_v34 = vpack.c.bf16 %v4251_v18, %v4251_v18  ;;  %v4057_v58 = vadd.f32 %v9226_v53, %v3854_v8  ;;  %v9278_v37 = vmax.f32 %v10747_v60, %v10746_v12 }
 0x3c0   : > { %v5886_v59 = vpack.c.bf16 %v4250_v19, %v4250_v19  ;;  %v4056_v56 = vadd.f32 %v9226_v53, %v3853_v0  ;;  %v3380_v61 = vpop.permute.xlu1 %3379 }
 0x3c1   : > { %10748 = vst [vmem:[#allocation143_spill] sm:$0xff] %v9278_v37  ;;  %5232 = vst.msk [vmem:[%s7697_s27 + $0x1ac] sm:$0xf] %vm5124_vm1, %v5887_v34  ;;  %v4253_v18 = vmax.f32 %v4057_v58, 0.0  ;;  %v3378_v8 = vpop.permute.xlu0 %3377  ;;  %v3856_v40 = vmax.f32 %v8688_v45, %v3380_v61  ;;  %v10750_v34 = vld [vmem:[#allocation272_spill] sm:$0xff]  ;;  %v10751_v58 = vld [vmem:[#allocation162_spill] sm:$0xff] }
 0x3c2   : > { %5231 = vst.msk [vmem:[%s7697_s27 + $0x1a8] sm:$0xf] %vm5124_vm1, %v5886_v59  ;;  %v4252_v25 = vmax.f32 %v4056_v56, 0.0  ;;  %v3855_v19 = vmax.f32 %v10749_v50, %v3378_v8  ;;  %3495 = vrot.lane.b32.xlu1 %v9273_v9, %s6396_s22  ;;  %3493 = vrot.lane.b32.xlu0 %v9278_v37, %s6396_s22  ;;  %v9293_v12 = vmax.f32 %v10751_v58, %v10750_v34  ;;  %v10752_v56 = vld [vmem:[#allocation273_spill] sm:$0xff]  ;;  %v10755_v58 = vld [vmem:[#allocation107_spill] sm:$0xff] }
 0x3c3   : > { %v5889_v0 = vpack.c.bf16 %v4253_v18, %v4253_v18  ;;  %v4059_v60 = vadd.f32 %v9226_v53, %v3856_v40  ;;  %v9298_v8 = vmax.f32 %v10753_v54, %v10752_v56  ;;  %v10759_v37 = vld [vmem:[#allocation173_spill] sm:$0xff] }
 0x3c4   : > { %v5888_v45 = vpack.c.bf16 %v4252_v25, %v4252_v25  ;;  %v4058_v59 = vadd.f32 %v9226_v53, %v3855_v19  ;;  %v3384_v61 = vpop.permute.xlu1 %3383 }
 0x3c5   : > { %10754 = vst [vmem:[#allocation140_spill] sm:$0xff] %v9298_v8  ;;  %5234 = vst.msk [vmem:[%s7697_s27 + $0x1b4] sm:$0xf] %vm5124_vm1, %v5889_v0  ;;  %v4255_v18 = vmax.f32 %v4059_v60, 0.0  ;;  %v3382_v40 = vpop.permute.xlu0 %3381  ;;  %v3858_v50 = vmax.f32 %v8708_v46, %v3384_v61  ;;  %v10756_v0 = vld [vmem:[#allocation34_spill] sm:$0xff]  ;;  %v10757_v60 = vld [vmem:[#allocation176_spill] sm:$0xff] }
 0x3c6   : > { %5233 = vst.msk [vmem:[%s7697_s27 + $0x1b0] sm:$0xf] %vm5124_vm1, %v5888_v45  ;;  %v4254_v34 = vmax.f32 %v4058_v59, 0.0  ;;  %v3857_v25 = vmax.f32 %v10755_v58, %v3382_v40  ;;  %3499 = vrot.lane.b32.xlu1 %v9293_v12, %s6396_s22  ;;  %3497 = vrot.lane.b32.xlu0 %v9298_v8, %s6396_s22  ;;  %v9313_v56 = vmax.f32 %v10757_v60, %v10756_v0  ;;  %v10758_v59 = vld [vmem:[#allocation47_spill] sm:$0xff]  ;;  %v10761_v60 = vld [vmem:[#allocation109_spill] sm:$0xff]  ;;  %v10765_v8 = vld [vmem:[#allocation172_spill] sm:$0xff] }
 0x3c7   : > { %v5891_v19 = vpack.c.bf16 %v4255_v18, %v4255_v18  ;;  %v4061_v54 = vadd.f32 %v9226_v53, %v3858_v50  ;;  %v9318_v40 = vmax.f32 %v10759_v37, %v10758_v59 }
 0x3c8   : > { %v5890_v46 = vpack.c.bf16 %v4254_v34, %v4254_v34  ;;  %v4060_v45 = vadd.f32 %v9226_v53, %v3857_v25  ;;  %v3388_v61 = vpop.permute.xlu1 %3387 }
 0x3c9   : > { %10760 = vst [vmem:[#allocation141_spill] sm:$0xff] %v9318_v40  ;;  %5236 = vst.msk [vmem:[%s7697_s27 + $0x1bc] sm:$0xf] %vm5124_vm1, %v5891_v19  ;;  %v4257_v18 = vmax.f32 %v4061_v54, 0.0  ;;  %v3386_v50 = vpop.permute.xlu0 %3385  ;;  %v3860_v58 = vmax.f32 %v8728_v39, %v3388_v61  ;;  %v10762_v19 = vld [vmem:[#allocation39_spill] sm:$0xff]  ;;  %v10763_v54 = vld [vmem:[#allocation174_spill] sm:$0xff] }
 0x3ca   : > { %5235 = vst.msk [vmem:[%s7697_s27 + $0x1b8] sm:$0xf] %vm5124_vm1, %v5890_v46  ;;  %v4256_v0 = vmax.f32 %v4060_v45, 0.0  ;;  %v3859_v34 = vmax.f32 %v10761_v60, %v3386_v50  ;;  %3503 = vrot.lane.b32.xlu1 %v9313_v56, %s6396_s22  ;;  %3501 = vrot.lane.b32.xlu0 %v9318_v40, %s6396_s22  ;;  %v9333_v59 = vmax.f32 %v10763_v54, %v10762_v19  ;;  %v10764_v45 = vld [vmem:[#allocation35_spill] sm:$0xff]  ;;  %v10767_v54 = vld [vmem:[#allocation106_spill] sm:$0xff] }
 0x3cb   : > { %v5893_v25 = vpack.c.bf16 %v4257_v18, %v4257_v18  ;;  %v4063_v37 = vadd.f32 %v9226_v53, %v3860_v58  ;;  %v9338_v50 = vmax.f32 %v10765_v8, %v10764_v45  ;;  %v10771_v40 = vld [vmem:[#allocation186_spill] sm:$0xff] }
 0x3cc   : > { %v5892_v39 = vpack.c.bf16 %v4256_v0, %v4256_v0  ;;  %v4062_v46 = vadd.f32 %v9226_v53, %v3859_v34  ;;  %v3392_v61 = vpop.permute.xlu1 %3391 }
 0x3cd   : > { %10766 = vst [vmem:[#allocation139_spill] sm:$0xff] %v9338_v50  ;;  %5238 = vst.msk [vmem:[%s7697_s27 + $0x1c4] sm:$0xf] %vm5124_vm1, %v5893_v25  ;;  %v4259_v18 = vmax.f32 %v4063_v37, 0.0  ;;  %v3390_v58 = vpop.permute.xlu0 %3389  ;;  %v3862_v60 = vmax.f32 %v8748_v41, %v3392_v61  ;;  %v10768_v25 = vld [vmem:[#allocation191_spill] sm:$0xff]  ;;  %v10769_v37 = vld [vmem:[#allocation189_spill] sm:$0xff] }
 0x3ce   : > { %5237 = vst.msk [vmem:[%s7697_s27 + $0x1c0] sm:$0xf] %vm5124_vm1, %v5892_v39  ;;  %v4258_v19 = vmax.f32 %v4062_v46, 0.0  ;;  %v3861_v0 = vmax.f32 %v10767_v54, %v3390_v58  ;;  %3507 = vrot.lane.b32.xlu1 %v9333_v59, %s6396_s22  ;;  %3505 = vrot.lane.b32.xlu0 %v9338_v50, %s6396_s22  ;;  %v9353_v45 = vmax.f32 %v10769_v37, %v10768_v25  ;;  %v10770_v46 = vld [vmem:[#allocation192_spill] sm:$0xff]  ;;  %v10776_v50 = vld [vmem:[#allocation185_spill] sm:$0xff] }
 0x3cf   : > { %v5895_v34 = vpack.c.bf16 %v4259_v18, %v4259_v18  ;;  %v4065_v8 = vadd.f32 %v9226_v53, %v3862_v60  ;;  %v9358_v58 = vmax.f32 %v10771_v40, %v10770_v46  ;;  %v10772_v37 = vld [vmem:[#allocation120_spill] sm:$0xff] }
 0x3d0   : > { %v5894_v41 = vpack.c.bf16 %v4258_v19, %v4258_v19  ;;  %v4064_v39 = vadd.f32 %v9226_v53, %v3861_v0  ;;  %v3396_v61 = vpop.permute.xlu1 %3395 }
 0x3d1   : > { %5240 = vst.msk [vmem:[%s7697_s27 + $0x1cc] sm:$0xf] %vm5124_vm1, %v5895_v34  ;;  %v4261_v18 = vmax.f32 %v4065_v8, 0.0  ;;  %v3394_v60 = vpop.permute.xlu0 %3393  ;;  %v3864_v54 = vmax.f32 %v8768_v33, %v3396_v61  ;;  %v10773_v34 = vld [vmem:[#allocation179_spill] sm:$0xff] }
 0x3d2   : > { %5239 = vst.msk [vmem:[%s7697_s27 + $0x1c8] sm:$0xf] %vm5124_vm1, %v5894_v41  ;;  %v4260_v25 = vmax.f32 %v4064_v39, 0.0  ;;  %v3863_v19 = vmax.f32 %v10772_v37, %v3394_v60  ;;  %3511 = vrot.lane.b32.xlu1 %v9353_v45, %s6396_s22  ;;  %3509 = vrot.lane.b32.xlu0 %v9358_v58, %s6396_s22  ;;  %v10774_v8 = vld [vmem:[#allocation187_spill] sm:$0xff]  ;;  %v10775_v39 = vld [vmem:[#allocation198_spill] sm:$0xff] }
 0x3d3   : > { %v5897_v0 = vpack.c.bf16 %v4261_v18, %v4261_v18  ;;  %v4067_v40 = vadd.f32 %v9226_v53, %v3864_v54  ;;  %v9373_v46 = vmax.f32 %v10774_v8, %v10773_v34  ;;  %v9378_v60 = vmax.f32 %v10776_v50, %v10775_v39  ;;  %v10780_v39 = vld [vmem:[#allocation202_spill] sm:$0xff] }
 0x3d4   : > { %v5896_v33 = vpack.c.bf16 %v4260_v25, %v4260_v25  ;;  %v4066_v41 = vadd.f32 %v9226_v53, %v3863_v19  ;;  %v3400_v61 = vpop.permute.xlu1 %3399 }
 0x3d5   : > { %5242 = vst.msk [vmem:[%s7697_s27 + $0x1d4] sm:$0xf] %vm5124_vm1, %v5897_v0  ;;  %v4263_v18 = vmax.f32 %v4067_v40, 0.0  ;;  %v3398_v54 = vpop.permute.xlu0 %3397  ;;  %v3866_v37 = vmax.f32 %v8788_v31, %v3400_v61  ;;  %v10777_v0 = vld [vmem:[#allocation223_spill] sm:$0xff]  ;;  %v10778_v40 = vld [vmem:[#allocation205_spill] sm:$0xff] }
 0x3d6   : > { %5241 = vst.msk [vmem:[%s7697_s27 + $0x1d0] sm:$0xf] %vm5124_vm1, %v5896_v33  ;;  %v4262_v34 = vmax.f32 %v4066_v41, 0.0  ;;  %v3865_v25 = vmax.f32 %v8793_v14, %v3398_v54  ;;  %3515 = vrot.lane.b32.xlu1 %v9373_v46, %s6396_s22  ;;  %3513 = vrot.lane.b32.xlu0 %v9378_v60, %s6396_s22  ;;  %v9393_v8 = vmax.f32 %v10778_v40, %v10777_v0  ;;  %v10779_v41 = vld [vmem:[#allocation225_spill] sm:$0xff] }
 0x3d7   : > { %v5899_v19 = vpack.c.bf16 %v4263_v18, %v4263_v18  ;;  %v4069_v50 = vadd.f32 %v9226_v53, %v3866_v37  ;;  %v9398_v14 = vmax.f32 %v10780_v39, %v10779_v41  ;;  %v10786_v39 = vld [vmem:[#allocation201_spill] sm:$0xff] }
 0x3d8   : > { %v5898_v31 = vpack.c.bf16 %v4262_v34, %v4262_v34  ;;  %v4068_v33 = vadd.f32 %v9226_v53, %v3865_v25  ;;  %v3404_v61 = vpop.permute.xlu1 %3403 }
 0x3d9   : > { %10781 = vst [vmem:[#allocation157_spill] sm:$0xff] %v9398_v14  ;;  %5244 = vst.msk [vmem:[%s7697_s27 + $0x1dc] sm:$0xf] %vm5124_vm1, %v5899_v19  ;;  %v4265_v18 = vmax.f32 %v4069_v50, 0.0  ;;  %v3402_v54 = vpop.permute.xlu0 %3401  ;;  %v3868_v37 = vmax.f32 %v8808_v55, %v3404_v61  ;;  %v10782_v19 = vld [vmem:[#allocation207_spill] sm:$0xff] }
 0x3da   : > { %5243 = vst.msk [vmem:[%s7697_s27 + $0x1d8] sm:$0xf] %vm5124_vm1, %v5898_v31  ;;  %v4264_v0 = vmax.f32 %v4068_v33, 0.0  ;;  %v3867_v34 = vmax.f32 %v8813_v5, %v3402_v54  ;;  %3519 = vrot.lane.b32.xlu1 %v9393_v8, %s6396_s22  ;;  %3517 = vrot.lane.b32.xlu0 %v9398_v14, %s6396_s22  ;;  %v10783_v50 = vld [vmem:[#allocation203_spill] sm:$0xff]  ;;  %v10785_v33 = vld [vmem:[#allocation208_spill] sm:$0xff]  ;;  %v10791_v14 = vld [vmem:[#allocation218_spill] sm:$0xff] }
 0x3db   : > { %v5901_v25 = vpack.c.bf16 %v4265_v18, %v4265_v18  ;;  %v4071_v40 = vadd.f32 %v9226_v53, %v3868_v37  ;;  %v9413_v41 = vmax.f32 %v10783_v50, %v10782_v19  ;;  %v9418_v5 = vmax.f32 %v10786_v39, %v10785_v33  ;;  %v10787_v50 = vld [vmem:[#allocation115_spill] sm:$0xff] }
 0x3dc   : > { %v5900_v55 = vpack.c.bf16 %v4264_v0, %v4264_v0  ;;  %v4070_v31 = vadd.f32 %v9226_v53, %v3867_v34  ;;  %v3408_v61 = vpop.permute.xlu1 %3407 }
 0x3dd   : > { %10784 = vst [vmem:[#allocation156_spill] sm:$0xff] %v9413_v41  ;;  %5246 = vst.msk [vmem:[%s7697_s27 + $0x1e4] sm:$0xf] %vm5124_vm1, %v5901_v25  ;;  %v4267_v18 = vmax.f32 %v4071_v40, 0.0  ;;  %v3406_v54 = vpop.permute.xlu0 %3405  ;;  %v3870_v37 = vmax.f32 %v8828_v20, %v3408_v61  ;;  %v10788_v25 = vld [vmem:[#allocation15_spill] sm:$0xff]  ;;  %v10789_v40 = vld [vmem:[#allocation6_spill] sm:$0xff] }
 0x3de   : > { %5245 = vst.msk [vmem:[%s7697_s27 + $0x1e0] sm:$0xf] %vm5124_vm1, %v5900_v55  ;;  %v4266_v19 = vmax.f32 %v4070_v31, 0.0  ;;  %v3869_v0 = vmax.f32 %v10787_v50, %v3406_v54  ;;  %3523 = vrot.lane.b32.xlu1 %v9413_v41, %s6396_s22  ;;  %3521 = vrot.lane.b32.xlu0 %v9418_v5, %s6396_s22  ;;  %v9433_v39 = vmax.f32 %v10789_v40, %v10788_v25  ;;  %v10790_v31 = vld [vmem:[#allocation11_spill] sm:$0xff]  ;;  %v10792_v50 = vld [vmem:[#allocation117_spill] sm:$0xff] }
 0x3df   : > { %v5903_v34 = vpack.c.bf16 %v4267_v18, %v4267_v18  ;;  %v4073_v33 = vadd.f32 %v9226_v53, %v3870_v37  ;;  %v9438_v54 = vmax.f32 %v10791_v14, %v10790_v31 }
 0x3e0   : > { %v5902_v20 = vpack.c.bf16 %v4266_v19, %v4266_v19  ;;  %v4072_v55 = vadd.f32 %v9226_v53, %v3869_v0  ;;  %v3412_v61 = vpop.permute.xlu1 %3411 }
 0x3e1   : > { %5248 = vst.msk [vmem:[%s7697_s27 + $0x1ec] sm:$0xf] %vm5124_vm1, %v5903_v34  ;;  %v4269_v18 = vmax.f32 %v4073_v33, 0.0  ;;  %v3410_v37 = vpop.permute.xlu0 %3409  ;;  %v3872_v41 = vmax.f32 %v10792_v50, %v3412_v61  ;;  %v10793_v34 = vld [vmem:[#allocation2_spill] sm:$0xff]  ;;  %v10794_v33 = vld [vmem:[#allocation219_spill] sm:$0xff]  ;;  %v10796_v50 = vld [vmem:[#allocation217_spill] sm:$0xff] }
 0x3e2   : > { %5247 = vst.msk [vmem:[%s7697_s27 + $0x1e8] sm:$0xf] %vm5124_vm1, %v5902_v20  ;;  %v4268_v25 = vmax.f32 %v4072_v55, 0.0  ;;  %v3871_v19 = vmax.f32 %v8853_v29, %v3410_v37  ;;  %3527 = vrot.lane.b32.xlu1 %v9433_v39, %s6396_s22  ;;  %3525 = vrot.lane.b32.xlu0 %v9438_v54, %s6396_s22  ;;  %v9453_v40 = vmax.f32 %v10794_v33, %v10793_v34  ;;  %v10795_v55 = vld [vmem:[#allocation8_spill] sm:$0xff] }
 0x3e3   : > { %v5905_v0 = vpack.c.bf16 %v4269_v18, %v4269_v18  ;;  %v4075_v14 = vadd.f32 %v9226_v53, %v3872_v41  ;;  %v9458_v29 = vmax.f32 %v10796_v50, %v10795_v55  ;;  %v10800_v50 = vld [vmem:[#allocation227_spill] sm:$0xff] }
 0x3e4   : > { %v5904_v61 = vpack.c.bf16 %v4268_v25, %v4268_v25  ;;  %v4074_v20 = vadd.f32 %v9226_v53, %v3871_v19  ;;  %v3416_v31 = vpop.permute.xlu1 %3415 }
 0x3e5   : > { %5250 = vst.msk [vmem:[%s7697_s27 + $0x1f4] sm:$0xf] %vm5124_vm1, %v5905_v0  ;;  %v4271_v18 = vmax.f32 %v4075_v14, 0.0  ;;  %v3414_v41 = vpop.permute.xlu0 %3413  ;;  %v3874_v37 = vmax.f32 %v8868_v11, %v3416_v31  ;;  %v10797_v0 = vld [vmem:[#allocation251_spill] sm:$0xff]  ;;  %v10798_v14 = vld [vmem:[#allocation230_spill] sm:$0xff] }
 0x3e6   : > { %5249 = vst.msk [vmem:[%s7697_s27 + $0x1f0] sm:$0xf] %vm5124_vm1, %v5904_v61  ;;  %v4270_v34 = vmax.f32 %v4074_v20, 0.0  ;;  %v3873_v25 = vmax.f32 %v8873_v17, %v3414_v41  ;;  %3531 = vrot.lane.b32.xlu1 %v9453_v40, %s6396_s22  ;;  %3529 = vrot.lane.b32.xlu0 %v9458_v29, %s6396_s22  ;;  %v9473_v55 = vmax.f32 %v10798_v14, %v10797_v0  ;;  %v10799_v20 = vld [vmem:[#allocation83_spill] sm:$0xff] }
 0x3e7   : > { %v5907_v19 = vpack.c.bf16 %v4271_v18, %v4271_v18  ;;  %v4077_v33 = vadd.f32 %v9226_v53, %v3874_v37  ;;  %v9478_v17 = vmax.f32 %v10800_v50, %v10799_v20  ;;  %v10804_v50 = vld [vmem:[#allocation226_spill] sm:$0xff] }
 0x3e8   : > { %v5906_v11 = vpack.c.bf16 %v4270_v34, %v4270_v34  ;;  %v4076_v61 = vadd.f32 %v9226_v53, %v3873_v25  ;;  %v3420_v31 = vpop.permute.xlu1 %3419 }
 0x3e9   : > { %5252 = vst.msk [vmem:[%s7697_s27 + $0x1fc] sm:$0xf] %vm5124_vm1, %v5907_v19  ;;  %v4273_v18 = vmax.f32 %v4077_v33, 0.0  ;;  %v3418_v41 = vpop.permute.xlu0 %3417  ;;  %v3876_v37 = vmax.f32 %v8888_v35, %v3420_v31  ;;  %v10801_v19 = vld [vmem:[#allocation232_spill] sm:$0xff] }
 0x3ea   : > { %5251 = vst.msk [vmem:[%s7697_s27 + $0x1f8] sm:$0xf] %vm5124_vm1, %v5906_v11  ;;  %v4272_v0 = vmax.f32 %v4076_v61, 0.0  ;;  %v3875_v34 = vmax.f32 %v8893_v28, %v3418_v41  ;;  %3535 = vrot.lane.b32.xlu1 %v9473_v55, %s6396_s22  ;;  %3533 = vrot.lane.b32.xlu0 %v9478_v17, %s6396_s22  ;;  %v10802_v33 = vld [vmem:[#allocation228_spill] sm:$0xff]  ;;  %v10803_v61 = vld [vmem:[#allocation233_spill] sm:$0xff] }
 0x3eb   : > { %v5909_v25 = vpack.c.bf16 %v4273_v18, %v4273_v18  ;;  %v4079_v14 = vadd.f32 %v9226_v53, %v3876_v37  ;;  %v9493_v20 = vmax.f32 %v10802_v33, %v10801_v19  ;;  %v9498_v28 = vmax.f32 %v10804_v50, %v10803_v61  ;;  %v10808_v50 = vld [vmem:[#allocation239_spill] sm:$0xff] }
 0x3ec   : > { %v5908_v35 = vpack.c.bf16 %v4272_v0, %v4272_v0  ;;  %v4078_v11 = vadd.f32 %v9226_v53, %v3875_v34  ;;  %v3424_v31 = vpop.permute.xlu1 %3423 }
 0x3ed   : > { %5254 = vst.msk [vmem:[%s7697_s27 + $0x204] sm:$0xf] %vm5124_vm1, %v5909_v25  ;;  %v4275_v18 = vmax.f32 %v4079_v14, 0.0  ;;  %v3422_v41 = vpop.permute.xlu0 %3421  ;;  %v3878_v37 = vmax.f32 %v8908_v23, %v3424_v31  ;;  %v10805_v25 = vld [vmem:[#allocation95_spill] sm:$0xff]  ;;  %v10806_v14 = vld [vmem:[#allocation242_spill] sm:$0xff] }
 0x3ee   : > { %5253 = vst.msk [vmem:[%s7697_s27 + $0x200] sm:$0xf] %vm5124_vm1, %v5908_v35  ;;  %v4274_v19 = vmax.f32 %v4078_v11, 0.0  ;;  %v3877_v0 = vmax.f32 %v8913_v36, %v3422_v41  ;;  %3539 = vrot.lane.b32.xlu1 %v9493_v20, %s6396_s22  ;;  %3537 = vrot.lane.b32.xlu0 %v9498_v28, %s6396_s22  ;;  %v9513_v61 = vmax.f32 %v10806_v14, %v10805_v25  ;;  %v10807_v11 = vld [vmem:[#allocation91_spill] sm:$0xff] }
 0x3ef   : > { %v5911_v34 = vpack.c.bf16 %v4275_v18, %v4275_v18  ;;  %v4081_v33 = vadd.f32 %v9226_v53, %v3878_v37  ;;  %v9518_v36 = vmax.f32 %v10808_v50, %v10807_v11  ;;  %v10812_v50 = vld [vmem:[#allocation238_spill] sm:$0xff] }
 0x3f0   : > { %v5910_v23 = vpack.c.bf16 %v4274_v19, %v4274_v19  ;;  %v4080_v35 = vadd.f32 %v9226_v53, %v3877_v0  ;;  %v3428_v31 = vpop.permute.xlu1 %3427 }
 0x3f1   : > { %5256 = vst.msk [vmem:[%s7697_s27 + $0x20c] sm:$0xf] %vm5124_vm1, %v5911_v34  ;;  %v4277_v18 = vmax.f32 %v4081_v33, 0.0  ;;  %v3426_v41 = vpop.permute.xlu0 %3425  ;;  %v3880_v37 = vmax.f32 %v8928_v27, %v3428_v31  ;;  %v10809_v34 = vld [vmem:[#allocation85_spill] sm:$0xff]  ;;  %v10810_v33 = vld [vmem:[#allocation240_spill] sm:$0xff] }
 0x3f2   : > { %5255 = vst.msk [vmem:[%s7697_s27 + $0x208] sm:$0xf] %vm5124_vm1, %v5910_v23  ;;  %v4276_v25 = vmax.f32 %v4080_v35, 0.0  ;;  %v3879_v19 = vmax.f32 %v8933_v47, %v3426_v41  ;;  %3543 = vrot.lane.b32.xlu1 %v9513_v61, %s6396_s22  ;;  %3541 = vrot.lane.b32.xlu0 %v9518_v36, %s6396_s22  ;;  %v9533_v11 = vmax.f32 %v10810_v33, %v10809_v34  ;;  %v10811_v35 = vld [vmem:[#allocation82_spill] sm:$0xff] }
 0x3f3   : > { %v5913_v0 = vpack.c.bf16 %v4277_v18, %v4277_v18  ;;  %v4083_v14 = vadd.f32 %v9226_v53, %v3880_v37  ;;  %v9538_v47 = vmax.f32 %v10812_v50, %v10811_v35 }
 0x3f4   : > { %v5912_v27 = vpack.c.bf16 %v4276_v25, %v4276_v25  ;;  %v4082_v23 = vadd.f32 %v9226_v53, %v3879_v19  ;;  %v3432_v31 = vpop.permute.xlu1 %3431 }
 0x3f5   : > { %5258 = vst.msk [vmem:[%s7697_s27 + $0x214] sm:$0xf] %vm5124_vm1, %v5913_v0  ;;  %v4279_v18 = vmax.f32 %v4083_v14, 0.0  ;;  %v3430_v41 = vpop.permute.xlu0 %3429  ;;  %v3882_v37 = vmax.f32 %v8948_v57, %v3432_v31 }
 0x3f6   : > { %5257 = vst.msk [vmem:[%s7697_s27 + $0x210] sm:$0xf] %vm5124_vm1, %v5912_v27  ;;  %v4278_v34 = vmax.f32 %v4082_v23, 0.0  ;;  %v3881_v25 = vmax.f32 %v8953_v6, %v3430_v41  ;;  %3547 = vrot.lane.b32.xlu1 %v9533_v11, %s6396_s22  ;;  %3545 = vrot.lane.b32.xlu0 %v9538_v47, %s6396_s22 }
 0x3f7   : > { %v5915_v19 = vpack.c.bf16 %v4279_v18, %v4279_v18  ;;  %v4085_v33 = vadd.f32 %v9226_v53, %v3882_v37 }
 0x3f8   : > { %v5914_v0 = vpack.c.bf16 %v4278_v34, %v4278_v34  ;;  %v4084_v14 = vadd.f32 %v9226_v53, %v3881_v25  ;;  %v3436_v35 = vpop.permute.xlu1 %3435 }
 0x3f9   : > { %5260 = vst.msk [vmem:[%s7697_s27 + $0x21c] sm:$0xf] %vm5124_vm1, %v5915_v19  ;;  %v4281_v57 = vmax.f32 %v4085_v33, 0.0  ;;  %v3434_v27 = vpop.permute.xlu0 %3433  ;;  %v3884_v6 = vmax.f32 %v8968_v48, %v3436_v35 }
 0x3fa   : > { %5259 = vst.msk [vmem:[%s7697_s27 + $0x218] sm:$0xf] %vm5124_vm1, %v5914_v0  ;;  %v4280_v23 = vmax.f32 %v4084_v14, 0.0  ;;  %v3883_v31 = vmax.f32 %v8973_v26, %v3434_v27 }
 0x3fb   : > { %v5917_v50 = vpack.c.bf16 %v4281_v57, %v4281_v57  ;;  %v4087_v18 = vadd.f32 %v9226_v53, %v3884_v6 }
 0x3fc   : > { %v5916_v41 = vpack.c.bf16 %v4280_v23, %v4280_v23  ;;  %v4086_v37 = vadd.f32 %v9226_v53, %v3883_v31  ;;  %v3440_v34 = vpop.permute.xlu1 %3439 }
 0x3fd   : > { %5262 = vst.msk [vmem:[%s7697_s27 + $0x224] sm:$0xf] %vm5124_vm1, %v5917_v50  ;;  %v4283_v25 = vmax.f32 %v4087_v18, 0.0  ;;  %v3438_v19 = vpop.permute.xlu0 %3437  ;;  %v3886_v48 = vmax.f32 %v8988_v52, %v3440_v34 }
 0x3fe   : > { %5261 = vst.msk [vmem:[%s7697_s27 + $0x220] sm:$0xf] %vm5124_vm1, %v5916_v41  ;;  %v4282_v33 = vmax.f32 %v4086_v37, 0.0  ;;  %v3885_v26 = vmax.f32 %v8993_v22, %v3438_v19 }
 0x3ff   : > { %v5919_v0 = vpack.c.bf16 %v4283_v25, %v4283_v25  ;;  %v4089_v14 = vadd.f32 %v9226_v53, %v3886_v48 }
 0x400   : > { %v5918_v35 = vpack.c.bf16 %v4282_v33, %v4282_v33  ;;  %v4088_v57 = vadd.f32 %v9226_v53, %v3885_v26  ;;  %v3444_v27 = vpop.permute.xlu1 %3443 }
 0x401   : > { %5264 = vst.msk [vmem:[%s7697_s27 + $0x22c] sm:$0xf] %vm5124_vm1, %v5919_v0  ;;  %v4285_v6 = vmax.f32 %v4089_v14, 0.0  ;;  %v3442_v23 = vpop.permute.xlu0 %3441  ;;  %v3888_v52 = vmax.f32 %v9008_v2, %v3444_v27 }
 0x402   : > { %5263 = vst.msk [vmem:[%s7697_s27 + $0x228] sm:$0xf] %vm5124_vm1, %v5918_v35  ;;  %v4284_v31 = vmax.f32 %v4088_v57, 0.0  ;;  %v3887_v22 = vmax.f32 %v9013_v10, %v3442_v23 }
 0x403   : > { %v5921_v50 = vpack.c.bf16 %v4285_v6, %v4285_v6  ;;  %v4091_v18 = vadd.f32 %v9226_v53, %v3888_v52 }
 0x404   : > { %v5920_v41 = vpack.c.bf16 %v4284_v31, %v4284_v31  ;;  %v4090_v37 = vadd.f32 %v9226_v53, %v3887_v22  ;;  %v3448_v34 = vpop.permute.xlu1 %3447 }
 0x405   : > { %5266 = vst.msk [vmem:[%s7697_s27 + $0x234] sm:$0xf] %vm5124_vm1, %v5921_v50  ;;  %v4287_v25 = vmax.f32 %v4091_v18, 0.0  ;;  %v3446_v19 = vpop.permute.xlu0 %3445  ;;  %v3890_v2 = vmax.f32 %v9028_v21, %v3448_v34 }
 0x406   : > { %5265 = vst.msk [vmem:[%s7697_s27 + $0x230] sm:$0xf] %vm5124_vm1, %v5920_v41  ;;  %v4286_v48 = vmax.f32 %v4090_v37, 0.0  ;;  %v3889_v10 = vmax.f32 %v9033_v63, %v3446_v19 }
 0x407   : > { %v5923_v33 = vpack.c.bf16 %v4287_v25, %v4287_v25  ;;  %v4093_v26 = vadd.f32 %v9226_v53, %v3890_v2 }
 0x408   : > { %v5922_v0 = vpack.c.bf16 %v4286_v48, %v4286_v48  ;;  %v4092_v14 = vadd.f32 %v9226_v53, %v3889_v10  ;;  %v3452_v35 = vpop.permute.xlu1 %3451 }
 0x409   : > { %5268 = vst.msk [vmem:[%s7697_s27 + $0x23c] sm:$0xf] %vm5124_vm1, %v5923_v33  ;;  %v4289_v57 = vmax.f32 %v4093_v26, 0.0  ;;  %v3450_v27 = vpop.permute.xlu0 %3449  ;;  %v3892_v21 = vmax.f32 %v9048_v49, %v3452_v35 }
 0x40a   : > { %5267 = vst.msk [vmem:[%s7697_s27 + $0x238] sm:$0xf] %vm5124_vm1, %v5922_v0  ;;  %v4288_v6 = vmax.f32 %v4092_v14, 0.0  ;;  %v3891_v63 = vmax.f32 %v9053_v42, %v3450_v27 }
 0x40b   : > { %v5925_v23 = vpack.c.bf16 %v4289_v57, %v4289_v57  ;;  %v4095_v52 = vadd.f32 %v9226_v53, %v3892_v21 }
 0x40c   : > { %v5924_v31 = vpack.c.bf16 %v4288_v6, %v4288_v6  ;;  %v4094_v22 = vadd.f32 %v9226_v53, %v3891_v63  ;;  %v3456_v50 = vpop.permute.xlu1 %3455 }
 0x40d   : > { %5270 = vst.msk [vmem:[%s7697_s27 + $0x244] sm:$0xf] %vm5124_vm1, %v5925_v23  ;;  %v4291_v18 = vmax.f32 %v4095_v52, 0.0  ;;  %v3454_v41 = vpop.permute.xlu0 %3453  ;;  %v3894_v49 = vmax.f32 %v9068_v15, %v3456_v50 }
 0x40e   : > { %5269 = vst.msk [vmem:[%s7697_s27 + $0x240] sm:$0xf] %vm5124_vm1, %v5924_v31  ;;  %v4290_v37 = vmax.f32 %v4094_v22, 0.0  ;;  %v3893_v42 = vmax.f32 %v9073_v13, %v3454_v41 }
 0x40f   : > { %v5927_v34 = vpack.c.bf16 %v4291_v18, %v4291_v18  ;;  %v4097_v25 = vadd.f32 %v9226_v53, %v3894_v49 }
 0x410   : > { %v5926_v19 = vpack.c.bf16 %v4290_v37, %v4290_v37  ;;  %v4096_v2 = vadd.f32 %v9226_v53, %v3893_v42  ;;  %v3460_v48 = vpop.permute.xlu1 %3459 }
 0x411   : > { %5272 = vst.msk [vmem:[%s7697_s27 + $0x24c] sm:$0xf] %vm5124_vm1, %v5927_v34  ;;  %v4293_v10 = vmax.f32 %v4097_v25, 0.0  ;;  %v3458_v33 = vpop.permute.xlu0 %3457  ;;  %v3896_v15 = vmax.f32 %v9088_v38, %v3460_v48 }
 0x412   : > { %5271 = vst.msk [vmem:[%s7697_s27 + $0x248] sm:$0xf] %vm5124_vm1, %v5926_v19  ;;  %v4292_v26 = vmax.f32 %v4096_v2, 0.0  ;;  %v3895_v13 = vmax.f32 %v9093_v43, %v3458_v33 }
 0x413   : > { %v5929_v0 = vpack.c.bf16 %v4293_v10, %v4293_v10  ;;  %v4099_v14 = vadd.f32 %v9226_v53, %v3896_v15 }
 0x414   : > { %v5928_v35 = vpack.c.bf16 %v4292_v26, %v4292_v26  ;;  %v4098_v57 = vadd.f32 %v9226_v53, %v3895_v13  ;;  %v3464_v27 = vpop.permute.xlu1 %3463 }
 0x415   : > { %5274 = vst.msk [vmem:[%s7697_s27 + $0x254] sm:$0xf] %vm5124_vm1, %v5929_v0  ;;  %v4295_v21 = vmax.f32 %v4099_v14, 0.0  ;;  %v3462_v6 = vpop.permute.xlu0 %3461  ;;  %v3898_v38 = vmax.f32 %v9108_v62, %v3464_v27  ;;  %v10813_v27 = vld [vmem:[#allocation114_spill] sm:$0xff] }
 0x416   : > { %5273 = vst.msk [vmem:[%s7697_s27 + $0x250] sm:$0xf] %vm5124_vm1, %v5928_v35  ;;  %v4294_v63 = vmax.f32 %v4098_v57, 0.0  ;;  %v3897_v43 = vmax.f32 %v9113_v51, %v3462_v6 }
 0x417   : > { %v5931_v23 = vpack.c.bf16 %v4295_v21, %v4295_v21  ;;  %v4101_v52 = vadd.f32 %v9226_v53, %v3898_v38 }
 0x418   : > { %v5930_v31 = vpack.c.bf16 %v4294_v63, %v4294_v63  ;;  %v4100_v22 = vadd.f32 %v9226_v53, %v3897_v43  ;;  %v3468_v50 = vpop.permute.xlu1 %3467 }
 0x419   : > { %5276 = vst.msk [vmem:[%s7697_s27 + $0x25c] sm:$0xf] %vm5124_vm1, %v5931_v23  ;;  %v4297_v18 = vmax.f32 %v4101_v52, 0.0  ;;  %v3466_v41 = vpop.permute.xlu0 %3465  ;;  %v3900_v62 = vmax.f32 %v9128_v32, %v3468_v50 }
 0x41a   : > { %5275 = vst.msk [vmem:[%s7697_s27 + $0x258] sm:$0xf] %vm5124_vm1, %v5930_v31  ;;  %v4296_v49 = vmax.f32 %v4100_v22, 0.0  ;;  %v3899_v51 = vmax.f32 %v9133_v24, %v3466_v41  ;;  %v10814_v22 = vld [vmem:[#allocation132_spill] sm:$0xff] }
 0x41b   : > { %v5933_v37 = vpack.c.bf16 %v4297_v18, %v4297_v18  ;;  %v4103_v42 = vadd.f32 %v9226_v53, %v3900_v62 }
 0x41c   : > { %v5932_v34 = vpack.c.bf16 %v4296_v49, %v4296_v49  ;;  %v4102_v25 = vadd.f32 %v9226_v53, %v3899_v51  ;;  %v3472_v19 = vpop.permute.xlu1 %3471 }
 0x41d   : > { %5278 = vst.msk [vmem:[%s7697_s27 + $0x264] sm:$0xf] %vm5124_vm1, %v5933_v37  ;;  %v4299_v2 = vmax.f32 %v4103_v42, 0.0  ;;  %v3470_v48 = vpop.permute.xlu0 %3469  ;;  %v3902_v32 = vmax.f32 %v9148_v1, %v3472_v19 }
 0x41e   : > { %5277 = vst.msk [vmem:[%s7697_s27 + $0x260] sm:$0xf] %vm5124_vm1, %v5932_v34  ;;  %v4298_v10 = vmax.f32 %v4102_v25, 0.0  ;;  %v3901_v24 = vmax.f32 %v9153_v44, %v3470_v48  ;;  %v10815_v25 = vld [vmem:[#allocation127_spill] sm:$0xff] }
 0x41f   : > { %v5935_v33 = vpack.c.bf16 %v4299_v2, %v4299_v2  ;;  %v4105_v15 = vadd.f32 %v9226_v53, %v3902_v32 }
 0x420   : > { %v5934_v26 = vpack.c.bf16 %v4298_v10, %v4298_v10  ;;  %v4104_v13 = vadd.f32 %v9226_v53, %v3901_v24  ;;  %v3476_v0 = vpop.permute.xlu1 %3475 }
 0x421   : > { %5280 = vst.msk [vmem:[%s7697_s27 + $0x26c] sm:$0xf] %vm5124_vm1, %v5935_v33  ;;  %v4301_v14 = vmax.f32 %v4105_v15, 0.0  ;;  %v3474_v35 = vpop.permute.xlu0 %3473  ;;  %v3904_v1 = vmax.f32 %v9168_v3, %v3476_v0 }
 0x422   : > { %5279 = vst.msk [vmem:[%s7697_s27 + $0x268] sm:$0xf] %vm5124_vm1, %v5934_v26  ;;  %v4300_v57 = vmax.f32 %v4104_v13, 0.0  ;;  %v3903_v44 = vmax.f32 %v10813_v27, %v3474_v35  ;;  %v10816_v13 = vld [vmem:[#allocation129_spill] sm:$0xff] }
 0x423   : > { %v5937_v21 = vpack.c.bf16 %v4301_v14, %v4301_v14  ;;  %v4107_v6 = vadd.f32 %v9226_v53, %v3904_v1 }
 0x424   : > { %v5936_v38 = vpack.c.bf16 %v4300_v57, %v4300_v57  ;;  %v4106_v63 = vadd.f32 %v9226_v53, %v3903_v44  ;;  %v3480_v43 = vpop.permute.xlu1 %3479 }
 0x425   : > { %5282 = vst.msk [vmem:[%s7697_s27 + $0x274] sm:$0xf] %vm5124_vm1, %v5937_v21  ;;  %v4303_v23 = vmax.f32 %v4107_v6, 0.0  ;;  %v3478_v52 = vpop.permute.xlu0 %3477  ;;  %v3906_v3 = vmax.f32 %v9188_v7, %v3480_v43 }
 0x426   : > { %5281 = vst.msk [vmem:[%s7697_s27 + $0x270] sm:$0xf] %vm5124_vm1, %v5936_v38  ;;  %v4302_v31 = vmax.f32 %v4106_v63, 0.0  ;;  %v3905_v50 = vmax.f32 %v10814_v22, %v3478_v52  ;;  %v10817_v38 = vld [vmem:[#allocation126_spill] sm:$0xff] }
 0x427   : > { %v5939_v18 = vpack.c.bf16 %v4303_v23, %v4303_v23  ;;  %v4109_v41 = vadd.f32 %v9226_v53, %v3906_v3 }
 0x428   : > { %v5938_v62 = vpack.c.bf16 %v4302_v31, %v4302_v31  ;;  %v4108_v49 = vadd.f32 %v9226_v53, %v3905_v50  ;;  %v3484_v51 = vpop.permute.xlu1 %3483 }
 0x429   : > { %5284 = vst.msk [vmem:[%s7697_s27 + $0x27c] sm:$0xf] %vm5124_vm1, %v5939_v18  ;;  %v4305_v37 = vmax.f32 %v4109_v41, 0.0  ;;  %v3482_v42 = vpop.permute.xlu0 %3481  ;;  %v3908_v7 = vmax.f32 %v9208_v16, %v3484_v51  ;;  %v10818_v41 = vld [vmem:[#allocation143_spill] sm:$0xff] }
 0x42a   : > { %5283 = vst.msk [vmem:[%s7697_s27 + $0x278] sm:$0xf] %vm5124_vm1, %v5938_v62  ;;  %v4304_v34 = vmax.f32 %v4108_v49, 0.0  ;;  %v3907_v19 = vmax.f32 %v10815_v25, %v3482_v42 }
 0x42b   : > { %v5941_v2 = vpack.c.bf16 %v4305_v37, %v4305_v37  ;;  %v4111_v48 = vadd.f32 %v9226_v53, %v3908_v7 }
 0x42c   : > { %v5940_v32 = vpack.c.bf16 %v4304_v34, %v4304_v34  ;;  %v4110_v10 = vadd.f32 %v9226_v53, %v3907_v19  ;;  %v3488_v24 = vpop.permute.xlu1 %3487 }
 0x42d   : > { %5286 = vst.msk [vmem:[%s7697_s27 + $0x284] sm:$0xf] %vm5124_vm1, %v5941_v2  ;;  %v4307_v33 = vmax.f32 %v4111_v48, 0.0  ;;  %v3486_v15 = vpop.permute.xlu0 %3485  ;;  %v3910_v16 = vmax.f32 %v9233_v30, %v3488_v24  ;;  %v10819_v2 = vld [vmem:[#allocation140_spill] sm:$0xff] }
 0x42e   : > { %5285 = vst.msk [vmem:[%s7697_s27 + $0x280] sm:$0xf] %vm5124_vm1, %v5940_v32  ;;  %v4306_v26 = vmax.f32 %v4110_v10, 0.0  ;;  %v3909_v0 = vmax.f32 %v10816_v13, %v3486_v15 }
 0x42f   : > { %v5943_v14 = vpack.c.bf16 %v4307_v33, %v4307_v33  ;;  %v4113_v35 = vadd.f32 %v9226_v53, %v3910_v16 }
 0x430   : > { %v5942_v1 = vpack.c.bf16 %v4306_v26, %v4306_v26  ;;  %v4112_v57 = vadd.f32 %v9226_v53, %v3909_v0  ;;  %v3492_v27 = vpop.permute.xlu1 %3491  ;;  %v10820_v0 = vld [vmem:[#allocation141_spill] sm:$0xff] }
 0x431   : > { %5288 = vst.msk [vmem:[%s7697_s27 + $0x28c] sm:$0xf] %vm5124_vm1, %v5943_v14  ;;  %v4309_v44 = vmax.f32 %v4113_v35, 0.0  ;;  %v3490_v21 = vpop.permute.xlu0 %3489  ;;  %v3912_v30 = vmax.f32 %v9253_v4, %v3492_v27 }
 0x432   : > { %5287 = vst.msk [vmem:[%s7697_s27 + $0x288] sm:$0xf] %vm5124_vm1, %v5942_v1  ;;  %v4308_v6 = vmax.f32 %v4112_v57, 0.0  ;;  %v3911_v63 = vmax.f32 %v10817_v38, %v3490_v21  ;;  %v10821_v38 = vld [vmem:[#allocation139_spill] sm:$0xff] }
 0x433   : > { %v5945_v43 = vpack.c.bf16 %v4309_v44, %v4309_v44  ;;  %v4115_v23 = vadd.f32 %v9226_v53, %v3912_v30 }
 0x434   : > { %v5944_v52 = vpack.c.bf16 %v4308_v6, %v4308_v6  ;;  %v4114_v3 = vadd.f32 %v9226_v53, %v3911_v63  ;;  %v3496_v31 = vpop.permute.xlu1 %3495 }
 0x435   : > { %5290 = vst.msk [vmem:[%s7697_s27 + $0x294] sm:$0xf] %vm5124_vm1, %v5945_v43  ;;  %v4311_v22 = vmax.f32 %v4115_v23, 0.0  ;;  %v3494_v50 = vpop.permute.xlu0 %3493  ;;  %v3914_v4 = vmax.f32 %v9273_v9, %v3496_v31 }
 0x436   : > { %5289 = vst.msk [vmem:[%s7697_s27 + $0x290] sm:$0xf] %vm5124_vm1, %v5944_v52  ;;  %v4310_v18 = vmax.f32 %v4114_v3, 0.0  ;;  %v3913_v62 = vmax.f32 %v10818_v41, %v3494_v50 }
 0x437   : > { %v5947_v49 = vpack.c.bf16 %v4311_v22, %v4311_v22  ;;  %v4117_v51 = vadd.f32 %v9226_v53, %v3914_v4 }
 0x438   : > { %v5946_v37 = vpack.c.bf16 %v4310_v18, %v4310_v18  ;;  %v4116_v42 = vadd.f32 %v9226_v53, %v3913_v62  ;;  %v3500_v7 = vpop.permute.xlu1 %3499 }
 0x439   : > { %5292 = vst.msk [vmem:[%s7697_s27 + $0x29c] sm:$0xf] %vm5124_vm1, %v5947_v49  ;;  %v4313_v34 = vmax.f32 %v4117_v51, 0.0  ;;  %v3498_v25 = vpop.permute.xlu0 %3497  ;;  %v3916_v9 = vmax.f32 %v9293_v12, %v3500_v7 }
 0x43a   : > { %5291 = vst.msk [vmem:[%s7697_s27 + $0x298] sm:$0xf] %vm5124_vm1, %v5946_v37  ;;  %v4312_v19 = vmax.f32 %v4116_v42, 0.0  ;;  %v3915_v48 = vmax.f32 %v10819_v2, %v3498_v25 }
 0x43b   : > { %v5949_v32 = vpack.c.bf16 %v4313_v34, %v4313_v34  ;;  %v4119_v10 = vadd.f32 %v9226_v53, %v3916_v9 }
 0x43c   : > { %v5948_v24 = vpack.c.bf16 %v4312_v19, %v4312_v19  ;;  %v4118_v33 = vadd.f32 %v9226_v53, %v3915_v48  ;;  %v3504_v15 = vpop.permute.xlu1 %3503 }
 0x43d   : > { %5294 = vst.msk [vmem:[%s7697_s27 + $0x2a4] sm:$0xf] %vm5124_vm1, %v5949_v32  ;;  %v4315_v16 = vmax.f32 %v4119_v10, 0.0  ;;  %v3502_v26 = vpop.permute.xlu0 %3501  ;;  %v3918_v12 = vmax.f32 %v9313_v56, %v3504_v15 }
 0x43e   : > { %5293 = vst.msk [vmem:[%s7697_s27 + $0x2a0] sm:$0xf] %vm5124_vm1, %v5948_v24  ;;  %v4314_v13 = vmax.f32 %v4118_v33, 0.0  ;;  %v3917_v14 = vmax.f32 %v10820_v0, %v3502_v26  ;;  %v10822_v33 = vld [vmem:[#allocation157_spill] sm:$0xff] }
 0x43f   : > { %v5951_v35 = vpack.c.bf16 %v4315_v16, %v4315_v16  ;;  %v4121_v1 = vadd.f32 %v9226_v53, %v3918_v12  ;;  %v9729_v16 = vld [vmem:[%s9802_s2] ss:$0 sm:$0xff] }
 0x440   : > { %v5950_v57 = vpack.c.bf16 %v4314_v13, %v4314_v13  ;;  %v4120_v27 = vadd.f32 %v9226_v53, %v3917_v14  ;;  %v3508_v44 = vpop.permute.xlu1 %3507  ;;  %v10823_v14 = vld [vmem:[#allocation156_spill] sm:$0xff] }
 0x441   : > { %5296 = vst.msk [vmem:[%s7697_s27 + $0x2ac] sm:$0xf] %vm5124_vm1, %v5951_v35  ;;  %v4317_v21 = vmax.f32 %v4121_v1, 0.0  ;;  %v3506_v30 = vpop.permute.xlu0 %3505  ;;  %v3920_v56 = vmax.f32 %v9333_v59, %v3508_v44 }
 0x442   : > { %5295 = vst.msk [vmem:[%s7697_s27 + $0x2a8] sm:$0xf] %vm5124_vm1, %v5950_v57  ;;  %v4316_v6 = vmax.f32 %v4120_v27, 0.0  ;;  %v3919_v63 = vmax.f32 %v10821_v38, %v3506_v30 }
 0x443   : > { %v5953_v43 = vpack.c.bf16 %v4317_v21, %v4317_v21  ;;  %v4123_v23 = vadd.f32 %v9226_v53, %v3920_v56 }
 0x444   : > { %v5952_v52 = vpack.c.bf16 %v4316_v6, %v4316_v6  ;;  %v4122_v3 = vadd.f32 %v9226_v53, %v3919_v63  ;;  %v3512_v31 = vpop.permute.xlu1 %3511 }
 0x445   : > { %5298 = vst.msk [vmem:[%s7697_s27 + $0x2b4] sm:$0xf] %vm5124_vm1, %v5953_v43  ;;  %v4319_v22 = vmax.f32 %v4123_v23, 0.0  ;;  %v3510_v50 = vpop.permute.xlu0 %3509  ;;  %v3922_v59 = vmax.f32 %v9353_v45, %v3512_v31 }
 0x446   : > { %5297 = vst.msk [vmem:[%s7697_s27 + $0x2b0] sm:$0xf] %vm5124_vm1, %v5952_v52  ;;  %v4318_v4 = vmax.f32 %v4122_v3, 0.0  ;;  %v3921_v18 = vmax.f32 %v9358_v58, %v3510_v50 }
 0x447   : > { %v5955_v41 = vpack.c.bf16 %v4319_v22, %v4319_v22  ;;  %v4125_v62 = vadd.f32 %v9226_v53, %v3922_v59 }
 0x448   : > { %v5954_v49 = vpack.c.bf16 %v4318_v4, %v4318_v4  ;;  %v4124_v51 = vadd.f32 %v9226_v53, %v3921_v18  ;;  %v3516_v37 = vpop.permute.xlu1 %3515 }
 0x449   : > { %5300 = vst.msk [vmem:[%s7697_s27 + $0x2bc] sm:$0xf] %vm5124_vm1, %v5955_v41  ;;  %v4321_v42 = vmax.f32 %v4125_v62, 0.0  ;;  %v3514_v7 = vpop.permute.xlu0 %3513  ;;  %v3924_v45 = vmax.f32 %v9373_v46, %v3516_v37 }
 0x44a   : > { %5299 = vst.msk [vmem:[%s7697_s27 + $0x2b8] sm:$0xf] %vm5124_vm1, %v5954_v49  ;;  %v4320_v34 = vmax.f32 %v4124_v51, 0.0  ;;  %v3923_v58 = vmax.f32 %v9378_v60, %v3514_v7 }
 0x44b   : > { %v5957_v25 = vpack.c.bf16 %v4321_v42, %v4321_v42  ;;  %v4127_v9 = vadd.f32 %v9226_v53, %v3924_v45 }
 0x44c   : > { %v5956_v19 = vpack.c.bf16 %v4320_v34, %v4320_v34  ;;  %v4126_v2 = vadd.f32 %v9226_v53, %v3923_v58  ;;  %v3520_v48 = vpop.permute.xlu1 %3519 }
 0x44d   : > { %5302 = vst.msk [vmem:[%s7697_s27 + $0x2c4] sm:$0xf] %vm5124_vm1, %v5957_v25  ;;  %v4323_v32 = vmax.f32 %v4127_v9, 0.0  ;;  %v3518_v10 = vpop.permute.xlu0 %3517  ;;  %v3926_v46 = vmax.f32 %v9393_v8, %v3520_v48 }
 0x44e   : > { %5301 = vst.msk [vmem:[%s7697_s27 + $0x2c0] sm:$0xf] %vm5124_vm1, %v5956_v19  ;;  %v4322_v24 = vmax.f32 %v4126_v2, 0.0  ;;  %v3925_v60 = vmax.f32 %v10822_v33, %v3518_v10 }
 0x44f   : > { %v5959_v15 = vpack.c.bf16 %v4323_v32, %v4323_v32  ;;  %v4129_v53 = vadd.f32 %v9729_v16, %v3926_v46 }
 0x450   : > { %v5958_v26 = vpack.c.bf16 %v4322_v24, %v4322_v24  ;;  %v4128_v12 = vadd.f32 %v9729_v16, %v3925_v60  ;;  %v3524_v13 = vpop.permute.xlu1 %3523 }
 0x451   : > { %5304 = vst.msk [vmem:[%s7697_s27 + $0x2cc] sm:$0xf] %vm5124_vm1, %v5959_v15  ;;  %v4325_v8 = vmax.f32 %v4129_v53, 0.0  ;;  %v3522_v0 = vpop.permute.xlu0 %3521  ;;  %v3928_v35 = vmax.f32 %v10823_v14, %v3524_v13 }
 0x452   : > { %5303 = vst.msk [vmem:[%s7697_s27 + $0x2c8] sm:$0xf] %vm5124_vm1, %v5958_v26  ;;  %v4324_v1 = vmax.f32 %v4128_v12, 0.0  ;;  %v3927_v57 = vmax.f32 %v9418_v5, %v3522_v0 }
 0x453   : > { %v5961_v27 = vpack.c.bf16 %v4325_v8, %v4325_v8  ;;  %v4131_v44 = vadd.f32 %v9729_v16, %v3928_v35 }
 0x454   : > { %v5960_v21 = vpack.c.bf16 %v4324_v1, %v4324_v1  ;;  %v4130_v30 = vadd.f32 %v9729_v16, %v3927_v57  ;;  %v3528_v56 = vpop.permute.xlu1 %3527 }
 0x455   : > { %5306 = vst.msk [vmem:[%s7697_s27 + $0x2d4] sm:$0xf] %vm5124_vm1, %v5961_v27  ;;  %v4327_v6 = vmax.f32 %v4131_v44, 0.0  ;;  %v3526_v38 = vpop.permute.xlu0 %3525  ;;  %v3930_v63 = vmax.f32 %v9433_v39, %v3528_v56 }
 0x456   : > { %5305 = vst.msk [vmem:[%s7697_s27 + $0x2d0] sm:$0xf] %vm5124_vm1, %v5960_v21  ;;  %v4326_v43 = vmax.f32 %v4130_v30, 0.0  ;;  %v3929_v5 = vmax.f32 %v9438_v54, %v3526_v38 }
 0x457   : > { %v5963_v23 = vpack.c.bf16 %v4327_v6, %v4327_v6  ;;  %v4133_v52 = vadd.f32 %v9729_v16, %v3930_v63 }
 0x458   : > { %v5962_v3 = vpack.c.bf16 %v4326_v43, %v4326_v43  ;;  %v4132_v31 = vadd.f32 %v9729_v16, %v3929_v5  ;;  %v3532_v22 = vpop.permute.xlu1 %3531 }
 0x459   : > { %5308 = vst.msk [vmem:[%s7697_s27 + $0x2dc] sm:$0xf] %vm5124_vm1, %v5963_v23  ;;  %v4329_v50 = vmax.f32 %v4133_v52, 0.0  ;;  %v3530_v59 = vpop.permute.xlu0 %3529  ;;  %v3932_v39 = vmax.f32 %v9453_v40, %v3532_v22 }
 0x45a   : > { %5307 = vst.msk [vmem:[%s7697_s27 + $0x2d8] sm:$0xf] %vm5124_vm1, %v5962_v3  ;;  %v4328_v4 = vmax.f32 %v4132_v31, 0.0  ;;  %v3931_v54 = vmax.f32 %v9458_v29, %v3530_v59 }
 0x45b   : > { %v5965_v18 = vpack.c.bf16 %v4329_v50, %v4329_v50  ;;  %v4135_v41 = vadd.f32 %v9729_v16, %v3932_v39 }
 0x45c   : > { %v5964_v62 = vpack.c.bf16 %v4328_v4, %v4328_v4  ;;  %v4134_v49 = vadd.f32 %v9729_v16, %v3931_v54  ;;  %v3536_v51 = vpop.permute.xlu1 %3535 }
 0x45d   : > { %5310 = vst.msk [vmem:[%s7697_s27 + $0x2e4] sm:$0xf] %vm5124_vm1, %v5965_v18  ;;  %v4331_v37 = vmax.f32 %v4135_v41, 0.0  ;;  %v3534_v42 = vpop.permute.xlu0 %3533  ;;  %v3934_v40 = vmax.f32 %v9473_v55, %v3536_v51 }
 0x45e   : > { %5309 = vst.msk [vmem:[%s7697_s27 + $0x2e0] sm:$0xf] %vm5124_vm1, %v5964_v62  ;;  %v4330_v7 = vmax.f32 %v4134_v49, 0.0  ;;  %v3933_v29 = vmax.f32 %v9478_v17, %v3534_v42 }
 0x45f   : > { %v5967_v45 = vpack.c.bf16 %v4331_v37, %v4331_v37  ;;  %v4137_v34 = vadd.f32 %v9729_v16, %v3934_v40 }
 0x460   : > { %v5966_v58 = vpack.c.bf16 %v4330_v7, %v4330_v7  ;;  %v4136_v25 = vadd.f32 %v9729_v16, %v3933_v29  ;;  %v3540_v9 = vpop.permute.xlu1 %3539 }
 0x461   : > { %5312 = vst.msk [vmem:[%s7697_s27 + $0x2ec] sm:$0xf] %vm5124_vm1, %v5967_v45  ;;  %v4333_v19 = vmax.f32 %v4137_v34, 0.0  ;;  %v3538_v2 = vpop.permute.xlu0 %3537  ;;  %v3936_v55 = vmax.f32 %v9493_v20, %v3540_v9 }
 0x462   : > { %5311 = vst.msk [vmem:[%s7697_s27 + $0x2e8] sm:$0xf] %vm5124_vm1, %v5966_v58  ;;  %v4332_v48 = vmax.f32 %v4136_v25, 0.0  ;;  %v3935_v17 = vmax.f32 %v9498_v28, %v3538_v2 }
 0x463   : > { %v5969_v32 = vpack.c.bf16 %v4333_v19, %v4333_v19  ;;  %v4139_v10 = vadd.f32 %v9729_v16, %v3936_v55 }
 0x464   : > { %v5968_v46 = vpack.c.bf16 %v4332_v48, %v4332_v48  ;;  %v4138_v24 = vadd.f32 %v9729_v16, %v3935_v17  ;;  %v3544_v33 = vpop.permute.xlu1 %3543 }
 0x465   : > { %5314 = vst.msk [vmem:[%s7697_s27 + $0x2f4] sm:$0xf] %vm5124_vm1, %v5969_v32  ;;  %v4335_v60 = vmax.f32 %v4139_v10, 0.0  ;;  %v3542_v15 = vpop.permute.xlu0 %3541  ;;  %v3938_v20 = vmax.f32 %v9513_v61, %v3544_v33 }
 0x466   : > { %5313 = vst.msk [vmem:[%s7697_s27 + $0x2f0] sm:$0xf] %vm5124_vm1, %v5968_v46  ;;  %v4334_v53 = vmax.f32 %v4138_v24, 0.0  ;;  %v3937_v28 = vmax.f32 %v9518_v36, %v3542_v15 }
 0x467   : > { %v5971_v26 = vpack.c.bf16 %v4335_v60, %v4335_v60  ;;  %v4141_v12 = vadd.f32 %v9729_v16, %v3938_v20 }
 0x468   : > { %v5970_v13 = vpack.c.bf16 %v4334_v53, %v4334_v53  ;;  %v4140_v8 = vadd.f32 %v9729_v16, %v3937_v28  ;;  %v3548_v0 = vpop.permute.xlu1 %3547 }
 0x469   : > { %5316 = vst.msk [vmem:[%s7697_s27 + $0x2fc] sm:$0xf] %vm5124_vm1, %v5971_v26  ;;  %v4337_v14 = vmax.f32 %v4141_v12, 0.0  ;;  %v3546_v35 = vpop.permute.xlu0 %3545  ;;  %v3940_v61 = vmax.f32 %v9533_v11, %v3548_v0 }
 0x46a   : > { %5315 = vst.msk [vmem:[%s7697_s27 + $0x2f8] sm:$0xf] %vm5124_vm1, %v5970_v13  ;;  %v4336_v36 = vmax.f32 %v4140_v8, 0.0  ;;  %v3939_v1 = vmax.f32 %v9538_v47, %v3546_v35 }
 0x46b   : > { %v5973_v57 = vpack.c.bf16 %v4337_v14, %v4337_v14  ;;  %v4143_v27 = vadd.f32 %v9729_v16, %v3940_v61 }
 0x46c   : > { %v5972_v44 = vpack.c.bf16 %v4336_v36, %v4336_v36  ;;  %v4142_v21 = vadd.f32 %v9729_v16, %v3939_v1 }
 0x46d   : > { %5318 = vst.msk [vmem:[%s7697_s27 + $0x304] sm:$0xf] %vm5124_vm1, %v5973_v57  ;;  %v4339_v30 = vmax.f32 %v4143_v27, 0.0 }
 0x46e   : > { %5317 = vst.msk [vmem:[%s7697_s27 + $0x300] sm:$0xf] %vm5124_vm1, %v5972_v44  ;;  %v4338_v56 = vmax.f32 %v4142_v21, 0.0 }
 0x46f   : > { %v5975_v6 = vpack.c.bf16 %v4339_v30, %v4339_v30 }
 0x470   : > { %v5974_v38 = vpack.c.bf16 %v4338_v56, %v4338_v56 }
 0x471   : > { %5320 = vst.msk [vmem:[%s7697_s27 + $0x30c] sm:$0xf] %vm5124_vm1, %v5975_v6 }
 0x472   : > { %5319 = vst.msk [vmem:[%s7697_s27 + $0x308] sm:$0xf] %vm5124_vm1, %v5974_v38 }
 0x473 PF: > { %s13_s12 = sadd.s32 1, %s6393_s12  }
 0x474   : > { %p10_p4 = scmp.ge.s32.totalorder %s13_s12, 4  }
 0x476   :  { %12 = sbr.rel (!%p10_p4) target bundleno = 1 (0x1), region = 62 }

// kernel: simple_cnn_forward.4
= control target key start
LH: loop header
LB: loop body
LE: loop exit
PB: predicated region body
PF: predicated region fallthrough
CT: control target
= control target key end

     0   :  { %s2072_s12 = smov 0   ;;  %s2868_s0 = inlined_call_operand.vmem [shape: bf16[784,256], index: 0, kind: input, shape index: {}]   ;;  %s2869_s1 = inlined_call_operand.vmem [shape: bf16[256,128], index: 1, kind: input, shape index: {}]   ;;  %s2870_s2 = inlined_call_operand.vmem [shape: f32[1,32], index: 2, kind: input, shape index: {}]   ;;  %s2871_s3 = inlined_call_operand.vmem [shape: bf16[784,32], index: 3, kind: output, shape index: {}]  }
   0x1 LB: > { %s1732_s13 = sadd.s32 4294967295, %s2047_s12   ;;  %p1736_p0 = scmp.ge.s32.totalorder %s2047_s12, 1  ;;  %s2047_s12 = sphi %s2072_s12, %s13_s12  }
   0x2   : > { %p139_p1 = scmp.lt.s32.totalorder %s2047_s12, 3 }
   0x4   : > { %p140_p2 = pnand %p1736_p0, %p139_p1 }
   0x5   : > { %v1951_v0 = vld [vmem:[%s2869_s1] sm:$0xff] (!%p140_p2)   ;;  %v2049_v1 = vmov (!%p140_p2), 0   ;;  %s164_s16 = smul.u32 (!%p140_p2), 49, %s1732_s13  ;;  %v1952_v2 = vld [vmem:[%s2869_s1 + $0x8] sm:$0xff] (!%p140_p2)   ;;  %v1953_v3 = vld [vmem:[%s2869_s1 + $0x10] sm:$0xff] (!%p140_p2)   ;;  %s2050_s26 = smov (!%p140_p2), 96  }
   0x6   : > { %143 = sbr.rel (%p140_p2) target bundleno = 625 (0x271), region = 32  ;;  %602 = vmatprep.subr.bf16.mxu0 (!%p140_p2), %v2049_v1  ;;  %1908 = vmatprep.subr.bf16.mxu1 (!%p140_p2), %v2049_v1  ;;  %v1954_v4 = vld [vmem:[%s2869_s1 + $0x18] sm:$0xff] (!%p140_p2)   ;;  %v1955_v5 = vld [vmem:[%s2869_s1 + $0x20] sm:$0xff] (!%p140_p2)   ;;  %v1956_v7 = vld [vmem:[%s2869_s1 + $0x28] sm:$0xff] (!%p140_p2)   ;;  %s2051_s27 = smov (!%p140_p2), 64   ;;  %vm1626_vm0 = vcmask (!%p140_p2), 257024  }
   0x7   : > { %603 = vmatpush1.bf16.msra.mxu0 (!%p140_p2), %v1951_v0  ;;  %1924 = vmatpush1.bf16.msra.mxu1 (!%p140_p2), %v1951_v0  ;;  %p165_p3 = scmp.lt.s32.totalorder (!%p140_p2), %s164_s16, 97  ;;  %v1957_v9 = vld [vmem:[%s2869_s1 + $0x30] sm:$0xff] (!%p140_p2)   ;;  %v1958_v10 = vld [vmem:[%s2869_s1 + $0x38] sm:$0xff] (!%p140_p2)   ;;  %v1959_v11 = vld [vmem:[%s2869_s1 + $0x40] sm:$0xff] (!%p140_p2)  }
   0x8   : > { %604 = vmatprep.subr.bf16.mxu0 (!%p140_p2), %v2049_v1  ;;  %1909 = vmatprep.subr.bf16.mxu1 (!%p140_p2), %v2049_v1  ;;  %v1960_v12 = vld [vmem:[%s2869_s1 + $0x48] sm:$0xff] (!%p140_p2)   ;;  %v1961_v13 = vld [vmem:[%s2869_s1 + $0x50] sm:$0xff] (!%p140_p2)   ;;  %v1962_v14 = vld [vmem:[%s2869_s1 + $0x58] sm:$0xff] (!%p140_p2)  }
   0x9   : > { %v1963_v15 = vld [vmem:[%s2869_s1 + $0x60] sm:$0xff] (!%p140_p2)   ;;  %v1964_v16 = vld [vmem:[%s2869_s1 + $0x68] sm:$0xff] (!%p140_p2)   ;;  %v1965_v17 = vld [vmem:[%s2869_s1 + $0x70] sm:$0xff] (!%p140_p2)  }
   0xa   : > { %v1966_v18 = vld [vmem:[%s2869_s1 + $0x78] sm:$0xff] (!%p140_p2)  }
   0xb   : > { %605 = vmatpush1.bf16.msra.mxu0 (!%p140_p2), %v1952_v2  ;;  %1925 = vmatpush1.bf16.msra.mxu1 (!%p140_p2), %v1952_v2 }
   0xc   : > { %606 = vmatprep.subr.bf16.mxu0 (!%p140_p2), %v2049_v1  ;;  %1910 = vmatprep.subr.bf16.mxu1 (!%p140_p2), %v2049_v1 }
   0xd   : > { %s2873_s16 = smov (!%p165_p3, %s164_s16), 97 }
   0xe   : > { %s1858_s23 = sshll.u32 %s2873_s16, 3  ;;  %s1739_s30 = sshll.u32 %s2873_s16, 2 }
   0xf   : > { %607 = vmatpush1.bf16.msra.mxu0 %v1953_v3  ;;  %1926 = vmatpush1.bf16.msra.mxu1 %v1953_v3  ;;  %s2109_s28 = scalar_lea.vmem %s2868_s0, %s1858_s23  ;;  %s2670_s6 = scalar_lea.vmem %s2871_s3, %s1739_s30 }
  0x10   : > { %608 = vmatprep.subr.bf16.mxu0 %v2049_v1  ;;  %1911 = vmatprep.subr.bf16.mxu1 %v2049_v1  ;;  %v1969_v6 = vld [vmem:[%s2109_s28 + $0x4] ss:$8 sps:$4 sm:$0xff]   ;;  %v1972_v8 = vld [vmem:[%s2109_s28 + $0xd4] ss:$8 sps:$4 sm:$0xff]   ;;  %v1967_v19 = vld [vmem:[%s2109_s28] ss:$8 sps:$4 sm:$0xff]  }
  0x11   : > { %634 = vmatprep.mubr.bf16.mxu0 %v1969_v6  ;;  %738 = vmatprep.mubr.bf16.mxu1 %v1972_v8  ;;  %v1970_v20 = vld [vmem:[%s2109_s28 + $0xd0] ss:$8 sps:$4 sm:$0xff]   ;;  %v1973_v21 = vld [vmem:[%s2109_s28 + $0x14] ss:$8 sps:$4 sm:$0xff]   ;;  %v1976_v22 = vld [vmem:[%s2109_s28 + $0xe4] ss:$8 sps:$4 sm:$0xff]  }
  0x12   : > { %v1975_v23 = vld [vmem:[%s2109_s28 + $0x10] ss:$8 sps:$4 sm:$0xff]   ;;  %v1978_v24 = vld [vmem:[%s2109_s28 + $0xe0] ss:$8 sps:$4 sm:$0xff]   ;;  %v1979_v25 = vld [vmem:[%s2109_s28 + $0x24] ss:$8 sps:$4 sm:$0xff]  }
  0x13   : > { %609 = vmatpush1.bf16.msra.mxu0 %v1954_v4  ;;  %1927 = vmatpush1.bf16.msra.mxu1 %v1954_v4  ;;  %v1982_v26 = vld [vmem:[%s2109_s28 + $0xf4] ss:$8 sps:$4 sm:$0xff]   ;;  %v1981_v27 = vld [vmem:[%s2109_s28 + $0x20] ss:$8 sps:$4 sm:$0xff]   ;;  %v1984_v28 = vld [vmem:[%s2109_s28 + $0xf0] ss:$8 sps:$4 sm:$0xff]  }
  0x14   : > { %610 = vmatprep.subr.bf16.mxu0 %v2049_v1  ;;  %1912 = vmatprep.subr.bf16.mxu1 %v2049_v1  ;;  %v1985_v29 = vld [vmem:[%s2109_s28 + $0x34] ss:$8 sps:$4 sm:$0xff]   ;;  %v1988_v30 = vld [vmem:[%s2109_s28 + $0x104] ss:$8 sps:$4 sm:$0xff]   ;;  %v1987_v31 = vld [vmem:[%s2109_s28 + $0x30] ss:$8 sps:$4 sm:$0xff]  }
  0x15   : > { %v1990_v32 = vld [vmem:[%s2109_s28 + $0x100] ss:$8 sps:$4 sm:$0xff]   ;;  %v1991_v33 = vld [vmem:[%s2109_s28 + $0x44] ss:$8 sps:$4 sm:$0xff]   ;;  %v1994_v34 = vld [vmem:[%s2109_s28 + $0x114] ss:$8 sps:$4 sm:$0xff]  }
  0x16   : > { %v1993_v35 = vld [vmem:[%s2109_s28 + $0x40] ss:$8 sps:$4 sm:$0xff]   ;;  %v1996_v36 = vld [vmem:[%s2109_s28 + $0x110] ss:$8 sps:$4 sm:$0xff]   ;;  %v1997_v37 = vld [vmem:[%s2109_s28 + $0x54] ss:$8 sps:$4 sm:$0xff]  }
  0x17   : > { %611 = vmatpush1.bf16.msra.mxu0 %v1955_v5  ;;  %1928 = vmatpush1.bf16.msra.mxu1 %v1955_v5  ;;  %v2000_v38 = vld [vmem:[%s2109_s28 + $0x124] ss:$8 sps:$4 sm:$0xff]   ;;  %v1999_v39 = vld [vmem:[%s2109_s28 + $0x50] ss:$8 sps:$4 sm:$0xff]   ;;  %v2002_v40 = vld [vmem:[%s2109_s28 + $0x120] ss:$8 sps:$4 sm:$0xff]  }
  0x18   : > { %612 = vmatprep.subr.bf16.mxu0 %v2049_v1  ;;  %1913 = vmatprep.subr.bf16.mxu1 %v2049_v1  ;;  %v2003_v41 = vld [vmem:[%s2109_s28 + $0x64] ss:$8 sps:$4 sm:$0xff]   ;;  %v2006_v42 = vld [vmem:[%s2109_s28 + $0x134] ss:$8 sps:$4 sm:$0xff]   ;;  %v2005_v43 = vld [vmem:[%s2109_s28 + $0x60] ss:$8 sps:$4 sm:$0xff]  }
  0x19   : > { %v2008_v44 = vld [vmem:[%s2109_s28 + $0x130] ss:$8 sps:$4 sm:$0xff]   ;;  %v2009_v45 = vld [vmem:[%s2109_s28 + $0x74] ss:$8 sps:$4 sm:$0xff]   ;;  %v2012_v46 = vld [vmem:[%s2109_s28 + $0x144] ss:$8 sps:$4 sm:$0xff]  }
  0x1a   : > { %v2011_v47 = vld [vmem:[%s2109_s28 + $0x70] ss:$8 sps:$4 sm:$0xff]   ;;  %v2014_v48 = vld [vmem:[%s2109_s28 + $0x140] ss:$8 sps:$4 sm:$0xff]   ;;  %v2015_v49 = vld [vmem:[%s2109_s28 + $0x84] ss:$8 sps:$4 sm:$0xff]  }
  0x1b   : > { %613 = vmatpush1.bf16.msra.mxu0 %v1956_v7  ;;  %1929 = vmatpush1.bf16.msra.mxu1 %v1956_v7  ;;  %v2018_v50 = vld [vmem:[%s2109_s28 + $0x154] ss:$8 sps:$4 sm:$0xff]   ;;  %v2017_v51 = vld [vmem:[%s2109_s28 + $0x80] ss:$8 sps:$4 sm:$0xff]   ;;  %v2020_v52 = vld [vmem:[%s2109_s28 + $0x150] ss:$8 sps:$4 sm:$0xff]  }
  0x1c   : > { %614 = vmatprep.subr.bf16.mxu0 %v2049_v1  ;;  %1914 = vmatprep.subr.bf16.mxu1 %v2049_v1  ;;  %v2021_v53 = vld [vmem:[%s2109_s28 + $0x94] ss:$8 sps:$4 sm:$0xff]   ;;  %v2024_v54 = vld [vmem:[%s2109_s28 + $0x164] ss:$8 sps:$4 sm:$0xff]   ;;  %v2023_v55 = vld [vmem:[%s2109_s28 + $0x90] ss:$8 sps:$4 sm:$0xff]  }
  0x1d   : > { %v2026_v56 = vld [vmem:[%s2109_s28 + $0x160] ss:$8 sps:$4 sm:$0xff]   ;;  %v2027_v57 = vld [vmem:[%s2109_s28 + $0xa4] ss:$8 sps:$4 sm:$0xff]   ;;  %v2030_v58 = vld [vmem:[%s2109_s28 + $0x174] ss:$8 sps:$4 sm:$0xff]  }
  0x1e   : > { %v226_v59 = vld [vmem:[%s2109_s28 + $0x180] sm:$0xff]  ;;  %v2032_v61 = vld [vmem:[%s2109_s28 + $0x170] ss:$8 sps:$4 sm:$0xff]   ;;  %v2033_v62 = vld [vmem:[%s2109_s28 + $0xb4] ss:$8 sps:$4 sm:$0xff]  }
  0x1f   : > { %615 = vmatpush1.bf16.msra.mxu0 %v1957_v9  ;;  %1930 = vmatpush1.bf16.msra.mxu1 %v1957_v9  ;;  %v2029_v60 = vld [vmem:[%s2109_s28 + $0xa0] ss:$8 sps:$4 sm:$0xff]   ;;  %v1789_v63 = vcombine.high %v226_v59, %v226_v59  ;;  %v2035_v0 = vld [vmem:[%s2109_s28 + $0xb0] ss:$8 sps:$4 sm:$0xff]   ;;  %v2038_v2 = vld [vmem:[%s2109_s28 + $0xc4] ss:$8 sps:$4 sm:$0xff]  }
  0x20   : > { %616 = vmatprep.subr.bf16.mxu0 %v2049_v1  ;;  %1915 = vmatprep.subr.bf16.mxu1 %v2049_v1  ;;  %v2040_v3 = vld [vmem:[%s2109_s28 + $0xc0] ss:$8 sps:$4 sm:$0xff]  }
  0x23   : > { %617 = vmatpush1.bf16.msra.mxu0 %v1958_v10  ;;  %1931 = vmatpush1.bf16.msra.mxu1 %v1958_v10 }
  0x24   : > { %618 = vmatprep.subr.bf16.mxu0 %v2049_v1  ;;  %1916 = vmatprep.subr.bf16.mxu1 %v2049_v1 }
  0x27   : > { %619 = vmatpush1.bf16.msra.mxu0 %v1959_v11  ;;  %1932 = vmatpush1.bf16.msra.mxu1 %v1959_v11 }
  0x28   : > { %620 = vmatprep.subr.bf16.mxu0 %v2049_v1  ;;  %1917 = vmatprep.subr.bf16.mxu1 %v2049_v1 }
  0x2b   : > { %621 = vmatpush1.bf16.msra.mxu0 %v1960_v12  ;;  %1933 = vmatpush1.bf16.msra.mxu1 %v1960_v12 }
  0x2c   : > { %622 = vmatprep.subr.bf16.mxu0 %v2049_v1  ;;  %1918 = vmatprep.subr.bf16.mxu1 %v2049_v1 }
  0x2f   : > { %623 = vmatpush1.bf16.msra.mxu0 %v1961_v13  ;;  %1934 = vmatpush1.bf16.msra.mxu1 %v1961_v13 }
  0x30   : > { %624 = vmatprep.subr.bf16.mxu0 %v2049_v1  ;;  %1919 = vmatprep.subr.bf16.mxu1 %v2049_v1 }
  0x33   : > { %625 = vmatpush1.bf16.msra.mxu0 %v1962_v14  ;;  %1935 = vmatpush1.bf16.msra.mxu1 %v1962_v14 }
  0x34   : > { %626 = vmatprep.subr.bf16.mxu0 %v2049_v1  ;;  %1920 = vmatprep.subr.bf16.mxu1 %v2049_v1 }
  0x37   : > { %627 = vmatpush1.bf16.msra.mxu0 %v1963_v15  ;;  %1936 = vmatpush1.bf16.msra.mxu1 %v1963_v15 }
  0x38   : > { %628 = vmatprep.subr.bf16.mxu0 %v2049_v1  ;;  %1921 = vmatprep.subr.bf16.mxu1 %v2049_v1 }
  0x3b   : > { %629 = vmatpush1.bf16.msra.mxu0 %v1964_v16  ;;  %1937 = vmatpush1.bf16.msra.mxu1 %v1964_v16 }
  0x3c   : > { %630 = vmatprep.subr.bf16.mxu0 %v2049_v1  ;;  %1922 = vmatprep.subr.bf16.mxu1 %v2049_v1 }
  0x3f   : > { %631 = vmatpush1.bf16.msra.mxu0 %v1965_v17  ;;  %1938 = vmatpush1.bf16.msra.mxu1 %v1965_v17 }
  0x40   : > { %632 = vmatprep.subr.bf16.mxu0 %v2049_v1  ;;  %1923 = vmatprep.subr.bf16.mxu1 %v2049_v1  ;;  %v1788_v1 = vcombine.low %v226_v59, %v226_v59 }
  0x43   : > { %633 = vmatpush1.bf16.msra.mxu0 %v1966_v18  ;;  %1939 = vmatpush1.bf16.msra.mxu1 %v1966_v18 }
  0x46   : > { %635 = vmatmul.mubr.bf16.vlgmr.msra.gmra.mrb[0].mxu0 %v1967_v19  ;;  %739 = vmatmul.mubr.bf16.vlgmr.msra.gmra.mrb[0].mxu1 %v1970_v20 }
  0x47   : > { %642 = vmatprep.mubr.bf16.mxu0 %v1973_v21  ;;  %746 = vmatprep.mubr.bf16.mxu1 %v1976_v22 }
  0x4e   : > { %643 = vmatmul.mubr.bf16.gmra.mrb[4].mxu0 %v1975_v23  ;;  %747 = vmatmul.mubr.bf16.gmra.mrb[4].mxu1 %v1978_v24 }
  0x4f   : > { %650 = vmatprep.mubr.bf16.mxu0 %v1979_v25  ;;  %754 = vmatprep.mubr.bf16.mxu1 %v1982_v26 }
  0x56   : > { %651 = vmatmul.mubr.bf16.gmra.mrb[8].mxu0 %v1981_v27  ;;  %755 = vmatmul.mubr.bf16.gmra.mrb[8].mxu1 %v1984_v28 }
  0x57   : > { %658 = vmatprep.mubr.bf16.mxu0 %v1985_v29  ;;  %762 = vmatprep.mubr.bf16.mxu1 %v1988_v30 }
  0x5e   : > { %659 = vmatmul.mubr.bf16.gmra.mrb[12].mxu0 %v1987_v31  ;;  %763 = vmatmul.mubr.bf16.gmra.mrb[12].mxu1 %v1990_v32 }
  0x5f   : > { %666 = vmatprep.mubr.bf16.mxu0 %v1991_v33  ;;  %770 = vmatprep.mubr.bf16.mxu1 %v1994_v34 }
  0x66   : > { %667 = vmatmul.mubr.bf16.gmra.mrb[16].mxu0 %v1993_v35  ;;  %771 = vmatmul.mubr.bf16.gmra.mrb[16].mxu1 %v1996_v36 }
  0x67   : > { %674 = vmatprep.mubr.bf16.mxu0 %v1997_v37  ;;  %778 = vmatprep.mubr.bf16.mxu1 %v2000_v38 }
  0x6e   : > { %675 = vmatmul.mubr.bf16.gmra.mrb[20].mxu0 %v1999_v39  ;;  %779 = vmatmul.mubr.bf16.gmra.mrb[20].mxu1 %v2002_v40 }
  0x6f   : > { %682 = vmatprep.mubr.bf16.mxu0 %v2003_v41  ;;  %786 = vmatprep.mubr.bf16.mxu1 %v2006_v42 }
  0x76   : > { %683 = vmatmul.mubr.bf16.gmra.mrb[24].mxu0 %v2005_v43  ;;  %787 = vmatmul.mubr.bf16.gmra.mrb[24].mxu1 %v2008_v44 }
  0x77   : > { %690 = vmatprep.mubr.bf16.mxu0 %v2009_v45  ;;  %794 = vmatprep.mubr.bf16.mxu1 %v2012_v46 }
  0x7e   : > { %691 = vmatmul.mubr.bf16.gmra.mrb[28].mxu0 %v2011_v47  ;;  %795 = vmatmul.mubr.bf16.gmra.mrb[28].mxu1 %v2014_v48 }
  0x7f   : > { %698 = vmatprep.mubr.bf16.mxu0 %v2015_v49  ;;  %802 = vmatprep.mubr.bf16.mxu1 %v2018_v50 }
  0x86   : > { %699 = vmatmul.mubr.bf16.gmra.mrb[32].mxu0 %v2017_v51  ;;  %803 = vmatmul.mubr.bf16.gmra.mrb[32].mxu1 %v2020_v52 }
  0x87   : > { %706 = vmatprep.mubr.bf16.mxu0 %v2021_v53  ;;  %810 = vmatprep.mubr.bf16.mxu1 %v2024_v54 }
  0x8e   : > { %707 = vmatmul.mubr.bf16.gmra.mrb[36].mxu0 %v2023_v55  ;;  %811 = vmatmul.mubr.bf16.gmra.mrb[36].mxu1 %v2026_v56 }
  0x8f   : > { %714 = vmatprep.mubr.bf16.mxu0 %v2027_v57  ;;  %818 = vmatprep.mubr.bf16.mxu1 %v2030_v58 }
  0x96   : > { %715 = vmatmul.mubr.bf16.gmra.mrb[40].mxu0 %v2029_v60  ;;  %819 = vmatmul.mubr.bf16.gmra.mrb[40].mxu1 %v2032_v61 }
  0x97   : > { %722 = vmatprep.mubr.bf16.mxu0 %v2033_v62  ;;  %826 = vmatprep.mubr.bf16.mxu1 %v1789_v63 }
  0x9e   : > { %723 = vmatmul.mubr.bf16.gmra.mrb[44].mxu0 %v2035_v0  ;;  %827 = vmatmul.mubr.bf16.gmra.mrb[44].mxu1 %v1788_v1 }
  0x9f   : > { %730 = vmatprep.mubr.bf16.mxu0 %v2038_v2 }
  0xa6   : > { %731 = vmatmul.mubr.bf16.gmra.mrb[48].mxu0 %v2040_v3 }
 0x119   : > { %v2217_v4 = vpop.f32.mrb[0].mxu0  ;;  %v2219_v5 = vpop.f32.mrb[0].mxu1 }
 0x11a   : > { %v742_v6 = vpop.f32.mrb[1].mxu1  ;;  %883 = vrot.lane.b32.xlu0 %v2217_v4, %s2050_s26  ;;  %v638_v7 = vpop.f32.mrb[1].mxu0 }
 0x11b   : > { %v2223_v8 = vpop.f32.mrb[2].mxu0  ;;  %v2225_v9 = vpop.f32.mrb[2].mxu1 }
 0x11c   : > { %937 = vrot.lane.b32.xlu1 %v2225_v9, %s2050_s26  ;;  %v641_v10 = vpop.f32.mrb[3].mxu0  ;;  %v745_v11 = vpop.f32.mrb[3].mxu1 }
 0x11e   : > { %935 = vrot.lane.b32.xlu0 %v2219_v5, %s2050_s26 }
 0x121   : > { %v2231_v12 = vpop.f32.mrb[4].mxu0  ;;  %v2233_v13 = vpop.f32.mrb[4].mxu1 }
 0x122   : > { %885 = vrot.lane.b32.xlu0 %v2223_v8, %s2050_s26  ;;  %887 = vrot.lane.b32.xlu1 %v2231_v12, %s2050_s26  ;;  %v646_v14 = vpop.f32.mrb[5].mxu0  ;;  %v750_v15 = vpop.f32.mrb[5].mxu1 }
 0x123   : > { %v2239_v16 = vpop.f32.mrb[6].mxu0  ;;  %v2241_v17 = vpop.f32.mrb[6].mxu1 }
 0x124   : > { %v649_v18 = vpop.f32.mrb[7].mxu0  ;;  %v753_v19 = vpop.f32.mrb[7].mxu1 }
 0x126   : > { %939 = vrot.lane.b32.xlu0 %v2233_v13, %s2050_s26  ;;  %889 = vrot.lane.b32.xlu1 %v2239_v16, %s2050_s26 }
 0x129   : > { %v2247_v20 = vpop.f32.mrb[8].mxu0  ;;  %v2249_v21 = vpop.f32.mrb[8].mxu1 }
 0x12a   : > { %941 = vrot.lane.b32.xlu1 %v2241_v17, %s2050_s26  ;;  %891 = vrot.lane.b32.xlu0 %v2247_v20, %s2050_s26  ;;  %v654_v22 = vpop.f32.mrb[9].mxu0  ;;  %v758_v23 = vpop.f32.mrb[9].mxu1 }
 0x12b   : > { %v2255_v24 = vpop.f32.mrb[10].mxu0  ;;  %v2257_v25 = vpop.f32.mrb[10].mxu1 }
 0x12c   : > { %v657_v26 = vpop.f32.mrb[11].mxu0  ;;  %v761_v27 = vpop.f32.mrb[11].mxu1 }
 0x12e   : > { %943 = vrot.lane.b32.xlu0 %v2249_v21, %s2050_s26  ;;  %893 = vrot.lane.b32.xlu1 %v2255_v24, %s2050_s26 }
 0x131   : > { %v2263_v28 = vpop.f32.mrb[12].mxu0  ;;  %v2265_v29 = vpop.f32.mrb[12].mxu1 }
 0x132   : > { %945 = vrot.lane.b32.xlu1 %v2257_v25, %s2050_s26  ;;  %895 = vrot.lane.b32.xlu0 %v2263_v28, %s2050_s26  ;;  %v662_v30 = vpop.f32.mrb[13].mxu0  ;;  %v766_v31 = vpop.f32.mrb[13].mxu1 }
 0x133   : > { %v2271_v32 = vpop.f32.mrb[14].mxu0  ;;  %v2273_v33 = vpop.f32.mrb[14].mxu1 }
 0x134   : > { %v665_v34 = vpop.f32.mrb[15].mxu0  ;;  %v769_v35 = vpop.f32.mrb[15].mxu1 }
 0x136   : > { %947 = vrot.lane.b32.xlu0 %v2265_v29, %s2050_s26  ;;  %897 = vrot.lane.b32.xlu1 %v2271_v32, %s2050_s26 }
 0x139   : > { %v2279_v36 = vpop.f32.mrb[16].mxu0  ;;  %v2281_v37 = vpop.f32.mrb[16].mxu1 }
 0x13a   : > { %949 = vrot.lane.b32.xlu1 %v2273_v33, %s2050_s26  ;;  %899 = vrot.lane.b32.xlu0 %v2279_v36, %s2050_s26  ;;  %v670_v38 = vpop.f32.mrb[17].mxu0  ;;  %v774_v39 = vpop.f32.mrb[17].mxu1 }
 0x13b   : > { %v2287_v40 = vpop.f32.mrb[18].mxu0  ;;  %v2289_v41 = vpop.f32.mrb[18].mxu1 }
 0x13c   : > { %v673_v42 = vpop.f32.mrb[19].mxu0  ;;  %v777_v43 = vpop.f32.mrb[19].mxu1 }
 0x13e   : > { %951 = vrot.lane.b32.xlu0 %v2281_v37, %s2050_s26  ;;  %901 = vrot.lane.b32.xlu1 %v2287_v40, %s2050_s26 }
 0x141   : > { %v2295_v44 = vpop.f32.mrb[20].mxu0  ;;  %v2297_v45 = vpop.f32.mrb[20].mxu1 }
 0x142   : > { %953 = vrot.lane.b32.xlu1 %v2289_v41, %s2050_s26  ;;  %903 = vrot.lane.b32.xlu0 %v2295_v44, %s2050_s26  ;;  %v678_v46 = vpop.f32.mrb[21].mxu0  ;;  %v782_v47 = vpop.f32.mrb[21].mxu1 }
 0x143   : > { %v2303_v48 = vpop.f32.mrb[22].mxu0  ;;  %v2305_v49 = vpop.f32.mrb[22].mxu1 }
 0x144   : > { %v681_v50 = vpop.f32.mrb[23].mxu0  ;;  %v785_v51 = vpop.f32.mrb[23].mxu1 }
 0x146   : > { %955 = vrot.lane.b32.xlu0 %v2297_v45, %s2050_s26  ;;  %905 = vrot.lane.b32.xlu1 %v2303_v48, %s2050_s26 }
 0x149   : > { %v2311_v52 = vpop.f32.mrb[24].mxu0  ;;  %v2313_v53 = vpop.f32.mrb[24].mxu1 }
 0x14a   : > { %957 = vrot.lane.b32.xlu1 %v2305_v49, %s2050_s26  ;;  %907 = vrot.lane.b32.xlu0 %v2311_v52, %s2050_s26  ;;  %v686_v54 = vpop.f32.mrb[25].mxu0  ;;  %v790_v55 = vpop.f32.mrb[25].mxu1 }
 0x14b   : > { %v2319_v56 = vpop.f32.mrb[26].mxu0  ;;  %v2321_v57 = vpop.f32.mrb[26].mxu1 }
 0x14c   : > { %v689_v58 = vpop.f32.mrb[27].mxu0  ;;  %v793_v59 = vpop.f32.mrb[27].mxu1 }
 0x14e   : > { %959 = vrot.lane.b32.xlu0 %v2313_v53, %s2050_s26  ;;  %909 = vrot.lane.b32.xlu1 %v2319_v56, %s2050_s26 }
 0x151   : > { %v2327_v60 = vpop.f32.mrb[28].mxu0  ;;  %v2329_v61 = vpop.f32.mrb[28].mxu1 }
 0x152   : > { %961 = vrot.lane.b32.xlu1 %v2321_v57, %s2050_s26  ;;  %911 = vrot.lane.b32.xlu0 %v2327_v60, %s2050_s26  ;;  %v694_v62 = vpop.f32.mrb[29].mxu0  ;;  %v798_v63 = vpop.f32.mrb[29].mxu1 }
 0x153   : > { %v2335_v0 = vpop.f32.mrb[30].mxu0  ;;  %v2337_v1 = vpop.f32.mrb[30].mxu1 }
 0x154   : > { %v697_v2 = vpop.f32.mrb[31].mxu0  ;;  %v801_v3 = vpop.f32.mrb[31].mxu1 }
 0x156   : > { %963 = vrot.lane.b32.xlu0 %v2329_v61, %s2050_s26  ;;  %913 = vrot.lane.b32.xlu1 %v2335_v0, %s2050_s26 }
 0x159   : > { %v2343_v6 = vpop.f32.mrb[32].mxu0  ;;  %v2345_v7 = vpop.f32.mrb[32].mxu1 }
 0x15a   : > { %965 = vrot.lane.b32.xlu1 %v2337_v1, %s2050_s26  ;;  %915 = vrot.lane.b32.xlu0 %v2343_v6, %s2050_s26  ;;  %v702_v10 = vpop.f32.mrb[33].mxu0  ;;  %v806_v11 = vpop.f32.mrb[33].mxu1 }
 0x15b   : > { %v2351_v14 = vpop.f32.mrb[34].mxu0  ;;  %v2353_v15 = vpop.f32.mrb[34].mxu1 }
 0x15c   : > { %v705_v18 = vpop.f32.mrb[35].mxu0  ;;  %v809_v19 = vpop.f32.mrb[35].mxu1 }
 0x15e   : > { %967 = vrot.lane.b32.xlu0 %v2345_v7, %s2050_s26  ;;  %917 = vrot.lane.b32.xlu1 %v2351_v14, %s2050_s26 }
 0x161   : > { %v2359_v22 = vpop.f32.mrb[36].mxu0  ;;  %v2361_v23 = vpop.f32.mrb[36].mxu1 }
 0x162   : > { %969 = vrot.lane.b32.xlu1 %v2353_v15, %s2050_s26  ;;  %919 = vrot.lane.b32.xlu0 %v2359_v22, %s2050_s26  ;;  %v710_v26 = vpop.f32.mrb[37].mxu0  ;;  %v814_v27 = vpop.f32.mrb[37].mxu1 }
 0x163   : > { %v2367_v30 = vpop.f32.mrb[38].mxu0  ;;  %v2369_v31 = vpop.f32.mrb[38].mxu1 }
 0x164   : > { %v713_v34 = vpop.f32.mrb[39].mxu0  ;;  %v817_v35 = vpop.f32.mrb[39].mxu1 }
 0x166   : > { %971 = vrot.lane.b32.xlu0 %v2361_v23, %s2050_s26  ;;  %921 = vrot.lane.b32.xlu1 %v2367_v30, %s2050_s26 }
 0x169   : > { %v2375_v38 = vpop.f32.mrb[40].mxu0  ;;  %v2377_v39 = vpop.f32.mrb[40].mxu1 }
 0x16a   : > { %973 = vrot.lane.b32.xlu1 %v2369_v31, %s2050_s26  ;;  %923 = vrot.lane.b32.xlu0 %v2375_v38, %s2050_s26  ;;  %v718_v42 = vpop.f32.mrb[41].mxu0  ;;  %v822_v43 = vpop.f32.mrb[41].mxu1 }
 0x16b   : > { %v2383_v46 = vpop.f32.mrb[42].mxu0  ;;  %v2385_v47 = vpop.f32.mrb[42].mxu1 }
 0x16c   : > { %v721_v50 = vpop.f32.mrb[43].mxu0  ;;  %v825_v51 = vpop.f32.mrb[43].mxu1 }
 0x16e   : > { %975 = vrot.lane.b32.xlu0 %v2377_v39, %s2050_s26  ;;  %925 = vrot.lane.b32.xlu1 %v2383_v46, %s2050_s26 }
 0x171   : > { %v2391_v54 = vpop.f32.mrb[44].mxu0  ;;  %v2393_v55 = vpop.f32.mrb[44].mxu1 }
 0x172   : > { %977 = vrot.lane.b32.xlu1 %v2385_v47, %s2050_s26  ;;  %927 = vrot.lane.b32.xlu0 %v2391_v54, %s2050_s26  ;;  %v726_v58 = vpop.f32.mrb[45].mxu0  ;;  %v830_v59 = vpop.f32.mrb[45].mxu1 }
 0x173   : > { %v2399_v62 = vpop.f32.mrb[46].mxu0  ;;  %v831_v63 = vpop.f32.mrb[46].mxu1 }
 0x174   : > { %v729_v2 = vpop.f32.mrb[47].mxu0  ;;  %v832_v3 = vpop.f32.mrb[47].mxu1 }
 0x176   : > { %979 = vrot.lane.b32.xlu0 %v2393_v55, %s2050_s26  ;;  %929 = vrot.lane.b32.xlu1 %v2399_v62, %s2050_s26 }
 0x179   : > { %v2405_v10 = vpop.f32.mrb[48].mxu0 }
 0x17a   : > { %931 = vrot.lane.b32.xlu0 %v2405_v10, %s2050_s26  ;;  %v734_v11 = vpop.f32.mrb[49].mxu0 }
 0x17b   : > { %v2409_v18 = vpop.f32.mrb[50].mxu0 }
 0x17c   : > { %933 = vrot.lane.b32.xlu1 %v2409_v18, %s2050_s26  ;;  %v737_v19 = vpop.f32.mrb[51].mxu0 }
 0x18c   : > { %v884_v26 = vpop.permute.xlu0 %883 }
 0x18d   : > { %v2414_v27 = vmax.f32 %v2217_v4, %v884_v26 }
 0x18e   : > { %v938_v34 = vpop.permute.xlu1 %937 }
 0x18f   : > { %1128 = vrot.lane.b32.xlu1 %v2414_v27, %s2051_s27  ;;  %v2434_v59 = vmax.f32 %v2225_v9, %v938_v34 }
 0x190   : > { %v936_v35 = vpop.permute.xlu0 %935 }
 0x191   : > { %v2419_v42 = vmax.f32 %v2219_v5, %v936_v35 }
 0x193   : > { %1180 = vrot.lane.b32.xlu1 %v2419_v42, %s2051_s27 }
 0x194   : > { %v886_v43 = vpop.permute.xlu0 %885  ;;  %v888_v50 = vpop.permute.xlu1 %887 }
 0x195   : > { %v2424_v51 = vmax.f32 %v2223_v8, %v886_v43  ;;  %v2427_v4 = vmax.f32 %v2231_v12, %v888_v50 }
 0x197   : > { %1130 = vrot.lane.b32.xlu0 %v2424_v51, %s2051_s27  ;;  %1132 = vrot.lane.b32.xlu1 %v2427_v4, %s2051_s27 }
 0x198   : > { %v940_v58 = vpop.permute.xlu0 %939  ;;  %v890_v5 = vpop.permute.xlu1 %889 }
 0x199   : > { %v2437_v63 = vmax.f32 %v2233_v13, %v940_v58  ;;  %v2444_v2 = vmax.f32 %v2239_v16, %v890_v5 }
 0x19b   : > { %1182 = vrot.lane.b32.xlu0 %v2434_v59, %s2051_s27  ;;  %1184 = vrot.lane.b32.xlu1 %v2437_v63, %s2051_s27 }
 0x19c   : > { %v942_v8 = vpop.permute.xlu1 %941  ;;  %v892_v12 = vpop.permute.xlu0 %891 }
 0x19d   : > { %v2447_v3 = vmax.f32 %v2247_v20, %v892_v12  ;;  %v2454_v11 = vmax.f32 %v2241_v17, %v942_v8 }
 0x19f   : > { %1134 = vrot.lane.b32.xlu0 %v2444_v2, %s2051_s27  ;;  %1136 = vrot.lane.b32.xlu1 %v2447_v3, %s2051_s27 }
 0x1a0   : > { %v944_v9 = vpop.permute.xlu0 %943  ;;  %v894_v13 = vpop.permute.xlu1 %893 }
 0x1a1   : > { %v2457_v19 = vmax.f32 %v2249_v21, %v944_v9  ;;  %v2464_v26 = vmax.f32 %v2255_v24, %v894_v13 }
 0x1a3   : > { %1186 = vrot.lane.b32.xlu0 %v2454_v11, %s2051_s27  ;;  %1188 = vrot.lane.b32.xlu1 %v2457_v19, %s2051_s27 }
 0x1a4   : > { %v946_v16 = vpop.permute.xlu1 %945  ;;  %v896_v20 = vpop.permute.xlu0 %895 }
 0x1a5   : > { %v2467_v34 = vmax.f32 %v2263_v28, %v896_v20  ;;  %v2474_v35 = vmax.f32 %v2257_v25, %v946_v16 }
 0x1a7   : > { %1138 = vrot.lane.b32.xlu0 %v2464_v26, %s2051_s27  ;;  %1140 = vrot.lane.b32.xlu1 %v2467_v34, %s2051_s27 }
 0x1a8   : > { %v948_v17 = vpop.permute.xlu0 %947  ;;  %v898_v21 = vpop.permute.xlu1 %897 }
 0x1a9   : > { %v2477_v43 = vmax.f32 %v2265_v29, %v948_v17  ;;  %v2484_v50 = vmax.f32 %v2271_v32, %v898_v21 }
 0x1ab   : > { %1190 = vrot.lane.b32.xlu0 %v2474_v35, %s2051_s27  ;;  %1192 = vrot.lane.b32.xlu1 %v2477_v43, %s2051_s27 }
 0x1ac   : > { %v950_v24 = vpop.permute.xlu1 %949  ;;  %v900_v28 = vpop.permute.xlu0 %899 }
 0x1ad   : > { %v2487_v58 = vmax.f32 %v2279_v36, %v900_v28  ;;  %v2494_v5 = vmax.f32 %v2273_v33, %v950_v24 }
 0x1af   : > { %1142 = vrot.lane.b32.xlu0 %v2484_v50, %s2051_s27  ;;  %1144 = vrot.lane.b32.xlu1 %v2487_v58, %s2051_s27 }
 0x1b0   : > { %v952_v25 = vpop.permute.xlu0 %951  ;;  %v902_v29 = vpop.permute.xlu1 %901 }
 0x1b1   : > { %v2497_v8 = vmax.f32 %v2281_v37, %v952_v25  ;;  %v2504_v12 = vmax.f32 %v2287_v40, %v902_v29 }
 0x1b3   : > { %1194 = vrot.lane.b32.xlu0 %v2494_v5, %s2051_s27  ;;  %1196 = vrot.lane.b32.xlu1 %v2497_v8, %s2051_s27 }
 0x1b4   : > { %v954_v32 = vpop.permute.xlu1 %953  ;;  %v904_v36 = vpop.permute.xlu0 %903 }
 0x1b5   : > { %v2507_v9 = vmax.f32 %v2295_v44, %v904_v36  ;;  %v2514_v13 = vmax.f32 %v2289_v41, %v954_v32 }
 0x1b7   : > { %1146 = vrot.lane.b32.xlu0 %v2504_v12, %s2051_s27  ;;  %1148 = vrot.lane.b32.xlu1 %v2507_v9, %s2051_s27 }
 0x1b8   : > { %v956_v33 = vpop.permute.xlu0 %955  ;;  %v906_v37 = vpop.permute.xlu1 %905 }
 0x1b9   : > { %v2517_v16 = vmax.f32 %v2297_v45, %v956_v33  ;;  %v2524_v20 = vmax.f32 %v2303_v48, %v906_v37 }
 0x1bb   : > { %1198 = vrot.lane.b32.xlu0 %v2514_v13, %s2051_s27  ;;  %1200 = vrot.lane.b32.xlu1 %v2517_v16, %s2051_s27 }
 0x1bc   : > { %v958_v40 = vpop.permute.xlu1 %957  ;;  %v908_v44 = vpop.permute.xlu0 %907 }
 0x1bd   : > { %v2527_v17 = vmax.f32 %v2311_v52, %v908_v44  ;;  %v2534_v21 = vmax.f32 %v2305_v49, %v958_v40 }
 0x1bf   : > { %1150 = vrot.lane.b32.xlu0 %v2524_v20, %s2051_s27  ;;  %1152 = vrot.lane.b32.xlu1 %v2527_v17, %s2051_s27 }
 0x1c0   : > { %v960_v41 = vpop.permute.xlu0 %959  ;;  %v910_v45 = vpop.permute.xlu1 %909 }
 0x1c1   : > { %v2537_v24 = vmax.f32 %v2313_v53, %v960_v41  ;;  %v2544_v28 = vmax.f32 %v2319_v56, %v910_v45 }
 0x1c3   : > { %1202 = vrot.lane.b32.xlu0 %v2534_v21, %s2051_s27  ;;  %1204 = vrot.lane.b32.xlu1 %v2537_v24, %s2051_s27 }
 0x1c4   : > { %v962_v48 = vpop.permute.xlu1 %961  ;;  %v912_v52 = vpop.permute.xlu0 %911 }
 0x1c5   : > { %v2547_v25 = vmax.f32 %v2327_v60, %v912_v52  ;;  %v2554_v29 = vmax.f32 %v2321_v57, %v962_v48 }
 0x1c7   : > { %1154 = vrot.lane.b32.xlu0 %v2544_v28, %s2051_s27  ;;  %1156 = vrot.lane.b32.xlu1 %v2547_v25, %s2051_s27 }
 0x1c8   : > { %v964_v49 = vpop.permute.xlu0 %963  ;;  %v914_v53 = vpop.permute.xlu1 %913 }
 0x1c9   : > { %v2557_v32 = vmax.f32 %v2329_v61, %v964_v49  ;;  %v2564_v36 = vmax.f32 %v2335_v0, %v914_v53 }
 0x1cb   : > { %1206 = vrot.lane.b32.xlu0 %v2554_v29, %s2051_s27  ;;  %1208 = vrot.lane.b32.xlu1 %v2557_v32, %s2051_s27 }
 0x1cc   : > { %v966_v56 = vpop.permute.xlu1 %965  ;;  %v916_v60 = vpop.permute.xlu0 %915 }
 0x1cd   : > { %v2567_v33 = vmax.f32 %v2343_v6, %v916_v60  ;;  %v2574_v37 = vmax.f32 %v2337_v1, %v966_v56 }
 0x1cf   : > { %1158 = vrot.lane.b32.xlu0 %v2564_v36, %s2051_s27  ;;  %1160 = vrot.lane.b32.xlu1 %v2567_v33, %s2051_s27 }
 0x1d0   : > { %v968_v57 = vpop.permute.xlu0 %967  ;;  %v918_v61 = vpop.permute.xlu1 %917 }
 0x1d1   : > { %v2577_v40 = vmax.f32 %v2345_v7, %v968_v57  ;;  %v2584_v44 = vmax.f32 %v2351_v14, %v918_v61 }
 0x1d3   : > { %1210 = vrot.lane.b32.xlu0 %v2574_v37, %s2051_s27  ;;  %1212 = vrot.lane.b32.xlu1 %v2577_v40, %s2051_s27 }
 0x1d4   : > { %v970_v0 = vpop.permute.xlu1 %969  ;;  %v920_v6 = vpop.permute.xlu0 %919 }
 0x1d5   : > { %v2587_v41 = vmax.f32 %v2359_v22, %v920_v6  ;;  %v2594_v45 = vmax.f32 %v2353_v15, %v970_v0 }
 0x1d7   : > { %1162 = vrot.lane.b32.xlu0 %v2584_v44, %s2051_s27  ;;  %1164 = vrot.lane.b32.xlu1 %v2587_v41, %s2051_s27 }
 0x1d8   : > { %v972_v1 = vpop.permute.xlu0 %971  ;;  %v922_v7 = vpop.permute.xlu1 %921 }
 0x1d9   : > { %v2597_v48 = vmax.f32 %v2361_v23, %v972_v1  ;;  %v2604_v52 = vmax.f32 %v2367_v30, %v922_v7 }
 0x1db   : > { %1214 = vrot.lane.b32.xlu0 %v2594_v45, %s2051_s27  ;;  %1216 = vrot.lane.b32.xlu1 %v2597_v48, %s2051_s27 }
 0x1dc   : > { %v974_v14 = vpop.permute.xlu1 %973  ;;  %v924_v22 = vpop.permute.xlu0 %923 }
 0x1dd   : > { %v2607_v49 = vmax.f32 %v2375_v38, %v924_v22  ;;  %v2614_v53 = vmax.f32 %v2369_v31, %v974_v14 }
 0x1df   : > { %1166 = vrot.lane.b32.xlu0 %v2604_v52, %s2051_s27  ;;  %1168 = vrot.lane.b32.xlu1 %v2607_v49, %s2051_s27 }
 0x1e0   : > { %v976_v15 = vpop.permute.xlu0 %975  ;;  %v926_v23 = vpop.permute.xlu1 %925 }
 0x1e1   : > { %v2617_v56 = vmax.f32 %v2377_v39, %v976_v15  ;;  %v2624_v60 = vmax.f32 %v2383_v46, %v926_v23 }
 0x1e3   : > { %1218 = vrot.lane.b32.xlu0 %v2614_v53, %s2051_s27  ;;  %1220 = vrot.lane.b32.xlu1 %v2617_v56, %s2051_s27 }
 0x1e4   : > { %v978_v30 = vpop.permute.xlu1 %977  ;;  %v928_v38 = vpop.permute.xlu0 %927 }
 0x1e5   : > { %v2627_v57 = vmax.f32 %v2391_v54, %v928_v38 }
 0x1e7   : > { %1170 = vrot.lane.b32.xlu0 %v2624_v60, %s2051_s27  ;;  %1172 = vrot.lane.b32.xlu1 %v2627_v57, %s2051_s27 }
 0x1e8   : > { %v980_v31 = vpop.permute.xlu0 %979  ;;  %v930_v39 = vpop.permute.xlu1 %929 }
 0x1e9   : > { %v2634_v61 = vmax.f32 %v2399_v62, %v930_v39  ;;  %v2647_v1 = vmax.f32 %v2393_v55, %v980_v31  ;;  %v2652_v62 = vmax.f32 %v2385_v47, %v978_v30 }
 0x1eb   : > { %1174 = vrot.lane.b32.xlu0 %v2634_v61, %s2051_s27 }
 0x1ec   : > { %v932_v46 = vpop.permute.xlu0 %931 }
 0x1ed   : > { %v2639_v0 = vmax.f32 %v2405_v10, %v932_v46  ;;  %v2661_v10 = vld [vmem:[%s2870_s2] ss:$0 sm:$0xff] }
 0x1ee   : > { %v934_v54 = vpop.permute.xlu1 %933 }
 0x1ef   : > { %v2642_v6 = vmax.f32 %v2409_v18, %v934_v54  ;;  %1176 = vrot.lane.b32.xlu1 %v2639_v0, %s2051_s27 }
 0x1f1   : > { %1178 = vrot.lane.b32.xlu0 %v2642_v6, %s2051_s27 }
 0x1f3   : > { %1224 = vrot.lane.b32.xlu1 %v2647_v1, %s2051_s27 }
 0x1f5   : > { %1222 = vrot.lane.b32.xlu0 %v2652_v62, %s2051_s27 }
 0x201   : > { %v1129_v18 = vpop.permute.xlu1 %1128 }
 0x202   : > { %v1275_v55 = vmax.f32 %v2414_v27, %v1129_v18 }
 0x204   : > { %v1331_v7 = vadd.f32 %v2661_v10, %v1275_v55 }
 0x205   : > { %v1181_v14 = vpop.permute.xlu1 %1180 }
 0x206   : > { %v1380_v47 = vmax.f32 %v1331_v7, 0.0  ;;  %v1301_v22 = vmax.f32 %v2419_v42, %v1181_v14 }
 0x208   : > { %v1859_v15 = vpack.c.bf16 %v1380_v47, %v1380_v47  ;;  %v1357_v23 = vadd.f32 %v2661_v10, %v1301_v22 }
 0x209   : > { %v1131_v30 = vpop.permute.xlu0 %1130  ;;  %v1133_v27 = vpop.permute.xlu1 %1132 }
 0x20a   : > { %1627 = vst.msk [vmem:[%s2670_s6] sm:$0xf] %vm1626_vm0, %v1859_v15  ;;  %v1406_v38 = vmax.f32 %v1357_v23, 0.0  ;;  %v1276_v31 = vmax.f32 %v2424_v51, %v1131_v30  ;;  %v1277_v42 = vmax.f32 %v2427_v4, %v1133_v27 }
 0x20c   : > { %v1885_v39 = vpack.c.bf16 %v1406_v38, %v1406_v38  ;;  %v1332_v46 = vadd.f32 %v2661_v10, %v1276_v31  ;;  %v1333_v54 = vadd.f32 %v2661_v10, %v1277_v42 }
 0x20d   : > { %v1183_v18 = vpop.permute.xlu0 %1182  ;;  %v1185_v55 = vpop.permute.xlu1 %1184 }
 0x20e   : > { %1653 = vst.msk [vmem:[%s2670_s6 + $0x68] sm:$0xf] %vm1626_vm0, %v1885_v39  ;;  %v1381_v7 = vmax.f32 %v1332_v46, 0.0  ;;  %v1382_v14 = vmax.f32 %v1333_v54, 0.0  ;;  %v1302_v47 = vmax.f32 %v2434_v59, %v1183_v18  ;;  %v1303_v22 = vmax.f32 %v2437_v63, %v1185_v55 }
 0x210   : > { %v1860_v51 = vpack.c.bf16 %v1381_v7, %v1381_v7  ;;  %v1861_v15 = vpack.c.bf16 %v1382_v14, %v1382_v14  ;;  %v1358_v4 = vadd.f32 %v2661_v10, %v1302_v47  ;;  %v1359_v23 = vadd.f32 %v2661_v10, %v1303_v22 }
 0x211   : > { %v1135_v30 = vpop.permute.xlu0 %1134  ;;  %v1137_v27 = vpop.permute.xlu1 %1136 }
 0x212   : > { %1628 = vst.msk [vmem:[%s2670_s6 + $0x4] sm:$0xf] %vm1626_vm0, %v1860_v51  ;;  %1629 = vst.msk [vmem:[%s2670_s6 + $0x8] sm:$0xf] %vm1626_vm0, %v1861_v15  ;;  %v1407_v38 = vmax.f32 %v1358_v4, 0.0  ;;  %v1408_v31 = vmax.f32 %v1359_v23, 0.0  ;;  %v1278_v59 = vmax.f32 %v2444_v2, %v1135_v30  ;;  %v1279_v63 = vmax.f32 %v2447_v3, %v1137_v27 }
 0x214   : > { %v1886_v42 = vpack.c.bf16 %v1407_v38, %v1407_v38  ;;  %v1887_v39 = vpack.c.bf16 %v1408_v31, %v1408_v31  ;;  %v1334_v46 = vadd.f32 %v2661_v10, %v1278_v59  ;;  %v1335_v54 = vadd.f32 %v2661_v10, %v1279_v63 }
 0x215   : > { %v1187_v18 = vpop.permute.xlu0 %1186  ;;  %v1189_v55 = vpop.permute.xlu1 %1188 }
 0x216   : > { %1654 = vst.msk [vmem:[%s2670_s6 + $0x6c] sm:$0xf] %vm1626_vm0, %v1886_v42  ;;  %1655 = vst.msk [vmem:[%s2670_s6 + $0x70] sm:$0xf] %vm1626_vm0, %v1887_v39  ;;  %v1383_v7 = vmax.f32 %v1334_v46, 0.0  ;;  %v1384_v14 = vmax.f32 %v1335_v54, 0.0  ;;  %v1304_v2 = vmax.f32 %v2454_v11, %v1187_v18  ;;  %v1305_v3 = vmax.f32 %v2457_v19, %v1189_v55 }
 0x218   : > { %v1862_v47 = vpack.c.bf16 %v1383_v7, %v1383_v7  ;;  %v1863_v22 = vpack.c.bf16 %v1384_v14, %v1384_v14  ;;  %v1360_v51 = vadd.f32 %v2661_v10, %v1304_v2  ;;  %v1361_v15 = vadd.f32 %v2661_v10, %v1305_v3 }
 0x219   : > { %v1139_v4 = vpop.permute.xlu0 %1138  ;;  %v1141_v23 = vpop.permute.xlu1 %1140 }
 0x21a   : > { %1630 = vst.msk [vmem:[%s2670_s6 + $0xc] sm:$0xf] %vm1626_vm0, %v1862_v47  ;;  %1631 = vst.msk [vmem:[%s2670_s6 + $0x10] sm:$0xf] %vm1626_vm0, %v1863_v22  ;;  %v1409_v30 = vmax.f32 %v1360_v51, 0.0  ;;  %v1410_v27 = vmax.f32 %v1361_v15, 0.0  ;;  %v1280_v11 = vmax.f32 %v2464_v26, %v1139_v4  ;;  %v1281_v19 = vmax.f32 %v2467_v34, %v1141_v23 }
 0x21c   : > { %v1888_v38 = vpack.c.bf16 %v1409_v30, %v1409_v30  ;;  %v1889_v31 = vpack.c.bf16 %v1410_v27, %v1410_v27  ;;  %v1336_v59 = vadd.f32 %v2661_v10, %v1280_v11  ;;  %v1337_v63 = vadd.f32 %v2661_v10, %v1281_v19 }
 0x21d   : > { %v1191_v42 = vpop.permute.xlu0 %1190  ;;  %v1193_v39 = vpop.permute.xlu1 %1192 }
 0x21e   : > { %1656 = vst.msk [vmem:[%s2670_s6 + $0x74] sm:$0xf] %vm1626_vm0, %v1888_v38  ;;  %1657 = vst.msk [vmem:[%s2670_s6 + $0x78] sm:$0xf] %vm1626_vm0, %v1889_v31  ;;  %v1385_v46 = vmax.f32 %v1336_v59, 0.0  ;;  %v1386_v54 = vmax.f32 %v1337_v63, 0.0  ;;  %v1306_v26 = vmax.f32 %v2474_v35, %v1191_v42  ;;  %v1307_v34 = vmax.f32 %v2477_v43, %v1193_v39 }
 0x220   : > { %v1864_v18 = vpack.c.bf16 %v1385_v46, %v1385_v46  ;;  %v1865_v55 = vpack.c.bf16 %v1386_v54, %v1386_v54  ;;  %v1362_v7 = vadd.f32 %v2661_v10, %v1306_v26  ;;  %v1363_v14 = vadd.f32 %v2661_v10, %v1307_v34 }
 0x221   : > { %v1143_v2 = vpop.permute.xlu0 %1142  ;;  %v1145_v3 = vpop.permute.xlu1 %1144 }
 0x222   : > { %1632 = vst.msk [vmem:[%s2670_s6 + $0x14] sm:$0xf] %vm1626_vm0, %v1864_v18  ;;  %1633 = vst.msk [vmem:[%s2670_s6 + $0x18] sm:$0xf] %vm1626_vm0, %v1865_v55  ;;  %v1411_v47 = vmax.f32 %v1362_v7, 0.0  ;;  %v1412_v22 = vmax.f32 %v1363_v14, 0.0  ;;  %v1282_v35 = vmax.f32 %v2484_v50, %v1143_v2  ;;  %v1283_v43 = vmax.f32 %v2487_v58, %v1145_v3 }
 0x224   : > { %v1890_v51 = vpack.c.bf16 %v1411_v47, %v1411_v47  ;;  %v1891_v15 = vpack.c.bf16 %v1412_v22, %v1412_v22  ;;  %v1338_v4 = vadd.f32 %v2661_v10, %v1282_v35  ;;  %v1339_v23 = vadd.f32 %v2661_v10, %v1283_v43 }
 0x225   : > { %v1195_v30 = vpop.permute.xlu0 %1194  ;;  %v1197_v27 = vpop.permute.xlu1 %1196 }
 0x226   : > { %1658 = vst.msk [vmem:[%s2670_s6 + $0x7c] sm:$0xf] %vm1626_vm0, %v1890_v51  ;;  %1659 = vst.msk [vmem:[%s2670_s6 + $0x80] sm:$0xf] %vm1626_vm0, %v1891_v15  ;;  %v1387_v11 = vmax.f32 %v1338_v4, 0.0  ;;  %v1388_v19 = vmax.f32 %v1339_v23, 0.0  ;;  %v1308_v50 = vmax.f32 %v2494_v5, %v1195_v30  ;;  %v1309_v58 = vmax.f32 %v2497_v8, %v1197_v27 }
 0x228   : > { %v1866_v38 = vpack.c.bf16 %v1387_v11, %v1387_v11  ;;  %v1867_v31 = vpack.c.bf16 %v1388_v19, %v1388_v19  ;;  %v1364_v59 = vadd.f32 %v2661_v10, %v1308_v50  ;;  %v1365_v63 = vadd.f32 %v2661_v10, %v1309_v58 }
 0x229   : > { %v1147_v42 = vpop.permute.xlu0 %1146  ;;  %v1149_v39 = vpop.permute.xlu1 %1148 }
 0x22a   : > { %1634 = vst.msk [vmem:[%s2670_s6 + $0x1c] sm:$0xf] %vm1626_vm0, %v1866_v38  ;;  %1635 = vst.msk [vmem:[%s2670_s6 + $0x20] sm:$0xf] %vm1626_vm0, %v1867_v31  ;;  %v1413_v46 = vmax.f32 %v1364_v59, 0.0  ;;  %v1414_v54 = vmax.f32 %v1365_v63, 0.0  ;;  %v1284_v5 = vmax.f32 %v2504_v12, %v1147_v42  ;;  %v1285_v8 = vmax.f32 %v2507_v9, %v1149_v39 }
 0x22c   : > { %v1892_v26 = vpack.c.bf16 %v1413_v46, %v1413_v46  ;;  %v1893_v34 = vpack.c.bf16 %v1414_v54, %v1414_v54  ;;  %v1340_v18 = vadd.f32 %v2661_v10, %v1284_v5  ;;  %v1341_v55 = vadd.f32 %v2661_v10, %v1285_v8 }
 0x22d   : > { %v1199_v7 = vpop.permute.xlu0 %1198  ;;  %v1201_v14 = vpop.permute.xlu1 %1200 }
 0x22e   : > { %1660 = vst.msk [vmem:[%s2670_s6 + $0x84] sm:$0xf] %vm1626_vm0, %v1892_v26  ;;  %1661 = vst.msk [vmem:[%s2670_s6 + $0x88] sm:$0xf] %vm1626_vm0, %v1893_v34  ;;  %v1389_v2 = vmax.f32 %v1340_v18, 0.0  ;;  %v1390_v3 = vmax.f32 %v1341_v55, 0.0  ;;  %v1310_v12 = vmax.f32 %v2514_v13, %v1199_v7  ;;  %v1311_v9 = vmax.f32 %v2517_v16, %v1201_v14 }
 0x230   : > { %v1868_v47 = vpack.c.bf16 %v1389_v2, %v1389_v2  ;;  %v1869_v22 = vpack.c.bf16 %v1390_v3, %v1390_v3  ;;  %v1366_v35 = vadd.f32 %v2661_v10, %v1310_v12  ;;  %v1367_v43 = vadd.f32 %v2661_v10, %v1311_v9 }
 0x231   : > { %v1151_v51 = vpop.permute.xlu0 %1150  ;;  %v1153_v15 = vpop.permute.xlu1 %1152 }
 0x232   : > { %1636 = vst.msk [vmem:[%s2670_s6 + $0x24] sm:$0xf] %vm1626_vm0, %v1868_v47  ;;  %1637 = vst.msk [vmem:[%s2670_s6 + $0x28] sm:$0xf] %vm1626_vm0, %v1869_v22  ;;  %v1415_v4 = vmax.f32 %v1366_v35, 0.0  ;;  %v1416_v23 = vmax.f32 %v1367_v43, 0.0  ;;  %v1286_v13 = vmax.f32 %v2524_v20, %v1151_v51  ;;  %v1287_v16 = vmax.f32 %v2527_v17, %v1153_v15 }
 0x234   : > { %v1894_v30 = vpack.c.bf16 %v1415_v4, %v1415_v4  ;;  %v1895_v27 = vpack.c.bf16 %v1416_v23, %v1416_v23  ;;  %v1342_v11 = vadd.f32 %v2661_v10, %v1286_v13  ;;  %v1343_v19 = vadd.f32 %v2661_v10, %v1287_v16 }
 0x235   : > { %v1203_v50 = vpop.permute.xlu0 %1202  ;;  %v1205_v58 = vpop.permute.xlu1 %1204 }
 0x236   : > { %1662 = vst.msk [vmem:[%s2670_s6 + $0x8c] sm:$0xf] %vm1626_vm0, %v1894_v30  ;;  %1663 = vst.msk [vmem:[%s2670_s6 + $0x90] sm:$0xf] %vm1626_vm0, %v1895_v27  ;;  %v1391_v38 = vmax.f32 %v1342_v11, 0.0  ;;  %v1392_v31 = vmax.f32 %v1343_v19, 0.0  ;;  %v1312_v20 = vmax.f32 %v2534_v21, %v1203_v50  ;;  %v1313_v17 = vmax.f32 %v2537_v24, %v1205_v58 }
 0x238   : > { %v1870_v59 = vpack.c.bf16 %v1391_v38, %v1391_v38  ;;  %v1871_v63 = vpack.c.bf16 %v1392_v31, %v1392_v31  ;;  %v1368_v42 = vadd.f32 %v2661_v10, %v1312_v20  ;;  %v1369_v39 = vadd.f32 %v2661_v10, %v1313_v17 }
 0x239   : > { %v1155_v46 = vpop.permute.xlu0 %1154  ;;  %v1157_v54 = vpop.permute.xlu1 %1156 }
 0x23a   : > { %1638 = vst.msk [vmem:[%s2670_s6 + $0x2c] sm:$0xf] %vm1626_vm0, %v1870_v59  ;;  %1639 = vst.msk [vmem:[%s2670_s6 + $0x30] sm:$0xf] %vm1626_vm0, %v1871_v63  ;;  %v1417_v5 = vmax.f32 %v1368_v42, 0.0  ;;  %v1418_v8 = vmax.f32 %v1369_v39, 0.0  ;;  %v1288_v21 = vmax.f32 %v2544_v28, %v1155_v46  ;;  %v1289_v24 = vmax.f32 %v2547_v25, %v1157_v54 }
 0x23c   : > { %v1896_v26 = vpack.c.bf16 %v1417_v5, %v1417_v5  ;;  %v1897_v34 = vpack.c.bf16 %v1418_v8, %v1418_v8  ;;  %v1344_v18 = vadd.f32 %v2661_v10, %v1288_v21  ;;  %v1345_v55 = vadd.f32 %v2661_v10, %v1289_v24 }
 0x23d   : > { %v1207_v7 = vpop.permute.xlu0 %1206  ;;  %v1209_v14 = vpop.permute.xlu1 %1208 }
 0x23e   : > { %1664 = vst.msk [vmem:[%s2670_s6 + $0x94] sm:$0xf] %vm1626_vm0, %v1896_v26  ;;  %1665 = vst.msk [vmem:[%s2670_s6 + $0x98] sm:$0xf] %vm1626_vm0, %v1897_v34  ;;  %v1393_v2 = vmax.f32 %v1344_v18, 0.0  ;;  %v1394_v3 = vmax.f32 %v1345_v55, 0.0  ;;  %v1314_v28 = vmax.f32 %v2554_v29, %v1207_v7  ;;  %v1315_v25 = vmax.f32 %v2557_v32, %v1209_v14 }
 0x240   : > { %v1872_v12 = vpack.c.bf16 %v1393_v2, %v1393_v2  ;;  %v1873_v9 = vpack.c.bf16 %v1394_v3, %v1394_v3  ;;  %v1370_v47 = vadd.f32 %v2661_v10, %v1314_v28  ;;  %v1371_v22 = vadd.f32 %v2661_v10, %v1315_v25 }
 0x241   : > { %v1159_v35 = vpop.permute.xlu0 %1158  ;;  %v1161_v43 = vpop.permute.xlu1 %1160 }
 0x242   : > { %1640 = vst.msk [vmem:[%s2670_s6 + $0x34] sm:$0xf] %vm1626_vm0, %v1872_v12  ;;  %1641 = vst.msk [vmem:[%s2670_s6 + $0x38] sm:$0xf] %vm1626_vm0, %v1873_v9  ;;  %v1419_v51 = vmax.f32 %v1370_v47, 0.0  ;;  %v1420_v15 = vmax.f32 %v1371_v22, 0.0  ;;  %v1290_v29 = vmax.f32 %v2564_v36, %v1159_v35  ;;  %v1291_v32 = vmax.f32 %v2567_v33, %v1161_v43 }
 0x244   : > { %v1898_v4 = vpack.c.bf16 %v1419_v51, %v1419_v51  ;;  %v1899_v23 = vpack.c.bf16 %v1420_v15, %v1420_v15  ;;  %v1346_v13 = vadd.f32 %v2661_v10, %v1290_v29  ;;  %v1347_v16 = vadd.f32 %v2661_v10, %v1291_v32 }
 0x245   : > { %v1211_v30 = vpop.permute.xlu0 %1210  ;;  %v1213_v27 = vpop.permute.xlu1 %1212 }
 0x246   : > { %1666 = vst.msk [vmem:[%s2670_s6 + $0x9c] sm:$0xf] %vm1626_vm0, %v1898_v4  ;;  %1667 = vst.msk [vmem:[%s2670_s6 + $0xa0] sm:$0xf] %vm1626_vm0, %v1899_v23  ;;  %v1395_v11 = vmax.f32 %v1346_v13, 0.0  ;;  %v1396_v19 = vmax.f32 %v1347_v16, 0.0  ;;  %v1316_v36 = vmax.f32 %v2574_v37, %v1211_v30  ;;  %v1317_v33 = vmax.f32 %v2577_v40, %v1213_v27 }
 0x248   : > { %v1874_v50 = vpack.c.bf16 %v1395_v11, %v1395_v11  ;;  %v1875_v58 = vpack.c.bf16 %v1396_v19, %v1396_v19  ;;  %v1372_v38 = vadd.f32 %v2661_v10, %v1316_v36  ;;  %v1373_v31 = vadd.f32 %v2661_v10, %v1317_v33 }
 0x249   : > { %v1163_v20 = vpop.permute.xlu0 %1162  ;;  %v1165_v17 = vpop.permute.xlu1 %1164 }
 0x24a   : > { %1642 = vst.msk [vmem:[%s2670_s6 + $0x3c] sm:$0xf] %vm1626_vm0, %v1874_v50  ;;  %1643 = vst.msk [vmem:[%s2670_s6 + $0x40] sm:$0xf] %vm1626_vm0, %v1875_v58  ;;  %v1421_v59 = vmax.f32 %v1372_v38, 0.0  ;;  %v1422_v63 = vmax.f32 %v1373_v31, 0.0  ;;  %v1292_v37 = vmax.f32 %v2584_v44, %v1163_v20  ;;  %v1293_v40 = vmax.f32 %v2587_v41, %v1165_v17 }
 0x24c   : > { %v1900_v42 = vpack.c.bf16 %v1421_v59, %v1421_v59  ;;  %v1901_v39 = vpack.c.bf16 %v1422_v63, %v1422_v63  ;;  %v1348_v46 = vadd.f32 %v2661_v10, %v1292_v37  ;;  %v1349_v54 = vadd.f32 %v2661_v10, %v1293_v40 }
 0x24d   : > { %v1215_v5 = vpop.permute.xlu0 %1214  ;;  %v1217_v8 = vpop.permute.xlu1 %1216 }
 0x24e   : > { %1668 = vst.msk [vmem:[%s2670_s6 + $0xa4] sm:$0xf] %vm1626_vm0, %v1900_v42  ;;  %1669 = vst.msk [vmem:[%s2670_s6 + $0xa8] sm:$0xf] %vm1626_vm0, %v1901_v39  ;;  %v1397_v21 = vmax.f32 %v1348_v46, 0.0  ;;  %v1398_v24 = vmax.f32 %v1349_v54, 0.0  ;;  %v1318_v44 = vmax.f32 %v2594_v45, %v1215_v5  ;;  %v1319_v41 = vmax.f32 %v2597_v48, %v1217_v8 }
 0x250   : > { %v1876_v26 = vpack.c.bf16 %v1397_v21, %v1397_v21  ;;  %v1877_v34 = vpack.c.bf16 %v1398_v24, %v1398_v24  ;;  %v1374_v18 = vadd.f32 %v2661_v10, %v1318_v44  ;;  %v1375_v55 = vadd.f32 %v2661_v10, %v1319_v41 }
 0x251   : > { %v1167_v7 = vpop.permute.xlu0 %1166  ;;  %v1169_v14 = vpop.permute.xlu1 %1168 }
 0x252   : > { %1644 = vst.msk [vmem:[%s2670_s6 + $0x44] sm:$0xf] %vm1626_vm0, %v1876_v26  ;;  %1645 = vst.msk [vmem:[%s2670_s6 + $0x48] sm:$0xf] %vm1626_vm0, %v1877_v34  ;;  %v1423_v2 = vmax.f32 %v1374_v18, 0.0  ;;  %v1424_v3 = vmax.f32 %v1375_v55, 0.0  ;;  %v1294_v45 = vmax.f32 %v2604_v52, %v1167_v7  ;;  %v1295_v48 = vmax.f32 %v2607_v49, %v1169_v14 }
 0x254   : > { %v1902_v28 = vpack.c.bf16 %v1423_v2, %v1423_v2  ;;  %v1903_v25 = vpack.c.bf16 %v1424_v3, %v1424_v3  ;;  %v1350_v12 = vadd.f32 %v2661_v10, %v1294_v45  ;;  %v1351_v9 = vadd.f32 %v2661_v10, %v1295_v48 }
 0x255   : > { %v1219_v47 = vpop.permute.xlu0 %1218  ;;  %v1221_v22 = vpop.permute.xlu1 %1220 }
 0x256   : > { %1670 = vst.msk [vmem:[%s2670_s6 + $0xac] sm:$0xf] %vm1626_vm0, %v1902_v28  ;;  %1671 = vst.msk [vmem:[%s2670_s6 + $0xb0] sm:$0xf] %vm1626_vm0, %v1903_v25  ;;  %v1399_v35 = vmax.f32 %v1350_v12, 0.0  ;;  %v1400_v43 = vmax.f32 %v1351_v9, 0.0  ;;  %v1320_v52 = vmax.f32 %v2614_v53, %v1219_v47  ;;  %v1321_v49 = vmax.f32 %v2617_v56, %v1221_v22 }
 0x258   : > { %v1878_v51 = vpack.c.bf16 %v1399_v35, %v1399_v35  ;;  %v1879_v15 = vpack.c.bf16 %v1400_v43, %v1400_v43  ;;  %v1376_v29 = vadd.f32 %v2661_v10, %v1320_v52  ;;  %v1377_v32 = vadd.f32 %v2661_v10, %v1321_v49 }
 0x259   : > { %v1171_v4 = vpop.permute.xlu0 %1170  ;;  %v1173_v23 = vpop.permute.xlu1 %1172 }
 0x25a   : > { %1646 = vst.msk [vmem:[%s2670_s6 + $0x4c] sm:$0xf] %vm1626_vm0, %v1878_v51  ;;  %1647 = vst.msk [vmem:[%s2670_s6 + $0x50] sm:$0xf] %vm1626_vm0, %v1879_v15  ;;  %v1425_v13 = vmax.f32 %v1376_v29, 0.0  ;;  %v1426_v16 = vmax.f32 %v1377_v32, 0.0  ;;  %v1296_v53 = vmax.f32 %v2624_v60, %v1171_v4  ;;  %v1297_v56 = vmax.f32 %v2627_v57, %v1173_v23 }
 0x25c   : > { %v1904_v30 = vpack.c.bf16 %v1425_v13, %v1425_v13  ;;  %v1905_v27 = vpack.c.bf16 %v1426_v16, %v1426_v16  ;;  %v1352_v11 = vadd.f32 %v2661_v10, %v1296_v53  ;;  %v1353_v19 = vadd.f32 %v2661_v10, %v1297_v56 }
 0x25d   : > { %v1175_v36 = vpop.permute.xlu0 %1174 }
 0x25e   : > { %1672 = vst.msk [vmem:[%s2670_s6 + $0xb4] sm:$0xf] %vm1626_vm0, %v1904_v30  ;;  %1673 = vst.msk [vmem:[%s2670_s6 + $0xb8] sm:$0xf] %vm1626_vm0, %v1905_v27  ;;  %v1401_v33 = vmax.f32 %v1352_v11, 0.0  ;;  %v1402_v50 = vmax.f32 %v1353_v19, 0.0  ;;  %v1298_v60 = vmax.f32 %v2634_v61, %v1175_v36 }
 0x260   : > { %v1880_v58 = vpack.c.bf16 %v1401_v33, %v1401_v33  ;;  %v1881_v38 = vpack.c.bf16 %v1402_v50, %v1402_v50  ;;  %v1354_v57 = vadd.f32 %v2661_v10, %v1298_v60 }
 0x261   : > { %v1177_v31 = vpop.permute.xlu1 %1176 }
 0x262   : > { %1648 = vst.msk [vmem:[%s2670_s6 + $0x54] sm:$0xf] %vm1626_vm0, %v1880_v58  ;;  %1649 = vst.msk [vmem:[%s2670_s6 + $0x58] sm:$0xf] %vm1626_vm0, %v1881_v38  ;;  %v1403_v20 = vmax.f32 %v1354_v57, 0.0  ;;  %v1299_v17 = vmax.f32 %v2639_v0, %v1177_v31 }
 0x263   : > { %v1179_v59 = vpop.permute.xlu0 %1178 }
 0x264   : > { %v1882_v63 = vpack.c.bf16 %v1403_v20, %v1403_v20  ;;  %v1355_v37 = vadd.f32 %v2661_v10, %v1299_v17  ;;  %v1300_v61 = vmax.f32 %v2642_v6, %v1179_v59 }
 0x265   : > { %v1225_v40 = vpop.permute.xlu1 %1224 }
 0x266   : > { %1650 = vst.msk [vmem:[%s2670_s6 + $0x5c] sm:$0xf] %vm1626_vm0, %v1882_v63  ;;  %v1404_v42 = vmax.f32 %v1355_v37, 0.0  ;;  %v1356_v39 = vadd.f32 %v2661_v10, %v1300_v61  ;;  %v1323_v46 = vmax.f32 %v2647_v1, %v1225_v40 }
 0x267   : > { %v1223_v54 = vpop.permute.xlu0 %1222 }
 0x268   : > { %v1883_v5 = vpack.c.bf16 %v1404_v42, %v1404_v42  ;;  %v1405_v0 = vmax.f32 %v1356_v39, 0.0  ;;  %v1379_v8 = vadd.f32 %v2661_v10, %v1323_v46  ;;  %v1322_v21 = vmax.f32 %v2652_v62, %v1223_v54 }
 0x26a   : > { %1651 = vst.msk [vmem:[%s2670_s6 + $0x60] sm:$0xf] %vm1626_vm0, %v1883_v5  ;;  %v1884_v6 = vpack.c.bf16 %v1405_v0, %v1405_v0  ;;  %v1428_v24 = vmax.f32 %v1379_v8, 0.0  ;;  %v1378_v44 = vadd.f32 %v2661_v10, %v1322_v21 }
 0x26c   : > { %1652 = vst.msk [vmem:[%s2670_s6 + $0x64] sm:$0xf] %vm1626_vm0, %v1884_v6  ;;  %v1907_v41 = vpack.c.bf16 %v1428_v24, %v1428_v24  ;;  %v1427_v26 = vmax.f32 %v1378_v44, 0.0 }
 0x26e   : > { %1675 = vst.msk [vmem:[%s2670_s6 + $0xc0] sm:$0xf] %vm1626_vm0, %v1907_v41  ;;  %v1906_v1 = vpack.c.bf16 %v1427_v26, %v1427_v26 }
 0x270   : > { %1674 = vst.msk [vmem:[%s2670_s6 + $0xbc] sm:$0xf] %vm1626_vm0, %v1906_v1 }
 0x271 PF: > { %s13_s12 = sadd.s32 1, %s2047_s12  }
 0x272   : > { %p10_p4 = scmp.ge.s32.totalorder %s13_s12, 4  }
 0x274   :  { %12 = sbr.rel (!%p10_p4) target bundleno = 1 (0x1), region = 62 }

// kernel: simple_cnn_forward.5
= control target key start
LH: loop header
LB: loop body
LE: loop exit
PB: predicated region body
PF: predicated region fallthrough
CT: control target
= control target key end

     0   :  { %s1768_s12 = smov 0   ;;  %s2099_s0 = inlined_call_operand.vmem [shape: bf16[16,1568], index: 0, kind: input, shape index: {}]   ;;  %s2100_s1 = inlined_call_operand.vmem [shape: bf16[1568,128], index: 1, kind: input, shape index: {}]   ;;  %s2101_s2 = inlined_call_operand.vmem [shape: f32[1,128], index: 2, kind: input, shape index: {}]   ;;  %s2102_s3 = inlined_call_operand.vmem [shape: f32[16,128], index: 3, kind: output, shape index: {}]  }
   0x1 LB: > { %s1351_s13 = sadd.s32 4294967295, %s1744_s12   ;;  %p1355_p0 = scmp.ge.s32.totalorder %s1744_s12, 1  ;;  %s1744_s12 = sphi %s1768_s12, %s13_s12  }
   0x2   : > { %p137_p1 = scmp.lt.s32.totalorder %s1744_s12, 3 }
   0x4   : > { %p138_p2 = pnand %p1355_p0, %p137_p1 }
   0x5   : > { %v1627_v0 = vld [vmem:[%s2100_s1 + $0x40] sm:$0xff] (!%p138_p2)   ;;  %v1631_v4 = vld [vmem:[%s2100_s1 + $0x48] sm:$0xff] (!%p138_p2)   ;;  %v1635_v8 = vld [vmem:[%s2100_s1 + $0x50] sm:$0xff] (!%p138_p2)   ;;  %p160_p3 = scmp.lt.s32.totalorder (!%p138_p2), %s1351_s13, 1  ;;  %vm1747_vm0 = vmmov (!%p138_p2), 0   ;;  %vm1013_vm1 = vcmask (!%p138_p2), 261120  }
   0x6   : > { %141 = sbr.rel (%p138_p2) target bundleno = 325 (0x145), region = 32  ;;  %v1628_v1 = vld [vmem:[%s2100_s1] sm:$0xff] (!%p138_p2)   ;;  %1473 = vmatprep.subr.bf16.mxu0 (!%p138_p2), %v1627_v0  ;;  %v1632_v5 = vld [vmem:[%s2100_s1 + $0x8] sm:$0xff] (!%p138_p2)   ;;  %v1636_v9 = vld [vmem:[%s2100_s1 + $0x10] sm:$0xff] (!%p138_p2)  }
   0x7   : > { %v1629_v2 = vld [vmem:[%s2100_s1 + $0xc0] sm:$0xff] (!%p138_p2)   ;;  %1474 = vmatpush3.bf16.msra.mxu0 (!%p138_p2), %v1628_v1  ;;  %v1633_v6 = vld [vmem:[%s2100_s1 + $0xc8] sm:$0xff] (!%p138_p2)   ;;  %v1637_v10 = vld [vmem:[%s2100_s1 + $0xd0] sm:$0xff] (!%p138_p2)  }
   0x8   : > { %v1630_v3 = vld [vmem:[%s2100_s1 + $0x80] sm:$0xff] (!%p138_p2)   ;;  %1495 = vmatprep.subr.bf16.mxu1 (!%p138_p2), %v1629_v2  ;;  %1475 = vmatprep.subr.bf16.mxu0 (!%p138_p2), %v1631_v4  ;;  %v1634_v7 = vld [vmem:[%s2100_s1 + $0x88] sm:$0xff] (!%p138_p2)   ;;  %v1638_v11 = vld [vmem:[%s2100_s1 + $0x90] sm:$0xff] (!%p138_p2)  }
   0x9   : > { %1496 = vmatpush3.bf16.msra.mxu1 (!%p138_p2), %v1630_v3  ;;  %v1639_v12 = vld [vmem:[%s2100_s1 + $0x58] sm:$0xff] (!%p138_p2)   ;;  %v1643_v16 = vld [vmem:[%s2100_s1 + $0x60] sm:$0xff] (!%p138_p2)   ;;  %v1647_v20 = vld [vmem:[%s2100_s1 + $0x68] sm:$0xff] (!%p138_p2)  }
   0xa   : > { %1497 = vmatprep.subr.bf16.mxu1 (!%p138_p2), %v1633_v6  ;;  %v1640_v13 = vld [vmem:[%s2100_s1 + $0x18] sm:$0xff] (!%p138_p2)   ;;  %v1644_v17 = vld [vmem:[%s2100_s1 + $0x20] sm:$0xff] (!%p138_p2)   ;;  %v1648_v21 = vld [vmem:[%s2100_s1 + $0x28] sm:$0xff] (!%p138_p2)  }
   0xb   : > { %1476 = vmatpush3.bf16.msra.mxu0 (!%p138_p2), %v1632_v5  ;;  %v1641_v14 = vld [vmem:[%s2100_s1 + $0xd8] sm:$0xff] (!%p138_p2)   ;;  %v1645_v18 = vld [vmem:[%s2100_s1 + $0xe0] sm:$0xff] (!%p138_p2)   ;;  %v1649_v22 = vld [vmem:[%s2100_s1 + $0xe8] sm:$0xff] (!%p138_p2)  }
   0xc   : > { %1477 = vmatprep.subr.bf16.mxu0 (!%p138_p2), %v1635_v8  ;;  %v1642_v15 = vld [vmem:[%s2100_s1 + $0x98] sm:$0xff] (!%p138_p2)   ;;  %v1646_v19 = vld [vmem:[%s2100_s1 + $0xa0] sm:$0xff] (!%p138_p2)   ;;  %v1650_v23 = vld [vmem:[%s2100_s1 + $0xa8] sm:$0xff] (!%p138_p2)  }
   0xd   : > { %1498 = vmatpush3.bf16.msra.mxu1 %v1634_v7  ;;  %s2104_s13 = smov (!%p160_p3, %s1351_s13), 1  ;;  %v1651_v24 = vld [vmem:[%s2100_s1 + $0x70] sm:$0xff]   ;;  %v1655_v28 = vld [vmem:[%s2100_s1 + $0x78] sm:$0xff]   ;;  %v1661_v35 = vld [vmem:[%s2100_s1 + $0x140] sm:$0xff]  }
   0xe   : > { %1499 = vmatprep.subr.bf16.mxu1 %v1637_v10  ;;  %v1652_v25 = vld [vmem:[%s2100_s1 + $0x30] sm:$0xff]   ;;  %s1616_s16 = smul.u32 52, %s2104_s13  ;;  %v1656_v29 = vld [vmem:[%s2100_s1 + $0x38] sm:$0xff]   ;;  %v1664_v39 = vld [vmem:[%s2100_s1 + $0x100] sm:$0xff]  }
   0xf   : > { %1478 = vmatpush3.bf16.msra.mxu0 %v1636_v9  ;;  %v1653_v26 = vld [vmem:[%s2100_s1 + $0xf0] sm:$0xff]   ;;  %v1657_v30 = vld [vmem:[%s2100_s1 + $0xf8] sm:$0xff]   ;;  %v1665_v40 = vld [vmem:[%s2100_s1 + $0x1c0] sm:$0xff]  }
  0x10   : > { %1479 = vmatprep.subr.bf16.mxu0 %v1639_v12  ;;  %v1654_v27 = vld [vmem:[%s2100_s1 + $0xb0] sm:$0xff]   ;;  %s1876_s27 = scalar_lea.vmem %s2099_s0, %s1616_s16  ;;  %v1658_v31 = vld [vmem:[%s2100_s1 + $0xb8] sm:$0xff]   ;;  %v1666_v41 = vld [vmem:[%s2100_s1 + $0x180] sm:$0xff]  }
  0x11   : > { %1500 = vmatpush3.bf16.msra.mxu1 %v1638_v11  ;;  %v170_v32 = vld [vmem:[%s1876_s27] sm:$0xff]  ;;  %v171_v36 = vld [vmem:[%s1876_s27 + $0x8] sm:$0xff]  ;;  %v1671_v46 = vld [vmem:[%s2100_s1 + $0x150] sm:$0xff]  }
  0x12   : > { %1501 = vmatprep.subr.bf16.mxu1 %v1641_v14  ;;  %v1359_v33 = vcombine.low %v170_v32, %v170_v32  ;;  %v1360_v34 = vcombine.high %v170_v32, %v170_v32  ;;  %v1361_v37 = vcombine.low %v171_v36, %v171_v36  ;;  %v1362_v38 = vcombine.high %v171_v36, %v171_v36  ;;  %v1667_v42 = vld [vmem:[%s2100_s1 + $0x148] sm:$0xff]   ;;  %v1672_v47 = vld [vmem:[%s2100_s1 + $0x110] sm:$0xff]   ;;  %v1675_v50 = vld [vmem:[%s2100_s1 + $0x158] sm:$0xff]  }
  0x13   : > { %1480 = vmatpush3.bf16.msra.mxu0 %v1640_v13  ;;  %v1668_v43 = vld [vmem:[%s2100_s1 + $0x108] sm:$0xff]   ;;  %v1673_v48 = vld [vmem:[%s2100_s1 + $0x1d0] sm:$0xff]   ;;  %v1676_v51 = vld [vmem:[%s2100_s1 + $0x118] sm:$0xff]  }
  0x14   : > { %1481 = vmatprep.subr.bf16.mxu0 %v1643_v16  ;;  %1049 = vmatprep.mubr.bf16.mxu0 %v1360_v34  ;;  %v1669_v44 = vld [vmem:[%s2100_s1 + $0x1c8] sm:$0xff]   ;;  %v1674_v49 = vld [vmem:[%s2100_s1 + $0x190] sm:$0xff]   ;;  %v1677_v52 = vld [vmem:[%s2100_s1 + $0x1d8] sm:$0xff]  }
  0x15   : > { %1502 = vmatpush3.bf16.msra.mxu1 %v1642_v15  ;;  %1089 = vmatprep.mubr.bf16.mxu1 %v1362_v38  ;;  %v1670_v45 = vld [vmem:[%s2100_s1 + $0x188] sm:$0xff]   ;;  %v1678_v53 = vld [vmem:[%s2100_s1 + $0x198] sm:$0xff]   ;;  %v1679_v54 = vld [vmem:[%s2100_s1 + $0x160] sm:$0xff]  }
  0x16   : > { %1503 = vmatprep.subr.bf16.mxu1 %v1645_v18  ;;  %v1680_v55 = vld [vmem:[%s2100_s1 + $0x120] sm:$0xff]   ;;  %v1683_v58 = vld [vmem:[%s2100_s1 + $0x168] sm:$0xff]   ;;  %v1687_v62 = vld [vmem:[%s2100_s1 + $0x170] sm:$0xff]  }
  0x17   : > { %1482 = vmatpush3.bf16.msra.mxu0 %v1644_v17  ;;  %v1681_v56 = vld [vmem:[%s2100_s1 + $0x1e0] sm:$0xff]   ;;  %v1684_v59 = vld [vmem:[%s2100_s1 + $0x128] sm:$0xff]   ;;  %v1688_v63 = vld [vmem:[%s2100_s1 + $0x130] sm:$0xff]  }
  0x18   : > { %1483 = vmatprep.subr.bf16.mxu0 %v1647_v20  ;;  %v1682_v57 = vld [vmem:[%s2100_s1 + $0x1a0] sm:$0xff]   ;;  %v1685_v60 = vld [vmem:[%s2100_s1 + $0x1e8] sm:$0xff]   ;;  %v1689_v0 = vld [vmem:[%s2100_s1 + $0x1f0] sm:$0xff]  }
  0x19   : > { %1504 = vmatpush3.bf16.msra.mxu1 %v1646_v19  ;;  %v1686_v61 = vld [vmem:[%s2100_s1 + $0x1a8] sm:$0xff]   ;;  %v1690_v1 = vld [vmem:[%s2100_s1 + $0x1b0] sm:$0xff]   ;;  %v1691_v2 = vld [vmem:[%s2100_s1 + $0x178] sm:$0xff]  }
  0x1a   : > { %1505 = vmatprep.subr.bf16.mxu1 %v1649_v22  ;;  %v1692_v3 = vld [vmem:[%s2100_s1 + $0x138] sm:$0xff]   ;;  %v172_v6 = vld [vmem:[%s1876_s27 + $0x10] sm:$0xff]  ;;  %v1697_v9 = vld [vmem:[%s2100_s1 + $0x240] sm:$0xff]  }
  0x1b   : > { %1484 = vmatpush3.bf16.msra.mxu0 %v1648_v21  ;;  %v1693_v4 = vld [vmem:[%s2100_s1 + $0x1f8] sm:$0xff]   ;;  %v1363_v7 = vcombine.low %v172_v6, %v172_v6  ;;  %v1364_v8 = vcombine.high %v172_v6, %v172_v6  ;;  %v1700_v13 = vld [vmem:[%s2100_s1 + $0x200] sm:$0xff]   ;;  %v1703_v16 = vld [vmem:[%s2100_s1 + $0x248] sm:$0xff]  }
  0x1c   : > { %1485 = vmatprep.subr.bf16.mxu0 %v1651_v24  ;;  %v1694_v5 = vld [vmem:[%s2100_s1 + $0x1b8] sm:$0xff]   ;;  %v1701_v14 = vld [vmem:[%s2100_s1 + $0x2c0] sm:$0xff]   ;;  %v1704_v17 = vld [vmem:[%s2100_s1 + $0x208] sm:$0xff]  }
  0x1d   : > { %1506 = vmatpush3.bf16.msra.mxu1 %v1650_v23  ;;  %v173_v10 = vld [vmem:[%s1876_s27 + $0x18] sm:$0xff]  ;;  %v1702_v15 = vld [vmem:[%s2100_s1 + $0x280] sm:$0xff]   ;;  %v1705_v18 = vld [vmem:[%s2100_s1 + $0x2c8] sm:$0xff]  }
  0x1e   : > { %1507 = vmatprep.subr.bf16.mxu1 %v1653_v26  ;;  %v1365_v11 = vcombine.low %v173_v10, %v173_v10  ;;  %v1366_v12 = vcombine.high %v173_v10, %v173_v10  ;;  %v1706_v19 = vld [vmem:[%s2100_s1 + $0x288] sm:$0xff]   ;;  %v1707_v20 = vld [vmem:[%s2100_s1 + $0x250] sm:$0xff]   ;;  %v1711_v24 = vld [vmem:[%s2100_s1 + $0x258] sm:$0xff]  }
  0x1f   : > { %1486 = vmatpush3.bf16.msra.mxu0 %v1652_v25  ;;  %v1708_v21 = vld [vmem:[%s2100_s1 + $0x210] sm:$0xff]   ;;  %v1712_v25 = vld [vmem:[%s2100_s1 + $0x218] sm:$0xff]   ;;  %v1719_v32 = vld [vmem:[%s2100_s1 + $0x268] sm:$0xff]  }
  0x20   : > { %1487 = vmatprep.subr.bf16.mxu0 %v1655_v28  ;;  %v1709_v22 = vld [vmem:[%s2100_s1 + $0x2d0] sm:$0xff]   ;;  %v1713_v26 = vld [vmem:[%s2100_s1 + $0x2d8] sm:$0xff]   ;;  %v1715_v28 = vld [vmem:[%s2100_s1 + $0x260] sm:$0xff]  }
  0x21   : > { %1508 = vmatpush3.bf16.msra.mxu1 %v1654_v27  ;;  %v1710_v23 = vld [vmem:[%s2100_s1 + $0x290] sm:$0xff]   ;;  %v1714_v27 = vld [vmem:[%s2100_s1 + $0x298] sm:$0xff]   ;;  %v1721_v34 = vld [vmem:[%s2100_s1 + $0x2e8] sm:$0xff]  }
  0x22   : > { %1509 = vmatprep.subr.bf16.mxu1 %v1657_v30  ;;  %v1717_v30 = vld [vmem:[%s2100_s1 + $0x2e0] sm:$0xff]   ;;  %v1723_v36 = vld [vmem:[%s2100_s1 + $0x270] sm:$0xff]  }
  0x23   : > { %1488 = vmatpush3.bf16.msra.mxu0 %v1656_v29  ;;  %v1716_v29 = vld [vmem:[%s2100_s1 + $0x220] sm:$0xff]   ;;  %v1725_v38 = vld [vmem:[%s2100_s1 + $0x2f0] sm:$0xff]  }
  0x24   : > { %1517 = vmatprep.subr.bf16.mxu0 %v1661_v35  ;;  %v1722_v35 = vld [vmem:[%s2100_s1 + $0x2a8] sm:$0xff]  }
  0x25   : > { %1510 = vmatpush3.bf16.msra.mxu1 %v1658_v31  ;;  %v1718_v31 = vld [vmem:[%s2100_s1 + $0x2a0] sm:$0xff]  }
  0x26   : > { %1050 = vmatmul.mubr.bf16.vlgmr.msra.gmra.mrb[0].mxu0 %v1359_v33  ;;  %1539 = vmatprep.subr.bf16.mxu1 %v1665_v40  ;;  %v1720_v33 = vld [vmem:[%s2100_s1 + $0x228] sm:$0xff]   ;;  %v1727_v40 = vld [vmem:[%s2100_s1 + $0x278] sm:$0xff]  }
  0x27   : > { %1518 = vmatpush3.bf16.msra.mxu0 %v1664_v39  ;;  %1129 = vmatprep.mubr.bf16.mxu0 %v1364_v8  ;;  %v1726_v39 = vld [vmem:[%s2100_s1 + $0x2b0] sm:$0xff]  }
  0x28   : > { %1090 = vmatmul.mubr.bf16.vlgmr.msra.gmra.mrb[0].mxu1 %v1361_v37  ;;  %1519 = vmatprep.subr.bf16.mxu0 %v1667_v42  ;;  %v1724_v37 = vld [vmem:[%s2100_s1 + $0x230] sm:$0xff]   ;;  %v1729_v42 = vld [vmem:[%s2100_s1 + $0x2f8] sm:$0xff]  }
  0x29   : > { %1540 = vmatpush3.bf16.msra.mxu1 %v1666_v41  ;;  %1169 = vmatprep.mubr.bf16.mxu1 %v1366_v12  ;;  %v1728_v41 = vld [vmem:[%s2100_s1 + $0x238] sm:$0xff]  }
  0x2a   : > { %1541 = vmatprep.subr.bf16.mxu1 %v1669_v44  ;;  %v174_v44 = vld [vmem:[%s1876_s27 + $0x20] sm:$0xff] }
  0x2b   : > { %1520 = vmatpush3.bf16.msra.mxu0 %v1668_v43  ;;  %v1730_v43 = vld [vmem:[%s2100_s1 + $0x2b8] sm:$0xff]  }
  0x2c   : > { %1521 = vmatprep.subr.bf16.mxu0 %v1671_v46  ;;  %v1367_v46 = vcombine.low %v174_v44, %v174_v44 }
  0x2d   : > { %1542 = vmatpush3.bf16.msra.mxu1 %v1670_v45  ;;  %v175_v45 = vld [vmem:[%s1876_s27 + $0x28] sm:$0xff] }
  0x2e   : > { %1543 = vmatprep.subr.bf16.mxu1 %v1673_v48  ;;  %v1369_v48 = vcombine.low %v175_v45, %v175_v45 }
  0x2f   : > { %1522 = vmatpush3.bf16.msra.mxu0 %v1672_v47  ;;  %v1368_v47 = vcombine.high %v174_v44, %v174_v44 }
  0x30   : > { %1523 = vmatprep.subr.bf16.mxu0 %v1675_v50  ;;  %v1735_v50 = vld [vmem:[%s2100_s1 + $0x300] sm:$0xff]  }
  0x31   : > { %1544 = vmatpush3.bf16.msra.mxu1 %v1674_v49  ;;  %v1370_v49 = vcombine.high %v175_v45, %v175_v45 }
  0x32   : > { %1545 = vmatprep.subr.bf16.mxu1 %v1677_v52  ;;  %v1736_v52 = vld [vmem:[%s2100_s1 + $0x308] sm:$0xff]  }
  0x33   : > { %1524 = vmatpush3.bf16.msra.mxu0 %v1676_v51  ;;  %v1746_v51 = vmov 0.0  }
  0x34   : > { %1525 = vmatprep.subr.bf16.mxu0 %v1679_v54 }
  0x35   : > { %1546 = vmatpush3.bf16.msra.mxu1 %v1678_v53  ;;  %v1737_v53 = vld [vmem:[%s1876_s27 + $0x30] ss:$0 sps:$4 sm:$0xff]   ;;  %s1357_s27 = sshll.u32 %s2104_s13, 3 }
  0x36   : > { %1547 = vmatprep.subr.bf16.mxu1 %v1681_v56  ;;  %s168_s23 = scalar_lea.vmem %s2102_s3, %s1357_s27 }
  0x37   : > { %1526 = vmatpush3.bf16.msra.mxu0 %v1680_v55  ;;  %v1358_v55 = vld [vmem:[%s2101_s2] ss:$0 sm:$0xff] }
  0x38   : > { %1527 = vmatprep.subr.bf16.mxu0 %v1683_v58 }
  0x39   : > { %1548 = vmatpush3.bf16.msra.mxu1 %v1682_v57 }
  0x3a   : > { %1549 = vmatprep.subr.bf16.mxu1 %v1685_v60 }
  0x3b   : > { %1528 = vmatpush3.bf16.msra.mxu0 %v1684_v59 }
  0x3c   : > { %1529 = vmatprep.subr.bf16.mxu0 %v1687_v62 }
  0x3d   : > { %1550 = vmatpush3.bf16.msra.mxu1 %v1686_v61 }
  0x3e   : > { %1551 = vmatprep.subr.bf16.mxu1 %v1689_v0 }
  0x3f   : > { %1530 = vmatpush3.bf16.msra.mxu0 %v1688_v63 }
  0x40   : > { %1531 = vmatprep.subr.bf16.mxu0 %v1691_v2 }
  0x41   : > { %1552 = vmatpush3.bf16.msra.mxu1 %v1690_v1 }
  0x42   : > { %1553 = vmatprep.subr.bf16.mxu1 %v1693_v4 }
  0x43   : > { %1532 = vmatpush3.bf16.msra.mxu0 %v1692_v3 }
  0x44   : > { %1561 = vmatprep.subr.bf16.mxu0 %v1697_v9 }
  0x45   : > { %1554 = vmatpush3.bf16.msra.mxu1 %v1694_v5 }
  0x46   : > { %1130 = vmatmul.mubr.bf16.vlgmr.msra.gmra.mrb[4].mxu0 %v1363_v7  ;;  %1583 = vmatprep.subr.bf16.mxu1 %v1701_v14 }
  0x47   : > { %1562 = vmatpush3.bf16.msra.mxu0 %v1700_v13  ;;  %1209 = vmatprep.mubr.bf16.mxu0 %v1368_v47 }
  0x48   : > { %1170 = vmatmul.mubr.bf16.vlgmr.msra.gmra.mrb[4].mxu1 %v1365_v11  ;;  %1563 = vmatprep.subr.bf16.mxu0 %v1703_v16 }
  0x49   : > { %1584 = vmatpush3.bf16.msra.mxu1 %v1702_v15  ;;  %1249 = vmatprep.mubr.bf16.mxu1 %v1370_v49 }
  0x4a   : > { %1585 = vmatprep.subr.bf16.mxu1 %v1705_v18 }
  0x4b   : > { %1564 = vmatpush3.bf16.msra.mxu0 %v1704_v17 }
  0x4c   : > { %1565 = vmatprep.subr.bf16.mxu0 %v1707_v20 }
  0x4d   : > { %1586 = vmatpush3.bf16.msra.mxu1 %v1706_v19 }
  0x4e   : > { %1587 = vmatprep.subr.bf16.mxu1 %v1709_v22 }
  0x4f   : > { %1566 = vmatpush3.bf16.msra.mxu0 %v1708_v21 }
  0x50   : > { %1567 = vmatprep.subr.bf16.mxu0 %v1711_v24 }
  0x51   : > { %1588 = vmatpush3.bf16.msra.mxu1 %v1710_v23 }
  0x52   : > { %1589 = vmatprep.subr.bf16.mxu1 %v1713_v26 }
  0x53   : > { %1568 = vmatpush3.bf16.msra.mxu0 %v1712_v25 }
  0x54   : > { %1569 = vmatprep.subr.bf16.mxu0 %v1715_v28 }
  0x55   : > { %1590 = vmatpush3.bf16.msra.mxu1 %v1714_v27 }
  0x56   : > { %1591 = vmatprep.subr.bf16.mxu1 %v1717_v30 }
  0x57   : > { %1570 = vmatpush3.bf16.msra.mxu0 %v1716_v29 }
  0x58   : > { %1571 = vmatprep.subr.bf16.mxu0 %v1719_v32 }
  0x59   : > { %1592 = vmatpush3.bf16.msra.mxu1 %v1718_v31 }
  0x5a   : > { %1593 = vmatprep.subr.bf16.mxu1 %v1721_v34 }
  0x5b   : > { %1572 = vmatpush3.bf16.msra.mxu0 %v1720_v33 }
  0x5c   : > { %1573 = vmatprep.subr.bf16.mxu0 %v1723_v36 }
  0x5d   : > { %1594 = vmatpush3.bf16.msra.mxu1 %v1722_v35 }
  0x5e   : > { %1595 = vmatprep.subr.bf16.mxu1 %v1725_v38 }
  0x5f   : > { %1574 = vmatpush3.bf16.msra.mxu0 %v1724_v37 }
  0x60   : > { %1575 = vmatprep.subr.bf16.mxu0 %v1727_v40 }
  0x61   : > { %1596 = vmatpush3.bf16.msra.mxu1 %v1726_v39 }
  0x62   : > { %1597 = vmatprep.subr.bf16.mxu1 %v1729_v42 }
  0x63   : > { %1576 = vmatpush3.bf16.msra.mxu0 %v1728_v41 }
  0x64   : > { %1608 = vmatprep.subr.bf16.mxu0 %v1746_v51 }
  0x65   : > { %1598 = vmatpush3.bf16.msra.mxu1 %v1730_v43 }
  0x66   : > { %1210 = vmatmul.mubr.bf16.vlgmr.msra.gmra.mrb[8].mxu0 %v1367_v46 }
  0x67   : > { %1609 = vmatpush3.bf16.msra.mxu0 %v1735_v50  ;;  %1612 = vmatprep.mubr.msk.bf16.mxu0 %vm1747_vm0, %v1746_v51 }
  0x68   : > { %1250 = vmatmul.mubr.bf16.vlgmr.msra.gmra.mrb[8].mxu1 %v1369_v48  ;;  %1610 = vmatprep.subr.bf16.mxu0 %v1746_v51 }
  0x6b   : > { %1611 = vmatpush3.bf16.msra.mxu0 %v1736_v52 }
  0x6e   : > { %1613 = vmatmul.mubr.msk.bf16.vlgmr.msra.gmra.mrb[12].mxu0 %vm1013_vm1, %v1737_v53 }
  0xf9   : > { %v1489_v54 = vpop.f32.mrb[0].mxu0 }
  0xfa   : > { %v1490_v56 = vpop.f32.mrb[1].mxu0 }
  0xfb   : > { %v1491_v57 = vadd.f32 %v1490_v56, %v1489_v54  ;;  %v1492_v58 = vpop.f32.mrb[2].mxu0  ;;  %v1511_v59 = vpop.f32.mrb[0].mxu1 }
  0xfc   : > { %v1493_v60 = vpop.f32.mrb[3].mxu0  ;;  %v1512_v61 = vpop.f32.mrb[1].mxu1 }
  0xfd   : > { %v1052_v62 = vadd.f32 %v1491_v57, %v1358_v55  ;;  %v1513_v63 = vadd.f32 %v1512_v61, %v1511_v59  ;;  %v1514_v0 = vpop.f32.mrb[2].mxu1 }
  0xfe   : > { %v1515_v1 = vpop.f32.mrb[3].mxu1 }
  0xff   : > { %v1092_v2 = vadd.f32 %v1513_v63, %v1052_v62 }
 0x119   : > { %v1533_v3 = vpop.f32.mrb[4].mxu0 }
 0x11a   : > { %v1534_v4 = vpop.f32.mrb[5].mxu0 }
 0x11b   : > { %v1535_v5 = vadd.f32 %v1534_v4, %v1533_v3  ;;  %v1536_v6 = vpop.f32.mrb[6].mxu0  ;;  %v1555_v7 = vpop.f32.mrb[4].mxu1 }
 0x11c   : > { %v1537_v8 = vpop.f32.mrb[7].mxu0  ;;  %v1556_v9 = vpop.f32.mrb[5].mxu1 }
 0x11d   : > { %v1132_v10 = vadd.f32 %v1535_v5, %v1092_v2  ;;  %v1557_v11 = vadd.f32 %v1556_v9, %v1555_v7  ;;  %v1558_v12 = vpop.f32.mrb[6].mxu1 }
 0x11e   : > { %v1559_v13 = vpop.f32.mrb[7].mxu1 }
 0x11f   : > { %v1172_v14 = vadd.f32 %v1557_v11, %v1132_v10 }
 0x139   : > { %v1577_v15 = vpop.f32.mrb[8].mxu0 }
 0x13a   : > { %v1578_v16 = vpop.f32.mrb[9].mxu0 }
 0x13b   : > { %v1599_v17 = vpop.f32.mrb[8].mxu1  ;;  %v1579_v18 = vadd.f32 %v1578_v16, %v1577_v15  ;;  %v1580_v19 = vpop.f32.mrb[10].mxu0 }
 0x13c   : > { %v1600_v20 = vpop.f32.mrb[9].mxu1  ;;  %v1581_v22 = vpop.f32.mrb[11].mxu0 }
 0x13d   : > { %v1601_v21 = vadd.f32 %v1600_v20, %v1599_v17  ;;  %v1602_v23 = vpop.f32.mrb[10].mxu1  ;;  %v1212_v24 = vadd.f32 %v1579_v18, %v1172_v14 }
 0x13e   : > { %v1603_v25 = vpop.f32.mrb[11].mxu1 }
 0x13f   : > { %v1252_v26 = vadd.f32 %v1601_v21, %v1212_v24 }
 0x141   : > { %v1291_v27 = vpop.f32.mrb[12].mxu0 }
 0x142   : > { %v1292_v28 = vadd.f32 %v1291_v27, %v1252_v26  ;;  %v1614_v29 = vpop.f32.mrb[13].mxu0 }
 0x143   : > { %v1294_v30 = vpop.f32.mrb[14].mxu0 }
 0x144   : > { %1297 = vst [vmem:[%s168_s23] sm:$0xff] %v1292_v28  ;;  %v1615_v31 = vpop.f32.mrb[15].mxu0 }
 0x145 PF: > { %s13_s12 = sadd.s32 1, %s1744_s12  }
 0x146   : > { %p10_p4 = scmp.ge.s32.totalorder %s13_s12, 4  }
 0x148   :  { %12 = sbr.rel (!%p10_p4) target bundleno = 1 (0x1), region = 62 }

</bundles_post_ra>
